<compile_context>
chip_gen: v5e
topology: v5e:2x2
jax: 0.10.0
libtpu: 0.0.40
codegen_flags: <defaults>
</compile_context>

<pallas_src>
import functools

import jax
import jax.numpy as jnp
from jax.experimental import pallas as pl
from jax.experimental.pallas import tpu as pltpu

# Static module hyper-parameters (from the PyTorch spec).
C_IN = 64            # conv0 input channels
C_MID = 128          # conv0 output channels == conv1 input channels
C_OUT = 128          # conv1 output channels
K0, S0 = 64, 32      # conv0 kernel / stride  (K0 == 2 * S0)
K1, S1 = 50, 25      # conv1 kernel / stride  (K1 == 2 * S1)
CH = S1 * C_MID      # 3200 lanes per conv1 half-window row


def _round_up(n, m):
    return ((n + m - 1) // m) * m


# ------------------------------- Pallas kernel ------------------------------

def _fused_kernel(x2_ref, w0_ref, b0_ref, w1_ref, b1_ref, o_ref, h3, hrows,
                  *, B, NB_pad, NEED, L2, ROWS1):
    NR0 = B * NB_pad

    # ---- conv0 (+bias+relu): ONE matmul over all 32-sample half-windows ----
    # (NR0, 2048) @ (2048, 256): cols [:128] = taps k<32, cols [128:] = taps k>=32.
    y0 = jnp.dot(x2_ref[...], w0_ref[...], preferred_element_type=jnp.float32)
    # h[r] = relu( lo_taps(half-window r) + hi_taps(half-window r+1) + b0 )
    lo0 = y0[: NR0 - 1, 0:C_MID]
    hi0 = y0[1:NR0, C_MID:2 * C_MID]
    h = jnp.maximum(lo0 + hi0 + b0_ref[...], 0.0).astype(jnp.bfloat16)

    # Stash per-batch natural-layout h (positions on sublanes, channels on lanes).
    for b in range(B):
        h3[b] = h[b * NB_pad: b * NB_pad + NEED, :]

    # ---- pack h into conv1 half-window rows (q-major, batch-minor) ----
    # hrows[q*B + b, p*128 + c] = h[b, q*25 + p, c]
    hrows[...] = jnp.zeros_like(hrows)
    for l in range(NEED):
        q, p = divmod(l, S1)
        row = h3[:, l:l + 1, :]                                   # (B, 1, 128) bf16
        hrows[q * B:(q + 1) * B, p * C_MID:(p + 1) * C_MID] = row[:, 0, :]

    # ---- conv1 (+bias+tanh) + masked global max: ONE matmul with N=256 ----
    # (ROWS1, 3200) @ (3200, 256): cols [:128] = taps k<25, cols [128:] = taps k>=25.
    y1 = jnp.dot(hrows[...], w1_ref[...], preferred_element_type=jnp.float32)
    lo1 = y1[: ROWS1 - B, 0:C_OUT]
    hi1 = y1[B:ROWS1, C_OUT:2 * C_OUT]
    z = jnp.tanh(lo1 + hi1 + b1_ref[...])                         # (ROWS1-B, 128) f32
    rid = jax.lax.broadcasted_iota(jnp.int32, z.shape, 0)
    z = jnp.where(rid < L2 * B, z, -jnp.inf)                      # mask padding rows
    o_ref[...] = jnp.max(z, axis=0, keepdims=True)                # (1, 128)


# --------------------------------- wrappers ---------------------------------

def prepare_params(params):
    """One-time re-layout of the Conv1d weights into half-window matmul form (bf16)."""
    w0, b0, w1, b1 = params
    # conv0: rows ordered (tap k, in-channel c); split low/high taps, concat on N.
    w0_mat = jnp.transpose(w0, (2, 1, 0)).reshape(K0 * C_IN, C_MID)        # (4096, 128)
    w0_cat = jnp.concatenate([w0_mat[:S0 * C_IN], w0_mat[S0 * C_IN:]],
                             axis=1).astype(jnp.bfloat16)                  # (2048, 256)
    # conv1: rows ordered (tap k1, channel c); split low/high taps, concat on N.
    w1_mat = jnp.transpose(w1, (2, 1, 0)).reshape(K1 * C_MID, C_OUT)       # (6400, 128)
    w1_cat = jnp.concatenate([w1_mat[:S1 * C_MID], w1_mat[S1 * C_MID:]],
                             axis=1).astype(jnp.bfloat16)                  # (3200, 256)
    return (w0_cat,
            b0.reshape(1, C_MID).astype(jnp.float32),
            w1_cat,
            b1.reshape(1, C_OUT).astype(jnp.float32))


def my_model_forward(x, prep):
    """x: (B, 64, L) float32. Returns scalar max(tanh(conv1(relu(conv0(x)))))."""
    w0_cat, b0r, w1_cat, b1r = prep
    B, C, L = x.shape
    if C != C_IN:
        raise ValueError("expected 64 input channels")
    L1 = (L - K0) // S0 + 1
    if L1 < K1:
        raise ValueError("input too short for conv1 (need L >= 1632)")
    L2 = (L1 - K1) // S1 + 1
    NEED = S1 * (L2 - 1) + K1            # conv0 positions conv1 actually consumes
    NHW = NEED + 1                       # 32-sample half-windows with real data
    NB_pad = _round_up(NHW, 8)           # sublane-aligned rows per batch (conv0)
    ROWS1 = _round_up((L2 + 1) * B, 8)   # sublane-aligned conv1 half-window rows

    # One cheap XLA re-layout of x (no gather, no duplication): channels-last,
    # grouped into 32-sample half-windows, zero-padded to NB_pad rows per batch.
    x2 = (x[:, :, :NHW * S0]
          .transpose(0, 2, 1)
          .reshape(B, NHW, S0 * C_IN))
    x2 = jnp.pad(x2, ((0, 0), (0, NB_pad - NHW), (0, 0)))
    x2 = x2.reshape(B * NB_pad, S0 * C_IN).astype(jnp.bfloat16)

    kernel = functools.partial(_fused_kernel, B=B, NB_pad=NB_pad, NEED=NEED,
                               L2=L2, ROWS1=ROWS1)
    out = pl.pallas_call(
        kernel,
        out_shape=jax.ShapeDtypeStruct((1, C_OUT), jnp.float32),
        grid=(1,),
        in_specs=[
            pl.BlockSpec((B * NB_pad, S0 * C_IN), lambda i: (0, 0)),   # x2
            pl.BlockSpec((S0 * C_IN, 2 * C_MID), lambda i: (0, 0)),    # w0_cat
            pl.BlockSpec((1, C_MID), lambda i: (0, 0)),                # b0
            pl.BlockSpec((S1 * C_MID, 2 * C_OUT), lambda i: (0, 0)),   # w1_cat
            pl.BlockSpec((1, C_OUT), lambda i: (0, 0)),                # b1
        ],
        out_specs=pl.BlockSpec((1, C_OUT), lambda i: (0, 0)),
        scratch_shapes=[
            pltpu.VMEM((B, NEED, C_MID), jnp.bfloat16),   # h in natural layout
            pltpu.VMEM((ROWS1, CH), jnp.bfloat16),        # conv1 half-window rows
        ],
        compiler_params=pltpu.CompilerParams(
            dimension_semantics=("arbitrary",)),
    )(x2, w0_cat, b0r, w1_cat, b1r)
    # Final reduction over the 128 output channels (trivial XLA op on 512 bytes).
    return jnp.max(out)


def init_params(key):
    k0, k1, k2, k3 = jax.random.split(key, 4)
    # Conv1d default init: U(-1/sqrt(fan_in), 1/sqrt(fan_in))
    fan0 = C_IN * K0
    fan1 = C_MID * K1
    w0 = jax.random.uniform(k0, (C_MID, C_IN, K0), jnp.float32,
                            minval=-1.0 / jnp.sqrt(fan0), maxval=1.0 / jnp.sqrt(fan0))
    b0 = jax.random.uniform(k1, (C_MID,), jnp.float32,
                            minval=-1.0 / jnp.sqrt(fan0), maxval=1.0 / jnp.sqrt(fan0))
    w1 = jax.random.uniform(k2, (C_OUT, C_MID, K1), jnp.float32,
                            minval=-1.0 / jnp.sqrt(fan1), maxval=1.0 / jnp.sqrt(fan1))
    b1 = jax.random.uniform(k3, (C_OUT,), jnp.float32,
                            minval=-1.0 / jnp.sqrt(fan1), maxval=1.0 / jnp.sqrt(fan1))
    return (w0, b0, w1, b1)


def reference_forward(x, params):
    """Pure-JAX f32 reference that mirrors the PyTorch module."""
    w0, b0, w1, b1 = params
    L = x.shape[2]
    L1 = (L - K0) // S0 + 1
    idx0 = jnp.arange(L1)[:, None] * S0 + jnp.arange(K0)[None, :]
    h = jnp.einsum('bclk,ock->bol', x[:, :, idx0], w0) + b0[None, :, None]
    h = jnp.maximum(h, 0.0)
    L2 = (L1 - K1) // S1 + 1
    idx1 = jnp.arange(L2)[:, None] * S1 + jnp.arange(K1)[None, :]
    z = jnp.einsum('bclk,ock->bol', h[:, :, idx1], w1) + b1[None, :, None]
    return jnp.max(jnp.tanh(z))


if __name__ == "__main__":
    key = jax.random.PRNGKey(0)
    pkey, xkey = jax.random.split(key)
    params = init_params(pkey)
    prep = prepare_params(params)       # one-time weight re-layout (bf16)

    fwd = jax.jit(my_model_forward)

    # (B, L) = (2, 1632): smallest valid length (conv0 -> 50 positions, conv1 -> 1 position).
    # (2, 2432): exercises L2 = 2 (multiple conv1 windows / padded rows / masking).
    for B, L in [(2, 1632), (2, 2432)]:
        x = jax.random.normal(jax.random.fold_in(xkey, L), (B, C_IN, L), jnp.float32)
        out = fwd(x, prep)
        jax.block_until_ready(out)
        assert out.shape == () and out.dtype == jnp.float32
        ref = reference_forward(x, params)
        assert abs(float(out) - float(ref)) < 5e-2, (L, float(out), float(ref))

    print("KERNEL_OK")
</pallas_src>

<mosaic_0001>
module attributes {stable_mosaic.version = 11 : i64} {
  func.func @_fused_kernel(%arg0: i32, %arg1: memref<112x2048xbf16, #tpu.memory_space<vmem>>, %arg2: memref<2048x256xbf16, #tpu.memory_space<vmem>>, %arg3: memref<1x128xf32, #tpu.memory_space<vmem>>, %arg4: memref<3200x256xbf16, #tpu.memory_space<vmem>>, %arg5: memref<1x128xf32, #tpu.memory_space<vmem>>, %arg6: memref<1x128xf32, #tpu.memory_space<vmem>>, %arg7: memref<2x50x128xbf16, #tpu.memory_space<vmem>>, %arg8: memref<8x3200xbf16, #tpu.memory_space<vmem>>) attributes {dimension_semantics = [#tpu.dimension_semantics<arbitrary>], iteration_bounds = array<i64: 1>, scalar_prefetch = 0 : i64, scratch_operands = 2 : i64, tpu.core_type = #tpu.core_type<tc>, window_params = [{pipeline_mode = #tpu.pipeline_mode<synchronous>, transform_indices = @transform_0, window_bounds = array<i64: 112, 2048>}, {pipeline_mode = #tpu.pipeline_mode<synchronous>, transform_indices = @transform_1, window_bounds = array<i64: 2048, 256>}, {pipeline_mode = #tpu.pipeline_mode<synchronous>, transform_indices = @transform_2, window_bounds = array<i64: 1, 128>}, {pipeline_mode = #tpu.pipeline_mode<synchronous>, transform_indices = @transform_3, window_bounds = array<i64: 3200, 256>}, {pipeline_mode = #tpu.pipeline_mode<synchronous>, transform_indices = @transform_4, window_bounds = array<i64: 1, 128>}, {pipeline_mode = #tpu.pipeline_mode<synchronous>, transform_indices = @transform_5, window_bounds = array<i64: 1, 128>}]} {
    %c0 = arith.constant 0 : index
    %c0_0 = arith.constant 0 : index
    %0 = vector.load %arg1[%c0, %c0_0] : memref<112x2048xbf16, #tpu.memory_space<vmem>>, vector<112x2048xbf16>
    %c0_1 = arith.constant 0 : index
    %c0_2 = arith.constant 0 : index
    %1 = vector.load %arg2[%c0_1, %c0_2] : memref<2048x256xbf16, #tpu.memory_space<vmem>>, vector<2048x256xbf16>
    %cst = arith.constant dense<0.000000e+00> : vector<112x256xf32>
    %2 = tpu.matmul %0, %1, %cst {dimension_numbers = #tpu.dot_dimension_numbers<[1], [0], [0], [1], [0, 0, 1, 1], [], []>} : vector<112x2048xbf16>, vector<2048x256xbf16>, vector<112x256xf32> -> vector<112x256xf32>
    %3 = vector.extract_strided_slice %2 {offsets = [0, 0], sizes = [111, 128], strides = [1, 1]} : vector<112x256xf32> to vector<111x128xf32>
    %4 = vector.extract_strided_slice %2 {offsets = [1, 128], sizes = [111, 128], strides = [1, 1]} : vector<112x256xf32> to vector<111x128xf32>
    %5 = arith.addf %3, %4 : vector<111x128xf32>
    %c0_3 = arith.constant 0 : index
    %c0_4 = arith.constant 0 : index
    %6 = vector.load %arg3[%c0_3, %c0_4] : memref<1x128xf32, #tpu.memory_space<vmem>>, vector<1x128xf32>
    %7 = vector.broadcast %6 : vector<1x128xf32> to vector<111x128xf32>
    %8 = arith.addf %5, %7 : vector<111x128xf32>
    %cst_5 = arith.constant 0.000000e+00 : f32
    %9 = vector.broadcast %cst_5 : f32 to vector<111x128xf32>
    %10 = arith.maximumf %8, %9 : vector<111x128xf32>
    %11 = arith.truncf %10 : vector<111x128xf32> to vector<111x128xbf16>
    %12 = vector.extract_strided_slice %11 {offsets = [0, 0], sizes = [50, 128], strides = [1, 1]} : vector<111x128xbf16> to vector<50x128xbf16>
    %c0_6 = arith.constant 0 : index
    %c0_7 = arith.constant 0 : index
    %c0_8 = arith.constant 0 : index
    %13 = vector.load %arg7[%c0_6, %c0_7, %c0_8] : memref<2x50x128xbf16, #tpu.memory_space<vmem>>, vector<1x50x128xbf16>
    %14 = vector.shape_cast %13 : vector<1x50x128xbf16> to vector<50x128xbf16>
    %15 = vector.shape_cast %12 : vector<50x128xbf16> to vector<1x50x128xbf16>
    tpu.vector_store %arg7[%c0_6, %c0_7, %c0_8], %15 {strides = array<i32>} : memref<2x50x128xbf16, #tpu.memory_space<vmem>>, vector<1x50x128xbf16>,
    %16 = vector.extract_strided_slice %11 {offsets = [56, 0], sizes = [50, 128], strides = [1, 1]} : vector<111x128xbf16> to vector<50x128xbf16>
    %c1 = arith.constant 1 : index
    %c0_9 = arith.constant 0 : index
    %c0_10 = arith.constant 0 : index
    %17 = vector.load %arg7[%c1, %c0_9, %c0_10] : memref<2x50x128xbf16, #tpu.memory_space<vmem>>, vector<1x50x128xbf16>
    %18 = vector.shape_cast %17 : vector<1x50x128xbf16> to vector<50x128xbf16>
    %19 = vector.shape_cast %16 : vector<50x128xbf16> to vector<1x50x128xbf16>
    tpu.vector_store %arg7[%c1, %c0_9, %c0_10], %19 {strides = array<i32>} : memref<2x50x128xbf16, #tpu.memory_space<vmem>>, vector<1x50x128xbf16>,
    %cst_11 = arith.constant 0.000000e+00 : bf16
    %20 = vector.broadcast %cst_11 : bf16 to vector<8x3200xbf16>
    %c0_12 = arith.constant 0 : index
    %c0_13 = arith.constant 0 : index
    %21 = vector.load %arg8[%c0_12, %c0_13] : memref<8x3200xbf16, #tpu.memory_space<vmem>>, vector<8x3200xbf16>
    tpu.vector_store %arg8[%c0_12, %c0_13], %20 {strides = array<i32>} : memref<8x3200xbf16, #tpu.memory_space<vmem>>, vector<8x3200xbf16>,
    %c0_14 = arith.constant 0 : index
    %c0_15 = arith.constant 0 : index
    %c0_16 = arith.constant 0 : index
    %22 = vector.load %arg7[%c0_14, %c0_15, %c0_16] : memref<2x50x128xbf16, #tpu.memory_space<vmem>>, vector<2x1x128xbf16>
    %23 = vector.shape_cast %22 : vector<2x1x128xbf16> to vector<2x128xbf16>
    %c0_17 = arith.constant 0 : index
    %c0_18 = arith.constant 0 : index
    %24 = vector.load %arg8[%c0_17, %c0_18] : memref<8x3200xbf16, #tpu.memory_space<vmem>>, vector<2x128xbf16>
    tpu.vector_store %arg8[%c0_17, %c0_18], %23 {strides = array<i32>} : memref<8x3200xbf16, #tpu.memory_space<vmem>>, vector<2x128xbf16>,
    %c0_19 = arith.constant 0 : index
    %c1_20 = arith.constant 1 : index
    %c0_21 = arith.constant 0 : index
    %25 = vector.load %arg7[%c0_19, %c1_20, %c0_21] : memref<2x50x128xbf16, #tpu.memory_space<vmem>>, vector<2x1x128xbf16>
    %26 = vector.shape_cast %25 : vector<2x1x128xbf16> to vector<2x128xbf16>
    %c0_22 = arith.constant 0 : index
    %c128 = arith.constant 128 : index
    %27 = vector.load %arg8[%c0_22, %c128] : memref<8x3200xbf16, #tpu.memory_space<vmem>>, vector<2x128xbf16>
    tpu.vector_store %arg8[%c0_22, %c128], %26 {strides = array<i32>} : memref<8x3200xbf16, #tpu.memory_space<vmem>>, vector<2x128xbf16>,
    %c0_23 = arith.constant 0 : index
    %c2 = arith.constant 2 : index
    %c0_24 = arith.constant 0 : index
    %28 = vector.load %arg7[%c0_23, %c2, %c0_24] : memref<2x50x128xbf16, #tpu.memory_space<vmem>>, vector<2x1x128xbf16>
    %29 = vector.shape_cast %28 : vector<2x1x128xbf16> to vector<2x128xbf16>
    %c0_25 = arith.constant 0 : index
    %c256 = arith.constant 256 : index
    %30 = vector.load %arg8[%c0_25, %c256] : memref<8x3200xbf16, #tpu.memory_space<vmem>>, vector<2x128xbf16>
    tpu.vector_store %arg8[%c0_25, %c256], %29 {strides = array<i32>} : memref<8x3200xbf16, #tpu.memory_space<vmem>>, vector<2x128xbf16>,
    %c0_26 = arith.constant 0 : index
    %c3 = arith.constant 3 : index
    %c0_27 = arith.constant 0 : index
    %31 = vector.load %arg7[%c0_26, %c3, %c0_27] : memref<2x50x128xbf16, #tpu.memory_space<vmem>>, vector<2x1x128xbf16>
    %32 = vector.shape_cast %31 : vector<2x1x128xbf16> to vector<2x128xbf16>
    %c0_28 = arith.constant 0 : index
    %c384 = arith.constant 384 : index
    %33 = vector.load %arg8[%c0_28, %c384] : memref<8x3200xbf16, #tpu.memory_space<vmem>>, vector<2x128xbf16>
    tpu.vector_store %arg8[%c0_28, %c384], %32 {strides = array<i32>} : memref<8x3200xbf16, #tpu.memory_space<vmem>>, vector<2x128xbf16>,
    %c0_29 = arith.constant 0 : index
    %c4 = arith.constant 4 : index
    %c0_30 = arith.constant 0 : index
    %34 = vector.load %arg7[%c0_29, %c4, %c0_30] : memref<2x50x128xbf16, #tpu.memory_space<vmem>>, vector<2x1x128xbf16>
    %35 = vector.shape_cast %34 : vector<2x1x128xbf16> to vector<2x128xbf16>
    %c0_31 = arith.constant 0 : index
    %c512 = arith.constant 512 : index
    %36 = vector.load %arg8[%c0_31, %c512] : memref<8x3200xbf16, #tpu.memory_space<vmem>>, vector<2x128xbf16>
    tpu.vector_store %arg8[%c0_31, %c512], %35 {strides = array<i32>} : memref<8x3200xbf16, #tpu.memory_space<vmem>>, vector<2x128xbf16>,
    %c0_32 = arith.constant 0 : index
    %c5 = arith.constant 5 : index
    %c0_33 = arith.constant 0 : index
    %37 = vector.load %arg7[%c0_32, %c5, %c0_33] : memref<2x50x128xbf16, #tpu.memory_space<vmem>>, vector<2x1x128xbf16>
    %38 = vector.shape_cast %37 : vector<2x1x128xbf16> to vector<2x128xbf16>
    %c0_34 = arith.constant 0 : index
    %c640 = arith.constant 640 : index
    %39 = vector.load %arg8[%c0_34, %c640] : memref<8x3200xbf16, #tpu.memory_space<vmem>>, vector<2x128xbf16>
    tpu.vector_store %arg8[%c0_34, %c640], %38 {strides = array<i32>} : memref<8x3200xbf16, #tpu.memory_space<vmem>>, vector<2x128xbf16>,
    %c0_35 = arith.constant 0 : index
    %c6 = arith.constant 6 : index
    %c0_36 = arith.constant 0 : index
    %40 = vector.load %arg7[%c0_35, %c6, %c0_36] : memref<2x50x128xbf16, #tpu.memory_space<vmem>>, vector<2x1x128xbf16>
    %41 = vector.shape_cast %40 : vector<2x1x128xbf16> to vector<2x128xbf16>
    %c0_37 = arith.constant 0 : index
    %c768 = arith.constant 768 : index
    %42 = vector.load %arg8[%c0_37, %c768] : memref<8x3200xbf16, #tpu.memory_space<vmem>>, vector<2x128xbf16>
    tpu.vector_store %arg8[%c0_37, %c768], %41 {strides = array<i32>} : memref<8x3200xbf16, #tpu.memory_space<vmem>>, vector<2x128xbf16>,
    %c0_38 = arith.constant 0 : index
    %c7 = arith.constant 7 : index
    %c0_39 = arith.constant 0 : index
    %43 = vector.load %arg7[%c0_38, %c7, %c0_39] : memref<2x50x128xbf16, #tpu.memory_space<vmem>>, vector<2x1x128xbf16>
    %44 = vector.shape_cast %43 : vector<2x1x128xbf16> to vector<2x128xbf16>
    %c0_40 = arith.constant 0 : index
    %c896 = arith.constant 896 : index
    %45 = vector.load %arg8[%c0_40, %c896] : memref<8x3200xbf16, #tpu.memory_space<vmem>>, vector<2x128xbf16>
    tpu.vector_store %arg8[%c0_40, %c896], %44 {strides = array<i32>} : memref<8x3200xbf16, #tpu.memory_space<vmem>>, vector<2x128xbf16>,
    %c0_41 = arith.constant 0 : index
    %c8 = arith.constant 8 : index
    %c0_42 = arith.constant 0 : index
    %46 = vector.load %arg7[%c0_41, %c8, %c0_42] : memref<2x50x128xbf16, #tpu.memory_space<vmem>>, vector<2x1x128xbf16>
    %47 = vector.shape_cast %46 : vector<2x1x128xbf16> to vector<2x128xbf16>
    %c0_43 = arith.constant 0 : index
    %c1024 = arith.constant 1024 : index
    %48 = vector.load %arg8[%c0_43, %c1024] : memref<8x3200xbf16, #tpu.memory_space<vmem>>, vector<2x128xbf16>
    tpu.vector_store %arg8[%c0_43, %c1024], %47 {strides = array<i32>} : memref<8x3200xbf16, #tpu.memory_space<vmem>>, vector<2x128xbf16>,
    %c0_44 = arith.constant 0 : index
    %c9 = arith.constant 9 : index
    %c0_45 = arith.constant 0 : index
    %49 = vector.load %arg7[%c0_44, %c9, %c0_45] : memref<2x50x128xbf16, #tpu.memory_space<vmem>>, vector<2x1x128xbf16>
    %50 = vector.shape_cast %49 : vector<2x1x128xbf16> to vector<2x128xbf16>
    %c0_46 = arith.constant 0 : index
    %c1152 = arith.constant 1152 : index
    %51 = vector.load %arg8[%c0_46, %c1152] : memref<8x3200xbf16, #tpu.memory_space<vmem>>, vector<2x128xbf16>
    tpu.vector_store %arg8[%c0_46, %c1152], %50 {strides = array<i32>} : memref<8x3200xbf16, #tpu.memory_space<vmem>>, vector<2x128xbf16>,
    %c0_47 = arith.constant 0 : index
    %c10 = arith.constant 10 : index
    %c0_48 = arith.constant 0 : index
    %52 = vector.load %arg7[%c0_47, %c10, %c0_48] : memref<2x50x128xbf16, #tpu.memory_space<vmem>>, vector<2x1x128xbf16>
    %53 = vector.shape_cast %52 : vector<2x1x128xbf16> to vector<2x128xbf16>
    %c0_49 = arith.constant 0 : index
    %c1280 = arith.constant 1280 : index
    %54 = vector.load %arg8[%c0_49, %c1280] : memref<8x3200xbf16, #tpu.memory_space<vmem>>, vector<2x128xbf16>
    tpu.vector_store %arg8[%c0_49, %c1280], %53 {strides = array<i32>} : memref<8x3200xbf16, #tpu.memory_space<vmem>>, vector<2x128xbf16>,
    %c0_50 = arith.constant 0 : index
    %c11 = arith.constant 11 : index
    %c0_51 = arith.constant 0 : index
    %55 = vector.load %arg7[%c0_50, %c11, %c0_51] : memref<2x50x128xbf16, #tpu.memory_space<vmem>>, vector<2x1x128xbf16>
    %56 = vector.shape_cast %55 : vector<2x1x128xbf16> to vector<2x128xbf16>
    %c0_52 = arith.constant 0 : index
    %c1408 = arith.constant 1408 : index
    %57 = vector.load %arg8[%c0_52, %c1408] : memref<8x3200xbf16, #tpu.memory_space<vmem>>, vector<2x128xbf16>
    tpu.vector_store %arg8[%c0_52, %c1408], %56 {strides = array<i32>} : memref<8x3200xbf16, #tpu.memory_space<vmem>>, vector<2x128xbf16>,
    %c0_53 = arith.constant 0 : index
    %c12 = arith.constant 12 : index
    %c0_54 = arith.constant 0 : index
    %58 = vector.load %arg7[%c0_53, %c12, %c0_54] : memref<2x50x128xbf16, #tpu.memory_space<vmem>>, vector<2x1x128xbf16>
    %59 = vector.shape_cast %58 : vector<2x1x128xbf16> to vector<2x128xbf16>
    %c0_55 = arith.constant 0 : index
    %c1536 = arith.constant 1536 : index
    %60 = vector.load %arg8[%c0_55, %c1536] : memref<8x3200xbf16, #tpu.memory_space<vmem>>, vector<2x128xbf16>
    tpu.vector_store %arg8[%c0_55, %c1536], %59 {strides = array<i32>} : memref<8x3200xbf16, #tpu.memory_space<vmem>>, vector<2x128xbf16>,
    %c0_56 = arith.constant 0 : index
    %c13 = arith.constant 13 : index
    %c0_57 = arith.constant 0 : index
    %61 = vector.load %arg7[%c0_56, %c13, %c0_57] : memref<2x50x128xbf16, #tpu.memory_space<vmem>>, vector<2x1x128xbf16>
    %62 = vector.shape_cast %61 : vector<2x1x128xbf16> to vector<2x128xbf16>
    %c0_58 = arith.constant 0 : index
    %c1664 = arith.constant 1664 : index
    %63 = vector.load %arg8[%c0_58, %c1664] : memref<8x3200xbf16, #tpu.memory_space<vmem>>, vector<2x128xbf16>
    tpu.vector_store %arg8[%c0_58, %c1664], %62 {strides = array<i32>} : memref<8x3200xbf16, #tpu.memory_space<vmem>>, vector<2x128xbf16>,
    %c0_59 = arith.constant 0 : index
    %c14 = arith.constant 14 : index
    %c0_60 = arith.constant 0 : index
    %64 = vector.load %arg7[%c0_59, %c14, %c0_60] : memref<2x50x128xbf16, #tpu.memory_space<vmem>>, vector<2x1x128xbf16>
    %65 = vector.shape_cast %64 : vector<2x1x128xbf16> to vector<2x128xbf16>
    %c0_61 = arith.constant 0 : index
    %c1792 = arith.constant 1792 : index
    %66 = vector.load %arg8[%c0_61, %c1792] : memref<8x3200xbf16, #tpu.memory_space<vmem>>, vector<2x128xbf16>
    tpu.vector_store %arg8[%c0_61, %c1792], %65 {strides = array<i32>} : memref<8x3200xbf16, #tpu.memory_space<vmem>>, vector<2x128xbf16>,
    %c0_62 = arith.constant 0 : index
    %c15 = arith.constant 15 : index
    %c0_63 = arith.constant 0 : index
    %67 = vector.load %arg7[%c0_62, %c15, %c0_63] : memref<2x50x128xbf16, #tpu.memory_space<vmem>>, vector<2x1x128xbf16>
    %68 = vector.shape_cast %67 : vector<2x1x128xbf16> to vector<2x128xbf16>
    %c0_64 = arith.constant 0 : index
    %c1920 = arith.constant 1920 : index
    %69 = vector.load %arg8[%c0_64, %c1920] : memref<8x3200xbf16, #tpu.memory_space<vmem>>, vector<2x128xbf16>
    tpu.vector_store %arg8[%c0_64, %c1920], %68 {strides = array<i32>} : memref<8x3200xbf16, #tpu.memory_space<vmem>>, vector<2x128xbf16>,
    %c0_65 = arith.constant 0 : index
    %c16 = arith.constant 16 : index
    %c0_66 = arith.constant 0 : index
    %70 = vector.load %arg7[%c0_65, %c16, %c0_66] : memref<2x50x128xbf16, #tpu.memory_space<vmem>>, vector<2x1x128xbf16>
    %71 = vector.shape_cast %70 : vector<2x1x128xbf16> to vector<2x128xbf16>
    %c0_67 = arith.constant 0 : index
    %c2048 = arith.constant 2048 : index
    %72 = vector.load %arg8[%c0_67, %c2048] : memref<8x3200xbf16, #tpu.memory_space<vmem>>, vector<2x128xbf16>
    tpu.vector_store %arg8[%c0_67, %c2048], %71 {strides = array<i32>} : memref<8x3200xbf16, #tpu.memory_space<vmem>>, vector<2x128xbf16>,
    %c0_68 = arith.constant 0 : index
    %c17 = arith.constant 17 : index
    %c0_69 = arith.constant 0 : index
    %73 = vector.load %arg7[%c0_68, %c17, %c0_69] : memref<2x50x128xbf16, #tpu.memory_space<vmem>>, vector<2x1x128xbf16>
    %74 = vector.shape_cast %73 : vector<2x1x128xbf16> to vector<2x128xbf16>
    %c0_70 = arith.constant 0 : index
    %c2176 = arith.constant 2176 : index
    %75 = vector.load %arg8[%c0_70, %c2176] : memref<8x3200xbf16, #tpu.memory_space<vmem>>, vector<2x128xbf16>
    tpu.vector_store %arg8[%c0_70, %c2176], %74 {strides = array<i32>} : memref<8x3200xbf16, #tpu.memory_space<vmem>>, vector<2x128xbf16>,
    %c0_71 = arith.constant 0 : index
    %c18 = arith.constant 18 : index
    %c0_72 = arith.constant 0 : index
    %76 = vector.load %arg7[%c0_71, %c18, %c0_72] : memref<2x50x128xbf16, #tpu.memory_space<vmem>>, vector<2x1x128xbf16>
    %77 = vector.shape_cast %76 : vector<2x1x128xbf16> to vector<2x128xbf16>
    %c0_73 = arith.constant 0 : index
    %c2304 = arith.constant 2304 : index
    %78 = vector.load %arg8[%c0_73, %c2304] : memref<8x3200xbf16, #tpu.memory_space<vmem>>, vector<2x128xbf16>
    tpu.vector_store %arg8[%c0_73, %c2304], %77 {strides = array<i32>} : memref<8x3200xbf16, #tpu.memory_space<vmem>>, vector<2x128xbf16>,
    %c0_74 = arith.constant 0 : index
    %c19 = arith.constant 19 : index
    %c0_75 = arith.constant 0 : index
    %79 = vector.load %arg7[%c0_74, %c19, %c0_75] : memref<2x50x128xbf16, #tpu.memory_space<vmem>>, vector<2x1x128xbf16>
    %80 = vector.shape_cast %79 : vector<2x1x128xbf16> to vector<2x128xbf16>
    %c0_76 = arith.constant 0 : index
    %c2432 = arith.constant 2432 : index
    %81 = vector.load %arg8[%c0_76, %c2432] : memref<8x3200xbf16, #tpu.memory_space<vmem>>, vector<2x128xbf16>
    tpu.vector_store %arg8[%c0_76, %c2432], %80 {strides = array<i32>} : memref<8x3200xbf16, #tpu.memory_space<vmem>>, vector<2x128xbf16>,
    %c0_77 = arith.constant 0 : index
    %c20 = arith.constant 20 : index
    %c0_78 = arith.constant 0 : index
    %82 = vector.load %arg7[%c0_77, %c20, %c0_78] : memref<2x50x128xbf16, #tpu.memory_space<vmem>>, vector<2x1x128xbf16>
    %83 = vector.shape_cast %82 : vector<2x1x128xbf16> to vector<2x128xbf16>
    %c0_79 = arith.constant 0 : index
    %c2560 = arith.constant 2560 : index
    %84 = vector.load %arg8[%c0_79, %c2560] : memref<8x3200xbf16, #tpu.memory_space<vmem>>, vector<2x128xbf16>
    tpu.vector_store %arg8[%c0_79, %c2560], %83 {strides = array<i32>} : memref<8x3200xbf16, #tpu.memory_space<vmem>>, vector<2x128xbf16>,
    %c0_80 = arith.constant 0 : index
    %c21 = arith.constant 21 : index
    %c0_81 = arith.constant 0 : index
    %85 = vector.load %arg7[%c0_80, %c21, %c0_81] : memref<2x50x128xbf16, #tpu.memory_space<vmem>>, vector<2x1x128xbf16>
    %86 = vector.shape_cast %85 : vector<2x1x128xbf16> to vector<2x128xbf16>
    %c0_82 = arith.constant 0 : index
    %c2688 = arith.constant 2688 : index
    %87 = vector.load %arg8[%c0_82, %c2688] : memref<8x3200xbf16, #tpu.memory_space<vmem>>, vector<2x128xbf16>
    tpu.vector_store %arg8[%c0_82, %c2688], %86 {strides = array<i32>} : memref<8x3200xbf16, #tpu.memory_space<vmem>>, vector<2x128xbf16>,
    %c0_83 = arith.constant 0 : index
    %c22 = arith.constant 22 : index
    %c0_84 = arith.constant 0 : index
    %88 = vector.load %arg7[%c0_83, %c22, %c0_84] : memref<2x50x128xbf16, #tpu.memory_space<vmem>>, vector<2x1x128xbf16>
    %89 = vector.shape_cast %88 : vector<2x1x128xbf16> to vector<2x128xbf16>
    %c0_85 = arith.constant 0 : index
    %c2816 = arith.constant 2816 : index
    %90 = vector.load %arg8[%c0_85, %c2816] : memref<8x3200xbf16, #tpu.memory_space<vmem>>, vector<2x128xbf16>
    tpu.vector_store %arg8[%c0_85, %c2816], %89 {strides = array<i32>} : memref<8x3200xbf16, #tpu.memory_space<vmem>>, vector<2x128xbf16>,
    %c0_86 = arith.constant 0 : index
    %c23 = arith.constant 23 : index
    %c0_87 = arith.constant 0 : index
    %91 = vector.load %arg7[%c0_86, %c23, %c0_87] : memref<2x50x128xbf16, #tpu.memory_space<vmem>>, vector<2x1x128xbf16>
    %92 = vector.shape_cast %91 : vector<2x1x128xbf16> to vector<2x128xbf16>
    %c0_88 = arith.constant 0 : index
    %c2944 = arith.constant 2944 : index
    %93 = vector.load %arg8[%c0_88, %c2944] : memref<8x3200xbf16, #tpu.memory_space<vmem>>, vector<2x128xbf16>
    tpu.vector_store %arg8[%c0_88, %c2944], %92 {strides = array<i32>} : memref<8x3200xbf16, #tpu.memory_space<vmem>>, vector<2x128xbf16>,
    %c0_89 = arith.constant 0 : index
    %c24 = arith.constant 24 : index
    %c0_90 = arith.constant 0 : index
    %94 = vector.load %arg7[%c0_89, %c24, %c0_90] : memref<2x50x128xbf16, #tpu.memory_space<vmem>>, vector<2x1x128xbf16>
    %95 = vector.shape_cast %94 : vector<2x1x128xbf16> to vector<2x128xbf16>
    %c0_91 = arith.constant 0 : index
    %c3072 = arith.constant 3072 : index
    %96 = vector.load %arg8[%c0_91, %c3072] : memref<8x3200xbf16, #tpu.memory_space<vmem>>, vector<2x128xbf16>
    tpu.vector_store %arg8[%c0_91, %c3072], %95 {strides = array<i32>} : memref<8x3200xbf16, #tpu.memory_space<vmem>>, vector<2x128xbf16>,
    %c0_92 = arith.constant 0 : index
    %c25 = arith.constant 25 : index
    %c0_93 = arith.constant 0 : index
    %97 = vector.load %arg7[%c0_92, %c25, %c0_93] : memref<2x50x128xbf16, #tpu.memory_space<vmem>>, vector<2x1x128xbf16>
    %98 = vector.shape_cast %97 : vector<2x1x128xbf16> to vector<2x128xbf16>
    %c2_94 = arith.constant 2 : index
    %c0_95 = arith.constant 0 : index
    %99 = vector.load %arg8[%c2_94, %c0_95] : memref<8x3200xbf16, #tpu.memory_space<vmem>>, vector<2x128xbf16>
    tpu.vector_store %arg8[%c2_94, %c0_95], %98 {strides = array<i32>} : memref<8x3200xbf16, #tpu.memory_space<vmem>>, vector<2x128xbf16>,
    %c0_96 = arith.constant 0 : index
    %c26 = arith.constant 26 : index
    %c0_97 = arith.constant 0 : index
    %100 = vector.load %arg7[%c0_96, %c26, %c0_97] : memref<2x50x128xbf16, #tpu.memory_space<vmem>>, vector<2x1x128xbf16>
    %101 = vector.shape_cast %100 : vector<2x1x128xbf16> to vector<2x128xbf16>
    %c2_98 = arith.constant 2 : index
    %c128_99 = arith.constant 128 : index
    %102 = vector.load %arg8[%c2_98, %c128_99] : memref<8x3200xbf16, #tpu.memory_space<vmem>>, vector<2x128xbf16>
    tpu.vector_store %arg8[%c2_98, %c128_99], %101 {strides = array<i32>} : memref<8x3200xbf16, #tpu.memory_space<vmem>>, vector<2x128xbf16>,
    %c0_100 = arith.constant 0 : index
    %c27 = arith.constant 27 : index
    %c0_101 = arith.constant 0 : index
    %103 = vector.load %arg7[%c0_100, %c27, %c0_101] : memref<2x50x128xbf16, #tpu.memory_space<vmem>>, vector<2x1x128xbf16>
    %104 = vector.shape_cast %103 : vector<2x1x128xbf16> to vector<2x128xbf16>
    %c2_102 = arith.constant 2 : index
    %c256_103 = arith.constant 256 : index
    %105 = vector.load %arg8[%c2_102, %c256_103] : memref<8x3200xbf16, #tpu.memory_space<vmem>>, vector<2x128xbf16>
    tpu.vector_store %arg8[%c2_102, %c256_103], %104 {strides = array<i32>} : memref<8x3200xbf16, #tpu.memory_space<vmem>>, vector<2x128xbf16>,
    %c0_104 = arith.constant 0 : index
    %c28 = arith.constant 28 : index
    %c0_105 = arith.constant 0 : index
    %106 = vector.load %arg7[%c0_104, %c28, %c0_105] : memref<2x50x128xbf16, #tpu.memory_space<vmem>>, vector<2x1x128xbf16>
    %107 = vector.shape_cast %106 : vector<2x1x128xbf16> to vector<2x128xbf16>
    %c2_106 = arith.constant 2 : index
    %c384_107 = arith.constant 384 : index
    %108 = vector.load %arg8[%c2_106, %c384_107] : memref<8x3200xbf16, #tpu.memory_space<vmem>>, vector<2x128xbf16>
    tpu.vector_store %arg8[%c2_106, %c384_107], %107 {strides = array<i32>} : memref<8x3200xbf16, #tpu.memory_space<vmem>>, vector<2x128xbf16>,
    %c0_108 = arith.constant 0 : index
    %c29 = arith.constant 29 : index
    %c0_109 = arith.constant 0 : index
    %109 = vector.load %arg7[%c0_108, %c29, %c0_109] : memref<2x50x128xbf16, #tpu.memory_space<vmem>>, vector<2x1x128xbf16>
    %110 = vector.shape_cast %109 : vector<2x1x128xbf16> to vector<2x128xbf16>
    %c2_110 = arith.constant 2 : index
    %c512_111 = arith.constant 512 : index
    %111 = vector.load %arg8[%c2_110, %c512_111] : memref<8x3200xbf16, #tpu.memory_space<vmem>>, vector<2x128xbf16>
    tpu.vector_store %arg8[%c2_110, %c512_111], %110 {strides = array<i32>} : memref<8x3200xbf16, #tpu.memory_space<vmem>>, vector<2x128xbf16>,
    %c0_112 = arith.constant 0 : index
    %c30 = arith.constant 30 : index
    %c0_113 = arith.constant 0 : index
    %112 = vector.load %arg7[%c0_112, %c30, %c0_113] : memref<2x50x128xbf16, #tpu.memory_space<vmem>>, vector<2x1x128xbf16>
    %113 = vector.shape_cast %112 : vector<2x1x128xbf16> to vector<2x128xbf16>
    %c2_114 = arith.constant 2 : index
    %c640_115 = arith.constant 640 : index
    %114 = vector.load %arg8[%c2_114, %c640_115] : memref<8x3200xbf16, #tpu.memory_space<vmem>>, vector<2x128xbf16>
    tpu.vector_store %arg8[%c2_114, %c640_115], %113 {strides = array<i32>} : memref<8x3200xbf16, #tpu.memory_space<vmem>>, vector<2x128xbf16>,
    %c0_116 = arith.constant 0 : index
    %c31 = arith.constant 31 : index
    %c0_117 = arith.constant 0 : index
    %115 = vector.load %arg7[%c0_116, %c31, %c0_117] : memref<2x50x128xbf16, #tpu.memory_space<vmem>>, vector<2x1x128xbf16>
    %116 = vector.shape_cast %115 : vector<2x1x128xbf16> to vector<2x128xbf16>
    %c2_118 = arith.constant 2 : index
    %c768_119 = arith.constant 768 : index
    %117 = vector.load %arg8[%c2_118, %c768_119] : memref<8x3200xbf16, #tpu.memory_space<vmem>>, vector<2x128xbf16>
    tpu.vector_store %arg8[%c2_118, %c768_119], %116 {strides = array<i32>} : memref<8x3200xbf16, #tpu.memory_space<vmem>>, vector<2x128xbf16>,
    %c0_120 = arith.constant 0 : index
    %c32 = arith.constant 32 : index
    %c0_121 = arith.constant 0 : index
    %118 = vector.load %arg7[%c0_120, %c32, %c0_121] : memref<2x50x128xbf16, #tpu.memory_space<vmem>>, vector<2x1x128xbf16>
    %119 = vector.shape_cast %118 : vector<2x1x128xbf16> to vector<2x128xbf16>
    %c2_122 = arith.constant 2 : index
    %c896_123 = arith.constant 896 : index
    %120 = vector.load %arg8[%c2_122, %c896_123] : memref<8x3200xbf16, #tpu.memory_space<vmem>>, vector<2x128xbf16>
    tpu.vector_store %arg8[%c2_122, %c896_123], %119 {strides = array<i32>} : memref<8x3200xbf16, #tpu.memory_space<vmem>>, vector<2x128xbf16>,
    %c0_124 = arith.constant 0 : index
    %c33 = arith.constant 33 : index
    %c0_125 = arith.constant 0 : index
    %121 = vector.load %arg7[%c0_124, %c33, %c0_125] : memref<2x50x128xbf16, #tpu.memory_space<vmem>>, vector<2x1x128xbf16>
    %122 = vector.shape_cast %121 : vector<2x1x128xbf16> to vector<2x128xbf16>
    %c2_126 = arith.constant 2 : index
    %c1024_127 = arith.constant 1024 : index
    %123 = vector.load %arg8[%c2_126, %c1024_127] : memref<8x3200xbf16, #tpu.memory_space<vmem>>, vector<2x128xbf16>
    tpu.vector_store %arg8[%c2_126, %c1024_127], %122 {strides = array<i32>} : memref<8x3200xbf16, #tpu.memory_space<vmem>>, vector<2x128xbf16>,
    %c0_128 = arith.constant 0 : index
    %c34 = arith.constant 34 : index
    %c0_129 = arith.constant 0 : index
    %124 = vector.load %arg7[%c0_128, %c34, %c0_129] : memref<2x50x128xbf16, #tpu.memory_space<vmem>>, vector<2x1x128xbf16>
    %125 = vector.shape_cast %124 : vector<2x1x128xbf16> to vector<2x128xbf16>
    %c2_130 = arith.constant 2 : index
    %c1152_131 = arith.constant 1152 : index
    %126 = vector.load %arg8[%c2_130, %c1152_131] : memref<8x3200xbf16, #tpu.memory_space<vmem>>, vector<2x128xbf16>
    tpu.vector_store %arg8[%c2_130, %c1152_131], %125 {strides = array<i32>} : memref<8x3200xbf16, #tpu.memory_space<vmem>>, vector<2x128xbf16>,
    %c0_132 = arith.constant 0 : index
    %c35 = arith.constant 35 : index
    %c0_133 = arith.constant 0 : index
    %127 = vector.load %arg7[%c0_132, %c35, %c0_133] : memref<2x50x128xbf16, #tpu.memory_space<vmem>>, vector<2x1x128xbf16>
    %128 = vector.shape_cast %127 : vector<2x1x128xbf16> to vector<2x128xbf16>
    %c2_134 = arith.constant 2 : index
    %c1280_135 = arith.constant 1280 : index
    %129 = vector.load %arg8[%c2_134, %c1280_135] : memref<8x3200xbf16, #tpu.memory_space<vmem>>, vector<2x128xbf16>
    tpu.vector_store %arg8[%c2_134, %c1280_135], %128 {strides = array<i32>} : memref<8x3200xbf16, #tpu.memory_space<vmem>>, vector<2x128xbf16>,
    %c0_136 = arith.constant 0 : index
    %c36 = arith.constant 36 : index
    %c0_137 = arith.constant 0 : index
    %130 = vector.load %arg7[%c0_136, %c36, %c0_137] : memref<2x50x128xbf16, #tpu.memory_space<vmem>>, vector<2x1x128xbf16>
    %131 = vector.shape_cast %130 : vector<2x1x128xbf16> to vector<2x128xbf16>
    %c2_138 = arith.constant 2 : index
    %c1408_139 = arith.constant 1408 : index
    %132 = vector.load %arg8[%c2_138, %c1408_139] : memref<8x3200xbf16, #tpu.memory_space<vmem>>, vector<2x128xbf16>
    tpu.vector_store %arg8[%c2_138, %c1408_139], %131 {strides = array<i32>} : memref<8x3200xbf16, #tpu.memory_space<vmem>>, vector<2x128xbf16>,
    %c0_140 = arith.constant 0 : index
    %c37 = arith.constant 37 : index
    %c0_141 = arith.constant 0 : index
    %133 = vector.load %arg7[%c0_140, %c37, %c0_141] : memref<2x50x128xbf16, #tpu.memory_space<vmem>>, vector<2x1x128xbf16>
    %134 = vector.shape_cast %133 : vector<2x1x128xbf16> to vector<2x128xbf16>
    %c2_142 = arith.constant 2 : index
    %c1536_143 = arith.constant 1536 : index
    %135 = vector.load %arg8[%c2_142, %c1536_143] : memref<8x3200xbf16, #tpu.memory_space<vmem>>, vector<2x128xbf16>
    tpu.vector_store %arg8[%c2_142, %c1536_143], %134 {strides = array<i32>} : memref<8x3200xbf16, #tpu.memory_space<vmem>>, vector<2x128xbf16>,
    %c0_144 = arith.constant 0 : index
    %c38 = arith.constant 38 : index
    %c0_145 = arith.constant 0 : index
    %136 = vector.load %arg7[%c0_144, %c38, %c0_145] : memref<2x50x128xbf16, #tpu.memory_space<vmem>>, vector<2x1x128xbf16>
    %137 = vector.shape_cast %136 : vector<2x1x128xbf16> to vector<2x128xbf16>
    %c2_146 = arith.constant 2 : index
    %c1664_147 = arith.constant 1664 : index
    %138 = vector.load %arg8[%c2_146, %c1664_147] : memref<8x3200xbf16, #tpu.memory_space<vmem>>, vector<2x128xbf16>
    tpu.vector_store %arg8[%c2_146, %c1664_147], %137 {strides = array<i32>} : memref<8x3200xbf16, #tpu.memory_space<vmem>>, vector<2x128xbf16>,
    %c0_148 = arith.constant 0 : index
    %c39 = arith.constant 39 : index
    %c0_149 = arith.constant 0 : index
    %139 = vector.load %arg7[%c0_148, %c39, %c0_149] : memref<2x50x128xbf16, #tpu.memory_space<vmem>>, vector<2x1x128xbf16>
    %140 = vector.shape_cast %139 : vector<2x1x128xbf16> to vector<2x128xbf16>
    %c2_150 = arith.constant 2 : index
    %c1792_151 = arith.constant 1792 : index
    %141 = vector.load %arg8[%c2_150, %c1792_151] : memref<8x3200xbf16, #tpu.memory_space<vmem>>, vector<2x128xbf16>
    tpu.vector_store %arg8[%c2_150, %c1792_151], %140 {strides = array<i32>} : memref<8x3200xbf16, #tpu.memory_space<vmem>>, vector<2x128xbf16>,
    %c0_152 = arith.constant 0 : index
    %c40 = arith.constant 40 : index
    %c0_153 = arith.constant 0 : index
    %142 = vector.load %arg7[%c0_152, %c40, %c0_153] : memref<2x50x128xbf16, #tpu.memory_space<vmem>>, vector<2x1x128xbf16>
    %143 = vector.shape_cast %142 : vector<2x1x128xbf16> to vector<2x128xbf16>
    %c2_154 = arith.constant 2 : index
    %c1920_155 = arith.constant 1920 : index
    %144 = vector.load %arg8[%c2_154, %c1920_155] : memref<8x3200xbf16, #tpu.memory_space<vmem>>, vector<2x128xbf16>
    tpu.vector_store %arg8[%c2_154, %c1920_155], %143 {strides = array<i32>} : memref<8x3200xbf16, #tpu.memory_space<vmem>>, vector<2x128xbf16>,
    %c0_156 = arith.constant 0 : index
    %c41 = arith.constant 41 : index
    %c0_157 = arith.constant 0 : index
    %145 = vector.load %arg7[%c0_156, %c41, %c0_157] : memref<2x50x128xbf16, #tpu.memory_space<vmem>>, vector<2x1x128xbf16>
    %146 = vector.shape_cast %145 : vector<2x1x128xbf16> to vector<2x128xbf16>
    %c2_158 = arith.constant 2 : index
    %c2048_159 = arith.constant 2048 : index
    %147 = vector.load %arg8[%c2_158, %c2048_159] : memref<8x3200xbf16, #tpu.memory_space<vmem>>, vector<2x128xbf16>
    tpu.vector_store %arg8[%c2_158, %c2048_159], %146 {strides = array<i32>} : memref<8x3200xbf16, #tpu.memory_space<vmem>>, vector<2x128xbf16>,
    %c0_160 = arith.constant 0 : index
    %c42 = arith.constant 42 : index
    %c0_161 = arith.constant 0 : index
    %148 = vector.load %arg7[%c0_160, %c42, %c0_161] : memref<2x50x128xbf16, #tpu.memory_space<vmem>>, vector<2x1x128xbf16>
    %149 = vector.shape_cast %148 : vector<2x1x128xbf16> to vector<2x128xbf16>
    %c2_162 = arith.constant 2 : index
    %c2176_163 = arith.constant 2176 : index
    %150 = vector.load %arg8[%c2_162, %c2176_163] : memref<8x3200xbf16, #tpu.memory_space<vmem>>, vector<2x128xbf16>
    tpu.vector_store %arg8[%c2_162, %c2176_163], %149 {strides = array<i32>} : memref<8x3200xbf16, #tpu.memory_space<vmem>>, vector<2x128xbf16>,
    %c0_164 = arith.constant 0 : index
    %c43 = arith.constant 43 : index
    %c0_165 = arith.constant 0 : index
    %151 = vector.load %arg7[%c0_164, %c43, %c0_165] : memref<2x50x128xbf16, #tpu.memory_space<vmem>>, vector<2x1x128xbf16>
    %152 = vector.shape_cast %151 : vector<2x1x128xbf16> to vector<2x128xbf16>
    %c2_166 = arith.constant 2 : index
    %c2304_167 = arith.constant 2304 : index
    %153 = vector.load %arg8[%c2_166, %c2304_167] : memref<8x3200xbf16, #tpu.memory_space<vmem>>, vector<2x128xbf16>
    tpu.vector_store %arg8[%c2_166, %c2304_167], %152 {strides = array<i32>} : memref<8x3200xbf16, #tpu.memory_space<vmem>>, vector<2x128xbf16>,
    %c0_168 = arith.constant 0 : index
    %c44 = arith.constant 44 : index
    %c0_169 = arith.constant 0 : index
    %154 = vector.load %arg7[%c0_168, %c44, %c0_169] : memref<2x50x128xbf16, #tpu.memory_space<vmem>>, vector<2x1x128xbf16>
    %155 = vector.shape_cast %154 : vector<2x1x128xbf16> to vector<2x128xbf16>
    %c2_170 = arith.constant 2 : index
    %c2432_171 = arith.constant 2432 : index
    %156 = vector.load %arg8[%c2_170, %c2432_171] : memref<8x3200xbf16, #tpu.memory_space<vmem>>, vector<2x128xbf16>
    tpu.vector_store %arg8[%c2_170, %c2432_171], %155 {strides = array<i32>} : memref<8x3200xbf16, #tpu.memory_space<vmem>>, vector<2x128xbf16>,
    %c0_172 = arith.constant 0 : index
    %c45 = arith.constant 45 : index
    %c0_173 = arith.constant 0 : index
    %157 = vector.load %arg7[%c0_172, %c45, %c0_173] : memref<2x50x128xbf16, #tpu.memory_space<vmem>>, vector<2x1x128xbf16>
    %158 = vector.shape_cast %157 : vector<2x1x128xbf16> to vector<2x128xbf16>
    %c2_174 = arith.constant 2 : index
    %c2560_175 = arith.constant 2560 : index
    %159 = vector.load %arg8[%c2_174, %c2560_175] : memref<8x3200xbf16, #tpu.memory_space<vmem>>, vector<2x128xbf16>
    tpu.vector_store %arg8[%c2_174, %c2560_175], %158 {strides = array<i32>} : memref<8x3200xbf16, #tpu.memory_space<vmem>>, vector<2x128xbf16>,
    %c0_176 = arith.constant 0 : index
    %c46 = arith.constant 46 : index
    %c0_177 = arith.constant 0 : index
    %160 = vector.load %arg7[%c0_176, %c46, %c0_177] : memref<2x50x128xbf16, #tpu.memory_space<vmem>>, vector<2x1x128xbf16>
    %161 = vector.shape_cast %160 : vector<2x1x128xbf16> to vector<2x128xbf16>
    %c2_178 = arith.constant 2 : index
    %c2688_179 = arith.constant 2688 : index
    %162 = vector.load %arg8[%c2_178, %c2688_179] : memref<8x3200xbf16, #tpu.memory_space<vmem>>, vector<2x128xbf16>
    tpu.vector_store %arg8[%c2_178, %c2688_179], %161 {strides = array<i32>} : memref<8x3200xbf16, #tpu.memory_space<vmem>>, vector<2x128xbf16>,
    %c0_180 = arith.constant 0 : index
    %c47 = arith.constant 47 : index
    %c0_181 = arith.constant 0 : index
    %163 = vector.load %arg7[%c0_180, %c47, %c0_181] : memref<2x50x128xbf16, #tpu.memory_space<vmem>>, vector<2x1x128xbf16>
    %164 = vector.shape_cast %163 : vector<2x1x128xbf16> to vector<2x128xbf16>
    %c2_182 = arith.constant 2 : index
    %c2816_183 = arith.constant 2816 : index
    %165 = vector.load %arg8[%c2_182, %c2816_183] : memref<8x3200xbf16, #tpu.memory_space<vmem>>, vector<2x128xbf16>
    tpu.vector_store %arg8[%c2_182, %c2816_183], %164 {strides = array<i32>} : memref<8x3200xbf16, #tpu.memory_space<vmem>>, vector<2x128xbf16>,
    %c0_184 = arith.constant 0 : index
    %c48 = arith.constant 48 : index
    %c0_185 = arith.constant 0 : index
    %166 = vector.load %arg7[%c0_184, %c48, %c0_185] : memref<2x50x128xbf16, #tpu.memory_space<vmem>>, vector<2x1x128xbf16>
    %167 = vector.shape_cast %166 : vector<2x1x128xbf16> to vector<2x128xbf16>
    %c2_186 = arith.constant 2 : index
    %c2944_187 = arith.constant 2944 : index
    %168 = vector.load %arg8[%c2_186, %c2944_187] : memref<8x3200xbf16, #tpu.memory_space<vmem>>, vector<2x128xbf16>
    tpu.vector_store %arg8[%c2_186, %c2944_187], %167 {strides = array<i32>} : memref<8x3200xbf16, #tpu.memory_space<vmem>>, vector<2x128xbf16>,
    %c0_188 = arith.constant 0 : index
    %c49 = arith.constant 49 : index
    %c0_189 = arith.constant 0 : index
    %169 = vector.load %arg7[%c0_188, %c49, %c0_189] : memref<2x50x128xbf16, #tpu.memory_space<vmem>>, vector<2x1x128xbf16>
    %170 = vector.shape_cast %169 : vector<2x1x128xbf16> to vector<2x128xbf16>
    %c2_190 = arith.constant 2 : index
    %c3072_191 = arith.constant 3072 : index
    %171 = vector.load %arg8[%c2_190, %c3072_191] : memref<8x3200xbf16, #tpu.memory_space<vmem>>, vector<2x128xbf16>
    tpu.vector_store %arg8[%c2_190, %c3072_191], %170 {strides = array<i32>} : memref<8x3200xbf16, #tpu.memory_space<vmem>>, vector<2x128xbf16>,
    %c0_192 = arith.constant 0 : index
    %c0_193 = arith.constant 0 : index
    %172 = vector.load %arg8[%c0_192, %c0_193] : memref<8x3200xbf16, #tpu.memory_space<vmem>>, vector<8x3200xbf16>
    %c0_194 = arith.constant 0 : index
    %c0_195 = arith.constant 0 : index
    %173 = vector.load %arg4[%c0_194, %c0_195] : memref<3200x256xbf16, #tpu.memory_space<vmem>>, vector<3200x256xbf16>
    %cst_196 = arith.constant dense<0.000000e+00> : vector<8x256xf32>
    %174 = tpu.matmul %172, %173, %cst_196 {dimension_numbers = #tpu.dot_dimension_numbers<[1], [0], [0], [1], [0, 0, 1, 1], [], []>} : vector<8x3200xbf16>, vector<3200x256xbf16>, vector<8x256xf32> -> vector<8x256xf32>
    %175 = vector.extract_strided_slice %174 {offsets = [0, 0], sizes = [6, 128], strides = [1, 1]} : vector<8x256xf32> to vector<6x128xf32>
    %176 = vector.extract_strided_slice %174 {offsets = [2, 128], sizes = [6, 128], strides = [1, 1]} : vector<8x256xf32> to vector<6x128xf32>
    %177 = arith.addf %175, %176 : vector<6x128xf32>
    %c0_197 = arith.constant 0 : index
    %c0_198 = arith.constant 0 : index
    %178 = vector.load %arg5[%c0_197, %c0_198] : memref<1x128xf32, #tpu.memory_space<vmem>>, vector<1x128xf32>
    %179 = vector.broadcast %178 : vector<1x128xf32> to vector<6x128xf32>
    %180 = arith.addf %177, %179 : vector<6x128xf32>
    %181 = math.tanh %180 : vector<6x128xf32>
    %182 = tpu.iota {dimensions = array<i32: 0>} : vector<6x128xi32>
    %c2_i32 = arith.constant 2 : i32
    %183 = vector.broadcast %c2_i32 : i32 to vector<6x128xi32>
    %184 = arith.cmpi slt, %182, %183 : vector<6x128xi32>
    %cst_199 = arith.constant 0xFF800000 : f32
    %185 = vector.broadcast %cst_199 : f32 to vector<6x128xf32>
    %186 = arith.select %184, %181, %185 : vector<6x128xi1>, vector<6x128xf32>
    %cst_200 = arith.constant dense<0xFF800000> : vector<128xf32>
    %187 = vector.multi_reduction <maximumf>, %186, %cst_200 [0] : vector<6x128xf32> to vector<128xf32>
    %188 = vector.shape_cast %187 : vector<128xf32> to vector<1x128xf32>
    %c0_201 = arith.constant 0 : index
    %c0_202 = arith.constant 0 : index
    %189 = vector.load %arg6[%c0_201, %c0_202] : memref<1x128xf32, #tpu.memory_space<vmem>>, vector<1x128xf32>
    tpu.vector_store %arg6[%c0_201, %c0_202], %188 {strides = array<i32>} : memref<1x128xf32, #tpu.memory_space<vmem>>, vector<1x128xf32>,
    return
  }
  func.func @transform_0(%arg0: i32) -> (i32, i32) {
    %c0_i32 = arith.constant 0 : i32
    %c0_i32_0 = arith.constant 0 : i32
    %c0_i32_1 = arith.constant 0 : i32
    return %c0_i32, %c0_i32_0 : i32, i32
  }
  func.func @transform_1(%arg0: i32) -> (i32, i32) {
    %c0_i32 = arith.constant 0 : i32
    %c0_i32_0 = arith.constant 0 : i32
    %c0_i32_1 = arith.constant 0 : i32
    return %c0_i32, %c0_i32_0 : i32, i32
  }
  func.func @transform_2(%arg0: i32) -> (i32, i32) {
    %c0_i32 = arith.constant 0 : i32
    %c0_i32_0 = arith.constant 0 : i32
    %c0_i32_1 = arith.constant 0 : i32
    return %c0_i32, %c0_i32_0 : i32, i32
  }
  func.func @transform_3(%arg0: i32) -> (i32, i32) {
    %c0_i32 = arith.constant 0 : i32
    %c0_i32_0 = arith.constant 0 : i32
    %c0_i32_1 = arith.constant 0 : i32
    return %c0_i32, %c0_i32_0 : i32, i32
  }
  func.func @transform_4(%arg0: i32) -> (i32, i32) {
    %c0_i32 = arith.constant 0 : i32
    %c0_i32_0 = arith.constant 0 : i32
    %c0_i32_1 = arith.constant 0 : i32
    return %c0_i32, %c0_i32_0 : i32, i32
  }
  func.func @transform_5(%arg0: i32) -> (i32, i32) {
    %c0_i32 = arith.constant 0 : i32
    %c0_i32_0 = arith.constant 0 : i32
    %c0_i32_1 = arith.constant 0 : i32
    return %c0_i32, %c0_i32_0 : i32, i32
  }
}

</mosaic_0001>

<bundles_post_ra>
// kernel: my_model_forward.1
= control target key start
LH: loop header
LB: loop body
LE: loop exit
PB: predicated region body
PF: predicated region fallthrough
CT: control target
= control target key end

     0   :  { %vm3651_vm0 = vcmask 1046528   ;;  %vm3788_vm1 = vcmask 1041409   ;;  %vm4083_vm2 = vcmask 1043459   ;;  %vm7535_vm4 = vcmask 1045504   ;;  %s17528_s1 = inlined_call_operand.vmem [shape: bf16[2048,256], index: 1, kind: input, shape index: {}]   ;;  %s17529_s0 = inlined_call_operand.vmem [shape: bf16[112,2048], index: 0, kind: input, shape index: {}]   ;;  %s17530_s2 = inlined_call_operand.vmem [shape: f32[1,128], index: 2, kind: input, shape index: {}]   ;;  %s17531_s3 = inlined_call_operand.vmem [shape: bf16[3200,256], index: 3, kind: input, shape index: {}]   ;;  %s17532_s4 = inlined_call_operand.vmem [shape: f32[1,128], index: 4, kind: input, shape index: {}]   ;;  %s17533_s5 = inlined_call_operand.vmem [shape: f32[1,128], index: 5, kind: output, shape index: {}]  }
   0x1   :  { %v8054_v0 = vld [vmem:[%s17528_s1 + $0x70] sm:$0xf]  ;;  %v10747_v1 = vld [vmem:[%s17528_s1 + $0x74] sm:$0xf0]  ;;  %v8046_v11 = vld [vmem:[%s17528_s1 + $0x60] sm:$0xf] }
   0x2   :  { %v8118_v2 = vld [vmem:[%s17528_s1 + $0xf0] sm:$0xf]  ;;  %v8055_v3 = vor.u32 %v10747_v1, %v8054_v0  ;;  %v10763_v4 = vld [vmem:[%s17528_s1 + $0xf4] sm:$0xf0]  ;;  %v10745_v13 = vld [vmem:[%s17528_s1 + $0x64] sm:$0xf0] }
   0x3   :  { %v8182_v5 = vld [vmem:[%s17528_s1 + $0x170] sm:$0xf]  ;;  %v10779_v6 = vld [vmem:[%s17528_s1 + $0x174] sm:$0xf0]  ;;  %v8119_v7 = vor.u32 %v10763_v4, %v8118_v2  ;;  %v8110_v14 = vld [vmem:[%s17528_s1 + $0xe0] sm:$0xf]  ;;  %v8047_v16 = vor.u32 %v10745_v13, %v8046_v11 }
   0x4   :  { %v8183_v8 = vor.u32 %v10779_v6, %v8182_v5  ;;  %v8246_v9 = vld [vmem:[%s17528_s1 + $0x1f0] sm:$0xf]  ;;  %v10795_v10 = vld [vmem:[%s17528_s1 + $0x1f4] sm:$0xf0]  ;;  %2229 = vmatpush.bf16.msra.mxu0 %v8055_v3  ;;  %v10761_v15 = vld [vmem:[%s17528_s1 + $0xe4] sm:$0xf0] }
   0x5   :  { %v8247_v12 = vor.u32 %v10795_v10, %v8246_v9  ;;  %2273 = vmatpush.bf16.msra.mxu1 %v8119_v7  ;;  %v8111_v17 = vor.u32 %v10761_v15, %v8110_v14  ;;  %v8174_v18 = vld [vmem:[%s17528_s1 + $0x160] sm:$0xf]  ;;  %v10777_v19 = vld [vmem:[%s17528_s1 + $0x164] sm:$0xf0]  ;;  %v8038_v23 = vld [vmem:[%s17528_s1 + $0x50] sm:$0xf] }
   0x6   :  { %2317 = vmatpush.bf16.msra.mxu2 %v8183_v8  ;;  %v8238_v20 = vld [vmem:[%s17528_s1 + $0x1e0] sm:$0xf]  ;;  %v8175_v21 = vor.u32 %v10777_v19, %v8174_v18  ;;  %v10793_v22 = vld [vmem:[%s17528_s1 + $0x1e4] sm:$0xf0]  ;;  %v10743_v24 = vld [vmem:[%s17528_s1 + $0x54] sm:$0xf0] }
   0x7   :  { %2361 = vmatpush.bf16.msra.mxu3 %v8247_v12  ;;  %v8239_v25 = vor.u32 %v10793_v22, %v8238_v20  ;;  %v8102_v26 = vld [vmem:[%s17528_s1 + $0xd0] sm:$0xf]  ;;  %v10759_v27 = vld [vmem:[%s17528_s1 + $0xd4] sm:$0xf0]  ;;  %v8039_v29 = vor.u32 %v10743_v24, %v8038_v23  ;;  %v8030_v35 = vld [vmem:[%s17528_s1 + $0x40] sm:$0xf] }
   0x8   :  { %v8166_v28 = vld [vmem:[%s17528_s1 + $0x150] sm:$0xf]  ;;  %2230 = vmatpush.bf16.msra.mxu0 %v8047_v16  ;;  %v10775_v30 = vld [vmem:[%s17528_s1 + $0x154] sm:$0xf0]  ;;  %v8103_v33 = vor.u32 %v10759_v27, %v8102_v26  ;;  %v10741_v36 = vld [vmem:[%s17528_s1 + $0x44] sm:$0xf0] }
   0x9   :  { %v8230_v31 = vld [vmem:[%s17528_s1 + $0x1d0] sm:$0xf]  ;;  %v10791_v32 = vld [vmem:[%s17528_s1 + $0x1d4] sm:$0xf0]  ;;  %2274 = vmatpush.bf16.msra.mxu1 %v8111_v17  ;;  %v8167_v34 = vor.u32 %v10775_v30, %v8166_v28  ;;  %v8094_v37 = vld [vmem:[%s17528_s1 + $0xc0] sm:$0xf]  ;;  %v8031_v44 = vor.u32 %v10741_v36, %v8030_v35 }
   0xa   :  { %2318 = vmatpush.bf16.msra.mxu2 %v8175_v21  ;;  %v8231_v38 = vor.u32 %v10791_v32, %v8230_v31  ;;  %v10757_v39 = vld [vmem:[%s17528_s1 + $0xc4] sm:$0xf0]  ;;  %v8158_v40 = vld [vmem:[%s17528_s1 + $0x140] sm:$0xf]  ;;  %v8022_v47 = vld [vmem:[%s17528_s1 + $0x30] sm:$0xf] }
   0xb   :  { %2362 = vmatpush.bf16.msra.mxu3 %v8239_v25  ;;  %v10773_v41 = vld [vmem:[%s17528_s1 + $0x144] sm:$0xf0]  ;;  %v8222_v42 = vld [vmem:[%s17528_s1 + $0x1c0] sm:$0xf]  ;;  %v8095_v45 = vor.u32 %v10757_v39, %v8094_v37  ;;  %v10739_v48 = vld [vmem:[%s17528_s1 + $0x34] sm:$0xf0] }
   0xc   :  { %v10789_v43 = vld [vmem:[%s17528_s1 + $0x1c4] sm:$0xf0]  ;;  %2231 = vmatpush.bf16.msra.mxu0 %v8039_v29  ;;  %v8159_v46 = vor.u32 %v10773_v41, %v8158_v40  ;;  %v8086_v49 = vld [vmem:[%s17528_s1 + $0xb0] sm:$0xf]  ;;  %v10755_v51 = vld [vmem:[%s17528_s1 + $0xb4] sm:$0xf0]  ;;  %v8023_v56 = vor.u32 %v10739_v48, %v8022_v47 }
   0xd   :  { %2275 = vmatpush.bf16.msra.mxu1 %v8103_v33  ;;  %v8223_v50 = vor.u32 %v10789_v43, %v8222_v42  ;;  %v8150_v52 = vld [vmem:[%s17528_s1 + $0x130] sm:$0xf]  ;;  %v10771_v53 = vld [vmem:[%s17528_s1 + $0x134] sm:$0xf0]  ;;  %v8087_v57 = vor.u32 %v10755_v51, %v8086_v49  ;;  %v8014_v59 = vld [vmem:[%s17528_s1 + $0x20] sm:$0xf] }
   0xe   :  { %2319 = vmatpush.bf16.msra.mxu2 %v8167_v34  ;;  %v8214_v54 = vld [vmem:[%s17528_s1 + $0x1b0] sm:$0xf]  ;;  %v10787_v55 = vld [vmem:[%s17528_s1 + $0x1b4] sm:$0xf0]  ;;  %v8151_v58 = vor.u32 %v10771_v53, %v8150_v52  ;;  %v10737_v60 = vld [vmem:[%s17528_s1 + $0x24] sm:$0xf0] }
   0xf   :  { %2363 = vmatpush.bf16.msra.mxu3 %v8231_v38  ;;  %v8078_v61 = vld [vmem:[%s17528_s1 + $0xa0] sm:$0xf]  ;;  %v8215_v62 = vor.u32 %v10787_v55, %v8214_v54  ;;  %v10753_v63 = vld [vmem:[%s17528_s1 + $0xa4] sm:$0xf0]  ;;  %v8015_v4 = vor.u32 %v10737_v60, %v8014_v59  ;;  %v8006_v7 = vld [vmem:[%s17528_s1 + $0x10] sm:$0xf] }
  0x10   :  { %2232 = vmatpush.bf16.msra.mxu0 %v8031_v44  ;;  %v8142_v0 = vld [vmem:[%s17528_s1 + $0x120] sm:$0xf]  ;;  %v10769_v1 = vld [vmem:[%s17528_s1 + $0x124] sm:$0xf0]  ;;  %v8079_v5 = vor.u32 %v10753_v63, %v8078_v61  ;;  %v10735_v8 = vld [vmem:[%s17528_s1 + $0x14] sm:$0xf0] }
  0x11   :  { %2276 = vmatpush.bf16.msra.mxu1 %v8095_v45  ;;  %v8206_v2 = vld [vmem:[%s17528_s1 + $0x1a0] sm:$0xf]  ;;  %v10785_v3 = vld [vmem:[%s17528_s1 + $0x1a4] sm:$0xf0]  ;;  %v8143_v6 = vor.u32 %v10769_v1, %v8142_v0  ;;  %v8070_v9 = vld [vmem:[%s17528_s1 + $0x90] sm:$0xf]  ;;  %v8007_v16 = vor.u32 %v10735_v8, %v8006_v7 }
  0x12   :  { %2320 = vmatpush.bf16.msra.mxu2 %v8159_v46  ;;  %v8207_v10 = vor.u32 %v10785_v3, %v8206_v2  ;;  %v10751_v11 = vld [vmem:[%s17528_s1 + $0x94] sm:$0xf0]  ;;  %v8134_v12 = vld [vmem:[%s17528_s1 + $0x110] sm:$0xf]  ;;  %v7998_v19 = vld [vmem:[%s17528_s1] sm:$0xf] }
  0x13   :  { %2364 = vmatpush.bf16.msra.mxu3 %v8223_v50  ;;  %v10767_v13 = vld [vmem:[%s17528_s1 + $0x114] sm:$0xf0]  ;;  %v8198_v14 = vld [vmem:[%s17528_s1 + $0x190] sm:$0xf]  ;;  %v8071_v17 = vor.u32 %v10751_v11, %v8070_v9  ;;  %v10733_v20 = vld [vmem:[%s17528_s1 + $0x4] sm:$0xf0] }
  0x14   :  { %2233 = vmatpush.bf16.msra.mxu0 %v8023_v56  ;;  %v10783_v15 = vld [vmem:[%s17528_s1 + $0x194] sm:$0xf0]  ;;  %v8135_v18 = vor.u32 %v10767_v13, %v8134_v12  ;;  %v8062_v21 = vld [vmem:[%s17528_s1 + $0x80] sm:$0xf]  ;;  %v10749_v23 = vld [vmem:[%s17528_s1 + $0x84] sm:$0xf0]  ;;  %v7999_v28 = vor.u32 %v10733_v20, %v7998_v19 }
  0x15   :  { %2277 = vmatpush.bf16.msra.mxu1 %v8087_v57  ;;  %v8199_v22 = vor.u32 %v10783_v15, %v8198_v14  ;;  %v8126_v24 = vld [vmem:[%s17528_s1 + $0x100] sm:$0xf]  ;;  %v10765_v25 = vld [vmem:[%s17528_s1 + $0x104] sm:$0xf0]  ;;  %v10620_v31 = vld [vmem:[%s17529_s0 + $0x4] sm:$0xf]  ;;  %v8063_v32 = vor.u32 %v10749_v23, %v8062_v21 }
  0x16   :  { %2321 = vmatpush.bf16.msra.mxu2 %v8151_v58  ;;  %v8190_v26 = vld [vmem:[%s17528_s1 + $0x180] sm:$0xf]  ;;  %v10781_v27 = vld [vmem:[%s17528_s1 + $0x184] sm:$0xf0]  ;;  %v8127_v33 = vor.u32 %v10765_v25, %v8126_v24  ;;  %v7552_v34 = vld [vmem:[%s17529_s0 + $0x40] sm:$0xf0] }
  0x17   :  { %2365 = vmatpush.bf16.msra.mxu3 %v8215_v62  ;;  %v7550_v29 = vld [vmem:[%s17529_s0] sm:$0xf]  ;;  %v7558_v35 = vld [vmem:[%s17529_s0 + $0x8] sm:$0xf]  ;;  %v8191_v37 = vor.u32 %v10781_v27, %v8190_v26  ;;  %v10621_v38 = vld [vmem:[%s17529_s0 + $0xc] sm:$0xf]  ;;  %v11671_v41 = vor.u32 %v10620_v31, %v7552_v34 }
  0x18   :  { %2234 = vmatpush.bf16.msra.mxu0 %v8015_v4  ;;  %v10628_v30 = vld [vmem:[%s17529_s0 + $0x3c] sm:$0xf0]  ;;  %v10629_v36 = vld [vmem:[%s17529_s0 + $0x44] sm:$0xf0]  ;;  %v7560_v39 = vld [vmem:[%s17529_s0 + $0x48] sm:$0xf0] }
  0x19   :  { %2278 = vmatpush.bf16.msra.mxu1 %v8079_v5  ;;  %v11669_v40 = vor.u32 %v10628_v30, %v7550_v29  ;;  %v11673_v42 = vor.u32 %v10629_v36, %v7558_v35  ;;  %v11675_v43 = vor.u32 %v10621_v38, %v7560_v39  ;;  %v7614_v44 = vld [vmem:[%s17529_s0 + $0x80] sm:$0xf]  ;;  %v10636_v46 = vld [vmem:[%s17529_s0 + $0x84] sm:$0xf]  ;;  %v7622_v48 = vld [vmem:[%s17529_s0 + $0x88] sm:$0xf] }
  0x1a   :  { %2322 = vmatpush.bf16.msra.mxu2 %v8143_v6  ;;  %v10644_v45 = vld [vmem:[%s17529_s0 + $0xbc] sm:$0xf0]  ;;  %v7616_v47 = vld [vmem:[%s17529_s0 + $0xc0] sm:$0xf0]  ;;  %v10645_v49 = vld [vmem:[%s17529_s0 + $0xc4] sm:$0xf0] }
  0x1b   :  { %2366 = vmatpush.bf16.msra.mxu3 %v8207_v10  ;;  %v10637_v50 = vld [vmem:[%s17529_s0 + $0x8c] sm:$0xf]  ;;  %v11705_v52 = vor.u32 %v10644_v45, %v7614_v44  ;;  %v11707_v53 = vor.u32 %v10636_v46, %v7616_v47  ;;  %v11709_v54 = vor.u32 %v10645_v49, %v7622_v48  ;;  %v7678_v56 = vld [vmem:[%s17529_s0 + $0x100] sm:$0xf]  ;;  %v10652_v58 = vld [vmem:[%s17529_s0 + $0x104] sm:$0xf] }
  0x1c   :  { %2235 = vmatpush.bf16.msra.mxu0 %v8007_v16  ;;  %v7624_v51 = vld [vmem:[%s17529_s0 + $0xc8] sm:$0xf0]  ;;  %v10660_v57 = vld [vmem:[%s17529_s0 + $0x13c] sm:$0xf0]  ;;  %v7680_v59 = vld [vmem:[%s17529_s0 + $0x140] sm:$0xf0] }
  0x1d   :  { %2279 = vmatpush.bf16.msra.mxu1 %v8071_v17  ;;  %v11711_v55 = vor.u32 %v10637_v50, %v7624_v51  ;;  %v7686_v60 = vld [vmem:[%s17529_s0 + $0x108] sm:$0xf]  ;;  %v10653_v62 = vld [vmem:[%s17529_s0 + $0x10c] sm:$0xf]  ;;  %v11741_v0 = vor.u32 %v10660_v57, %v7678_v56  ;;  %v11743_v1 = vor.u32 %v10652_v58, %v7680_v59  ;;  %v7742_v4 = vld [vmem:[%s17529_s0 + $0x180] sm:$0xf] }
  0x1e   :  { %2323 = vmatpush.bf16.msra.mxu2 %v8135_v18  ;;  %v10661_v61 = vld [vmem:[%s17529_s0 + $0x144] sm:$0xf0]  ;;  %v7688_v63 = vld [vmem:[%s17529_s0 + $0x148] sm:$0xf0]  ;;  %v10676_v5 = vld [vmem:[%s17529_s0 + $0x1bc] sm:$0xf0] }
  0x1f   :  { %2367 = vmatpush.bf16.msra.mxu3 %v8199_v22  ;;  %v11745_v2 = vor.u32 %v10661_v61, %v7686_v60  ;;  %v11747_v3 = vor.u32 %v10653_v62, %v7688_v63  ;;  %v10668_v6 = vld [vmem:[%s17529_s0 + $0x184] sm:$0xf]  ;;  %v7750_v8 = vld [vmem:[%s17529_s0 + $0x188] sm:$0xf]  ;;  %v10669_v10 = vld [vmem:[%s17529_s0 + $0x18c] sm:$0xf]  ;;  %v11777_v12 = vor.u32 %v10676_v5, %v7742_v4 }
  0x20   :  { %2236 = vmatpush.bf16.msra.mxu0 %v7999_v28  ;;  %v7744_v7 = vld [vmem:[%s17529_s0 + $0x1c0] sm:$0xf0]  ;;  %v10677_v9 = vld [vmem:[%s17529_s0 + $0x1c4] sm:$0xf0]  ;;  %v7752_v11 = vld [vmem:[%s17529_s0 + $0x1c8] sm:$0xf0] }
  0x21   :  { %2280 = vmatpush.bf16.msra.mxu1 %v8063_v32  ;;  %v11779_v13 = vor.u32 %v10668_v6, %v7744_v7  ;;  %v11781_v14 = vor.u32 %v10677_v9, %v7750_v8  ;;  %v11783_v15 = vor.u32 %v10669_v10, %v7752_v11  ;;  %v8310_v16 = vld [vmem:[%s17528_s1 + $0x270] sm:$0xf]  ;;  %v10811_v17 = vld [vmem:[%s17528_s1 + $0x274] sm:$0xf0]  ;;  %v8302_v27 = vld [vmem:[%s17528_s1 + $0x260] sm:$0xf] }
  0x22   :  { %2324 = vmatpush.bf16.msra.mxu2 %v8127_v33  ;;  %v8374_v18 = vld [vmem:[%s17528_s1 + $0x2f0] sm:$0xf]  ;;  %v8311_v19 = vor.u32 %v10811_v17, %v8310_v16  ;;  %v10827_v20 = vld [vmem:[%s17528_s1 + $0x2f4] sm:$0xf0]  ;;  %v10809_v29 = vld [vmem:[%s17528_s1 + $0x264] sm:$0xf0] }
  0x23   :  { %2368 = vmatpush.bf16.msra.mxu3 %v8191_v37  ;;  %2237 = vmatmul.bf16.vlgmr.msra.gmra.mxu0 %v11669_v40  ;;  %v8438_v21 = vld [vmem:[%s17528_s1 + $0x370] sm:$0xf]  ;;  %v10843_v22 = vld [vmem:[%s17528_s1 + $0x374] sm:$0xf0]  ;;  %v8375_v23 = vor.u32 %v10827_v20, %v8374_v18  ;;  %v8366_v30 = vld [vmem:[%s17528_s1 + $0x2e0] sm:$0xf]  ;;  %v8303_v32 = vor.u32 %v10809_v29, %v8302_v27 }
  0x24   :  { %2281 = vmatmul.bf16.vlgmr.msra.gmra.mxu1 %v11671_v41  ;;  %v8439_v24 = vor.u32 %v10843_v22, %v8438_v21  ;;  %v8502_v25 = vld [vmem:[%s17528_s1 + $0x3f0] sm:$0xf]  ;;  %v10859_v26 = vld [vmem:[%s17528_s1 + $0x3f4] sm:$0xf0]  ;;  %2405 = vmatpush.bf16.msrb.mxu0 %v8311_v19  ;;  %v10825_v31 = vld [vmem:[%s17528_s1 + $0x2e4] sm:$0xf0] }
  0x25   :  { %2325 = vmatmul.bf16.vlgmr.msra.gmra.mxu2 %v11673_v42  ;;  %v8503_v28 = vor.u32 %v10859_v26, %v8502_v25  ;;  %2449 = vmatpush.bf16.msrb.mxu1 %v8375_v23  ;;  %v8367_v33 = vor.u32 %v10825_v31, %v8366_v30  ;;  %v8430_v34 = vld [vmem:[%s17528_s1 + $0x360] sm:$0xf]  ;;  %v10841_v35 = vld [vmem:[%s17528_s1 + $0x364] sm:$0xf0]  ;;  %v8294_v39 = vld [vmem:[%s17528_s1 + $0x250] sm:$0xf] }
  0x26   :  { %2369 = vmatmul.bf16.vlgmr.msra.gmra.mxu3 %v11675_v43  ;;  %2493 = vmatpush.bf16.msrb.mxu2 %v8439_v24  ;;  %v8494_v36 = vld [vmem:[%s17528_s1 + $0x3e0] sm:$0xf]  ;;  %v8431_v37 = vor.u32 %v10841_v35, %v8430_v34  ;;  %v10857_v38 = vld [vmem:[%s17528_s1 + $0x3e4] sm:$0xf0]  ;;  %v10807_v44 = vld [vmem:[%s17528_s1 + $0x254] sm:$0xf0] }
  0x27   :  { %2537 = vmatpush.bf16.msrb.mxu3 %v8503_v28  ;;  %v7806_v45 = vld [vmem:[%s17529_s0 + $0x200] sm:$0xf]  ;;  %v8495_v47 = vor.u32 %v10857_v38, %v8494_v36  ;;  %v8358_v48 = vld [vmem:[%s17528_s1 + $0x2d0] sm:$0xf]  ;;  %v10823_v49 = vld [vmem:[%s17528_s1 + $0x2d4] sm:$0xf0]  ;;  %v8295_v51 = vor.u32 %v10807_v44, %v8294_v39 }
  0x28   :  { %v10692_v46 = vld [vmem:[%s17529_s0 + $0x23c] sm:$0xf0]  ;;  %v8422_v50 = vld [vmem:[%s17528_s1 + $0x350] sm:$0xf]  ;;  %2406 = vmatpush.bf16.msrb.mxu0 %v8303_v32  ;;  %v10839_v56 = vld [vmem:[%s17528_s1 + $0x354] sm:$0xf0]  ;;  %v8359_v62 = vor.u32 %v10823_v49, %v8358_v48 }
  0x29   :  { %v8486_v57 = vld [vmem:[%s17528_s1 + $0x3d0] sm:$0xf]  ;;  %v10855_v58 = vld [vmem:[%s17528_s1 + $0x3d4] sm:$0xf0]  ;;  %v10684_v59 = vld [vmem:[%s17529_s0 + $0x204] sm:$0xf]  ;;  %2450 = vmatpush.bf16.msrb.mxu1 %v8367_v33  ;;  %v8423_v63 = vor.u32 %v10839_v56, %v8422_v50  ;;  %v11894_v11 = vor.u32 %v10692_v46, %v7806_v45 }
  0x2a   :  { %v7808_v60 = vld [vmem:[%s17529_s0 + $0x240] sm:$0xf0]  ;;  %v7814_v61 = vld [vmem:[%s17529_s0 + $0x208] sm:$0xf]  ;;  %2494 = vmatpush.bf16.msrb.mxu2 %v8431_v37  ;;  %v10685_v5 = vld [vmem:[%s17529_s0 + $0x20c] sm:$0xf]  ;;  %v8487_v7 = vor.u32 %v10855_v58, %v8486_v57 }
  0x2b   :  { %v10693_v4 = vld [vmem:[%s17529_s0 + $0x244] sm:$0xf0]  ;;  %v7816_v6 = vld [vmem:[%s17529_s0 + $0x248] sm:$0xf0]  ;;  %2538 = vmatpush.bf16.msrb.mxu3 %v8495_v47  ;;  %v8286_v8 = vld [vmem:[%s17528_s1 + $0x240] sm:$0xf]  ;;  %v11905_v19 = vor.u32 %v10684_v59, %v7808_v60 }
  0x2c   :  { %v10805_v9 = vld [vmem:[%s17528_s1 + $0x244] sm:$0xf0]  ;;  %v8350_v10 = vld [vmem:[%s17528_s1 + $0x2c0] sm:$0xf]  ;;  %2407 = vmatpush.bf16.msrb.mxu0 %v8295_v51  ;;  %v11907_v20 = vor.u32 %v10693_v4, %v7814_v61  ;;  %v11915_v23 = vor.u32 %v10685_v5, %v7816_v6  ;;  %v8278_v28 = vld [vmem:[%s17528_s1 + $0x230] sm:$0xf] }
  0x2d   :  { %v10821_v16 = vld [vmem:[%s17528_s1 + $0x2c4] sm:$0xf0]  ;;  %v8414_v17 = vld [vmem:[%s17528_s1 + $0x340] sm:$0xf]  ;;  %2451 = vmatpush.bf16.msrb.mxu1 %v8359_v62  ;;  %v8287_v24 = vor.u32 %v10805_v9, %v8286_v8  ;;  %v10803_v29 = vld [vmem:[%s17528_s1 + $0x234] sm:$0xf0] }
  0x2e   :  { %v10837_v18 = vld [vmem:[%s17528_s1 + $0x344] sm:$0xf0]  ;;  %2495 = vmatpush.bf16.msrb.mxu2 %v8423_v63  ;;  %v8478_v21 = vld [vmem:[%s17528_s1 + $0x3c0] sm:$0xf]  ;;  %v8351_v25 = vor.u32 %v10821_v16, %v8350_v10  ;;  %v8342_v30 = vld [vmem:[%s17528_s1 + $0x2b0] sm:$0xf]  ;;  %v8279_v31 = vor.u32 %v10803_v29, %v8278_v28 }
  0x2f   :  { %v10853_v22 = vld [vmem:[%s17528_s1 + $0x3c4] sm:$0xf0]  ;;  %2539 = vmatpush.bf16.msrb.mxu3 %v8487_v7  ;;  %v8415_v26 = vor.u32 %v10837_v18, %v8414_v17  ;;  %v10819_v32 = vld [vmem:[%s17528_s1 + $0x2b4] sm:$0xf0]  ;;  %v8406_v33 = vld [vmem:[%s17528_s1 + $0x330] sm:$0xf] }
  0x30   :  { %v8479_v27 = vor.u32 %v10853_v22, %v8478_v21  ;;  %2408 = vmatpush.bf16.msrb.mxu0 %v8287_v24  ;;  %v10835_v34 = vld [vmem:[%s17528_s1 + $0x334] sm:$0xf0]  ;;  %v8343_v35 = vor.u32 %v10819_v32, %v8342_v30  ;;  %v8470_v37 = vld [vmem:[%s17528_s1 + $0x3b0] sm:$0xf]  ;;  %v8270_v39 = vld [vmem:[%s17528_s1 + $0x220] sm:$0xf] }
  0x31   :  { %2452 = vmatpush.bf16.msrb.mxu1 %v8351_v25  ;;  %v8407_v36 = vor.u32 %v10835_v34, %v8406_v33  ;;  %v10851_v38 = vld [vmem:[%s17528_s1 + $0x3b4] sm:$0xf0]  ;;  %v10801_v45 = vld [vmem:[%s17528_s1 + $0x224] sm:$0xf0]  ;;  %v8334_v46 = vld [vmem:[%s17528_s1 + $0x2a0] sm:$0xf] }
  0x32   :  { %2496 = vmatpush.bf16.msrb.mxu2 %v8415_v26  ;;  %v8471_v44 = vor.u32 %v10851_v38, %v8470_v37  ;;  %v10817_v47 = vld [vmem:[%s17528_s1 + $0x2a4] sm:$0xf0]  ;;  %v8398_v48 = vld [vmem:[%s17528_s1 + $0x320] sm:$0xf]  ;;  %v8271_v51 = vor.u32 %v10801_v45, %v8270_v39  ;;  %v8262_v61 = vld [vmem:[%s17528_s1 + $0x210] sm:$0xf] }
  0x33   :  { %2242 = vmatmul.bf16.gmra.mxu0 %v11705_v52  ;;  %2540 = vmatpush.bf16.msrb.mxu3 %v8479_v27  ;;  %v10833_v49 = vld [vmem:[%s17528_s1 + $0x324] sm:$0xf0]  ;;  %v8462_v50 = vld [vmem:[%s17528_s1 + $0x3a0] sm:$0xf]  ;;  %v8335_v59 = vor.u32 %v10817_v47, %v8334_v46  ;;  %v10799_v62 = vld [vmem:[%s17528_s1 + $0x214] sm:$0xf0] }
  0x34   :  { %2286 = vmatmul.bf16.gmra.mxu1 %v11707_v53  ;;  %2409 = vmatpush.bf16.msrb.mxu0 %v8279_v31  ;;  %v10849_v56 = vld [vmem:[%s17528_s1 + $0x3a4] sm:$0xf0]  ;;  %v7870_v57 = vld [vmem:[%s17529_s0 + $0x280] sm:$0xf]  ;;  %v8399_v60 = vor.u32 %v10833_v49, %v8398_v48  ;;  %v8326_v63 = vld [vmem:[%s17528_s1 + $0x290] sm:$0xf]  ;;  %v8263_v24 = vor.u32 %v10799_v62, %v8262_v61 }
  0x35   :  { %2330 = vmatmul.bf16.gmra.mxu2 %v11709_v54  ;;  %v10708_v58 = vld [vmem:[%s17529_s0 + $0x2bc] sm:$0xf0]  ;;  %2453 = vmatpush.bf16.msrb.mxu1 %v8343_v35  ;;  %v10700_v4 = vld [vmem:[%s17529_s0 + $0x284] sm:$0xf]  ;;  %v8463_v6 = vor.u32 %v10849_v56, %v8462_v50  ;;  %v10815_v7 = vld [vmem:[%s17528_s1 + $0x294] sm:$0xf0] }
  0x36   :  { %2374 = vmatmul.bf16.gmra.mxu3 %v11711_v55  ;;  %2497 = vmatpush.bf16.msrb.mxu2 %v8407_v36  ;;  %v7872_v5 = vld [vmem:[%s17529_s0 + $0x2c0] sm:$0xf0]  ;;  %v8390_v8 = vld [vmem:[%s17528_s1 + $0x310] sm:$0xf]  ;;  %v10831_v9 = vld [vmem:[%s17528_s1 + $0x314] sm:$0xf0]  ;;  %v8327_v25 = vor.u32 %v10815_v7, %v8326_v63  ;;  %v12026_v30 = vor.u32 %v10708_v58, %v7870_v57 }
  0x37   :  { %2541 = vmatpush.bf16.msrb.mxu3 %v8471_v44  ;;  %v7878_v10 = vld [vmem:[%s17529_s0 + $0x288] sm:$0xf]  ;;  %v8454_v16 = vld [vmem:[%s17528_s1 + $0x390] sm:$0xf]  ;;  %v10847_v17 = vld [vmem:[%s17528_s1 + $0x394] sm:$0xf0]  ;;  %v8391_v26 = vor.u32 %v10831_v9, %v8390_v8  ;;  %v12037_v35 = vor.u32 %v10700_v4, %v7872_v5 }
  0x38   :  { %v10709_v18 = vld [vmem:[%s17529_s0 + $0x2c4] sm:$0xf0]  ;;  %v10701_v21 = vld [vmem:[%s17529_s0 + $0x28c] sm:$0xf]  ;;  %2410 = vmatpush.bf16.msrb.mxu0 %v8271_v51  ;;  %v8254_v27 = vld [vmem:[%s17528_s1 + $0x200] sm:$0xf]  ;;  %v8455_v31 = vor.u32 %v10847_v17, %v8454_v16 }
  0x39   :  { %v7880_v22 = vld [vmem:[%s17529_s0 + $0x2c8] sm:$0xf0]  ;;  %2454 = vmatpush.bf16.msrb.mxu1 %v8335_v59  ;;  %v10797_v28 = vld [vmem:[%s17528_s1 + $0x204] sm:$0xf0]  ;;  %v8318_v29 = vld [vmem:[%s17528_s1 + $0x280] sm:$0xf]  ;;  %v12039_v36 = vor.u32 %v10709_v18, %v7878_v10 }
  0x3a   :  { %2498 = vmatpush.bf16.msrb.mxu2 %v8399_v60  ;;  %v10813_v32 = vld [vmem:[%s17528_s1 + $0x284] sm:$0xf0]  ;;  %v8382_v33 = vld [vmem:[%s17528_s1 + $0x300] sm:$0xf]  ;;  %v12047_v39 = vor.u32 %v10701_v21, %v7880_v22  ;;  %v8255_v44 = vor.u32 %v10797_v28, %v8254_v27  ;;  %v10716_v50 = vld [vmem:[%s17529_s0 + $0x304] sm:$0xf] }
  0x3b   :  { %2542 = vmatpush.bf16.msrb.mxu3 %v8463_v6  ;;  %v10829_v34 = vld [vmem:[%s17528_s1 + $0x304] sm:$0xf0]  ;;  %v8446_v37 = vld [vmem:[%s17528_s1 + $0x380] sm:$0xf]  ;;  %v8319_v45 = vor.u32 %v10813_v32, %v8318_v29  ;;  %v7936_v51 = vld [vmem:[%s17529_s0 + $0x340] sm:$0xf0] }
  0x3c   :  { %v10845_v38 = vld [vmem:[%s17528_s1 + $0x384] sm:$0xf0]  ;;  %2411 = vmatpush.bf16.msrb.mxu0 %v8263_v24  ;;  %v8383_v46 = vor.u32 %v10829_v34, %v8382_v33  ;;  %v7934_v48 = vld [vmem:[%s17529_s0 + $0x300] sm:$0xf]  ;;  %v10717_v58 = vld [vmem:[%s17529_s0 + $0x30c] sm:$0xf]  ;;  %v12079_v61 = vor.u32 %v10716_v50, %v7936_v51 }
  0x3d   :  { %2455 = vmatpush.bf16.msrb.mxu1 %v8327_v25  ;;  %v8447_v47 = vor.u32 %v10845_v38, %v8446_v37  ;;  %v10724_v49 = vld [vmem:[%s17529_s0 + $0x33c] sm:$0xf0]  ;;  %v7942_v56 = vld [vmem:[%s17529_s0 + $0x308] sm:$0xf]  ;;  %v7944_v59 = vld [vmem:[%s17529_s0 + $0x348] sm:$0xf0] }
  0x3e   :  { %2499 = vmatpush.bf16.msrb.mxu2 %v8391_v26  ;;  %v10725_v57 = vld [vmem:[%s17529_s0 + $0x344] sm:$0xf0]  ;;  %v12077_v60 = vor.u32 %v10724_v49, %v7934_v48  ;;  %17616 = vst [vmem:[#allocation5_spill] sm:$0xff] %v12079_v61  ;;  %v12083_v63 = vor.u32 %v10717_v58, %v7944_v59  ;;  %v7566_v4 = vld [vmem:[%s17529_s0 + $0x10] sm:$0xf] }
  0x3f   :  { %2543 = vmatpush.bf16.msrb.mxu3 %v8455_v31  ;;  %v12081_v62 = vor.u32 %v10725_v57, %v7942_v56  ;;  %v10630_v5 = vld [vmem:[%s17529_s0 + $0x4c] sm:$0xf0]  ;;  %v10622_v6 = vld [vmem:[%s17529_s0 + $0x14] sm:$0xf]  ;;  %v7574_v8 = vld [vmem:[%s17529_s0 + $0x18] sm:$0xf] }
  0x40   :  { %2412 = vmatpush.bf16.msrb.mxu0 %v8255_v44  ;;  %17615 = vst [vmem:[#allocation4_spill] sm:$0xff] %v12077_v60  ;;  %v7568_v7 = vld [vmem:[%s17529_s0 + $0x50] sm:$0xf0]  ;;  %v10631_v9 = vld [vmem:[%s17529_s0 + $0x54] sm:$0xf0]  ;;  %v12113_v17 = vor.u32 %v10630_v5, %v7566_v4 }
  0x41   :  { %2456 = vmatpush.bf16.msrb.mxu1 %v8319_v45  ;;  %17617 = vst [vmem:[#allocation6_spill] sm:$0xff] %v12081_v62  ;;  %v10623_v10 = vld [vmem:[%s17529_s0 + $0x1c] sm:$0xf]  ;;  %v12115_v18 = vor.u32 %v10622_v6, %v7568_v7  ;;  %v12117_v21 = vor.u32 %v10631_v9, %v7574_v8  ;;  %v7630_v24 = vld [vmem:[%s17529_s0 + $0x90] sm:$0xf] }
  0x42   :  { %2500 = vmatpush.bf16.msrb.mxu2 %v8383_v46  ;;  %17618 = vst [vmem:[#allocation7_spill] sm:$0xff] %v12083_v63  ;;  %v7576_v16 = vld [vmem:[%s17529_s0 + $0x58] sm:$0xf0]  ;;  %v10646_v25 = vld [vmem:[%s17529_s0 + $0xcc] sm:$0xf0] }
  0x43   :  { %2247 = vmatmul.bf16.gmra.mxu0 %v11741_v0  ;;  %2544 = vmatpush.bf16.msrb.mxu3 %v8447_v47  ;;  %17619 = vst [vmem:[#allocation8_spill] sm:$0xff] %v12113_v17  ;;  %v12119_v22 = vor.u32 %v10623_v10, %v7576_v16  ;;  %v10638_v26 = vld [vmem:[%s17529_s0 + $0x94] sm:$0xf]  ;;  %v7638_v28 = vld [vmem:[%s17529_s0 + $0x98] sm:$0xf]  ;;  %v12149_v33 = vor.u32 %v10646_v25, %v7630_v24 }
  0x44   :  { %2291 = vmatmul.bf16.gmra.mxu1 %v11743_v1  ;;  %17620 = vst [vmem:[#allocation9_spill] sm:$0xff] %v12115_v18  ;;  %v7632_v27 = vld [vmem:[%s17529_s0 + $0xd0] sm:$0xf0]  ;;  %v10647_v29 = vld [vmem:[%s17529_s0 + $0xd4] sm:$0xf0] }
  0x45   :  { %2335 = vmatmul.bf16.gmra.mxu2 %v11745_v2  ;;  %17621 = vst [vmem:[#allocation10_spill] sm:$0xff] %v12117_v21  ;;  %v10639_v31 = vld [vmem:[%s17529_s0 + $0x9c] sm:$0xf]  ;;  %v12151_v37 = vor.u32 %v10638_v26, %v7632_v27  ;;  %v12153_v38 = vor.u32 %v10647_v29, %v7638_v28  ;;  %v7694_v58 = vld [vmem:[%s17529_s0 + $0x110] sm:$0xf] }
  0x46   :  { %2379 = vmatmul.bf16.gmra.mxu3 %v11747_v3  ;;  %17622 = vst [vmem:[#allocation11_spill] sm:$0xff] %v12119_v22  ;;  %v7640_v32 = vld [vmem:[%s17529_s0 + $0xd8] sm:$0xf0]  ;;  %v10662_v59 = vld [vmem:[%s17529_s0 + $0x14c] sm:$0xf0] }
  0x47   :  { %17623 = vst [vmem:[#allocation12_spill] sm:$0xff] %v12149_v33  ;;  %v12155_v45 = vor.u32 %v10639_v31, %v7640_v32  ;;  %v10654_v4 = vld [vmem:[%s17529_s0 + $0x114] sm:$0xf]  ;;  %v7702_v6 = vld [vmem:[%s17529_s0 + $0x118] sm:$0xf]  ;;  %v12187_v16 = vor.u32 %v10662_v59, %v7694_v58 }
  0x48   :  { %17624 = vst [vmem:[#allocation13_spill] sm:$0xff] %v12151_v37  ;;  %v7696_v5 = vld [vmem:[%s17529_s0 + $0x150] sm:$0xf0]  ;;  %v10663_v7 = vld [vmem:[%s17529_s0 + $0x154] sm:$0xf0] }
  0x49   :  { %17625 = vst [vmem:[#allocation14_spill] sm:$0xff] %v12153_v38  ;;  %v10655_v8 = vld [vmem:[%s17529_s0 + $0x11c] sm:$0xf]  ;;  %v12189_v27 = vor.u32 %v10654_v4, %v7696_v5  ;;  %v12191_v28 = vor.u32 %v10663_v7, %v7702_v6  ;;  %v10678_v58 = vld [vmem:[%s17529_s0 + $0x1cc] sm:$0xf0] }
  0x4a   :  { %17626 = vst [vmem:[#allocation15_spill] sm:$0xff] %v12155_v45  ;;  %v7704_v9 = vld [vmem:[%s17529_s0 + $0x158] sm:$0xf0]  ;;  %v10670_v59 = vld [vmem:[%s17529_s0 + $0x194] sm:$0xf] }
  0x4b   :  { %17627 = vst [vmem:[#allocation16_spill] sm:$0xff] %v12187_v16  ;;  %v12193_v31 = vor.u32 %v10655_v8, %v7704_v9  ;;  %v7760_v4 = vld [vmem:[%s17529_s0 + $0x1d0] sm:$0xf0]  ;;  %v7766_v5 = vld [vmem:[%s17529_s0 + $0x198] sm:$0xf] }
  0x4c   :  { %17628 = vst [vmem:[#allocation17_spill] sm:$0xff] %v12189_v27  ;;  %v10679_v6 = vld [vmem:[%s17529_s0 + $0x1d4] sm:$0xf0]  ;;  %v10671_v7 = vld [vmem:[%s17529_s0 + $0x19c] sm:$0xf] }
  0x4d   :  { %17629 = vst [vmem:[#allocation18_spill] sm:$0xff] %v12191_v28  ;;  %v7768_v8 = vld [vmem:[%s17529_s0 + $0x1d8] sm:$0xf0] }
  0x4e   :  { %17630 = vst [vmem:[#allocation19_spill] sm:$0xff] %v12193_v31 }
  0x53   :  { %2252 = vmatmul.bf16.gmra.mxu0 %v11777_v12 }
  0x54   :  { %2296 = vmatmul.bf16.gmra.mxu1 %v11779_v13 }
  0x55   :  { %2340 = vmatmul.bf16.gmra.mxu2 %v11781_v14 }
  0x56   :  { %2384 = vmatmul.bf16.gmra.mxu3 %v11783_v15 }
  0x63   :  { %2257 = vmatmul.bf16.gmra.mxu0 %v11894_v11 }
  0x64   :  { %2301 = vmatmul.bf16.gmra.mxu1 %v11905_v19 }
  0x65   :  { %2345 = vmatmul.bf16.gmra.mxu2 %v11907_v20 }
  0x66   :  { %2389 = vmatmul.bf16.gmra.mxu3 %v11915_v23 }
  0x73   :  { %2262 = vmatmul.bf16.gmra.mxu0 %v12026_v30 }
  0x74   :  { %2306 = vmatmul.bf16.gmra.mxu1 %v12037_v35 }
  0x75   :  { %2350 = vmatmul.bf16.gmra.mxu2 %v12039_v36 }
  0x76   :  { %2394 = vmatmul.bf16.gmra.mxu3 %v12047_v39 }
  0x83   :  { %2267 = vmatmul.bf16.gmra.mxu0 %v12077_v60 }
  0x84   :  { %2311 = vmatmul.bf16.gmra.mxu1 %v12079_v61 }
  0x85   :  { %2355 = vmatmul.bf16.gmra.mxu2 %v12081_v62 }
  0x86   :  { %2399 = vmatmul.bf16.gmra.mxu3 %v12083_v63 }
  0x93   :  { %2413 = vmatmul.bf16.vlgmr.msrb.gmra.mxu0 %v12113_v17 }
  0x94   :  { %2457 = vmatmul.bf16.vlgmr.msrb.gmra.mxu1 %v12115_v18 }
  0x95   :  { %2501 = vmatmul.bf16.vlgmr.msrb.gmra.mxu2 %v12117_v21 }
  0x96   :  { %2545 = vmatmul.bf16.vlgmr.msrb.gmra.mxu3 %v12119_v22 }
  0xa0   :  { %v2238_v34 = vpop.f32.mrf.mxu0 }
  0xa1   :  { %v2282_v44 = vpop.f32.mrf.mxu1 }
  0xa2   :  { %v2283_v46 = vadd.f32 %v2282_v44, %v2238_v34 }
  0xa3   :  { %2418 = vmatmul.bf16.gmra.mxu0 %v12149_v33 }
  0xa4   :  { %2462 = vmatmul.bf16.gmra.mxu1 %v12151_v37 }
  0xa5   :  { %2506 = vmatmul.bf16.gmra.mxu2 %v12153_v38 }
  0xa6   :  { %2550 = vmatmul.bf16.gmra.mxu3 %v12155_v45 }
  0xa8   :  { %v2326_v47 = vpop.f32.mrf.mxu2  ;;  %v2240_v50 = vpop.f32.mrf.mxu0 }
  0xa9   :  { %v2327_v48 = vadd.f32 %v2326_v47, %v2283_v46  ;;  %v2370_v49 = vpop.f32.mrf.mxu3  ;;  %v2284_v51 = vpop.f32.mrf.mxu1 }
  0xaa   :  { %v2285_v57 = vadd.f32 %v2284_v51, %v2240_v50 }
  0xab   :  { %v12161_v56 = vadd.f32 %v2370_v49, %v2327_v48 }
  0xb0   :  { %v2328_v10 = vpop.f32.mrf.mxu2  ;;  %v2243_v26 = vpop.f32.mrf.mxu0 }
  0xb1   :  { %v2329_v24 = vadd.f32 %v2328_v10, %v2285_v57  ;;  %v2372_v25 = vpop.f32.mrf.mxu3  ;;  %v2287_v29 = vpop.f32.mrf.mxu1  ;;  %v7758_v57 = vld [vmem:[%s17529_s0 + $0x190] sm:$0xf] }
  0xb2   :  { %v2288_v34 = vadd.f32 %v2287_v29, %v2243_v26  ;;  %v12227_v10 = vor.u32 %v10678_v58, %v7758_v57  ;;  %v12229_v29 = vor.u32 %v10670_v59, %v7760_v4  ;;  %v8630_v57 = vld [vmem:[%s17528_s1 + $0x4f0] sm:$0xf]  ;;  %v10891_v58 = vld [vmem:[%s17528_s1 + $0x4f4] sm:$0xf0] }
  0xb3   :  { %v12195_v32 = vadd.f32 %v2372_v25, %v2329_v24  ;;  %2423 = vmatmul.bf16.gmra.mxu0 %v12187_v16  ;;  %v8631_v4 = vor.u32 %v10891_v58, %v8630_v57 }
  0xb4   :  { %2467 = vmatmul.bf16.gmra.mxu1 %v12189_v27  ;;  %17631 = vst [vmem:[#allocation20_spill] sm:$0xff] %v12227_v10  ;;  %v8542_v27 = vld [vmem:[%s17528_s1 + $0x440] sm:$0xf] }
  0xb5   :  { %2511 = vmatmul.bf16.gmra.mxu2 %v12191_v28  ;;  %17632 = vst [vmem:[#allocation21_spill] sm:$0xff] %v12229_v29  ;;  %2625 = vmatpush.bf16.msra.mxu1 %v8631_v4  ;;  %v8750_v4 = vld [vmem:[%s17528_s1 + $0x5e0] sm:$0xf] }
  0xb6   :  { %2555 = vmatmul.bf16.gmra.mxu3 %v12193_v31  ;;  %v7830_v31 = vld [vmem:[%s17529_s0 + $0x218] sm:$0xf] }
  0xb8   :  { %v2331_v44 = vpop.f32.mrf.mxu2  ;;  %v2245_v48 = vpop.f32.mrf.mxu0 }
  0xb9   :  { %v2332_v46 = vadd.f32 %v2331_v44, %v2288_v34  ;;  %v2375_v47 = vpop.f32.mrf.mxu3  ;;  %v2289_v49 = vpop.f32.mrf.mxu1  ;;  %v12231_v34 = vor.u32 %v10679_v6, %v7766_v5  ;;  %v8694_v5 = vld [vmem:[%s17528_s1 + $0x570] sm:$0xf]  ;;  %v10907_v6 = vld [vmem:[%s17528_s1 + $0x574] sm:$0xf0] }
  0xba   :  { %v2290_v51 = vadd.f32 %v2289_v49, %v2245_v48  ;;  %v8566_v49 = vld [vmem:[%s17528_s1 + $0x470] sm:$0xf] }
  0xbb   :  { %v12201_v50 = vadd.f32 %v2375_v47, %v2332_v46  ;;  %17633 = vst [vmem:[#allocation22_spill] sm:$0xff] %v12231_v34  ;;  %v12233_v46 = vor.u32 %v10671_v7, %v7768_v8  ;;  %v8758_v7 = vld [vmem:[%s17528_s1 + $0x5f0] sm:$0xf] }
  0xbd   :  { %17634 = vst [vmem:[#allocation23_spill] sm:$0xff] %v12233_v46 }
  0xc0   :  { %v2333_v9 = vpop.f32.mrf.mxu2  ;;  %v2248_v26 = vpop.f32.mrf.mxu0 }
  0xc1   :  { %v2334_v24 = vadd.f32 %v2333_v9, %v2290_v51  ;;  %v2377_v25 = vpop.f32.mrf.mxu3  ;;  %v2292_v44 = vpop.f32.mrf.mxu1  ;;  %v10875_v51 = vld [vmem:[%s17528_s1 + $0x474] sm:$0xf0]  ;;  %v8695_v9 = vor.u32 %v10907_v6, %v8694_v5  ;;  %v8622_v5 = vld [vmem:[%s17528_s1 + $0x4e0] sm:$0xf]  ;;  %v10889_v6 = vld [vmem:[%s17528_s1 + $0x4e4] sm:$0xf0] }
  0xc2   :  { %v2293_v48 = vadd.f32 %v2292_v44, %v2248_v26  ;;  %v8567_v59 = vor.u32 %v10875_v51, %v8566_v49  ;;  %v10873_v26 = vld [vmem:[%s17528_s1 + $0x464] sm:$0xf0] }
  0xc3   :  { %v12235_v47 = vadd.f32 %v2377_v25, %v2334_v24  ;;  %2428 = vmatmul.bf16.gmra.mxu0 %v12227_v10  ;;  %v10923_v24 = vld [vmem:[%s17528_s1 + $0x5f4] sm:$0xf0]  ;;  %v8558_v25 = vld [vmem:[%s17528_s1 + $0x460] sm:$0xf]  ;;  %2669 = vmatpush.bf16.msra.mxu2 %v8695_v9  ;;  %v7822_v9 = vld [vmem:[%s17529_s0 + $0x210] sm:$0xf] }
  0xc4   :  { %2472 = vmatmul.bf16.gmra.mxu1 %v12229_v29  ;;  %2581 = vmatpush.bf16.msra.mxu0 %v8567_v59  ;;  %v8759_v57 = vor.u32 %v10923_v24, %v8758_v7  ;;  %v8559_v58 = vor.u32 %v10873_v26, %v8558_v25  ;;  %v10905_v59 = vld [vmem:[%s17528_s1 + $0x564] sm:$0xf0]  ;;  %v10694_v25 = vld [vmem:[%s17529_s0 + $0x24c] sm:$0xf0]  ;;  %v10919_v29 = vld [vmem:[%s17528_s1 + $0x5d4] sm:$0xf0] }
  0xc5   :  { %2516 = vmatmul.bf16.gmra.mxu2 %v12231_v34  ;;  %v10921_v7 = vld [vmem:[%s17528_s1 + $0x5e4] sm:$0xf0]  ;;  %v7824_v10 = vld [vmem:[%s17529_s0 + $0x250] sm:$0xf0]  ;;  %v12339_v28 = vor.u32 %v10694_v25, %v7822_v9  ;;  %v8670_v25 = vld [vmem:[%s17528_s1 + $0x540] sm:$0xf] }
  0xc6   :  { %2560 = vmatmul.bf16.gmra.mxu3 %v12233_v46  ;;  %v8686_v46 = vld [vmem:[%s17528_s1 + $0x560] sm:$0xf]  ;;  %v10885_v9 = vld [vmem:[%s17528_s1 + $0x4c4] sm:$0xf0] }
  0xc7   :  { %2713 = vmatpush.bf16.msra.mxu3 %v8759_v57  ;;  %v8687_v26 = vor.u32 %v10905_v59, %v8686_v46  ;;  %v8678_v46 = vld [vmem:[%s17528_s1 + $0x550] sm:$0xf]  ;;  %v10686_v57 = vld [vmem:[%s17529_s0 + $0x214] sm:$0xf]  ;;  %17635 = vst [vmem:[#allocation24_spill] sm:$0xff] %v12339_v28 }
  0xc8   :  { %v2336_v8 = vpop.f32.mrf.mxu2  ;;  %v2250_v51 = vpop.f32.mrf.mxu0  ;;  %2582 = vmatpush.bf16.msra.mxu0 %v8559_v58  ;;  %v10695_v58 = vld [vmem:[%s17529_s0 + $0x254] sm:$0xf0] }
  0xc9   :  { %v2337_v44 = vadd.f32 %v2336_v8, %v2293_v48  ;;  %v2380_v49 = vpop.f32.mrf.mxu3  ;;  %v2294_v34 = vpop.f32.mrf.mxu1  ;;  %v8623_v48 = vor.u32 %v10889_v6, %v8622_v5  ;;  %v8751_v5 = vor.u32 %v10921_v7, %v8750_v4  ;;  %v8550_v6 = vld [vmem:[%s17528_s1 + $0x450] sm:$0xf]  ;;  %2670 = vmatpush.bf16.msra.mxu2 %v8687_v26  ;;  %v10869_v26 = vld [vmem:[%s17528_s1 + $0x444] sm:$0xf0] }
  0xca   :  { %v2295_v24 = vadd.f32 %v2294_v34, %v2250_v51  ;;  %v8614_v34 = vld [vmem:[%s17528_s1 + $0x4d0] sm:$0xf]  ;;  %v10903_v51 = vld [vmem:[%s17528_s1 + $0x554] sm:$0xf0] }
  0xcb   :  { %v12289_v8 = vadd.f32 %v2380_v49, %v2337_v44  ;;  %v10871_v44 = vld [vmem:[%s17528_s1 + $0x454] sm:$0xf0]  ;;  %2626 = vmatpush.bf16.msra.mxu1 %v8623_v48  ;;  %v8742_v7 = vld [vmem:[%s17528_s1 + $0x5d0] sm:$0xf]  ;;  %v8679_v48 = vor.u32 %v10903_v51, %v8678_v46  ;;  %2714 = vmatpush.bf16.msra.mxu3 %v8751_v5  ;;  %v8606_v46 = vld [vmem:[%s17528_s1 + $0x4c0] sm:$0xf]  ;;  %v12350_v5 = vor.u32 %v10686_v57, %v7824_v10 }
  0xcc   :  { %v10887_v49 = vld [vmem:[%s17528_s1 + $0x4d4] sm:$0xf0]  ;;  %v8551_v59 = vor.u32 %v10871_v44, %v8550_v6  ;;  %v10687_v6 = vld [vmem:[%s17529_s0 + $0x21c] sm:$0xf]  ;;  %v8734_v10 = vld [vmem:[%s17528_s1 + $0x5c0] sm:$0xf] }
  0xcd   :  { %v8615_v4 = vor.u32 %v10887_v49, %v8614_v34  ;;  %v7832_v44 = vld [vmem:[%s17529_s0 + $0x258] sm:$0xf0]  ;;  %v8743_v34 = vor.u32 %v10919_v29, %v8742_v7  ;;  %17636 = vst [vmem:[#allocation25_spill] sm:$0xff] %v12350_v5  ;;  %v12352_v29 = vor.u32 %v10695_v58, %v7830_v31  ;;  %2671 = vmatpush.bf16.msra.mxu2 %v8679_v48  ;;  %v10917_v57 = vld [vmem:[%s17528_s1 + $0x5c4] sm:$0xf0] }
  0xce   :  { %2583 = vmatpush.bf16.msra.mxu0 %v8551_v59  ;;  %v8543_v31 = vor.u32 %v10869_v26, %v8542_v27  ;;  %v8607_v58 = vor.u32 %v10885_v9, %v8606_v46  ;;  %v8534_v27 = vld [vmem:[%s17528_s1 + $0x430] sm:$0xf]  ;;  %v10883_v48 = vld [vmem:[%s17528_s1 + $0x4b4] sm:$0xf0] }
  0xcf   :  { %17637 = vst [vmem:[#allocation26_spill] sm:$0xff] %v12352_v29  ;;  %2627 = vmatpush.bf16.msra.mxu1 %v8615_v4  ;;  %2715 = vmatpush.bf16.msra.mxu3 %v8743_v34  ;;  %v8662_v26 = vld [vmem:[%s17528_s1 + $0x530] sm:$0xf]  ;;  %v10899_v46 = vld [vmem:[%s17528_s1 + $0x534] sm:$0xf0] }
  0xd0   :  { %v2338_v49 = vpop.f32.mrf.mxu2  ;;  %v2253_v45 = vpop.f32.mrf.mxu0 }
  0xd1   :  { %v2339_v51 = vadd.f32 %v2338_v49, %v2295_v24  ;;  %v2382_v16 = vpop.f32.mrf.mxu3  ;;  %v10901_v24 = vld [vmem:[%s17528_s1 + $0x544] sm:$0xf0]  ;;  %v2297_v7 = vpop.f32.mrf.mxu1  ;;  %v12363_v49 = vor.u32 %v10687_v6, %v7832_v44  ;;  %v8735_v6 = vor.u32 %v10917_v57, %v8734_v10 }
  0xd2   :  { %v2298_v4 = vadd.f32 %v2297_v7, %v2253_v45  ;;  %v8671_v38 = vor.u32 %v10901_v24, %v8670_v25  ;;  %2584 = vmatpush.bf16.msra.mxu0 %v8543_v31  ;;  %v10867_v45 = vld [vmem:[%s17528_s1 + $0x434] sm:$0xf0]  ;;  %v8663_v25 = vor.u32 %v10899_v46, %v8662_v26  ;;  %v8526_v24 = vld [vmem:[%s17528_s1 + $0x420] sm:$0xf]  ;;  %v10865_v7 = vld [vmem:[%s17528_s1 + $0x424] sm:$0xf0] }
  0xd3   :  { %17638 = vst [vmem:[#allocation27_spill] sm:$0xff] %v12363_v49  ;;  %v12371_v59 = vadd.f32 %v2382_v16, %v2339_v51  ;;  %2433 = vmatmul.bf16.gmra.mxu0 %v12339_v28  ;;  %v8598_v16 = vld [vmem:[%s17528_s1 + $0x4b0] sm:$0xf]  ;;  %2628 = vmatpush.bf16.msra.mxu1 %v8607_v58  ;;  %v8535_v44 = vor.u32 %v10867_v45, %v8534_v27  ;;  %v10881_v27 = vld [vmem:[%s17528_s1 + $0x4a4] sm:$0xf0] }
  0xd4   :  { %2477 = vmatmul.bf16.gmra.mxu1 %v12350_v5  ;;  %2672 = vmatpush.bf16.msra.mxu2 %v8671_v38  ;;  %v8599_v34 = vor.u32 %v10883_v48, %v8598_v16  ;;  %v8726_v51 = vld [vmem:[%s17528_s1 + $0x5b0] sm:$0xf]  ;;  %v10915_v38 = vld [vmem:[%s17528_s1 + $0x5b4] sm:$0xf0]  ;;  %v8654_v45 = vld [vmem:[%s17528_s1 + $0x520] sm:$0xf]  ;;  %v8527_v48 = vor.u32 %v10865_v7, %v8526_v24 }
  0xd5   :  { %2521 = vmatmul.bf16.gmra.mxu2 %v12352_v29  ;;  %2716 = vmatpush.bf16.msra.mxu3 %v8735_v6  ;;  %v8727_v58 = vor.u32 %v10915_v38, %v8726_v51  ;;  %v8590_v6 = vld [vmem:[%s17528_s1 + $0x4a0] sm:$0xf]  ;;  %v10913_v51 = vld [vmem:[%s17528_s1 + $0x5a4] sm:$0xf0]  ;;  %v10710_v24 = vld [vmem:[%s17529_s0 + $0x2cc] sm:$0xf0] }
  0xd6   :  { %2565 = vmatmul.bf16.gmra.mxu3 %v12363_v49  ;;  %2585 = vmatpush.bf16.msra.mxu0 %v8535_v44  ;;  %v8591_v26 = vor.u32 %v10881_v27, %v8590_v6  ;;  %v8718_v46 = vld [vmem:[%s17528_s1 + $0x5a0] sm:$0xf]  ;;  %v7886_v44 = vld [vmem:[%s17529_s0 + $0x290] sm:$0xf]  ;;  %v10895_v27 = vld [vmem:[%s17528_s1 + $0x514] sm:$0xf0] }
  0xd7   :  { %2629 = vmatpush.bf16.msra.mxu1 %v8599_v34  ;;  %v8518_v6 = vld [vmem:[%s17528_s1 + $0x410] sm:$0xf]  ;;  %v10879_v34 = vld [vmem:[%s17528_s1 + $0x494] sm:$0xf0]  ;;  %v10703_v29 = vld [vmem:[%s17529_s0 + $0x29c] sm:$0xf]  ;;  %v12475_v22 = vor.u32 %v10710_v24, %v7886_v44 }
  0xd8   :  { %v2341_v9 = vpop.f32.mrf.mxu2  ;;  %v2255_v57 = vpop.f32.mrf.mxu0  ;;  %2673 = vmatpush.bf16.msra.mxu2 %v8663_v25  ;;  %v8646_v25 = vld [vmem:[%s17528_s1 + $0x510] sm:$0xf]  ;;  %v7896_v5 = vld [vmem:[%s17529_s0 + $0x2d8] sm:$0xf0]  ;;  %v10877_v24 = vld [vmem:[%s17528_s1 + $0x484] sm:$0xf0] }
  0xd9   :  { %v2342_v31 = vadd.f32 %v2341_v9, %v2298_v4  ;;  %v2385_v10 = vpop.f32.mrf.mxu3  ;;  %v2299_v16 = vpop.f32.mrf.mxu1  ;;  %v10897_v4 = vld [vmem:[%s17528_s1 + $0x524] sm:$0xf0]  ;;  %2717 = vmatpush.bf16.msra.mxu3 %v8727_v58  ;;  %v8710_v58 = vld [vmem:[%s17528_s1 + $0x590] sm:$0xf]  ;;  %v8647_v37 = vor.u32 %v10895_v27, %v8646_v25  ;;  %17639 = vst [vmem:[#allocation28_spill] sm:$0xff] %v12475_v22 }
  0xda   :  { %v2300_v38 = vadd.f32 %v2299_v16, %v2255_v57  ;;  %v8655_v7 = vor.u32 %v10897_v4, %v8654_v45  ;;  %v8719_v57 = vor.u32 %v10913_v51, %v8718_v46  ;;  %v10702_v45 = vld [vmem:[%s17529_s0 + $0x294] sm:$0xf]  ;;  %v10911_v16 = vld [vmem:[%s17528_s1 + $0x594] sm:$0xf0]  ;;  %2586 = vmatpush.bf16.msra.mxu0 %v8527_v48  ;;  %v8510_v48 = vld [vmem:[%s17528_s1 + $0x400] sm:$0xf] }
  0xdb   :  { %v12425_v9 = vadd.f32 %v2385_v10, %v2342_v31  ;;  %v10863_v31 = vld [vmem:[%s17528_s1 + $0x414] sm:$0xf0]  ;;  %v8582_v10 = vld [vmem:[%s17528_s1 + $0x490] sm:$0xf]  ;;  %v7888_v4 = vld [vmem:[%s17529_s0 + $0x2d0] sm:$0xf0]  ;;  %2630 = vmatpush.bf16.msra.mxu1 %v8591_v26  ;;  %v8711_v21 = vor.u32 %v10911_v16, %v8710_v58 }
  0xdc   :  { %v7894_v46 = vld [vmem:[%s17529_s0 + $0x298] sm:$0xf]  ;;  %v8519_v49 = vor.u32 %v10863_v31, %v8518_v6  ;;  %2674 = vmatpush.bf16.msra.mxu2 %v8655_v7  ;;  %v8583_v28 = vor.u32 %v10879_v34, %v8582_v10  ;;  %v10861_v6 = vld [vmem:[%s17528_s1 + $0x404] sm:$0xf0]  ;;  %v8574_v26 = vld [vmem:[%s17528_s1 + $0x480] sm:$0xf]  ;;  %v12486_v34 = vor.u32 %v10702_v45, %v7888_v4 }
  0xdd   :  { %v10711_v51 = vld [vmem:[%s17529_s0 + $0x2d4] sm:$0xf0]  ;;  %2718 = vmatpush.bf16.msra.mxu3 %v8719_v57  ;;  %v8638_v57 = vld [vmem:[%s17528_s1 + $0x500] sm:$0xf]  ;;  %v10893_v25 = vld [vmem:[%s17528_s1 + $0x504] sm:$0xf0]  ;;  %v8575_v45 = vor.u32 %v10877_v24, %v8574_v26 }
  0xde   :  { %17640 = vst [vmem:[#allocation29_spill] sm:$0xff] %v12486_v34  ;;  %v12488_v44 = vor.u32 %v10711_v51, %v7894_v46  ;;  %2587 = vmatpush.bf16.msra.mxu0 %v8519_v49  ;;  %v8702_v58 = vld [vmem:[%s17528_s1 + $0x580] sm:$0xf]  ;;  %v10909_v16 = vld [vmem:[%s17528_s1 + $0x584] sm:$0xf0]  ;;  %v8639_v51 = vor.u32 %v10893_v25, %v8638_v57 }
  0xdf   :  { %2631 = vmatpush.bf16.msra.mxu1 %v8583_v28  ;;  %v7958_v24 = vld [vmem:[%s17529_s0 + $0x318] sm:$0xf]  ;;  %v10719_v25 = vld [vmem:[%s17529_s0 + $0x31c] sm:$0xf] }
  0xe0   :  { %v2343_v33 = vpop.f32.mrf.mxu2  ;;  %v2258_v10 = vpop.f32.mrf.mxu0  ;;  %17641 = vst [vmem:[#allocation30_spill] sm:$0xff] %v12488_v44  ;;  %2675 = vmatpush.bf16.msra.mxu2 %v8647_v37  ;;  %v10727_v57 = vld [vmem:[%s17529_s0 + $0x354] sm:$0xf0] }
  0xe1   :  { %v2344_v7 = vadd.f32 %v2343_v33, %v2300_v38  ;;  %v2387_v31 = vpop.f32.mrf.mxu3  ;;  %v2302_v27 = vpop.f32.mrf.mxu1  ;;  %v12499_v33 = vor.u32 %v10703_v29, %v7896_v5  ;;  %v8511_v38 = vor.u32 %v10861_v6, %v8510_v48  ;;  %2719 = vmatpush.bf16.msra.mxu3 %v8711_v21  ;;  %v8703_v5 = vor.u32 %v10909_v16, %v8702_v58  ;;  %v7950_v21 = vld [vmem:[%s17529_s0 + $0x310] sm:$0xf] }
  0xe2   :  { %v2303_v46 = vadd.f32 %v2302_v27, %v2258_v10  ;;  %v7952_v10 = vld [vmem:[%s17529_s0 + $0x350] sm:$0xf0]  ;;  %v7960_v27 = vld [vmem:[%s17529_s0 + $0x358] sm:$0xf0] }
  0xe3   :  { %17642 = vst [vmem:[#allocation31_spill] sm:$0xff] %v12499_v33  ;;  %v12507_v4 = vadd.f32 %v2387_v31, %v2344_v7  ;;  %2438 = vmatmul.bf16.gmra.mxu0 %v12475_v22  ;;  %2632 = vmatpush.bf16.msra.mxu1 %v8575_v45  ;;  %v10726_v7 = vld [vmem:[%s17529_s0 + $0x34c] sm:$0xf0]  ;;  %v10718_v31 = vld [vmem:[%s17529_s0 + $0x314] sm:$0xf] }
  0xe4   :  { %2482 = vmatmul.bf16.gmra.mxu1 %v12486_v34  ;;  %2588 = vmatpush.bf16.msra.mxu0 %v8511_v38  ;;  %v12539_v45 = vor.u32 %v10726_v7, %v7950_v21 }
  0xe5   :  { %2526 = vmatmul.bf16.gmra.mxu2 %v12488_v44  ;;  %2720 = vmatpush.bf16.msra.mxu3 %v8703_v5  ;;  %v12543_v5 = vor.u32 %v10727_v57, %v7958_v24  ;;  %v7582_v57 = vld [vmem:[%s17529_s0 + $0x20] sm:$0xf] }
  0xe6   :  { %2570 = vmatmul.bf16.gmra.mxu3 %v12499_v33  ;;  %2676 = vmatpush.bf16.msra.mxu2 %v8639_v51  ;;  %17643 = vst [vmem:[#allocation32_spill] sm:$0xff] %v12539_v45  ;;  %v12541_v51 = vor.u32 %v10718_v31, %v7952_v10 }
  0xe7   :  { %17645 = vst [vmem:[#allocation34_spill] sm:$0xff] %v12543_v5 }
  0xe8   :  { %v2346_v29 = vpop.f32.mrf.mxu2  ;;  %v2260_v28 = vpop.f32.mrf.mxu0  ;;  %17644 = vst [vmem:[#allocation33_spill] sm:$0xff] %v12541_v51 }
  0xe9   :  { %v2347_v49 = vadd.f32 %v2346_v29, %v2303_v46  ;;  %v2390_v48 = vpop.f32.mrf.mxu3  ;;  %v2304_v37 = vpop.f32.mrf.mxu1 }
  0xea   :  { %v2305_v26 = vadd.f32 %v2304_v37, %v2260_v28 }
  0xeb   :  { %v12513_v6 = vadd.f32 %v2390_v48, %v2347_v49  ;;  %v12545_v49 = vor.u32 %v10719_v25, %v7960_v27  ;;  %v10632_v25 = vld [vmem:[%s17529_s0 + $0x5c] sm:$0xf0]  ;;  %v10624_v27 = vld [vmem:[%s17529_s0 + $0x24] sm:$0xf] }
  0xed   :  { %17646 = vst [vmem:[#allocation35_spill] sm:$0xff] %v12545_v49 }
  0xf0   :  { %v2348_v38 = vpop.f32.mrf.mxu2  ;;  %v2263_v46 = vpop.f32.mrf.mxu0 }
  0xf1   :  { %v2349_v58 = vadd.f32 %v2348_v38, %v2305_v26  ;;  %v2392_v16 = vpop.f32.mrf.mxu3  ;;  %v2307_v29 = vpop.f32.mrf.mxu1  ;;  %v7584_v38 = vld [vmem:[%s17529_s0 + $0x60] sm:$0xf0] }
  0xf2   :  { %v2308_v28 = vadd.f32 %v2307_v29, %v2263_v46  ;;  %v10625_v46 = vld [vmem:[%s17529_s0 + $0x2c] sm:$0xf] }
  0xf3   :  { %v12547_v48 = vadd.f32 %v2392_v16, %v2349_v58  ;;  %2443 = vmatmul.bf16.gmra.mxu0 %v12539_v45  ;;  %v7590_v58 = vld [vmem:[%s17529_s0 + $0x28] sm:$0xf]  ;;  %v7592_v29 = vld [vmem:[%s17529_s0 + $0x68] sm:$0xf0] }
  0xf4   :  { %2487 = vmatmul.bf16.gmra.mxu1 %v12541_v51  ;;  %v10633_v16 = vld [vmem:[%s17529_s0 + $0x64] sm:$0xf0]  ;;  %v12585_v51 = vor.u32 %v10625_v46, %v7592_v29  ;;  %v10648_v46 = vld [vmem:[%s17529_s0 + $0xdc] sm:$0xf0]  ;;  %v10640_v29 = vld [vmem:[%s17529_s0 + $0xa4] sm:$0xf] }
  0xf5   :  { %2531 = vmatmul.bf16.gmra.mxu2 %v12543_v5 }
  0xf6   :  { %2575 = vmatmul.bf16.gmra.mxu3 %v12545_v49  ;;  %v12583_v49 = vor.u32 %v10633_v16, %v7590_v58  ;;  %17650 = vst [vmem:[#allocation39_spill] sm:$0xff] %v12585_v51 }
  0xf8   :  { %v2351_v37 = vpop.f32.mrf.mxu2  ;;  %v2265_v7 = vpop.f32.mrf.mxu0  ;;  %17649 = vst [vmem:[#allocation38_spill] sm:$0xff] %v12583_v49 }
  0xf9   :  { %v2352_v26 = vadd.f32 %v2351_v37, %v2308_v28  ;;  %v2395_v21 = vpop.f32.mrf.mxu3  ;;  %v2309_v31 = vpop.f32.mrf.mxu1  ;;  %v12579_v37 = vor.u32 %v10632_v25, %v7582_v57 }
  0xfa   :  { %v2310_v24 = vadd.f32 %v2309_v31, %v2265_v7  ;;  %v12581_v31 = vor.u32 %v10624_v27, %v7584_v38 }
  0xfb   :  { %v12553_v10 = vadd.f32 %v2395_v21, %v2352_v26  ;;  %17647 = vst [vmem:[#allocation36_spill] sm:$0xff] %v12579_v37 }
  0xfc   :  { %17648 = vst [vmem:[#allocation37_spill] sm:$0xff] %v12581_v31 }
 0x100   :  { %v2353_v28 = vpop.f32.mrf.mxu2  ;;  %v2268_v7 = vpop.f32.mrf.mxu0 }
 0x101   :  { %v2354_v26 = vadd.f32 %v2353_v28, %v2310_v24  ;;  %v2397_v21 = vpop.f32.mrf.mxu3  ;;  %v2312_v5 = vpop.f32.mrf.mxu1  ;;  %v7654_v28 = vld [vmem:[%s17529_s0 + $0xa8] sm:$0xf] }
 0x102   :  { %v2313_v33 = vadd.f32 %v2312_v5, %v2268_v7  ;;  %v7646_v5 = vld [vmem:[%s17529_s0 + $0xa0] sm:$0xf]  ;;  %v7656_v7 = vld [vmem:[%s17529_s0 + $0xe8] sm:$0xf0] }
 0x103   :  { %v12587_v45 = vadd.f32 %v2397_v21, %v2354_v26  ;;  %2589 = vmatmul.bf16.vlgmr.msra.gmra.mxu0 %v12579_v37  ;;  %v10649_v26 = vld [vmem:[%s17529_s0 + $0xe4] sm:$0xf0]  ;;  %v10641_v21 = vld [vmem:[%s17529_s0 + $0xac] sm:$0xf] }
 0x104   :  { %2633 = vmatmul.bf16.vlgmr.msra.gmra.mxu1 %v12581_v31  ;;  %v12626_v44 = vor.u32 %v10641_v21, %v7656_v7  ;;  %v7718_v21 = vld [vmem:[%s17529_s0 + $0x128] sm:$0xf] }
 0x105   :  { %2677 = vmatmul.bf16.vlgmr.msra.gmra.mxu2 %v12583_v49  ;;  %v12623_v49 = vor.u32 %v10649_v26, %v7654_v28  ;;  %v10665_v7 = vld [vmem:[%s17529_s0 + $0x164] sm:$0xf0] }
 0x106   :  { %2721 = vmatmul.bf16.vlgmr.msra.gmra.mxu3 %v12585_v51  ;;  %17654 = vst [vmem:[#allocation43_spill] sm:$0xff] %v12626_v44 }
 0x107   :  { %17653 = vst [vmem:[#allocation42_spill] sm:$0xff] %v12623_v49 }
 0x108   :  { %v2356_v24 = vpop.f32.mrf.mxu2  ;;  %v2270_v27 = vpop.f32.mrf.mxu0 }
 0x109   :  { %v2357_v57 = vadd.f32 %v2356_v24, %v2313_v33  ;;  %v2400_v25 = vpop.f32.mrf.mxu3  ;;  %v2314_v38 = vpop.f32.mrf.mxu1  ;;  %v7648_v33 = vld [vmem:[%s17529_s0 + $0xe0] sm:$0xf0] }
 0x10a   :  { %v2315_v16 = vadd.f32 %v2314_v38, %v2270_v27  ;;  %v12621_v51 = vor.u32 %v10640_v29, %v7648_v33 }
 0x10b   :  { %v12593_v58 = vadd.f32 %v2400_v25, %v2357_v57  ;;  %v12619_v57 = vor.u32 %v10648_v46, %v7646_v5 }
 0x10c   :  { %17652 = vst [vmem:[#allocation41_spill] sm:$0xff] %v12621_v51 }
 0x10d   :  { %17651 = vst [vmem:[#allocation40_spill] sm:$0xff] %v12619_v57 }
 0x110   :  { %v2358_v24 = vpop.f32.mrf.mxu2  ;;  %v2414_v38 = vpop.f32.mrf.mxu0 }
 0x111   :  { %v2359_v25 = vadd.f32 %v2358_v24, %v2315_v16  ;;  %v2402_v27 = vpop.f32.mrf.mxu3  ;;  %v2415_v31 = vadd.f32 %v2414_v38, %v12161_v56  ;;  %v2458_v37 = vpop.f32.mrf.mxu1  ;;  %v10657_v24 = vld [vmem:[%s17529_s0 + $0x12c] sm:$0xf] }
 0x113   :  { %v12628_v34 = vadd.f32 %v2402_v27, %v2359_v25  ;;  %v2459_v22 = vadd.f32 %v2458_v37, %v2415_v31  ;;  %2594 = vmatmul.bf16.gmra.mxu0 %v12619_v57  ;;  %v7710_v37 = vld [vmem:[%s17529_s0 + $0x120] sm:$0xf]  ;;  %v7720_v25 = vld [vmem:[%s17529_s0 + $0x168] sm:$0xf0] }
 0x114   :  { %2638 = vmatmul.bf16.gmra.mxu1 %v12621_v51  ;;  %v10664_v31 = vld [vmem:[%s17529_s0 + $0x15c] sm:$0xf0] }
 0x115   :  { %2682 = vmatmul.bf16.gmra.mxu2 %v12623_v49  ;;  %v12661_v38 = vor.u32 %v10664_v31, %v7710_v37  ;;  %v12668_v49 = vor.u32 %v10657_v24, %v7720_v25  ;;  %v10680_v24 = vld [vmem:[%s17529_s0 + $0x1dc] sm:$0xf0]  ;;  %v7782_v25 = vld [vmem:[%s17529_s0 + $0x1a8] sm:$0xf] }
 0x116   :  { %2726 = vmatmul.bf16.gmra.mxu3 %v12626_v44 }
 0x117   :  { %17655 = vst [vmem:[#allocation44_spill] sm:$0xff] %v12661_v38 }
 0x118   :  { %v2502_v16 = vpop.f32.mrf.mxu2  ;;  %v2416_v29 = vpop.f32.mrf.mxu0  ;;  %17658 = vst [vmem:[#allocation47_spill] sm:$0xff] %v12668_v49 }
 0x119   :  { %v2503_v5 = vadd.f32 %v2502_v16, %v2459_v22  ;;  %v2546_v46 = vpop.f32.mrf.mxu3  ;;  %v2417_v56 = vadd.f32 %v2416_v29, %v12195_v32  ;;  %v2460_v33 = vpop.f32.mrf.mxu1  ;;  %v10656_v22 = vld [vmem:[%s17529_s0 + $0x124] sm:$0xf] }
 0x11a   :  { %v7712_v32 = vld [vmem:[%s17529_s0 + $0x160] sm:$0xf0] }
 0x11b   :  { %v12635_v28 = vadd.f32 %v2546_v46, %v2503_v5  ;;  %v2461_v26 = vadd.f32 %v2460_v33, %v2417_v56  ;;  %v12663_v29 = vor.u32 %v10656_v22, %v7712_v32  ;;  %v12665_v56 = vor.u32 %v10665_v7, %v7718_v21 }
 0x11d   :  { %17656 = vst [vmem:[#allocation45_spill] sm:$0xff] %v12663_v29 }
 0x11e   :  { %17657 = vst [vmem:[#allocation46_spill] sm:$0xff] %v12665_v56 }
 0x120   :  { %v2504_v27 = vpop.f32.mrf.mxu2  ;;  %v2419_v46 = vpop.f32.mrf.mxu0 }
 0x121   :  { %v2505_v16 = vadd.f32 %v2504_v27, %v2461_v26  ;;  %v2548_v5 = vpop.f32.mrf.mxu3  ;;  %v2420_v33 = vadd.f32 %v2419_v46, %v12201_v50  ;;  %v2463_v44 = vpop.f32.mrf.mxu1  ;;  %v10681_v27 = vld [vmem:[%s17529_s0 + $0x1e4] sm:$0xf0] }
 0x123   :  { %v12670_v51 = vadd.f32 %v2548_v5, %v2505_v16  ;;  %v2464_v57 = vadd.f32 %v2463_v44, %v2420_v33  ;;  %2599 = vmatmul.bf16.gmra.mxu0 %v12661_v38  ;;  %v7774_v44 = vld [vmem:[%s17529_s0 + $0x1a0] sm:$0xf]  ;;  %v10673_v16 = vld [vmem:[%s17529_s0 + $0x1ac] sm:$0xf] }
 0x124   :  { %2643 = vmatmul.bf16.gmra.mxu1 %v12663_v29  ;;  %v7784_v5 = vld [vmem:[%s17529_s0 + $0x1e8] sm:$0xf0]  ;;  %v12703_v33 = vor.u32 %v10680_v24, %v7774_v44  ;;  %v10955_v44 = vld [vmem:[%s17528_s1 + $0x6f4] sm:$0xf0] }
 0x125   :  { %2687 = vmatmul.bf16.gmra.mxu2 %v12665_v56  ;;  %v12710_v56 = vor.u32 %v10673_v16, %v7784_v5 }
 0x126   :  { %2731 = vmatmul.bf16.gmra.mxu3 %v12668_v49  ;;  %17659 = vst [vmem:[#allocation48_spill] sm:$0xff] %v12703_v33 }
 0x127   :  { %17662 = vst [vmem:[#allocation51_spill] sm:$0xff] %v12710_v56 }
 0x128   :  { %v2507_v26 = vpop.f32.mrf.mxu2  ;;  %v2421_v22 = vpop.f32.mrf.mxu0 }
 0x129   :  { %v2508_v37 = vadd.f32 %v2507_v26, %v2464_v57  ;;  %v2551_v31 = vpop.f32.mrf.mxu3  ;;  %v2422_v50 = vadd.f32 %v2421_v22, %v12235_v47  ;;  %v2465_v32 = vpop.f32.mrf.mxu1  ;;  %v10672_v57 = vld [vmem:[%s17529_s0 + $0x1a4] sm:$0xf] }
 0x12a   :  { %v7776_v47 = vld [vmem:[%s17529_s0 + $0x1e0] sm:$0xf0] }
 0x12b   :  { %v12677_v21 = vadd.f32 %v2551_v31, %v2508_v37  ;;  %v2466_v7 = vadd.f32 %v2465_v32, %v2422_v50  ;;  %v12705_v22 = vor.u32 %v10672_v57, %v7776_v47  ;;  %v12707_v50 = vor.u32 %v10681_v27, %v7782_v25  ;;  %v8950_v47 = vld [vmem:[%s17528_s1 + $0x770] sm:$0xf]  ;;  %v10971_v25 = vld [vmem:[%s17528_s1 + $0x774] sm:$0xf0] }
 0x12c   :  { %v9014_v27 = vld [vmem:[%s17528_s1 + $0x7f0] sm:$0xf]  ;;  %v8951_v5 = vor.u32 %v10971_v25, %v8950_v47  ;;  %v10953_v47 = vld [vmem:[%s17528_s1 + $0x6e4] sm:$0xf0]  ;;  %v8942_v25 = vld [vmem:[%s17528_s1 + $0x760] sm:$0xf] }
 0x12d   :  { %17660 = vst [vmem:[#allocation49_spill] sm:$0xff] %v12705_v22 }
 0x12e   :  { %17661 = vst [vmem:[#allocation50_spill] sm:$0xff] %v12707_v50  ;;  %2845 = vmatpush.bf16.msrb.mxu2 %v8951_v5  ;;  %v10696_v5 = vld [vmem:[%s17529_s0 + $0x25c] sm:$0xf0] }
 0x130   :  { %v2509_v46 = vpop.f32.mrf.mxu2  ;;  %v2424_v31 = vpop.f32.mrf.mxu0 }
 0x131   :  { %v2510_v26 = vadd.f32 %v2509_v46, %v2466_v7  ;;  %v2553_v37 = vpop.f32.mrf.mxu3  ;;  %v2425_v32 = vadd.f32 %v2424_v31, %v12289_v8  ;;  %v2468_v49 = vpop.f32.mrf.mxu1  ;;  %v8822_v7 = vld [vmem:[%s17528_s1 + $0x670] sm:$0xf]  ;;  %v10939_v8 = vld [vmem:[%s17528_s1 + $0x674] sm:$0xf0] }
 0x132   :  { %v8823_v24 = vor.u32 %v10939_v8, %v8822_v7  ;;  %v10987_v46 = vld [vmem:[%s17528_s1 + $0x7f4] sm:$0xf0] }
 0x133   :  { %v12712_v29 = vadd.f32 %v2553_v37, %v2510_v26  ;;  %v2469_v38 = vadd.f32 %v2468_v49, %v2425_v32  ;;  %2604 = vmatmul.bf16.gmra.mxu0 %v12703_v33  ;;  %v8886_v49 = vld [vmem:[%s17528_s1 + $0x6f0] sm:$0xf]  ;;  %v8814_v26 = vld [vmem:[%s17528_s1 + $0x660] sm:$0xf]  ;;  %v10937_v37 = vld [vmem:[%s17528_s1 + $0x664] sm:$0xf0]  ;;  %v9015_v8 = vor.u32 %v10987_v46, %v9014_v27 }
 0x134   :  { %2648 = vmatmul.bf16.gmra.mxu1 %v12705_v22  ;;  %v8887_v57 = vor.u32 %v10955_v44, %v8886_v49  ;;  %2757 = vmatpush.bf16.msrb.mxu0 %v8823_v24  ;;  %v8815_v49 = vor.u32 %v10937_v37, %v8814_v26  ;;  %v8878_v44 = vld [vmem:[%s17528_s1 + $0x6e0] sm:$0xf]  ;;  %v10985_v46 = vld [vmem:[%s17528_s1 + $0x7e4] sm:$0xf0]  ;;  %v7848_v22 = vld [vmem:[%s17529_s0 + $0x268] sm:$0xf0] }
 0x135   :  { %2692 = vmatmul.bf16.gmra.mxu2 %v12707_v50  ;;  %v8879_v24 = vor.u32 %v10953_v47, %v8878_v44  ;;  %v9006_v27 = vld [vmem:[%s17528_s1 + $0x7e0] sm:$0xf]  ;;  %2889 = vmatpush.bf16.msrb.mxu3 %v9015_v8  ;;  %v10688_v47 = vld [vmem:[%s17529_s0 + $0x224] sm:$0xf]  ;;  %v10935_v8 = vld [vmem:[%s17528_s1 + $0x654] sm:$0xf0] }
 0x136   :  { %2736 = vmatmul.bf16.gmra.mxu3 %v12710_v56  ;;  %2801 = vmatpush.bf16.msrb.mxu1 %v8887_v57  ;;  %v10969_v57 = vld [vmem:[%s17528_s1 + $0x764] sm:$0xf0]  ;;  %v8806_v56 = vld [vmem:[%s17528_s1 + $0x650] sm:$0xf]  ;;  %v10689_v50 = vld [vmem:[%s17529_s0 + $0x22c] sm:$0xf] }
 0x137   :  { %v8943_v37 = vor.u32 %v10969_v57, %v8942_v25  ;;  %v8870_v25 = vld [vmem:[%s17528_s1 + $0x6d0] sm:$0xf]  ;;  %v8862_v33 = vld [vmem:[%s17528_s1 + $0x6c0] sm:$0xf] }
 0x138   :  { %v2512_v16 = vpop.f32.mrf.mxu2  ;;  %v2426_v7 = vpop.f32.mrf.mxu0  ;;  %2758 = vmatpush.bf16.msrb.mxu0 %v8815_v49  ;;  %v8934_v57 = vld [vmem:[%s17528_s1 + $0x750] sm:$0xf] }
 0x139   :  { %v2513_v31 = vadd.f32 %v2512_v16, %v2469_v38  ;;  %v2556_v32 = vpop.f32.mrf.mxu3  ;;  %v2427_v38 = vadd.f32 %v2426_v7, %v12371_v59  ;;  %v2470_v16 = vpop.f32.mrf.mxu1  ;;  %v7838_v59 = vld [vmem:[%s17529_s0 + $0x220] sm:$0xf]  ;;  %v9007_v7 = vor.u32 %v10985_v46, %v9006_v27  ;;  %v10967_v27 = vld [vmem:[%s17528_s1 + $0x754] sm:$0xf0]  ;;  %v10697_v46 = vld [vmem:[%s17529_s0 + $0x264] sm:$0xf0]  ;;  %2846 = vmatpush.bf16.msrb.mxu2 %v8943_v37 }
 0x13a   :  { %2802 = vmatpush.bf16.msrb.mxu1 %v8879_v24  ;;  %v8935_v24 = vor.u32 %v10967_v27, %v8934_v57  ;;  %v8798_v57 = vld [vmem:[%s17528_s1 + $0x640] sm:$0xf]  ;;  %v10933_v27 = vld [vmem:[%s17528_s1 + $0x644] sm:$0xf0] }
 0x13b   :  { %v12767_v26 = vadd.f32 %v2556_v32, %v2513_v31  ;;  %v2471_v44 = vadd.f32 %v2470_v16, %v2427_v38  ;;  %v7840_v31 = vld [vmem:[%s17529_s0 + $0x260] sm:$0xf0]  ;;  %v7846_v32 = vld [vmem:[%s17529_s0 + $0x228] sm:$0xf]  ;;  %v8807_v38 = vor.u32 %v10935_v8, %v8806_v56  ;;  %v10951_v16 = vld [vmem:[%s17528_s1 + $0x6d4] sm:$0xf0]  ;;  %2890 = vmatpush.bf16.msrb.mxu3 %v9007_v7 }
 0x13c   :  { %v8871_v49 = vor.u32 %v10951_v16, %v8870_v25  ;;  %v8998_v56 = vld [vmem:[%s17528_s1 + $0x7d0] sm:$0xf]  ;;  %v10983_v8 = vld [vmem:[%s17528_s1 + $0x7d4] sm:$0xf0]  ;;  %v12817_v16 = vor.u32 %v10696_v5, %v7838_v59  ;;  %v12828_v7 = vor.u32 %v10688_v47, %v7840_v31  ;;  %v10949_v59 = vld [vmem:[%s17528_s1 + $0x6c4] sm:$0xf0]  ;;  %v12842_v31 = vor.u32 %v10689_v50, %v7848_v22 }
 0x13d   :  { %v8999_v37 = vor.u32 %v10983_v8, %v8998_v56  ;;  %v12830_v56 = vor.u32 %v10697_v46, %v7846_v32  ;;  %2759 = vmatpush.bf16.msrb.mxu0 %v8807_v38  ;;  %v8926_v5 = vld [vmem:[%s17528_s1 + $0x740] sm:$0xf]  ;;  %2847 = vmatpush.bf16.msrb.mxu2 %v8935_v24  ;;  %v8799_v32 = vor.u32 %v10933_v27, %v8798_v57  ;;  %v10981_v46 = vld [vmem:[%s17528_s1 + $0x7c4] sm:$0xf0]  ;;  %v8918_v24 = vld [vmem:[%s17528_s1 + $0x730] sm:$0xf] }
 0x13e   :  { %17663 = vst [vmem:[#allocation52_spill] sm:$0xff] %v12817_v16  ;;  %2803 = vmatpush.bf16.msrb.mxu1 %v8871_v49  ;;  %v8990_v38 = vld [vmem:[%s17528_s1 + $0x7c0] sm:$0xf]  ;;  %v8982_v57 = vld [vmem:[%s17528_s1 + $0x7b0] sm:$0xf] }
 0x13f   :  { %17664 = vst [vmem:[#allocation53_spill] sm:$0xff] %v12828_v7  ;;  %2891 = vmatpush.bf16.msrb.mxu3 %v8999_v37  ;;  %v10963_v37 = vld [vmem:[%s17528_s1 + $0x734] sm:$0xf0] }
 0x140   :  { %v2514_v25 = vpop.f32.mrf.mxu2  ;;  %v2429_v63 = vpop.f32.mrf.mxu0  ;;  %17665 = vst [vmem:[#allocation54_spill] sm:$0xff] %v12830_v56 }
 0x141   :  { %v2515_v18 = vadd.f32 %v2514_v25, %v2471_v44  ;;  %v2558_v17 = vpop.f32.mrf.mxu3  ;;  %v10965_v44 = vld [vmem:[%s17528_s1 + $0x744] sm:$0xf0]  ;;  %v2430_v8 = vadd.f32 %v2429_v63, %v12425_v9  ;;  %v2473_v47 = vpop.f32.mrf.mxu1  ;;  %17666 = vst [vmem:[#allocation55_spill] sm:$0xff] %v12842_v31  ;;  %v8863_v25 = vor.u32 %v10949_v59, %v8862_v33  ;;  %v8991_v63 = vor.u32 %v10981_v46, %v8990_v38  ;;  %v8790_v9 = vld [vmem:[%s17528_s1 + $0x630] sm:$0xf] }
 0x142   :  { %v8927_v62 = vor.u32 %v10965_v44, %v8926_v5  ;;  %2760 = vmatpush.bf16.msrb.mxu0 %v8799_v32  ;;  %v10947_v33 = vld [vmem:[%s17528_s1 + $0x6b4] sm:$0xf0]  ;;  %v8919_v59 = vor.u32 %v10963_v37, %v8918_v24  ;;  %v8782_v5 = vld [vmem:[%s17528_s1 + $0x620] sm:$0xf]  ;;  %v10929_v44 = vld [vmem:[%s17528_s1 + $0x624] sm:$0xf0] }
 0x143   :  { %v12850_v49 = vadd.f32 %v2558_v17, %v2515_v18  ;;  %v2474_v61 = vadd.f32 %v2473_v47, %v2430_v8  ;;  %2609 = vmatmul.bf16.gmra.mxu0 %v12817_v16  ;;  %v10931_v17 = vld [vmem:[%s17528_s1 + $0x634] sm:$0xf0]  ;;  %v8854_v18 = vld [vmem:[%s17528_s1 + $0x6b0] sm:$0xf]  ;;  %2804 = vmatpush.bf16.msrb.mxu1 %v8863_v25  ;;  %v8846_v46 = vld [vmem:[%s17528_s1 + $0x6a0] sm:$0xf] }
 0x144   :  { %2653 = vmatmul.bf16.gmra.mxu1 %v12828_v7  ;;  %2848 = vmatpush.bf16.msrb.mxu2 %v8927_v62  ;;  %v8791_v22 = vor.u32 %v10931_v17, %v8790_v9  ;;  %v8855_v50 = vor.u32 %v10947_v33, %v8854_v18  ;;  %v10979_v62 = vld [vmem:[%s17528_s1 + $0x7b4] sm:$0xf0]  ;;  %v10945_v25 = vld [vmem:[%s17528_s1 + $0x6a4] sm:$0xf0]  ;;  %v8974_v33 = vld [vmem:[%s17528_s1 + $0x7a0] sm:$0xf] }
 0x145   :  { %2697 = vmatmul.bf16.gmra.mxu2 %v12830_v56  ;;  %2892 = vmatpush.bf16.msrb.mxu3 %v8991_v63  ;;  %v8983_v38 = vor.u32 %v10979_v62, %v8982_v57  ;;  %v8910_v63 = vld [vmem:[%s17528_s1 + $0x720] sm:$0xf]  ;;  %v10961_v18 = vld [vmem:[%s17528_s1 + $0x724] sm:$0xf0]  ;;  %v8847_v57 = vor.u32 %v10945_v25, %v8846_v46  ;;  %v10943_v46 = vld [vmem:[%s17528_s1 + $0x694] sm:$0xf0] }
 0x146   :  { %2741 = vmatmul.bf16.gmra.mxu3 %v12842_v31  ;;  %2761 = vmatpush.bf16.msrb.mxu0 %v8791_v22  ;;  %v10977_v24 = vld [vmem:[%s17528_s1 + $0x7a4] sm:$0xf0]  ;;  %v10712_v22 = vld [vmem:[%s17529_s0 + $0x2dc] sm:$0xf0]  ;;  %v10959_v25 = vld [vmem:[%s17528_s1 + $0x714] sm:$0xf0] }
 0x147   :  { %2805 = vmatpush.bf16.msrb.mxu1 %v8855_v50  ;;  %v8774_v50 = vld [vmem:[%s17528_s1 + $0x610] sm:$0xf]  ;;  %v8766_v7 = vld [vmem:[%s17528_s1 + $0x600] sm:$0xf]  ;;  %v10925_v16 = vld [vmem:[%s17528_s1 + $0x604] sm:$0xf0] }
 0x148   :  { %v2517_v27 = vpop.f32.mrf.mxu2  ;;  %v2431_v32 = vpop.f32.mrf.mxu0  ;;  %2849 = vmatpush.bf16.msrb.mxu2 %v8919_v59  ;;  %v10927_v59 = vld [vmem:[%s17528_s1 + $0x614] sm:$0xf0] }
 0x149   :  { %v2518_v8 = vadd.f32 %v2517_v27, %v2474_v61  ;;  %v2561_v47 = vpop.f32.mrf.mxu3  ;;  %v2432_v9 = vadd.f32 %v2431_v32, %v12507_v4  ;;  %v2475_v17 = vpop.f32.mrf.mxu1  ;;  %v8783_v61 = vor.u32 %v10929_v44, %v8782_v5  ;;  %v7902_v4 = vld [vmem:[%s17529_s0 + $0x2a0] sm:$0xf]  ;;  %v8911_v27 = vor.u32 %v10961_v18, %v8910_v63  ;;  %v10704_v5 = vld [vmem:[%s17529_s0 + $0x2a4] sm:$0xf]  ;;  %2893 = vmatpush.bf16.msrb.mxu3 %v8983_v38  ;;  %v8838_v32 = vld [vmem:[%s17528_s1 + $0x690] sm:$0xf] }
 0x14a   :  { %v7904_v44 = vld [vmem:[%s17529_s0 + $0x2e0] sm:$0xf0]  ;;  %v8902_v38 = vld [vmem:[%s17528_s1 + $0x710] sm:$0xf]  ;;  %v10713_v63 = vld [vmem:[%s17529_s0 + $0x2e4] sm:$0xf0]  ;;  %v12955_v31 = vor.u32 %v10712_v22, %v7902_v4 }
 0x14b   :  { %v12905_v37 = vadd.f32 %v2561_v47, %v2518_v8  ;;  %v2476_v62 = vadd.f32 %v2475_v17, %v2432_v9  ;;  %v7910_v8 = vld [vmem:[%s17529_s0 + $0x2a8] sm:$0xf]  ;;  %v8975_v47 = vor.u32 %v10977_v24, %v8974_v33  ;;  %2762 = vmatpush.bf16.msrb.mxu0 %v8783_v61  ;;  %v8775_v9 = vor.u32 %v10927_v59, %v8774_v50  ;;  %v8966_v17 = vld [vmem:[%s17528_s1 + $0x790] sm:$0xf]  ;;  %v10975_v18 = vld [vmem:[%s17528_s1 + $0x794] sm:$0xf0] }
 0x14c   :  { %v10705_v33 = vld [vmem:[%s17529_s0 + $0x2ac] sm:$0xf]  ;;  %2806 = vmatpush.bf16.msrb.mxu1 %v8847_v57  ;;  %2850 = vmatpush.bf16.msrb.mxu2 %v8911_v27  ;;  %v8839_v61 = vor.u32 %v10943_v46, %v8838_v32  ;;  %v8903_v50 = vor.u32 %v10959_v25, %v8902_v38  ;;  %17667 = vst [vmem:[#allocation56_spill] sm:$0xff] %v12955_v31  ;;  %v8830_v57 = vld [vmem:[%s17528_s1 + $0x680] sm:$0xf] }
 0x14d   :  { %v7912_v24 = vld [vmem:[%s17529_s0 + $0x2e8] sm:$0xf0]  ;;  %2894 = vmatpush.bf16.msrb.mxu3 %v8975_v47  ;;  %v8967_v56 = vor.u32 %v10975_v18, %v8966_v17  ;;  %v12966_v38 = vor.u32 %v10704_v5, %v7904_v44  ;;  %v12968_v4 = vor.u32 %v10713_v63, %v7910_v8  ;;  %v10941_v22 = vld [vmem:[%s17528_s1 + $0x684] sm:$0xf0]  ;;  %v8894_v47 = vld [vmem:[%s17528_s1 + $0x700] sm:$0xf]  ;;  %v8767_v5 = vor.u32 %v10925_v16, %v8766_v7 }
 0x14e   :  { %v10957_v25 = vld [vmem:[%s17528_s1 + $0x704] sm:$0xf0]  ;;  %v12980_v18 = vor.u32 %v10705_v33, %v7912_v24  ;;  %v8958_v44 = vld [vmem:[%s17528_s1 + $0x780] sm:$0xf] }
 0x14f   :  { %17668 = vst [vmem:[#allocation57_spill] sm:$0xff] %v12966_v38  ;;  %2763 = vmatpush.bf16.msrb.mxu0 %v8775_v9  ;;  %v10973_v8 = vld [vmem:[%s17528_s1 + $0x784] sm:$0xf0]  ;;  %v8895_v60 = vor.u32 %v10957_v25, %v8894_v47  ;;  %v10721_v47 = vld [vmem:[%s17529_s0 + $0x32c] sm:$0xf] }
 0x150   :  { %v2519_v59 = vpop.f32.mrf.mxu2  ;;  %v2434_v46 = vpop.f32.mrf.mxu0  ;;  %17669 = vst [vmem:[#allocation58_spill] sm:$0xff] %v12968_v4  ;;  %2807 = vmatpush.bf16.msrb.mxu1 %v8839_v61  ;;  %2851 = vmatpush.bf16.msrb.mxu2 %v8903_v50  ;;  %v8959_v9 = vor.u32 %v10973_v8, %v8958_v44  ;;  %v7976_v25 = vld [vmem:[%s17529_s0 + $0x368] sm:$0xf0] }
 0x151   :  { %v2520_v27 = vadd.f32 %v2519_v59, %v2476_v62  ;;  %v2563_v32 = vpop.f32.mrf.mxu3  ;;  %v2435_v62 = vadd.f32 %v2434_v46, %v12513_v6  ;;  %v2478_v17 = vpop.f32.mrf.mxu1  ;;  %17670 = vst [vmem:[#allocation59_spill] sm:$0xff] %v12980_v18  ;;  %v8831_v59 = vor.u32 %v10941_v22, %v8830_v57  ;;  %2895 = vmatpush.bf16.msrb.mxu3 %v8967_v56  ;;  %v7974_v46 = vld [vmem:[%s17529_s0 + $0x328] sm:$0xf] }
 0x152   :  { %v10729_v22 = vld [vmem:[%s17529_s0 + $0x364] sm:$0xf0] }
 0x153   :  { %v12988_v63 = vadd.f32 %v2563_v32, %v2520_v27  ;;  %v2479_v6 = vadd.f32 %v2478_v17, %v2435_v62  ;;  %2614 = vmatmul.bf16.gmra.mxu0 %v12955_v31  ;;  %v7966_v27 = vld [vmem:[%s17529_s0 + $0x320] sm:$0xf] }
 0x154   :  { %2658 = vmatmul.bf16.gmra.mxu1 %v12966_v38  ;;  %2764 = vmatpush.bf16.msrb.mxu0 %v8767_v5  ;;  %v10728_v32 = vld [vmem:[%s17529_s0 + $0x35c] sm:$0xf0] }
 0x155   :  { %2702 = vmatmul.bf16.gmra.mxu2 %v12968_v4  ;;  %2808 = vmatpush.bf16.msrb.mxu1 %v8831_v59  ;;  %v13021_v17 = vor.u32 %v10728_v32, %v7966_v27 }
 0x156   :  { %2746 = vmatmul.bf16.gmra.mxu3 %v12980_v18  ;;  %2852 = vmatpush.bf16.msrb.mxu2 %v8895_v60  ;;  %v10720_v60 = vld [vmem:[%s17529_s0 + $0x324] sm:$0xf] }
 0x157   :  { %2896 = vmatpush.bf16.msrb.mxu3 %v8959_v9  ;;  %17671 = vst [vmem:[#allocation60_spill] sm:$0xff] %v13021_v17 }
 0x158   :  { %v2522_v16 = vpop.f32.mrf.mxu2  ;;  %v2436_v24 = vpop.f32.mrf.mxu0 }
 0x159   :  { %v2523_v7 = vadd.f32 %v2522_v16, %v2479_v6  ;;  %v2566_v33 = vpop.f32.mrf.mxu3  ;;  %v2437_v61 = vadd.f32 %v2436_v24, %v12547_v48  ;;  %v2480_v50 = vpop.f32.mrf.mxu1  ;;  %v7968_v48 = vld [vmem:[%s17529_s0 + $0x360] sm:$0xf0]  ;;  %v13025_v6 = vor.u32 %v10729_v22, %v7974_v46  ;;  %v7598_v46 = vld [vmem:[%s17529_s0 + $0x30] sm:$0xf] }
 0x15a   :  { %v13023_v59 = vor.u32 %v10720_v60, %v7968_v48  ;;  %v10634_v22 = vld [vmem:[%s17529_s0 + $0x6c] sm:$0xf0] }
 0x15b   :  { %v12995_v57 = vadd.f32 %v2566_v33, %v2523_v7  ;;  %v2481_v56 = vadd.f32 %v2480_v50, %v2437_v61  ;;  %17673 = vst [vmem:[#allocation62_spill] sm:$0xff] %v13025_v6  ;;  %v13028_v7 = vor.u32 %v10721_v47, %v7976_v25  ;;  %v10626_v47 = vld [vmem:[%s17529_s0 + $0x34] sm:$0xf]  ;;  %v7606_v25 = vld [vmem:[%s17529_s0 + $0x38] sm:$0xf] }
 0x15c   :  { %17672 = vst [vmem:[#allocation61_spill] sm:$0xff] %v13023_v59 }
 0x15d   :  { %17674 = vst [vmem:[#allocation63_spill] sm:$0xff] %v13028_v7 }
 0x160   :  { %v2524_v62 = vpop.f32.mrf.mxu2  ;;  %v2439_v8 = vpop.f32.mrf.mxu0 }
 0x161   :  { %v2525_v5 = vadd.f32 %v2524_v62, %v2481_v56  ;;  %v2568_v44 = vpop.f32.mrf.mxu3  ;;  %v2440_v9 = vadd.f32 %v2439_v8, %v12553_v10  ;;  %v2483_v16 = vpop.f32.mrf.mxu1  ;;  %v10635_v62 = vld [vmem:[%s17529_s0 + $0x74] sm:$0xf0] }
 0x163   :  { %v13030_v33 = vadd.f32 %v2568_v44, %v2525_v5  ;;  %v2484_v24 = vadd.f32 %v2483_v16, %v2440_v9  ;;  %2619 = vmatmul.bf16.gmra.mxu0 %v13021_v17  ;;  %v10627_v5 = vld [vmem:[%s17529_s0 + $0x3c] sm:$0xf]  ;;  %v13063_v9 = vor.u32 %v10634_v22, %v7598_v46 }
 0x164   :  { %2663 = vmatmul.bf16.gmra.mxu1 %v13023_v59  ;;  %v7608_v44 = vld [vmem:[%s17529_s0 + $0x78] sm:$0xf0] }
 0x165   :  { %2707 = vmatmul.bf16.gmra.mxu2 %v13025_v6  ;;  %17675 = vst [vmem:[#allocation64_spill] sm:$0xff] %v13063_v9 }
 0x166   :  { %2751 = vmatmul.bf16.gmra.mxu3 %v13028_v7 }
 0x168   :  { %v2527_v61 = vpop.f32.mrf.mxu2  ;;  %v2441_v27 = vpop.f32.mrf.mxu0 }
 0x169   :  { %v2528_v50 = vadd.f32 %v2527_v61, %v2484_v24  ;;  %v2571_v56 = vpop.f32.mrf.mxu3  ;;  %v2442_v10 = vadd.f32 %v2441_v27, %v12587_v45  ;;  %v2485_v32 = vpop.f32.mrf.mxu1  ;;  %v7600_v45 = vld [vmem:[%s17529_s0 + $0x70] sm:$0xf0] }
 0x16b   :  { %v13037_v60 = vadd.f32 %v2571_v56, %v2528_v50  ;;  %v2486_v48 = vadd.f32 %v2485_v32, %v2442_v10  ;;  %v13065_v50 = vor.u32 %v10626_v47, %v7600_v45  ;;  %v13067_v56 = vor.u32 %v10635_v62, %v7606_v25 }
 0x16c   :  { %v13070_v32 = vor.u32 %v10627_v5, %v7608_v44  ;;  %v7662_v5 = vld [vmem:[%s17529_s0 + $0xb0] sm:$0xf] }
 0x16d   :  { %17676 = vst [vmem:[#allocation65_spill] sm:$0xff] %v13065_v50  ;;  %v10650_v44 = vld [vmem:[%s17529_s0 + $0xec] sm:$0xf0] }
 0x16e   :  { %17677 = vst [vmem:[#allocation66_spill] sm:$0xff] %v13067_v56 }
 0x16f   :  { %17678 = vst [vmem:[#allocation67_spill] sm:$0xff] %v13070_v32 }
 0x170   :  { %v2529_v8 = vpop.f32.mrf.mxu2  ;;  %v2444_v61 = vpop.f32.mrf.mxu0 }
 0x171   :  { %v2530_v16 = vadd.f32 %v2529_v8, %v2486_v48  ;;  %v2573_v24 = vpop.f32.mrf.mxu3  ;;  %v2445_v27 = vadd.f32 %v2444_v61, %v12593_v58  ;;  %v2488_v10 = vpop.f32.mrf.mxu1  ;;  %v7670_v8 = vld [vmem:[%s17529_s0 + $0xb8] sm:$0xf]  ;;  %v7672_v61 = vld [vmem:[%s17529_s0 + $0xf8] sm:$0xf0] }
 0x173   :  { %v13072_v7 = vadd.f32 %v2573_v24, %v2530_v16  ;;  %v2489_v6 = vadd.f32 %v2488_v10, %v2445_v27  ;;  %2765 = vmatmul.bf16.vlgmr.msrb.gmra.mxu0 %v13063_v9  ;;  %v10651_v16 = vld [vmem:[%s17529_s0 + $0xf4] sm:$0xf0]  ;;  %v10643_v24 = vld [vmem:[%s17529_s0 + $0xbc] sm:$0xf]  ;;  %v13105_v10 = vor.u32 %v10650_v44, %v7662_v5 }
 0x174   :  { %2809 = vmatmul.bf16.vlgmr.msrb.gmra.mxu1 %v13065_v50 }
 0x175   :  { %2853 = vmatmul.bf16.vlgmr.msrb.gmra.mxu2 %v13067_v56  ;;  %17679 = vst [vmem:[#allocation68_spill] sm:$0xff] %v13105_v10  ;;  %v13112_v56 = vor.u32 %v10643_v24, %v7672_v61  ;;  %v10666_v24 = vld [vmem:[%s17529_s0 + $0x16c] sm:$0xf0]  ;;  %v7734_v61 = vld [vmem:[%s17529_s0 + $0x138] sm:$0xf] }
 0x176   :  { %2897 = vmatmul.bf16.vlgmr.msrb.gmra.mxu3 %v13070_v32 }
 0x177   :  { %17682 = vst [vmem:[#allocation71_spill] sm:$0xff] %v13112_v56 }
 0x178   :  { %v2532_v48 = vpop.f32.mrf.mxu2  ;;  %v2446_v47 = vpop.f32.mrf.mxu0 }
 0x179   :  { %v2533_v46 = vadd.f32 %v2532_v48, %v2489_v6  ;;  %v2576_v22 = vpop.f32.mrf.mxu3  ;;  %v2447_v58 = vadd.f32 %v2446_v47, %v12628_v34  ;;  %v2490_v45 = vpop.f32.mrf.mxu1  ;;  %v10642_v6 = vld [vmem:[%s17529_s0 + $0xb4] sm:$0xf] }
 0x17a   :  { %v7664_v34 = vld [vmem:[%s17529_s0 + $0xf0] sm:$0xf0] }
 0x17b   :  { %v13079_v25 = vadd.f32 %v2576_v22, %v2533_v46  ;;  %v2491_v62 = vadd.f32 %v2490_v45, %v2447_v58  ;;  %v13107_v47 = vor.u32 %v10642_v6, %v7664_v34  ;;  %v13109_v58 = vor.u32 %v10651_v16, %v7670_v8 }
 0x17d   :  { %17680 = vst [vmem:[#allocation69_spill] sm:$0xff] %v13107_v47 }
 0x17e   :  { %17681 = vst [vmem:[#allocation70_spill] sm:$0xff] %v13109_v58 }
 0x180   :  { %v2534_v27 = vpop.f32.mrf.mxu2  ;;  %v2590_v22 = vpop.f32.mrf.mxu0 }
 0x181   :  { %v2535_v48 = vadd.f32 %v2534_v27, %v2491_v62  ;;  %v2578_v46 = vpop.f32.mrf.mxu3  ;;  %v2591_v45 = vadd.f32 %v2590_v22, %v12635_v28  ;;  %v2634_v32 = vpop.f32.mrf.mxu1  ;;  %v10667_v27 = vld [vmem:[%s17529_s0 + $0x174] sm:$0xf0] }
 0x183   :  { %v13114_v50 = vadd.f32 %v2578_v46, %v2535_v48  ;;  %v2635_v9 = vadd.f32 %v2634_v32, %v2591_v45  ;;  %2770 = vmatmul.bf16.gmra.mxu0 %v13105_v10  ;;  %v7726_v32 = vld [vmem:[%s17529_s0 + $0x130] sm:$0xf]  ;;  %v10659_v48 = vld [vmem:[%s17529_s0 + $0x13c] sm:$0xf] }
 0x184   :  { %2814 = vmatmul.bf16.gmra.mxu1 %v13107_v47  ;;  %v7736_v46 = vld [vmem:[%s17529_s0 + $0x178] sm:$0xf0]  ;;  %v13147_v45 = vor.u32 %v10666_v24, %v7726_v32 }
 0x185   :  { %2858 = vmatmul.bf16.gmra.mxu2 %v13109_v58  ;;  %v13154_v58 = vor.u32 %v10659_v48, %v7736_v46  ;;  %v10682_v48 = vld [vmem:[%s17529_s0 + $0x1ec] sm:$0xf0]  ;;  %v7798_v46 = vld [vmem:[%s17529_s0 + $0x1b8] sm:$0xf] }
 0x186   :  { %2902 = vmatmul.bf16.gmra.mxu3 %v13112_v56  ;;  %17683 = vst [vmem:[#allocation72_spill] sm:$0xff] %v13147_v45 }
 0x187   :  { %17686 = vst [vmem:[#allocation75_spill] sm:$0xff] %v13154_v58 }
 0x188   :  { %v2678_v62 = vpop.f32.mrf.mxu2  ;;  %v2592_v6 = vpop.f32.mrf.mxu0 }
 0x189   :  { %v2679_v5 = vadd.f32 %v2678_v62, %v2635_v9  ;;  %v2722_v44 = vpop.f32.mrf.mxu3  ;;  %v2593_v28 = vadd.f32 %v2592_v6, %v12670_v51  ;;  %v2636_v34 = vpop.f32.mrf.mxu1  ;;  %v10658_v9 = vld [vmem:[%s17529_s0 + $0x134] sm:$0xf] }
 0x18a   :  { %v7728_v51 = vld [vmem:[%s17529_s0 + $0x170] sm:$0xf0] }
 0x18b   :  { %v13121_v8 = vadd.f32 %v2722_v44, %v2679_v5  ;;  %v2637_v16 = vadd.f32 %v2636_v34, %v2593_v28  ;;  %v13149_v6 = vor.u32 %v10658_v9, %v7728_v51  ;;  %v13151_v28 = vor.u32 %v10667_v27, %v7734_v61 }
 0x18d   :  { %17684 = vst [vmem:[#allocation73_spill] sm:$0xff] %v13149_v6 }
 0x18e   :  { %17685 = vst [vmem:[#allocation74_spill] sm:$0xff] %v13151_v28 }
 0x190   :  { %v2680_v22 = vpop.f32.mrf.mxu2  ;;  %v2595_v44 = vpop.f32.mrf.mxu0 }
 0x191   :  { %v2681_v62 = vadd.f32 %v2680_v22, %v2637_v16  ;;  %v2724_v5 = vpop.f32.mrf.mxu3  ;;  %v2596_v34 = vadd.f32 %v2595_v44, %v12677_v21  ;;  %v2639_v56 = vpop.f32.mrf.mxu1  ;;  %v10683_v22 = vld [vmem:[%s17529_s0 + $0x1f4] sm:$0xf0] }
 0x193   :  { %v13156_v47 = vadd.f32 %v2724_v5, %v2681_v62  ;;  %v2640_v10 = vadd.f32 %v2639_v56, %v2596_v34  ;;  %2775 = vmatmul.bf16.gmra.mxu0 %v13147_v45  ;;  %v7790_v56 = vld [vmem:[%s17529_s0 + $0x1b0] sm:$0xf]  ;;  %v10675_v62 = vld [vmem:[%s17529_s0 + $0x1bc] sm:$0xf] }
 0x194   :  { %2819 = vmatmul.bf16.gmra.mxu1 %v13149_v6  ;;  %v7800_v5 = vld [vmem:[%s17529_s0 + $0x1f8] sm:$0xf0]  ;;  %v13189_v34 = vor.u32 %v10682_v48, %v7790_v56 }
 0x195   :  { %2863 = vmatmul.bf16.gmra.mxu2 %v13151_v28  ;;  %v13196_v28 = vor.u32 %v10675_v62, %v7800_v5  ;;  %v8120_v56 = vld [vmem:[%s17528_s1 + $0xf8] sm:$0xf0] }
 0x196   :  { %2907 = vmatmul.bf16.gmra.mxu3 %v13154_v58  ;;  %17687 = vst [vmem:[#allocation76_spill] sm:$0xff] %v13189_v34 }
 0x197   :  { %17690 = vst [vmem:[#allocation79_spill] sm:$0xff] %v13196_v28 }
 0x198   :  { %v2683_v16 = vpop.f32.mrf.mxu2  ;;  %v2597_v9 = vpop.f32.mrf.mxu0 }
 0x199   :  { %v2684_v32 = vadd.f32 %v2683_v16, %v2640_v10  ;;  %v2727_v24 = vpop.f32.mrf.mxu3  ;;  %v2598_v21 = vadd.f32 %v2597_v9, %v12712_v29  ;;  %v2641_v51 = vpop.f32.mrf.mxu1  ;;  %v10674_v10 = vld [vmem:[%s17529_s0 + $0x1b4] sm:$0xf] }
 0x19a   :  { %v7792_v29 = vld [vmem:[%s17529_s0 + $0x1f0] sm:$0xf0] }
 0x19b   :  { %v13163_v61 = vadd.f32 %v2727_v24, %v2684_v32  ;;  %v2642_v27 = vadd.f32 %v2641_v51, %v2598_v21  ;;  %v13191_v9 = vor.u32 %v10674_v10, %v7792_v29  ;;  %v13193_v21 = vor.u32 %v10683_v22, %v7798_v46  ;;  %v10778_v29 = vld [vmem:[%s17528_s1 + $0x174] sm:$0xf]  ;;  %v8184_v46 = vld [vmem:[%s17528_s1 + $0x178] sm:$0xf0] }
 0x19c   :  { %v10794_v22 = vld [vmem:[%s17528_s1 + $0x1f4] sm:$0xf]  ;;  %v8187_v5 = vor.u32 %v10778_v29, %v8184_v46  ;;  %v8112_v29 = vld [vmem:[%s17528_s1 + $0xe8] sm:$0xf0]  ;;  %v10776_v46 = vld [vmem:[%s17528_s1 + $0x164] sm:$0xf] }
 0x19d   :  { %17688 = vst [vmem:[#allocation77_spill] sm:$0xff] %v13191_v9 }
 0x19e   :  { %17689 = vst [vmem:[#allocation78_spill] sm:$0xff] %v13193_v21  ;;  %3021 = vmatpush.bf16.msra.mxu2 %v8187_v5  ;;  %v10698_v5 = vld [vmem:[%s17529_s0 + $0x26c] sm:$0xf0] }
 0x1a0   :  { %v2685_v44 = vpop.f32.mrf.mxu2  ;;  %v2600_v24 = vpop.f32.mrf.mxu0 }
 0x1a1   :  { %v2686_v16 = vadd.f32 %v2685_v44, %v2642_v27  ;;  %v2729_v32 = vpop.f32.mrf.mxu3  ;;  %v2601_v51 = vadd.f32 %v2600_v24, %v12767_v26  ;;  %v2644_v58 = vpop.f32.mrf.mxu1  ;;  %v10746_v27 = vld [vmem:[%s17528_s1 + $0x74] sm:$0xf]  ;;  %v8056_v26 = vld [vmem:[%s17528_s1 + $0x78] sm:$0xf0] }
 0x1a2   :  { %v8059_v48 = vor.u32 %v10746_v27, %v8056_v26  ;;  %v8248_v44 = vld [vmem:[%s17528_s1 + $0x1f8] sm:$0xf0] }
 0x1a3   :  { %v13198_v6 = vadd.f32 %v2729_v32, %v2686_v16  ;;  %v2645_v45 = vadd.f32 %v2644_v58, %v2601_v51  ;;  %2780 = vmatmul.bf16.gmra.mxu0 %v13189_v34  ;;  %v10762_v58 = vld [vmem:[%s17528_s1 + $0xf4] sm:$0xf]  ;;  %v10744_v16 = vld [vmem:[%s17528_s1 + $0x64] sm:$0xf]  ;;  %v8048_v32 = vld [vmem:[%s17528_s1 + $0x68] sm:$0xf0]  ;;  %v8251_v26 = vor.u32 %v10794_v22, %v8248_v44 }
 0x1a4   :  { %2824 = vmatmul.bf16.gmra.mxu1 %v13191_v9  ;;  %v8123_v10 = vor.u32 %v10762_v58, %v8120_v56  ;;  %2933 = vmatpush.bf16.msra.mxu0 %v8059_v48  ;;  %v8051_v58 = vor.u32 %v10744_v16, %v8048_v32  ;;  %v10760_v56 = vld [vmem:[%s17528_s1 + $0xe4] sm:$0xf]  ;;  %v8240_v44 = vld [vmem:[%s17528_s1 + $0x1e8] sm:$0xf0]  ;;  %v7864_v9 = vld [vmem:[%s17529_s0 + $0x278] sm:$0xf0] }
 0x1a5   :  { %2868 = vmatmul.bf16.gmra.mxu2 %v13193_v21  ;;  %v8115_v48 = vor.u32 %v10760_v56, %v8112_v29  ;;  %v10792_v22 = vld [vmem:[%s17528_s1 + $0x1e4] sm:$0xf]  ;;  %3065 = vmatpush.bf16.msra.mxu3 %v8251_v26  ;;  %v10690_v29 = vld [vmem:[%s17529_s0 + $0x234] sm:$0xf]  ;;  %v8040_v26 = vld [vmem:[%s17528_s1 + $0x58] sm:$0xf0] }
 0x1a6   :  { %2912 = vmatmul.bf16.gmra.mxu3 %v13196_v28  ;;  %2977 = vmatpush.bf16.msra.mxu1 %v8123_v10  ;;  %v8176_v10 = vld [vmem:[%s17528_s1 + $0x168] sm:$0xf0]  ;;  %v10742_v28 = vld [vmem:[%s17528_s1 + $0x54] sm:$0xf]  ;;  %v10691_v21 = vld [vmem:[%s17529_s0 + $0x23c] sm:$0xf] }
 0x1a7   :  { %v8179_v32 = vor.u32 %v10776_v46, %v8176_v10  ;;  %v10758_v46 = vld [vmem:[%s17528_s1 + $0xd4] sm:$0xf]  ;;  %v10756_v34 = vld [vmem:[%s17528_s1 + $0xc4] sm:$0xf] }
 0x1a8   :  { %v2688_v62 = vpop.f32.mrf.mxu2  ;;  %v2602_v27 = vpop.f32.mrf.mxu0  ;;  %2934 = vmatpush.bf16.msra.mxu0 %v8051_v58  ;;  %v10774_v10 = vld [vmem:[%s17528_s1 + $0x154] sm:$0xf] }
 0x1a9   :  { %v2689_v24 = vadd.f32 %v2688_v62, %v2645_v45  ;;  %v2732_v51 = vpop.f32.mrf.mxu3  ;;  %v2603_v45 = vadd.f32 %v2602_v27, %v12850_v49  ;;  %v2646_v62 = vpop.f32.mrf.mxu1  ;;  %v7854_v49 = vld [vmem:[%s17529_s0 + $0x230] sm:$0xf]  ;;  %v8243_v27 = vor.u32 %v10792_v22, %v8240_v44  ;;  %v8168_v22 = vld [vmem:[%s17528_s1 + $0x158] sm:$0xf0]  ;;  %v10699_v44 = vld [vmem:[%s17529_s0 + $0x274] sm:$0xf0]  ;;  %3022 = vmatpush.bf16.msra.mxu2 %v8179_v32 }
 0x1aa   :  { %2978 = vmatpush.bf16.msra.mxu1 %v8115_v48  ;;  %v8171_v48 = vor.u32 %v10774_v10, %v8168_v22  ;;  %v10740_v10 = vld [vmem:[%s17528_s1 + $0x44] sm:$0xf]  ;;  %v8032_v22 = vld [vmem:[%s17528_s1 + $0x48] sm:$0xf0] }
 0x1ab   :  { %v13253_v16 = vadd.f32 %v2732_v51, %v2689_v24  ;;  %v2647_v56 = vadd.f32 %v2646_v62, %v2603_v45  ;;  %v7856_v24 = vld [vmem:[%s17529_s0 + $0x270] sm:$0xf0]  ;;  %v7862_v51 = vld [vmem:[%s17529_s0 + $0x238] sm:$0xf]  ;;  %v8043_v45 = vor.u32 %v10742_v28, %v8040_v26  ;;  %v8104_v62 = vld [vmem:[%s17528_s1 + $0xd8] sm:$0xf0]  ;;  %3066 = vmatpush.bf16.msra.mxu3 %v8243_v27 }
 0x1ac   :  { %v8107_v58 = vor.u32 %v10758_v46, %v8104_v62  ;;  %v10790_v28 = vld [vmem:[%s17528_s1 + $0x1d4] sm:$0xf]  ;;  %v8232_v26 = vld [vmem:[%s17528_s1 + $0x1d8] sm:$0xf0]  ;;  %v13303_v62 = vor.u32 %v10698_v5, %v7854_v49  ;;  %v13314_v27 = vor.u32 %v10690_v29, %v7856_v24  ;;  %v8096_v49 = vld [vmem:[%s17528_s1 + $0xc8] sm:$0xf0]  ;;  %v13328_v24 = vor.u32 %v10691_v21, %v7864_v9 }
 0x1ad   :  { %v8235_v32 = vor.u32 %v10790_v28, %v8232_v26  ;;  %v13316_v28 = vor.u32 %v10699_v44, %v7862_v51  ;;  %2935 = vmatpush.bf16.msra.mxu0 %v8043_v45  ;;  %v10772_v5 = vld [vmem:[%s17528_s1 + $0x144] sm:$0xf]  ;;  %3023 = vmatpush.bf16.msra.mxu2 %v8171_v48  ;;  %v8035_v51 = vor.u32 %v10740_v10, %v8032_v22  ;;  %v8224_v44 = vld [vmem:[%s17528_s1 + $0x1c8] sm:$0xf0]  ;;  %v10770_v48 = vld [vmem:[%s17528_s1 + $0x134] sm:$0xf] }
 0x1ae   :  { %17691 = vst [vmem:[#allocation80_spill] sm:$0xff] %v13303_v62  ;;  %2979 = vmatpush.bf16.msra.mxu1 %v8107_v58  ;;  %v10788_v45 = vld [vmem:[%s17528_s1 + $0x1c4] sm:$0xf]  ;;  %v10786_v10 = vld [vmem:[%s17528_s1 + $0x1b4] sm:$0xf] }
 0x1af   :  { %17692 = vst [vmem:[#allocation81_spill] sm:$0xff] %v13314_v27  ;;  %3067 = vmatpush.bf16.msra.mxu3 %v8235_v32  ;;  %v8152_v32 = vld [vmem:[%s17528_s1 + $0x138] sm:$0xf0] }
 0x1b0   :  { %v2690_v46 = vpop.f32.mrf.mxu2  ;;  %v2605_v18 = vpop.f32.mrf.mxu0  ;;  %17693 = vst [vmem:[#allocation82_spill] sm:$0xff] %v13316_v28 }
 0x1b1   :  { %v2691_v59 = vadd.f32 %v2690_v46, %v2647_v56  ;;  %v2734_v17 = vpop.f32.mrf.mxu3  ;;  %v8160_v56 = vld [vmem:[%s17528_s1 + $0x148] sm:$0xf0]  ;;  %v2606_v26 = vadd.f32 %v2605_v18, %v12905_v37  ;;  %v2649_v29 = vpop.f32.mrf.mxu1  ;;  %17694 = vst [vmem:[#allocation83_spill] sm:$0xff] %v13328_v24  ;;  %v8099_v46 = vor.u32 %v10756_v34, %v8096_v49  ;;  %v8227_v37 = vor.u32 %v10788_v45, %v8224_v44  ;;  %v10738_v18 = vld [vmem:[%s17528_s1 + $0x34] sm:$0xf] }
 0x1b2   :  { %v8163_v4 = vor.u32 %v10772_v5, %v8160_v56  ;;  %2936 = vmatpush.bf16.msra.mxu0 %v8035_v51  ;;  %v8088_v34 = vld [vmem:[%s17528_s1 + $0xb8] sm:$0xf0]  ;;  %v8155_v49 = vor.u32 %v10770_v48, %v8152_v32  ;;  %v10736_v5 = vld [vmem:[%s17528_s1 + $0x24] sm:$0xf]  ;;  %v8016_v56 = vld [vmem:[%s17528_s1 + $0x28] sm:$0xf0] }
 0x1b3   :  { %v13336_v58 = vadd.f32 %v2734_v17, %v2691_v59  ;;  %v2650_v38 = vadd.f32 %v2649_v29, %v2606_v26  ;;  %2785 = vmatmul.bf16.gmra.mxu0 %v13303_v62  ;;  %v8024_v17 = vld [vmem:[%s17528_s1 + $0x38] sm:$0xf0]  ;;  %v10754_v59 = vld [vmem:[%s17528_s1 + $0xb4] sm:$0xf]  ;;  %2980 = vmatpush.bf16.msra.mxu1 %v8099_v46  ;;  %v10752_v44 = vld [vmem:[%s17528_s1 + $0xa4] sm:$0xf] }
 0x1b4   :  { %2829 = vmatmul.bf16.gmra.mxu1 %v13314_v27  ;;  %3024 = vmatpush.bf16.msra.mxu2 %v8163_v4  ;;  %v8027_v9 = vor.u32 %v10738_v18, %v8024_v17  ;;  %v8091_v21 = vor.u32 %v10754_v59, %v8088_v34  ;;  %v8216_v4 = vld [vmem:[%s17528_s1 + $0x1b8] sm:$0xf0]  ;;  %v8080_v46 = vld [vmem:[%s17528_s1 + $0xa8] sm:$0xf0]  ;;  %v10784_v34 = vld [vmem:[%s17528_s1 + $0x1a4] sm:$0xf] }
 0x1b5   :  { %2873 = vmatmul.bf16.gmra.mxu2 %v13316_v28  ;;  %3068 = vmatpush.bf16.msra.mxu3 %v8227_v37  ;;  %v8219_v45 = vor.u32 %v10786_v10, %v8216_v4  ;;  %v10768_v37 = vld [vmem:[%s17528_s1 + $0x124] sm:$0xf]  ;;  %v8144_v59 = vld [vmem:[%s17528_s1 + $0x128] sm:$0xf0]  ;;  %v8083_v10 = vor.u32 %v10752_v44, %v8080_v46  ;;  %v8072_v44 = vld [vmem:[%s17528_s1 + $0x98] sm:$0xf0] }
 0x1b6   :  { %2917 = vmatmul.bf16.gmra.mxu3 %v13328_v24  ;;  %2937 = vmatpush.bf16.msra.mxu0 %v8027_v9  ;;  %v8208_v48 = vld [vmem:[%s17528_s1 + $0x1a8] sm:$0xf0]  ;;  %v10714_v9 = vld [vmem:[%s17529_s0 + $0x2ec] sm:$0xf0]  ;;  %v8136_v46 = vld [vmem:[%s17528_s1 + $0x118] sm:$0xf0] }
 0x1b7   :  { %2981 = vmatpush.bf16.msra.mxu1 %v8091_v21  ;;  %v10734_v21 = vld [vmem:[%s17528_s1 + $0x14] sm:$0xf]  ;;  %v10732_v27 = vld [vmem:[%s17528_s1 + $0x4] sm:$0xf]  ;;  %v8000_v62 = vld [vmem:[%s17528_s1 + $0x8] sm:$0xf0] }
 0x1b8   :  { %v2693_v22 = vpop.f32.mrf.mxu2  ;;  %v2607_v51 = vpop.f32.mrf.mxu0  ;;  %3025 = vmatpush.bf16.msra.mxu2 %v8155_v49  ;;  %v8008_v49 = vld [vmem:[%s17528_s1 + $0x18] sm:$0xf0] }
 0x1b9   :  { %v2694_v26 = vadd.f32 %v2693_v22, %v2650_v38  ;;  %v2737_v29 = vpop.f32.mrf.mxu3  ;;  %v2608_v18 = vadd.f32 %v2607_v51, %v12988_v63  ;;  %v2651_v17 = vpop.f32.mrf.mxu1  ;;  %v8019_v38 = vor.u32 %v10736_v5, %v8016_v56  ;;  %v7918_v63 = vld [vmem:[%s17529_s0 + $0x2b0] sm:$0xf]  ;;  %v8147_v22 = vor.u32 %v10768_v37, %v8144_v59  ;;  %v10706_v5 = vld [vmem:[%s17529_s0 + $0x2b4] sm:$0xf]  ;;  %3069 = vmatpush.bf16.msra.mxu3 %v8219_v45  ;;  %v10715_v37 = vld [vmem:[%s17529_s0 + $0x2f4] sm:$0xf0] }
 0x1ba   :  { %v7920_v56 = vld [vmem:[%s17529_s0 + $0x2f0] sm:$0xf0]  ;;  %v8200_v59 = vld [vmem:[%s17528_s1 + $0x198] sm:$0xf0]  ;;  %v13441_v24 = vor.u32 %v10714_v9, %v7918_v63  ;;  %v8064_v9 = vld [vmem:[%s17528_s1 + $0x88] sm:$0xf0] }
 0x1bb   :  { %v13391_v32 = vadd.f32 %v2737_v29, %v2694_v26  ;;  %v2652_v4 = vadd.f32 %v2651_v17, %v2608_v18  ;;  %v7926_v26 = vld [vmem:[%s17529_s0 + $0x2b8] sm:$0xf]  ;;  %v8211_v29 = vor.u32 %v10784_v34, %v8208_v48  ;;  %v10750_v51 = vld [vmem:[%s17528_s1 + $0x94] sm:$0xf]  ;;  %2938 = vmatpush.bf16.msra.mxu0 %v8019_v38  ;;  %v8011_v18 = vor.u32 %v10734_v21, %v8008_v49  ;;  %v10707_v34 = vld [vmem:[%s17529_s0 + $0x2bc] sm:$0xf] }
 0x1bc   :  { %v10766_v45 = vld [vmem:[%s17528_s1 + $0x114] sm:$0xf]  ;;  %v7928_v48 = vld [vmem:[%s17529_s0 + $0x2f8] sm:$0xf0]  ;;  %2982 = vmatpush.bf16.msra.mxu1 %v8083_v10  ;;  %3026 = vmatpush.bf16.msra.mxu2 %v8147_v22  ;;  %v8075_v38 = vor.u32 %v10750_v51, %v8072_v44  ;;  %v10748_v10 = vld [vmem:[%s17528_s1 + $0x84] sm:$0xf]  ;;  %v13454_v63 = vor.u32 %v10715_v37, %v7926_v26 }
 0x1bd   :  { %v10782_v17 = vld [vmem:[%s17528_s1 + $0x194] sm:$0xf]  ;;  %v8139_v21 = vor.u32 %v10766_v45, %v8136_v46  ;;  %3070 = vmatpush.bf16.msra.mxu3 %v8211_v29  ;;  %v13452_v45 = vor.u32 %v10706_v5, %v7920_v56  ;;  %v10764_v29 = vld [vmem:[%s17528_s1 + $0x104] sm:$0xf]  ;;  %v8128_v46 = vld [vmem:[%s17528_s1 + $0x108] sm:$0xf0]  ;;  %v8003_v5 = vor.u32 %v10732_v27, %v8000_v62 }
 0x1be   :  { %v8203_v28 = vor.u32 %v10782_v17, %v8200_v59  ;;  %v13466_v59 = vor.u32 %v10707_v34, %v7928_v48  ;;  %v10780_v56 = vld [vmem:[%s17528_s1 + $0x184] sm:$0xf]  ;;  %v8192_v26 = vld [vmem:[%s17528_s1 + $0x188] sm:$0xf0]  ;;  %v8131_v31 = vor.u32 %v10764_v29, %v8128_v46  ;;  %v10723_v29 = vld [vmem:[%s17529_s0 + $0x33c] sm:$0xf] }
 0x1bf   :  { %2939 = vmatpush.bf16.msra.mxu0 %v8011_v18  ;;  %v8195_v18 = vor.u32 %v10780_v56, %v8192_v26  ;;  %v7992_v46 = vld [vmem:[%s17529_s0 + $0x378] sm:$0xf0] }
 0x1c0   :  { %v2695_v49 = vpop.f32.mrf.mxu2  ;;  %v2610_v44 = vpop.f32.mrf.mxu0  ;;  %2983 = vmatpush.bf16.msra.mxu1 %v8075_v38  ;;  %3027 = vmatpush.bf16.msra.mxu2 %v8139_v21 }
 0x1c1   :  { %v2696_v22 = vadd.f32 %v2695_v49, %v2652_v4  ;;  %v2739_v51 = vpop.f32.mrf.mxu3  ;;  %v2611_v4 = vadd.f32 %v2610_v44, %v12995_v57  ;;  %v2654_v17 = vpop.f32.mrf.mxu1  ;;  %v8067_v49 = vor.u32 %v10748_v10, %v8064_v9  ;;  %3071 = vmatpush.bf16.msra.mxu3 %v8203_v28  ;;  %v7990_v44 = vld [vmem:[%s17529_s0 + $0x338] sm:$0xf] }
 0x1c2   :  { %v10731_v9 = vld [vmem:[%s17529_s0 + $0x374] sm:$0xf0] }
 0x1c3   :  { %v13474_v37 = vadd.f32 %v2739_v51, %v2696_v22  ;;  %v2655_v57 = vadd.f32 %v2654_v17, %v2611_v4  ;;  %2790 = vmatmul.bf16.gmra.mxu0 %v13441_v24  ;;  %v7982_v22 = vld [vmem:[%s17529_s0 + $0x330] sm:$0xf] }
 0x1c4   :  { %2834 = vmatmul.bf16.gmra.mxu1 %v13452_v45  ;;  %2940 = vmatpush.bf16.msra.mxu0 %v8003_v5  ;;  %v10730_v51 = vld [vmem:[%s17529_s0 + $0x36c] sm:$0xf0] }
 0x1c5   :  { %2878 = vmatmul.bf16.gmra.mxu2 %v13454_v63  ;;  %2984 = vmatpush.bf16.msra.mxu1 %v8067_v49  ;;  %v13507_v17 = vor.u32 %v10730_v51, %v7982_v22 }
 0x1c6   :  { %2922 = vmatmul.bf16.gmra.mxu3 %v13466_v59  ;;  %3028 = vmatpush.bf16.msra.mxu2 %v8131_v31  ;;  %v10722_v31 = vld [vmem:[%s17529_s0 + $0x334] sm:$0xf] }
 0x1c7   :  { %3072 = vmatpush.bf16.msra.mxu3 %v8195_v18 }
 0x1c8   :  { %v2698_v62 = vpop.f32.mrf.mxu2  ;;  %v2612_v48 = vpop.f32.mrf.mxu0 }
 0x1c9   :  { %v2699_v27 = vadd.f32 %v2698_v62, %v2655_v57  ;;  %v2742_v34 = vpop.f32.mrf.mxu3  ;;  %v2613_v38 = vadd.f32 %v2612_v48, %v13030_v33  ;;  %v2656_v21 = vpop.f32.mrf.mxu1  ;;  %v7984_v33 = vld [vmem:[%s17529_s0 + $0x370] sm:$0xf0]  ;;  %v13511_v57 = vor.u32 %v10731_v9, %v7990_v44 }
 0x1ca   :  { %v13509_v49 = vor.u32 %v10722_v31, %v7984_v33 }
 0x1cb   :  { %v13481_v10 = vadd.f32 %v2742_v34, %v2699_v27  ;;  %v2657_v28 = vadd.f32 %v2656_v21, %v2613_v38  ;;  %v13514_v27 = vor.u32 %v10723_v29, %v7992_v46 }
 0x1d0   :  { %v2700_v4 = vpop.f32.mrf.mxu2  ;;  %v2615_v26 = vpop.f32.mrf.mxu0 }
 0x1d1   :  { %v2701_v5 = vadd.f32 %v2700_v4, %v2657_v28  ;;  %v2744_v56 = vpop.f32.mrf.mxu3  ;;  %v2616_v18 = vadd.f32 %v2615_v26, %v13037_v60  ;;  %v2659_v62 = vpop.f32.mrf.mxu1 }
 0x1d3   :  { %v13516_v34 = vadd.f32 %v2744_v56, %v2701_v5  ;;  %v2660_v48 = vadd.f32 %v2659_v62, %v2616_v18  ;;  %2795 = vmatmul.bf16.gmra.mxu0 %v13507_v17 }
 0x1d4   :  { %2839 = vmatmul.bf16.gmra.mxu1 %v13509_v49 }
 0x1d5   :  { %2883 = vmatmul.bf16.gmra.mxu2 %v13511_v57 }
 0x1d6   :  { %2927 = vmatmul.bf16.gmra.mxu3 %v13514_v27 }
 0x1d8   :  { %v2703_v38 = vpop.f32.mrf.mxu2  ;;  %v2617_v22 = vpop.f32.mrf.mxu0 }
 0x1d9   :  { %v2704_v21 = vadd.f32 %v2703_v38, %v2660_v48  ;;  %v2747_v28 = vpop.f32.mrf.mxu3  ;;  %v2618_v60 = vadd.f32 %v2617_v22, %v13072_v7  ;;  %v2661_v51 = vpop.f32.mrf.mxu1 }
 0x1db   :  { %v13523_v31 = vadd.f32 %v2747_v28, %v2704_v21  ;;  %v2662_v33 = vadd.f32 %v2661_v51, %v2618_v60 }
 0x1e0   :  { %v2705_v44 = vpop.f32.mrf.mxu2  ;;  %v2620_v46 = vpop.f32.mrf.mxu0 }
 0x1e1   :  { %v2706_v9 = vadd.f32 %v2705_v44, %v2662_v33  ;;  %v2749_v29 = vpop.f32.mrf.mxu3  ;;  %v2621_v4 = vadd.f32 %v2620_v46, %v13079_v25  ;;  %v2664_v5 = vpop.f32.mrf.mxu1 }
 0x1e3   :  { %v13526_v56 = vadd.f32 %v2749_v29, %v2706_v9  ;;  %v2665_v26 = vadd.f32 %v2664_v5, %v2621_v4  ;;  %2941 = vmatmul.bf16.vlgmr.msra.gmra.mxu0 %v11669_v40 }
 0x1e4   :  { %2985 = vmatmul.bf16.vlgmr.msra.gmra.mxu1 %v11671_v41 }
 0x1e5   :  { %3029 = vmatmul.bf16.vlgmr.msra.gmra.mxu2 %v11673_v42 }
 0x1e6   :  { %3073 = vmatmul.bf16.vlgmr.msra.gmra.mxu3 %v11675_v43 }
 0x1e8   :  { %v2708_v7 = vpop.f32.mrf.mxu2  ;;  %v2622_v48 = vpop.f32.mrf.mxu0 }
 0x1e9   :  { %v2709_v18 = vadd.f32 %v2708_v7, %v2665_v26  ;;  %v2752_v62 = vpop.f32.mrf.mxu3  ;;  %v2623_v38 = vadd.f32 %v2622_v48, %v13114_v50  ;;  %v2666_v21 = vpop.f32.mrf.mxu1 }
 0x1eb   :  { %v13533_v25 = vadd.f32 %v2752_v62, %v2709_v18  ;;  %v2667_v28 = vadd.f32 %v2666_v21, %v2623_v38 }
 0x1f0   :  { %v2710_v22 = vpop.f32.mrf.mxu2  ;;  %v2766_v40 = vpop.f32.mrf.mxu0 }
 0x1f1   :  { %v2711_v60 = vadd.f32 %v2710_v22, %v2667_v28  ;;  %v2754_v51 = vpop.f32.mrf.mxu3  ;;  %v2767_v41 = vadd.f32 %v2766_v40, %v13121_v8  ;;  %v2810_v33 = vpop.f32.mrf.mxu1 }
 0x1f3   :  { %v13536_v42 = vadd.f32 %v2754_v51, %v2711_v60  ;;  %v2811_v43 = vadd.f32 %v2810_v33, %v2767_v41  ;;  %2946 = vmatmul.bf16.gmra.mxu0 %v11705_v52 }
 0x1f4   :  { %2990 = vmatmul.bf16.gmra.mxu1 %v11707_v53 }
 0x1f5   :  { %3034 = vmatmul.bf16.gmra.mxu2 %v11709_v54 }
 0x1f6   :  { %3078 = vmatmul.bf16.gmra.mxu3 %v11711_v55 }
 0x1f8   :  { %v2854_v50 = vpop.f32.mrf.mxu2  ;;  %v2768_v29 = vpop.f32.mrf.mxu0 }
 0x1f9   :  { %v2855_v44 = vadd.f32 %v2854_v50, %v2811_v43  ;;  %v2898_v9 = vpop.f32.mrf.mxu3  ;;  %v2769_v46 = vadd.f32 %v2768_v29, %v13156_v47  ;;  %v2812_v4 = vpop.f32.mrf.mxu1  ;;  %v8312_v43 = vld [vmem:[%s17528_s1 + $0x278] sm:$0xf0]  ;;  %v10826_v50 = vld [vmem:[%s17528_s1 + $0x2f4] sm:$0xf] }
 0x1fb   :  { %v13543_v8 = vadd.f32 %v2898_v9, %v2855_v44  ;;  %v2813_v5 = vadd.f32 %v2812_v4, %v2769_v46  ;;  %v10842_v44 = vld [vmem:[%s17528_s1 + $0x374] sm:$0xf]  ;;  %v8440_v9 = vld [vmem:[%s17528_s1 + $0x378] sm:$0xf0] }
 0x1fc   :  { %v8443_v46 = vor.u32 %v10842_v44, %v8440_v9  ;;  %v10854_v44 = vld [vmem:[%s17528_s1 + $0x3d4] sm:$0xf]  ;;  %v8488_v9 = vld [vmem:[%s17528_s1 + $0x3d8] sm:$0xf0] }
 0x1fe   :  { %3197 = vmatpush.bf16.msrb.mxu2 %v8443_v46 }
 0x200   :  { %v2856_v26 = vpop.f32.mrf.mxu2  ;;  %v2771_v52 = vpop.f32.mrf.mxu0 }
 0x201   :  { %v2857_v7 = vadd.f32 %v2856_v26, %v2813_v5  ;;  %v2900_v18 = vpop.f32.mrf.mxu3  ;;  %v2772_v53 = vadd.f32 %v2771_v52, %v13163_v61  ;;  %v2815_v62 = vpop.f32.mrf.mxu1  ;;  %v10808_v26 = vld [vmem:[%s17528_s1 + $0x264] sm:$0xf] }
 0x203   :  { %v13546_v54 = vadd.f32 %v2900_v18, %v2857_v7  ;;  %v2816_v55 = vadd.f32 %v2815_v62, %v2772_v53  ;;  %2951 = vmatmul.bf16.gmra.mxu0 %v11741_v0  ;;  %v10824_v7 = vld [vmem:[%s17528_s1 + $0x2e4] sm:$0xf] }
 0x204   :  { %2995 = vmatmul.bf16.gmra.mxu1 %v11743_v1 }
 0x205   :  { %3039 = vmatmul.bf16.gmra.mxu2 %v11745_v2 }
 0x206   :  { %3083 = vmatmul.bf16.gmra.mxu3 %v11747_v3 }
 0x208   :  { %v2859_v47 = vpop.f32.mrf.mxu2  ;;  %v2773_v21 = vpop.f32.mrf.mxu0 }
 0x209   :  { %v2860_v48 = vadd.f32 %v2859_v47, %v2816_v55  ;;  %v2903_v38 = vpop.f32.mrf.mxu3  ;;  %v2774_v28 = vadd.f32 %v2773_v21, %v13198_v6  ;;  %v2817_v22 = vpop.f32.mrf.mxu1  ;;  %v10810_v6 = vld [vmem:[%s17528_s1 + $0x274] sm:$0xf]  ;;  %v8368_v55 = vld [vmem:[%s17528_s1 + $0x2e8] sm:$0xf0]  ;;  %v10840_v47 = vld [vmem:[%s17528_s1 + $0x364] sm:$0xf] }
 0x20b   :  { %v13553_v61 = vadd.f32 %v2903_v38, %v2860_v48  ;;  %v2818_v60 = vadd.f32 %v2817_v22, %v2774_v28  ;;  %v8432_v48 = vld [vmem:[%s17528_s1 + $0x368] sm:$0xf0]  ;;  %v8371_v28 = vor.u32 %v10824_v7, %v8368_v55 }
 0x20c   :  { %v8435_v22 = vor.u32 %v10840_v47, %v8432_v48 }
 0x20e   :  { %3198 = vmatpush.bf16.msrb.mxu2 %v8435_v22 }
 0x210   :  { %v2861_v51 = vpop.f32.mrf.mxu2  ;;  %v2776_v0 = vpop.f32.mrf.mxu0 }
 0x211   :  { %v2862_v40 = vadd.f32 %v2861_v51, %v2818_v60  ;;  %v2905_v41 = vpop.f32.mrf.mxu3  ;;  %v2777_v1 = vadd.f32 %v2776_v0, %v13253_v16  ;;  %v2820_v33 = vpop.f32.mrf.mxu1  ;;  %v8315_v16 = vor.u32 %v10810_v6, %v8312_v43  ;;  %v10856_v60 = vld [vmem:[%s17528_s1 + $0x3e4] sm:$0xf]  ;;  %v8496_v51 = vld [vmem:[%s17528_s1 + $0x3e8] sm:$0xf0]  ;;  %v8360_v6 = vld [vmem:[%s17528_s1 + $0x2d8] sm:$0xf0] }
 0x212   :  { %v10838_v43 = vld [vmem:[%s17528_s1 + $0x354] sm:$0xf] }
 0x213   :  { %v13556_v2 = vadd.f32 %v2905_v41, %v2862_v40  ;;  %v2821_v3 = vadd.f32 %v2820_v33, %v2777_v1  ;;  %2956 = vmatmul.bf16.gmra.mxu0 %v11777_v12  ;;  %v8376_v12 = vld [vmem:[%s17528_s1 + $0x2f8] sm:$0xf0]  ;;  %v8499_v41 = vor.u32 %v10856_v60, %v8496_v51  ;;  %v10822_v33 = vld [vmem:[%s17528_s1 + $0x2d4] sm:$0xf] }
 0x214   :  { %3000 = vmatmul.bf16.gmra.mxu1 %v11779_v13  ;;  %v8379_v29 = vor.u32 %v10826_v50, %v8376_v12  ;;  %v10858_v13 = vld [vmem:[%s17528_s1 + $0x3f4] sm:$0xf]  ;;  %3109 = vmatpush.bf16.msrb.mxu0 %v8315_v16  ;;  %v8296_v1 = vld [vmem:[%s17528_s1 + $0x258] sm:$0xf0]  ;;  %v8363_v16 = vor.u32 %v10822_v33, %v8360_v6 }
 0x215   :  { %3044 = vmatmul.bf16.gmra.mxu2 %v11781_v14  ;;  %v8504_v14 = vld [vmem:[%s17528_s1 + $0x3f8] sm:$0xf0] }
 0x216   :  { %3088 = vmatmul.bf16.gmra.mxu3 %v11783_v15  ;;  %v8507_v4 = vor.u32 %v10858_v13, %v8504_v14  ;;  %3153 = vmatpush.bf16.msrb.mxu1 %v8379_v29  ;;  %v8304_v15 = vld [vmem:[%s17528_s1 + $0x268] sm:$0xf0]  ;;  %v8424_v50 = vld [vmem:[%s17528_s1 + $0x358] sm:$0xf0]  ;;  %v8491_v29 = vor.u32 %v10854_v44, %v8488_v9  ;;  %v10804_v13 = vld [vmem:[%s17528_s1 + $0x244] sm:$0xf] }
 0x217   :  { %v8307_v62 = vor.u32 %v10808_v26, %v8304_v15  ;;  %v8427_v12 = vor.u32 %v10838_v43, %v8424_v50  ;;  %v8288_v14 = vld [vmem:[%s17528_s1 + $0x248] sm:$0xf0]  ;;  %v8280_v51 = vld [vmem:[%s17528_s1 + $0x238] sm:$0xf0] }
 0x218   :  { %v2864_v5 = vpop.f32.mrf.mxu2  ;;  %v2778_v53 = vpop.f32.mrf.mxu0  ;;  %3241 = vmatpush.bf16.msrb.mxu3 %v8507_v4  ;;  %v10820_v4 = vld [vmem:[%s17528_s1 + $0x2c4] sm:$0xf]  ;;  %v8291_v7 = vor.u32 %v10804_v13, %v8288_v14  ;;  %v8272_v50 = vld [vmem:[%s17528_s1 + $0x228] sm:$0xf0] }
 0x219   :  { %v2865_v18 = vadd.f32 %v2864_v5, %v2821_v3  ;;  %v2908_v52 = vpop.f32.mrf.mxu3  ;;  %v2779_v38 = vadd.f32 %v2778_v53, %v13336_v58  ;;  %v2822_v21 = vpop.f32.mrf.mxu1  ;;  %3110 = vmatpush.bf16.msrb.mxu0 %v8307_v62  ;;  %v10806_v58 = vld [vmem:[%s17528_s1 + $0x254] sm:$0xf]  ;;  %3199 = vmatpush.bf16.msrb.mxu2 %v8427_v12  ;;  %v8416_v53 = vld [vmem:[%s17528_s1 + $0x348] sm:$0xf0]  ;;  %v10832_v13 = vld [vmem:[%s17528_s1 + $0x324] sm:$0xf] }
 0x21a   :  { %3154 = vmatpush.bf16.msrb.mxu1 %v8371_v28  ;;  %v8299_v3 = vor.u32 %v10806_v58, %v8296_v1  ;;  %v10834_v58 = vld [vmem:[%s17528_s1 + $0x334] sm:$0xf]  ;;  %v8408_v1 = vld [vmem:[%s17528_s1 + $0x338] sm:$0xf0]  ;;  %v8400_v14 = vld [vmem:[%s17528_s1 + $0x328] sm:$0xf0] }
 0x21b   :  { %v13611_v40 = vadd.f32 %v2908_v52, %v2865_v18  ;;  %v2823_v0 = vadd.f32 %v2822_v21, %v2779_v38  ;;  %v8352_v18 = vld [vmem:[%s17528_s1 + $0x2c8] sm:$0xf0]  ;;  %v10836_v52 = vld [vmem:[%s17528_s1 + $0x344] sm:$0xf] }
 0x21c   :  { %3242 = vmatpush.bf16.msrb.mxu3 %v8499_v41  ;;  %v8355_v47 = vor.u32 %v10820_v4, %v8352_v18  ;;  %v8419_v48 = vor.u32 %v10836_v52, %v8416_v53  ;;  %v10852_v38 = vld [vmem:[%s17528_s1 + $0x3c4] sm:$0xf]  ;;  %v8480_v21 = vld [vmem:[%s17528_s1 + $0x3c8] sm:$0xf0]  ;;  %v10818_v41 = vld [vmem:[%s17528_s1 + $0x2b4] sm:$0xf] }
 0x21d   :  { %3111 = vmatpush.bf16.msrb.mxu0 %v8299_v3  ;;  %v8483_v22 = vor.u32 %v10852_v38, %v8480_v21  ;;  %v8472_v3 = vld [vmem:[%s17528_s1 + $0x3b8] sm:$0xf0]  ;;  %v8464_v18 = vld [vmem:[%s17528_s1 + $0x3a8] sm:$0xf0]  ;;  %v10830_v21 = vld [vmem:[%s17528_s1 + $0x314] sm:$0xf] }
 0x21e   :  { %3155 = vmatpush.bf16.msrb.mxu1 %v8363_v16  ;;  %3200 = vmatpush.bf16.msrb.mxu2 %v8419_v48  ;;  %v10816_v16 = vld [vmem:[%s17528_s1 + $0x2a4] sm:$0xf]  ;;  %v8328_v38 = vld [vmem:[%s17528_s1 + $0x298] sm:$0xf0] }
 0x220   :  { %v2866_v46 = vpop.f32.mrf.mxu2  ;;  %v2781_v15 = vpop.f32.mrf.mxu0  ;;  %3243 = vmatpush.bf16.msrb.mxu3 %v8491_v29 }
 0x221   :  { %v2867_v5 = vadd.f32 %v2866_v46, %v2823_v0  ;;  %v2910_v26 = vpop.f32.mrf.mxu3  ;;  %v2782_v62 = vadd.f32 %v2781_v15, %v13391_v32  ;;  %v2825_v55 = vpop.f32.mrf.mxu1  ;;  %3112 = vmatpush.bf16.msrb.mxu0 %v8291_v7  ;;  %v10802_v32 = vld [vmem:[%s17528_s1 + $0x234] sm:$0xf]  ;;  %v8336_v46 = vld [vmem:[%s17528_s1 + $0x2a8] sm:$0xf0]  ;;  %v8403_v15 = vor.u32 %v10832_v13, %v8400_v14  ;;  %v10848_v7 = vld [vmem:[%s17528_s1 + $0x3a4] sm:$0xf] }
 0x222   :  { %3156 = vmatpush.bf16.msrb.mxu1 %v8355_v47  ;;  %v8283_v0 = vor.u32 %v10802_v32, %v8280_v51  ;;  %v8467_v53 = vor.u32 %v10848_v7, %v8464_v18  ;;  %v10814_v47 = vld [vmem:[%s17528_s1 + $0x294] sm:$0xf] }
 0x223   :  { %v13662_v28 = vadd.f32 %v2910_v26, %v2867_v5  ;;  %v2826_v60 = vadd.f32 %v2825_v55, %v2782_v62  ;;  %2961 = vmatmul.bf16.gmra.mxu0 %v11894_v11  ;;  %v8344_v11 = vld [vmem:[%s17528_s1 + $0x2b8] sm:$0xf0]  ;;  %v8339_v26 = vor.u32 %v10816_v16, %v8336_v46  ;;  %v10846_v51 = vld [vmem:[%s17528_s1 + $0x394] sm:$0xf]  ;;  %v8448_v46 = vld [vmem:[%s17528_s1 + $0x388] sm:$0xf0] }
 0x224   :  { %3005 = vmatmul.bf16.gmra.mxu1 %v11905_v19  ;;  %v8347_v33 = vor.u32 %v10818_v41, %v8344_v11  ;;  %v8411_v19 = vor.u32 %v10834_v58, %v8408_v1  ;;  %3244 = vmatpush.bf16.msrb.mxu3 %v8483_v22  ;;  %v8264_v55 = vld [vmem:[%s17528_s1 + $0x218] sm:$0xf0]  ;;  %v10796_v58 = vld [vmem:[%s17528_s1 + $0x204] sm:$0xf]  ;;  %v8256_v1 = vld [vmem:[%s17528_s1 + $0x208] sm:$0xf0] }
 0x225   :  { %3049 = vmatmul.bf16.gmra.mxu2 %v11907_v20  ;;  %v10850_v20 = vld [vmem:[%s17528_s1 + $0x3b4] sm:$0xf]  ;;  %3113 = vmatpush.bf16.msrb.mxu0 %v8283_v0  ;;  %v8392_v22 = vld [vmem:[%s17528_s1 + $0x318] sm:$0xf0] }
 0x226   :  { %3093 = vmatmul.bf16.gmra.mxu3 %v11915_v23  ;;  %v8475_v6 = vor.u32 %v10850_v20, %v8472_v3  ;;  %3157 = vmatpush.bf16.msrb.mxu1 %v8347_v33  ;;  %v10800_v23 = vld [vmem:[%s17528_s1 + $0x224] sm:$0xf]  ;;  %v8395_v32 = vor.u32 %v10830_v21, %v8392_v22  ;;  %v8456_v41 = vld [vmem:[%s17528_s1 + $0x398] sm:$0xf0]  ;;  %v17697_v22 = vld [vmem:[#allocation6_spill] sm:$0xff] }
 0x227   :  { %v8275_v29 = vor.u32 %v10800_v23, %v8272_v50  ;;  %3201 = vmatpush.bf16.msrb.mxu2 %v8411_v19  ;;  %v8459_v0 = vor.u32 %v10846_v51, %v8456_v41  ;;  %v10812_v33 = vld [vmem:[%s17528_s1 + $0x284] sm:$0xf]  ;;  %v8384_v50 = vld [vmem:[%s17528_s1 + $0x308] sm:$0xf0] }
 0x228   :  { %v2869_v43 = vpop.f32.mrf.mxu2  ;;  %v2783_v9 = vpop.f32.mrf.mxu0  ;;  %3245 = vmatpush.bf16.msrb.mxu3 %v8475_v6  ;;  %v8259_v6 = vor.u32 %v10796_v58, %v8256_v1  ;;  %v10828_v23 = vld [vmem:[%s17528_s1 + $0x304] sm:$0xf] }
 0x229   :  { %v2870_v12 = vadd.f32 %v2869_v43, %v2826_v60  ;;  %v2913_v44 = vpop.f32.mrf.mxu3  ;;  %v2784_v4 = vadd.f32 %v2783_v9, %v13474_v37  ;;  %v2827_v5 = vpop.f32.mrf.mxu1  ;;  %3114 = vmatpush.bf16.msrb.mxu0 %v8275_v29  ;;  %v10798_v37 = vld [vmem:[%s17528_s1 + $0x214] sm:$0xf]  ;;  %v8331_v60 = vor.u32 %v10814_v47, %v8328_v38  ;;  %v8320_v43 = vld [vmem:[%s17528_s1 + $0x288] sm:$0xf0]  ;;  %v8387_v9 = vor.u32 %v10828_v23, %v8384_v50  ;;  %v10844_v29 = vld [vmem:[%s17528_s1 + $0x384] sm:$0xf] }
 0x22a   :  { %3158 = vmatpush.bf16.msrb.mxu1 %v8339_v26  ;;  %v8267_v48 = vor.u32 %v10798_v37, %v8264_v55  ;;  %v8451_v14 = vor.u32 %v10844_v29, %v8448_v46  ;;  %v17695_v38 = vld [vmem:[#allocation4_spill] sm:$0xff]  ;;  %v17696_v21 = vld [vmem:[#allocation5_spill] sm:$0xff] }
 0x22b   :  { %v13717_v52 = vadd.f32 %v2913_v44, %v2870_v12  ;;  %v2828_v62 = vadd.f32 %v2827_v5, %v2784_v4  ;;  %3202 = vmatpush.bf16.msrb.mxu2 %v8403_v15  ;;  %v8323_v44 = vor.u32 %v10812_v33, %v8320_v43  ;;  %v17701_v50 = vld [vmem:[#allocation8_spill] sm:$0xff] }
 0x22c   :  { %3246 = vmatpush.bf16.msrb.mxu3 %v8467_v53 }
 0x22d   :  { %3115 = vmatpush.bf16.msrb.mxu0 %v8267_v48 }
 0x22e   :  { %3159 = vmatpush.bf16.msrb.mxu1 %v8331_v60 }
 0x22f   :  { %3203 = vmatpush.bf16.msrb.mxu2 %v8395_v32 }
 0x230   :  { %v2871_v11 = vpop.f32.mrf.mxu2  ;;  %v2786_v3 = vpop.f32.mrf.mxu0  ;;  %3247 = vmatpush.bf16.msrb.mxu3 %v8459_v0 }
 0x231   :  { %v2872_v19 = vadd.f32 %v2871_v11, %v2828_v62  ;;  %v2915_v20 = vpop.f32.mrf.mxu3  ;;  %v2787_v16 = vadd.f32 %v2786_v3, %v13481_v10  ;;  %v2830_v12 = vpop.f32.mrf.mxu1  ;;  %3116 = vmatpush.bf16.msrb.mxu0 %v8259_v6 }
 0x232   :  { %3160 = vmatpush.bf16.msrb.mxu1 %v8323_v44 }
 0x233   :  { %v13768_v13 = vadd.f32 %v2915_v20, %v2872_v19  ;;  %v2831_v4 = vadd.f32 %v2830_v12, %v2787_v16  ;;  %2966 = vmatmul.bf16.gmra.mxu0 %v12026_v30  ;;  %3204 = vmatpush.bf16.msrb.mxu2 %v8387_v9  ;;  %v17702_v16 = vld [vmem:[#allocation9_spill] sm:$0xff]  ;;  %v17703_v12 = vld [vmem:[#allocation10_spill] sm:$0xff] }
 0x234   :  { %3010 = vmatmul.bf16.gmra.mxu1 %v12037_v35  ;;  %3248 = vmatpush.bf16.msrb.mxu3 %v8451_v14 }
 0x235   :  { %3054 = vmatmul.bf16.gmra.mxu2 %v12039_v36 }
 0x236   :  { %3098 = vmatmul.bf16.gmra.mxu3 %v12047_v39 }
 0x238   :  { %v2874_v10 = vpop.f32.mrf.mxu2  ;;  %v2788_v15 = vpop.f32.mrf.mxu0 }
 0x239   :  { %v2875_v5 = vadd.f32 %v2874_v10, %v2831_v4  ;;  %v2918_v26 = vpop.f32.mrf.mxu3  ;;  %v2789_v7 = vadd.f32 %v2788_v15, %v13516_v34  ;;  %v2832_v18 = vpop.f32.mrf.mxu1  ;;  %v17698_v34 = vld [vmem:[#allocation7_spill] sm:$0xff] }
 0x23b   :  { %v13775_v53 = vadd.f32 %v2918_v26, %v2875_v5  ;;  %v2833_v62 = vadd.f32 %v2832_v18, %v2789_v7 }
 0x240   :  { %v2876_v30 = vpop.f32.mrf.mxu2  ;;  %v2791_v35 = vpop.f32.mrf.mxu0 }
 0x241   :  { %v2877_v37 = vadd.f32 %v2876_v30, %v2833_v62  ;;  %v2920_v55 = vpop.f32.mrf.mxu3  ;;  %v2792_v36 = vadd.f32 %v2791_v35, %v13523_v31  ;;  %v2835_v47 = vpop.f32.mrf.mxu1  ;;  %v17709_v35 = vld [vmem:[#allocation14_spill] sm:$0xff] }
 0x243   :  { %v13778_v39 = vadd.f32 %v2920_v55, %v2877_v37  ;;  %v2836_v48 = vadd.f32 %v2835_v47, %v2792_v36  ;;  %2971 = vmatmul.bf16.gmra.mxu0 %v17695_v38  ;;  %v17707_v37 = vld [vmem:[#allocation12_spill] sm:$0xff]  ;;  %v17708_v55 = vld [vmem:[#allocation13_spill] sm:$0xff]  ;;  %v17710_v36 = vld [vmem:[#allocation15_spill] sm:$0xff] }
 0x244   :  { %3015 = vmatmul.bf16.gmra.mxu1 %v17696_v21 }
 0x245   :  { %3059 = vmatmul.bf16.gmra.mxu2 %v17697_v22 }
 0x246   :  { %3103 = vmatmul.bf16.gmra.mxu3 %v17698_v34 }
 0x248   :  { %v2879_v60 = vpop.f32.mrf.mxu2  ;;  %v2793_v41 = vpop.f32.mrf.mxu0 }
 0x249   :  { %v2880_v32 = vadd.f32 %v2879_v60, %v2836_v48  ;;  %v2923_v51 = vpop.f32.mrf.mxu3  ;;  %v2794_v0 = vadd.f32 %v2793_v41, %v13526_v56  ;;  %v2837_v11 = vpop.f32.mrf.mxu1  ;;  %v17704_v56 = vld [vmem:[#allocation11_spill] sm:$0xff] }
 0x24b   :  { %v13785_v31 = vadd.f32 %v2923_v51, %v2880_v32  ;;  %v2838_v58 = vadd.f32 %v2837_v11, %v2794_v0 }
 0x24d   :  { %17699 = vst [vmem:[#allocation4_spill] sm:$0xff] %v13785_v31 }
 0x250   :  { %v2881_v1 = vpop.f32.mrf.mxu2  ;;  %v2796_v20 = vpop.f32.mrf.mxu0 }
 0x251   :  { %v2882_v33 = vadd.f32 %v2881_v1, %v2838_v58  ;;  %v2925_v19 = vpop.f32.mrf.mxu3  ;;  %v2797_v3 = vadd.f32 %v2796_v20, %v13533_v25  ;;  %v2840_v6 = vpop.f32.mrf.mxu1  ;;  %v17711_v1 = vld [vmem:[#allocation16_spill] sm:$0xff]  ;;  %v17714_v20 = vld [vmem:[#allocation19_spill] sm:$0xff] }
 0x253   :  { %v13788_v43 = vadd.f32 %v2925_v19, %v2882_v33  ;;  %v2841_v23 = vadd.f32 %v2840_v6, %v2797_v3  ;;  %3117 = vmatmul.bf16.vlgmr.msrb.gmra.mxu0 %v17701_v50  ;;  %v17712_v33 = vld [vmem:[#allocation17_spill] sm:$0xff]  ;;  %v17713_v19 = vld [vmem:[#allocation18_spill] sm:$0xff] }
 0x254   :  { %3161 = vmatmul.bf16.vlgmr.msrb.gmra.mxu1 %v17702_v16 }
 0x255   :  { %17700 = vst [vmem:[#allocation5_spill] sm:$0xff] %v13788_v43  ;;  %3205 = vmatmul.bf16.vlgmr.msrb.gmra.mxu2 %v17703_v12 }
 0x256   :  { %3249 = vmatmul.bf16.vlgmr.msrb.gmra.mxu3 %v17704_v56 }
 0x258   :  { %v2884_v44 = vpop.f32.mrf.mxu2  ;;  %v2798_v46 = vpop.f32.mrf.mxu0 }
 0x259   :  { %v2885_v9 = vadd.f32 %v2884_v44, %v2841_v23  ;;  %v2928_v29 = vpop.f32.mrf.mxu3  ;;  %v2799_v14 = vadd.f32 %v2798_v46, %v13536_v42  ;;  %v2842_v4 = vpop.f32.mrf.mxu1 }
 0x25b   :  { %v13795_v25 = vadd.f32 %v2928_v29, %v2885_v9  ;;  %v2843_v10 = vadd.f32 %v2842_v4, %v2799_v14 }
 0x25d   :  { %17705 = vst [vmem:[#allocation6_spill] sm:$0xff] %v13795_v25 }
 0x260   :  { %v2886_v5 = vpop.f32.mrf.mxu2  ;;  %v2942_v7 = vpop.f32.mrf.mxu0 }
 0x261   :  { %v2887_v26 = vadd.f32 %v2886_v5, %v2843_v10  ;;  %v2930_v15 = vpop.f32.mrf.mxu3  ;;  %v2986_v18 = vpop.f32.mrf.mxu1  ;;  %v17715_v5 = vld [vmem:[#allocation20_spill] sm:$0xff] }
 0x262   :  { %v2987_v30 = vadd.f32 %v2986_v18, %v2942_v7  ;;  %v10890_v7 = vld [vmem:[%s17528_s1 + $0x4f4] sm:$0xf]  ;;  %v17716_v18 = vld [vmem:[#allocation21_spill] sm:$0xff] }
 0x263   :  { %v13797_v62 = vadd.f32 %v2930_v15, %v2887_v26  ;;  %3122 = vmatmul.bf16.gmra.mxu0 %v17707_v37  ;;  %v10874_v26 = vld [vmem:[%s17528_s1 + $0x474] sm:$0xf]  ;;  %v8568_v15 = vld [vmem:[%s17528_s1 + $0x478] sm:$0xf0] }
 0x264   :  { %3166 = vmatmul.bf16.gmra.mxu1 %v17708_v55  ;;  %v8571_v37 = vor.u32 %v10874_v26, %v8568_v15  ;;  %v8632_v55 = vld [vmem:[%s17528_s1 + $0x4f8] sm:$0xf0]  ;;  %v10902_v15 = vld [vmem:[%s17528_s1 + $0x554] sm:$0xf] }
 0x265   :  { %17706 = vst [vmem:[#allocation7_spill] sm:$0xff] %v13797_v62  ;;  %3210 = vmatmul.bf16.gmra.mxu2 %v17709_v35  ;;  %v10906_v35 = vld [vmem:[%s17528_s1 + $0x574] sm:$0xf]  ;;  %v8616_v26 = vld [vmem:[%s17528_s1 + $0x4d8] sm:$0xf0] }
 0x266   :  { %3254 = vmatmul.bf16.gmra.mxu3 %v17710_v36  ;;  %v8696_v36 = vld [vmem:[%s17528_s1 + $0x578] sm:$0xf0]  ;;  %3285 = vmatpush.bf16.msra.mxu0 %v8571_v37  ;;  %v10918_v37 = vld [vmem:[%s17528_s1 + $0x5d4] sm:$0xf] }
 0x268   :  { %v3030_v42 = vpop.f32.mrf.mxu2  ;;  %v2944_v38 = vpop.f32.mrf.mxu0 }
 0x269   :  { %v3031_v47 = vadd.f32 %v3030_v42, %v2987_v30  ;;  %v3074_v48 = vpop.f32.mrf.mxu3  ;;  %v2988_v21 = vpop.f32.mrf.mxu1  ;;  %v17717_v30 = vld [vmem:[#allocation22_spill] sm:$0xff]  ;;  %v17718_v42 = vld [vmem:[#allocation23_spill] sm:$0xff] }
 0x26a   :  { %v2989_v34 = vadd.f32 %v2988_v21, %v2944_v38  ;;  %v10922_v38 = vld [vmem:[%s17528_s1 + $0x5f4] sm:$0xf]  ;;  %v8760_v21 = vld [vmem:[%s17528_s1 + $0x5f8] sm:$0xf0] }
 0x26b   :  { %v13803_v22 = vadd.f32 %v3074_v48, %v3031_v47  ;;  %v8635_v47 = vor.u32 %v10890_v7, %v8632_v55  ;;  %v8699_v48 = vor.u32 %v10906_v35, %v8696_v36  ;;  %v8680_v7 = vld [vmem:[%s17528_s1 + $0x558] sm:$0xf0] }
 0x26c   :  { %v8744_v55 = vld [vmem:[%s17528_s1 + $0x5d8] sm:$0xf0] }
 0x26d   :  { %3329 = vmatpush.bf16.msra.mxu1 %v8635_v47  ;;  %3373 = vmatpush.bf16.msra.mxu2 %v8699_v48  ;;  %v8747_v35 = vor.u32 %v10918_v37, %v8744_v55  ;;  %v8544_v47 = vld [vmem:[%s17528_s1 + $0x448] sm:$0xf0]  ;;  %v10884_v48 = vld [vmem:[%s17528_s1 + $0x4c4] sm:$0xf] }
 0x270   :  { %v3032_v60 = vpop.f32.mrf.mxu2  ;;  %v2947_v41 = vpop.f32.mrf.mxu0 }
 0x271   :  { %v3033_v32 = vadd.f32 %v3032_v60, %v2989_v34  ;;  %v3076_v51 = vpop.f32.mrf.mxu3  ;;  %v2991_v0 = vpop.f32.mrf.mxu1  ;;  %v8763_v34 = vor.u32 %v10922_v38, %v8760_v21 }
 0x272   :  { %v2992_v58 = vadd.f32 %v2991_v0, %v2947_v41  ;;  %v10888_v41 = vld [vmem:[%s17528_s1 + $0x4e4] sm:$0xf] }
 0x273   :  { %v13805_v11 = vadd.f32 %v3076_v51, %v3033_v32  ;;  %3127 = vmatmul.bf16.gmra.mxu0 %v17711_v1  ;;  %v10872_v32 = vld [vmem:[%s17528_s1 + $0x464] sm:$0xf]  ;;  %v8560_v51 = vld [vmem:[%s17528_s1 + $0x468] sm:$0xf0]  ;;  %3417 = vmatpush.bf16.msra.mxu3 %v8763_v34 }
 0x274   :  { %3171 = vmatmul.bf16.gmra.mxu1 %v17712_v33  ;;  %v8563_v33 = vor.u32 %v10872_v32, %v8560_v51  ;;  %v8608_v32 = vld [vmem:[%s17528_s1 + $0x4c8] sm:$0xf0]  ;;  %v10900_v51 = vld [vmem:[%s17528_s1 + $0x544] sm:$0xf] }
 0x275   :  { %3215 = vmatmul.bf16.gmra.mxu2 %v17713_v19  ;;  %v8624_v19 = vld [vmem:[%s17528_s1 + $0x4e8] sm:$0xf0] }
 0x276   :  { %3259 = vmatmul.bf16.gmra.mxu3 %v17714_v20  ;;  %v10904_v20 = vld [vmem:[%s17528_s1 + $0x564] sm:$0xf]  ;;  %3286 = vmatpush.bf16.msra.mxu0 %v8563_v33 }
 0x277   :  { %v10916_v33 = vld [vmem:[%s17528_s1 + $0x5c4] sm:$0xf] }
 0x278   :  { %v3035_v3 = vpop.f32.mrf.mxu2  ;;  %v2949_v50 = vpop.f32.mrf.mxu0 }
 0x279   :  { %v3036_v6 = vadd.f32 %v3035_v3, %v2992_v58  ;;  %v3079_v23 = vpop.f32.mrf.mxu3  ;;  %v2993_v16 = vpop.f32.mrf.mxu1  ;;  %v8688_v3 = vld [vmem:[%s17528_s1 + $0x568] sm:$0xf0] }
 0x27a   :  { %v2994_v56 = vadd.f32 %v2993_v16, %v2949_v50  ;;  %v8691_v50 = vor.u32 %v10904_v20, %v8688_v3  ;;  %v10920_v16 = vld [vmem:[%s17528_s1 + $0x5e4] sm:$0xf] }
 0x27b   :  { %v13811_v12 = vadd.f32 %v3079_v23, %v3036_v6  ;;  %v8627_v23 = vor.u32 %v10888_v41, %v8624_v19  ;;  %v8672_v41 = vld [vmem:[%s17528_s1 + $0x548] sm:$0xf0] }
 0x27c   :  { %3374 = vmatpush.bf16.msra.mxu2 %v8691_v50  ;;  %v8736_v19 = vld [vmem:[%s17528_s1 + $0x5c8] sm:$0xf0]  ;;  %v10866_v50 = vld [vmem:[%s17528_s1 + $0x434] sm:$0xf] }
 0x27d   :  { %3330 = vmatpush.bf16.msra.mxu1 %v8627_v23  ;;  %v17719_v23 = vld [vmem:[#allocation24_spill] sm:$0xff] }
 0x280   :  { %v3037_v44 = vpop.f32.mrf.mxu2  ;;  %v2952_v46 = vpop.f32.mrf.mxu0 }
 0x281   :  { %v3038_v9 = vadd.f32 %v3037_v44, %v2994_v56  ;;  %v3081_v29 = vpop.f32.mrf.mxu3  ;;  %v2996_v14 = vpop.f32.mrf.mxu1  ;;  %v8752_v56 = vld [vmem:[%s17528_s1 + $0x5e8] sm:$0xf0] }
 0x282   :  { %v2997_v10 = vadd.f32 %v2996_v14, %v2952_v46  ;;  %v10870_v46 = vld [vmem:[%s17528_s1 + $0x454] sm:$0xf]  ;;  %v8552_v14 = vld [vmem:[%s17528_s1 + $0x458] sm:$0xf0] }
 0x283   :  { %v13813_v4 = vadd.f32 %v3081_v29, %v3038_v9  ;;  %3132 = vmatmul.bf16.gmra.mxu0 %v17715_v5  ;;  %v8755_v29 = vor.u32 %v10920_v16, %v8752_v56  ;;  %v8555_v5 = vor.u32 %v10870_v46, %v8552_v14  ;;  %v8536_v16 = vld [vmem:[%s17528_s1 + $0x438] sm:$0xf0]  ;;  %v10882_v56 = vld [vmem:[%s17528_s1 + $0x4b4] sm:$0xf] }
 0x284   :  { %3176 = vmatmul.bf16.gmra.mxu1 %v17716_v18  ;;  %v8539_v46 = vor.u32 %v10866_v50, %v8536_v16  ;;  %v8600_v14 = vld [vmem:[%s17528_s1 + $0x4b8] sm:$0xf0]  ;;  %v10878_v50 = vld [vmem:[%s17528_s1 + $0x494] sm:$0xf] }
 0x285   :  { %3220 = vmatmul.bf16.gmra.mxu2 %v17717_v30  ;;  %3418 = vmatpush.bf16.msra.mxu3 %v8755_v29  ;;  %v8683_v30 = vor.u32 %v10902_v15, %v8680_v7  ;;  %v17721_v29 = vld [vmem:[#allocation26_spill] sm:$0xff]  ;;  %v8603_v15 = vor.u32 %v10882_v56, %v8600_v14  ;;  %v8584_v56 = vld [vmem:[%s17528_s1 + $0x498] sm:$0xf0]  ;;  %v10910_v14 = vld [vmem:[%s17528_s1 + $0x594] sm:$0xf] }
 0x286   :  { %3264 = vmatmul.bf16.gmra.mxu3 %v17718_v42  ;;  %3287 = vmatpush.bf16.msra.mxu0 %v8555_v5  ;;  %v10868_v42 = vld [vmem:[%s17528_s1 + $0x444] sm:$0xf]  ;;  %v8664_v5 = vld [vmem:[%s17528_s1 + $0x538] sm:$0xf0] }
 0x287   :  { %3375 = vmatpush.bf16.msra.mxu2 %v8683_v30  ;;  %v8728_v30 = vld [vmem:[%s17528_s1 + $0x5b8] sm:$0xf0] }
 0x288   :  { %v3040_v60 = vpop.f32.mrf.mxu2  ;;  %v2954_v1 = vpop.f32.mrf.mxu0 }
 0x289   :  { %v3041_v0 = vadd.f32 %v3040_v60, %v2997_v10  ;;  %v3084_v58 = vpop.f32.mrf.mxu3  ;;  %v2998_v6 = vpop.f32.mrf.mxu1  ;;  %v10886_v10 = vld [vmem:[%s17528_s1 + $0x4d4] sm:$0xf]  ;;  %3419 = vmatpush.bf16.msra.mxu3 %v8747_v35  ;;  %v8547_v60 = vor.u32 %v10868_v42, %v8544_v47  ;;  %v10864_v35 = vld [vmem:[%s17528_s1 + $0x424] sm:$0xf] }
 0x28a   :  { %v2999_v9 = vadd.f32 %v2998_v6, %v2954_v1  ;;  %v8619_v18 = vor.u32 %v10886_v10, %v8616_v26  ;;  %v8675_v1 = vor.u32 %v10900_v51, %v8672_v41  ;;  %v8739_v6 = vor.u32 %v10916_v33, %v8736_v19  ;;  %v10898_v10 = vld [vmem:[%s17528_s1 + $0x534] sm:$0xf]  ;;  %v10880_v42 = vld [vmem:[%s17528_s1 + $0x4a4] sm:$0xf] }
 0x28b   :  { %v13867_v44 = vadd.f32 %v3084_v58, %v3041_v0  ;;  %v8611_v58 = vor.u32 %v10884_v48, %v8608_v32  ;;  %3288 = vmatpush.bf16.msra.mxu0 %v8547_v60  ;;  %v17722_v26 = vld [vmem:[#allocation27_spill] sm:$0xff]  ;;  %v8667_v7 = vor.u32 %v10898_v10, %v8664_v5  ;;  %v10896_v60 = vld [vmem:[%s17528_s1 + $0x524] sm:$0xf]  ;;  %v8656_v32 = vld [vmem:[%s17528_s1 + $0x528] sm:$0xf0] }
 0x28c   :  { %3331 = vmatpush.bf16.msra.mxu1 %v8619_v18  ;;  %3376 = vmatpush.bf16.msra.mxu2 %v8675_v1  ;;  %v10914_v18 = vld [vmem:[%s17528_s1 + $0x5b4] sm:$0xf]  ;;  %v8720_v1 = vld [vmem:[%s17528_s1 + $0x5a8] sm:$0xf0]  ;;  %v8712_v10 = vld [vmem:[%s17528_s1 + $0x598] sm:$0xf0] }
 0x28d   :  { %3420 = vmatpush.bf16.msra.mxu3 %v8739_v6  ;;  %v8731_v37 = vor.u32 %v10914_v18, %v8728_v30  ;;  %v10862_v6 = vld [vmem:[%s17528_s1 + $0x414] sm:$0xf]  ;;  %v8512_v18 = vld [vmem:[%s17528_s1 + $0x408] sm:$0xf0]  ;;  %v10876_v30 = vld [vmem:[%s17528_s1 + $0x484] sm:$0xf] }
 0x28f   :  { %3289 = vmatpush.bf16.msra.mxu0 %v8539_v46  ;;  %v8587_v46 = vor.u32 %v10878_v50, %v8584_v56 }
 0x290   :  { %v3042_v36 = vpop.f32.mrf.mxu2  ;;  %v2957_v34 = vpop.f32.mrf.mxu0  ;;  %3332 = vmatpush.bf16.msra.mxu1 %v8611_v58  ;;  %3377 = vmatpush.bf16.msra.mxu2 %v8667_v7  ;;  %v10912_v58 = vld [vmem:[%s17528_s1 + $0x5a4] sm:$0xf] }
 0x291   :  { %v3043_v38 = vadd.f32 %v3042_v36, %v2999_v9  ;;  %v3086_v21 = vpop.f32.mrf.mxu3  ;;  %v3001_v0 = vpop.f32.mrf.mxu1  ;;  %v17720_v9 = vld [vmem:[#allocation25_spill] sm:$0xff]  ;;  %v8528_v36 = vld [vmem:[%s17528_s1 + $0x428] sm:$0xf0]  ;;  %3421 = vmatpush.bf16.msra.mxu3 %v8731_v37 }
 0x292   :  { %v3002_v3 = vadd.f32 %v3001_v0, %v2957_v34  ;;  %v8592_v34 = vld [vmem:[%s17528_s1 + $0x4a8] sm:$0xf0]  ;;  %v8659_v0 = vor.u32 %v10896_v60, %v8656_v32  ;;  %v10860_v7 = vld [vmem:[%s17528_s1 + $0x404] sm:$0xf] }
 0x293   :  { %v13917_v20 = vadd.f32 %v3086_v21, %v3043_v38  ;;  %3137 = vmatmul.bf16.gmra.mxu0 %v17719_v23  ;;  %v8531_v21 = vor.u32 %v10864_v35, %v8528_v36  ;;  %v8595_v41 = vor.u32 %v10880_v42, %v8592_v34  ;;  %v8520_v23 = vld [vmem:[%s17528_s1 + $0x418] sm:$0xf0]  ;;  %v8515_v36 = vor.u32 %v10860_v7, %v8512_v18  ;;  %v8576_v42 = vld [vmem:[%s17528_s1 + $0x488] sm:$0xf0]  ;;  %v10908_v60 = vld [vmem:[%s17528_s1 + $0x584] sm:$0xf] }
 0x294   :  { %3181 = vmatmul.bf16.gmra.mxu1 %v17720_v9  ;;  %v8523_v16 = vor.u32 %v10862_v6, %v8520_v23  ;;  %v10894_v9 = vld [vmem:[%s17528_s1 + $0x514] sm:$0xf]  ;;  %3378 = vmatpush.bf16.msra.mxu2 %v8659_v0  ;;  %v8704_v32 = vld [vmem:[%s17528_s1 + $0x588] sm:$0xf0]  ;;  %v17727_v18 = vld [vmem:[#allocation32_spill] sm:$0xff] }
 0x295   :  { %3225 = vmatmul.bf16.gmra.mxu2 %v17721_v29  ;;  %3333 = vmatpush.bf16.msra.mxu1 %v8603_v15  ;;  %v8648_v29 = vld [vmem:[%s17528_s1 + $0x518] sm:$0xf0]  ;;  %v8707_v0 = vor.u32 %v10908_v60, %v8704_v32 }
 0x296   :  { %3269 = vmatmul.bf16.gmra.mxu3 %v17722_v26  ;;  %3290 = vmatpush.bf16.msra.mxu0 %v8531_v21  ;;  %v8651_v5 = vor.u32 %v10894_v9, %v8648_v29  ;;  %v8715_v26 = vor.u32 %v10910_v14, %v8712_v10  ;;  %v8579_v21 = vor.u32 %v10876_v30, %v8576_v42  ;;  %v17728_v30 = vld [vmem:[#allocation33_spill] sm:$0xff] }
 0x298   :  { %v3045_v55 = vpop.f32.mrf.mxu2  ;;  %v2959_v38 = vpop.f32.mrf.mxu0  ;;  %3379 = vmatpush.bf16.msra.mxu2 %v8651_v5 }
 0x299   :  { %v3046_v47 = vadd.f32 %v3045_v55, %v3002_v3  ;;  %v3089_v48 = vpop.f32.mrf.mxu3  ;;  %v3003_v51 = vpop.f32.mrf.mxu1  ;;  %v8723_v3 = vor.u32 %v10912_v58, %v8720_v1  ;;  %3334 = vmatpush.bf16.msra.mxu1 %v8595_v41  ;;  %v17723_v58 = vld [vmem:[#allocation28_spill] sm:$0xff]  ;;  %v17724_v1 = vld [vmem:[#allocation29_spill] sm:$0xff] }
 0x29a   :  { %v3004_v19 = vadd.f32 %v3003_v51, %v2959_v38  ;;  %3291 = vmatpush.bf16.msra.mxu0 %v8523_v16 }
 0x29b   :  { %v13971_v33 = vadd.f32 %v3089_v48, %v3046_v47  ;;  %3422 = vmatpush.bf16.msra.mxu3 %v8723_v3  ;;  %v10892_v47 = vld [vmem:[%s17528_s1 + $0x504] sm:$0xf]  ;;  %v8640_v48 = vld [vmem:[%s17528_s1 + $0x508] sm:$0xf0]  ;;  %v17726_v3 = vld [vmem:[#allocation31_spill] sm:$0xff] }
 0x29c   :  { %v8643_v34 = vor.u32 %v10892_v47, %v8640_v48 }
 0x29d   :  { %3335 = vmatpush.bf16.msra.mxu1 %v8587_v46 }
 0x29e   :  { %3292 = vmatpush.bf16.msra.mxu0 %v8515_v36  ;;  %3380 = vmatpush.bf16.msra.mxu2 %v8643_v34 }
 0x29f   :  { %3423 = vmatpush.bf16.msra.mxu3 %v8715_v26 }
 0x2a0   :  { %v3047_v15 = vpop.f32.mrf.mxu2  ;;  %v2962_v35 = vpop.f32.mrf.mxu0 }
 0x2a1   :  { %v3048_v37 = vadd.f32 %v3047_v15, %v3004_v19  ;;  %v3091_v55 = vpop.f32.mrf.mxu3  ;;  %v3006_v38 = vpop.f32.mrf.mxu1  ;;  %3336 = vmatpush.bf16.msra.mxu1 %v8579_v21  ;;  %v17725_v19 = vld [vmem:[#allocation30_spill] sm:$0xff] }
 0x2a2   :  { %v3007_v41 = vadd.f32 %v3006_v38, %v2962_v35 }
 0x2a3   :  { %v14021_v51 = vadd.f32 %v3091_v55, %v3048_v37  ;;  %3142 = vmatmul.bf16.gmra.mxu0 %v17723_v58  ;;  %3424 = vmatpush.bf16.msra.mxu3 %v8707_v0  ;;  %v17729_v37 = vld [vmem:[#allocation34_spill] sm:$0xff]  ;;  %v17730_v55 = vld [vmem:[#allocation35_spill] sm:$0xff] }
 0x2a4   :  { %3186 = vmatmul.bf16.gmra.mxu1 %v17724_v1 }
 0x2a5   :  { %3230 = vmatmul.bf16.gmra.mxu2 %v17725_v19  ;;  %v17731_v19 = vld [vmem:[#allocation36_spill] sm:$0xff] }
 0x2a6   :  { %3274 = vmatmul.bf16.gmra.mxu3 %v17726_v3  ;;  %v17732_v3 = vld [vmem:[#allocation37_spill] sm:$0xff] }
 0x2a8   :  { %v3050_v6 = vpop.f32.mrf.mxu2  ;;  %v2964_v16 = vpop.f32.mrf.mxu0 }
 0x2a9   :  { %v3051_v23 = vadd.f32 %v3050_v6, %v3007_v41  ;;  %v3094_v50 = vpop.f32.mrf.mxu3  ;;  %v3008_v56 = vpop.f32.mrf.mxu1  ;;  %v17733_v6 = vld [vmem:[#allocation38_spill] sm:$0xff] }
 0x2aa   :  { %v3009_v29 = vadd.f32 %v3008_v56, %v2964_v16 }
 0x2ab   :  { %v14027_v9 = vadd.f32 %v3094_v50, %v3051_v23  ;;  %v17734_v23 = vld [vmem:[#allocation39_spill] sm:$0xff] }
 0x2b0   :  { %v3052_v46 = vpop.f32.mrf.mxu2  ;;  %v2967_v5 = vpop.f32.mrf.mxu0 }
 0x2b1   :  { %v3053_v14 = vadd.f32 %v3052_v46, %v3009_v29  ;;  %v3096_v10 = vpop.f32.mrf.mxu3  ;;  %v3011_v26 = vpop.f32.mrf.mxu1 }
 0x2b2   :  { %v3012_v7 = vadd.f32 %v3011_v26, %v2967_v5 }
 0x2b3   :  { %v14029_v15 = vadd.f32 %v3096_v10, %v3053_v14  ;;  %3147 = vmatmul.bf16.gmra.mxu0 %v17727_v18 }
 0x2b4   :  { %3191 = vmatmul.bf16.gmra.mxu1 %v17728_v30 }
 0x2b5   :  { %3235 = vmatmul.bf16.gmra.mxu2 %v17729_v37 }
 0x2b6   :  { %3279 = vmatmul.bf16.gmra.mxu3 %v17730_v55 }
 0x2b8   :  { %v3055_v35 = vpop.f32.mrf.mxu2  ;;  %v2969_v47 = vpop.f32.mrf.mxu0 }
 0x2b9   :  { %v3056_v36 = vadd.f32 %v3055_v35, %v3012_v7  ;;  %v3099_v42 = vpop.f32.mrf.mxu3  ;;  %v3013_v48 = vpop.f32.mrf.mxu1 }
 0x2ba   :  { %v3014_v21 = vadd.f32 %v3013_v48, %v2969_v47  ;;  %v17737_v47 = vld [vmem:[#allocation42_spill] sm:$0xff]  ;;  %v17738_v48 = vld [vmem:[#allocation43_spill] sm:$0xff] }
 0x2bb   :  { %v14035_v38 = vadd.f32 %v3099_v42, %v3056_v36  ;;  %v17735_v36 = vld [vmem:[#allocation40_spill] sm:$0xff]  ;;  %v17736_v42 = vld [vmem:[#allocation41_spill] sm:$0xff] }
 0x2c0   :  { %v3057_v34 = vpop.f32.mrf.mxu2  ;;  %v2972_v41 = vpop.f32.mrf.mxu0 }
 0x2c1   :  { %v3058_v60 = vadd.f32 %v3057_v34, %v3014_v21  ;;  %v3101_v32 = vpop.f32.mrf.mxu3  ;;  %v3016_v0 = vpop.f32.mrf.mxu1 }
 0x2c2   :  { %v3017_v1 = vadd.f32 %v3016_v0, %v2972_v41 }
 0x2c3   :  { %v14037_v58 = vadd.f32 %v3101_v32, %v3058_v60  ;;  %3293 = vmatmul.bf16.vlgmr.msra.gmra.mxu0 %v17731_v19 }
 0x2c4   :  { %3337 = vmatmul.bf16.vlgmr.msra.gmra.mxu1 %v17732_v3 }
 0x2c5   :  { %3381 = vmatmul.bf16.vlgmr.msra.gmra.mxu2 %v17733_v6 }
 0x2c6   :  { %3425 = vmatmul.bf16.vlgmr.msra.gmra.mxu3 %v17734_v23 }
 0x2c8   :  { %v3060_v50 = vpop.f32.mrf.mxu2  ;;  %v2974_v29 = vpop.f32.mrf.mxu0 }
 0x2c9   :  { %v3061_v16 = vadd.f32 %v3060_v50, %v3017_v1  ;;  %v3104_v56 = vpop.f32.mrf.mxu3  ;;  %v3018_v46 = vpop.f32.mrf.mxu1 }
 0x2ca   :  { %v3019_v10 = vadd.f32 %v3018_v46, %v2974_v29  ;;  %v17739_v46 = vld [vmem:[#allocation44_spill] sm:$0xff] }
 0x2cb   :  { %v14043_v14 = vadd.f32 %v3104_v56, %v3061_v16 }
 0x2d0   :  { %v3062_v5 = vpop.f32.mrf.mxu2  ;;  %v3118_v18 = vpop.f32.mrf.mxu0 }
 0x2d1   :  { %v3063_v26 = vadd.f32 %v3062_v5, %v3019_v10  ;;  %v3106_v7 = vpop.f32.mrf.mxu3  ;;  %v3119_v30 = vadd.f32 %v3118_v18, %v13803_v22  ;;  %v3162_v37 = vpop.f32.mrf.mxu1  ;;  %v17740_v10 = vld [vmem:[#allocation45_spill] sm:$0xff]  ;;  %v17741_v5 = vld [vmem:[#allocation46_spill] sm:$0xff] }
 0x2d3   :  { %v14046_v55 = vadd.f32 %v3106_v7, %v3063_v26  ;;  %v3163_v35 = vadd.f32 %v3162_v37, %v3119_v30  ;;  %3298 = vmatmul.bf16.gmra.mxu0 %v17735_v36 }
 0x2d4   :  { %3342 = vmatmul.bf16.gmra.mxu1 %v17736_v42 }
 0x2d5   :  { %3386 = vmatmul.bf16.gmra.mxu2 %v17737_v47 }
 0x2d6   :  { %3430 = vmatmul.bf16.gmra.mxu3 %v17738_v48 }
 0x2d8   :  { %v3206_v21 = vpop.f32.mrf.mxu2  ;;  %v3120_v32 = vpop.f32.mrf.mxu0 }
 0x2d9   :  { %v3207_v34 = vadd.f32 %v3206_v21, %v3163_v35  ;;  %v3250_v60 = vpop.f32.mrf.mxu3  ;;  %v3121_v41 = vadd.f32 %v3120_v32, %v13805_v11  ;;  %v3164_v0 = vpop.f32.mrf.mxu1  ;;  %v17742_v11 = vld [vmem:[#allocation47_spill] sm:$0xff] }
 0x2db   :  { %v14053_v22 = vadd.f32 %v3250_v60, %v3207_v34  ;;  %v3165_v1 = vadd.f32 %v3164_v0, %v3121_v41  ;;  %v17743_v0 = vld [vmem:[#allocation48_spill] sm:$0xff] }
 0x2e0   :  { %v3208_v19 = vpop.f32.mrf.mxu2  ;;  %v3123_v23 = vpop.f32.mrf.mxu0 }
 0x2e1   :  { %v3209_v3 = vadd.f32 %v3208_v19, %v3165_v1  ;;  %v3252_v6 = vpop.f32.mrf.mxu3  ;;  %v3124_v50 = vadd.f32 %v3123_v23, %v13811_v12  ;;  %v3167_v16 = vpop.f32.mrf.mxu1  ;;  %v8824_v1 = vld [vmem:[%s17528_s1 + $0x678] sm:$0xf0]  ;;  %v10954_v19 = vld [vmem:[%s17528_s1 + $0x6f4] sm:$0xf] }
 0x2e2   :  { %v8888_v23 = vld [vmem:[%s17528_s1 + $0x6f8] sm:$0xf0] }
 0x2e3   :  { %v14056_v56 = vadd.f32 %v3252_v6, %v3209_v3  ;;  %v3168_v29 = vadd.f32 %v3167_v16, %v3124_v50  ;;  %3303 = vmatmul.bf16.gmra.mxu0 %v17739_v46  ;;  %v17744_v3 = vld [vmem:[#allocation49_spill] sm:$0xff]  ;;  %v10970_v50 = vld [vmem:[%s17528_s1 + $0x774] sm:$0xf]  ;;  %v8952_v16 = vld [vmem:[%s17528_s1 + $0x778] sm:$0xf0]  ;;  %v8891_v46 = vor.u32 %v10954_v19, %v8888_v23 }
 0x2e4   :  { %3347 = vmatmul.bf16.gmra.mxu1 %v17740_v10  ;;  %v8955_v10 = vor.u32 %v10970_v50, %v8952_v16  ;;  %v9008_v19 = vld [vmem:[%s17528_s1 + $0x7e8] sm:$0xf0]  ;;  %v8808_v23 = vld [vmem:[%s17528_s1 + $0x658] sm:$0xf0]  ;;  %v10950_v50 = vld [vmem:[%s17528_s1 + $0x6d4] sm:$0xf] }
 0x2e5   :  { %3391 = vmatmul.bf16.gmra.mxu2 %v17741_v5  ;;  %v10986_v5 = vld [vmem:[%s17528_s1 + $0x7f4] sm:$0xf]  ;;  %3505 = vmatpush.bf16.msrb.mxu1 %v8891_v46 }
 0x2e6   :  { %3435 = vmatmul.bf16.gmra.mxu3 %v17742_v11  ;;  %v9016_v11 = vld [vmem:[%s17528_s1 + $0x7f8] sm:$0xf0]  ;;  %3549 = vmatpush.bf16.msrb.mxu2 %v8955_v10  ;;  %v10966_v46 = vld [vmem:[%s17528_s1 + $0x754] sm:$0xf] }
 0x2e7   :  { %v8936_v10 = vld [vmem:[%s17528_s1 + $0x758] sm:$0xf0] }
 0x2e8   :  { %v3211_v26 = vpop.f32.mrf.mxu2  ;;  %v3125_v30 = vpop.f32.mrf.mxu0 }
 0x2e9   :  { %v3212_v7 = vadd.f32 %v3211_v26, %v3168_v29  ;;  %v3255_v18 = vpop.f32.mrf.mxu3  ;;  %v3126_v37 = vadd.f32 %v3125_v30, %v13813_v4  ;;  %v3169_v35 = vpop.f32.mrf.mxu1  ;;  %v10938_v4 = vld [vmem:[%s17528_s1 + $0x674] sm:$0xf]  ;;  %v9019_v26 = vor.u32 %v10986_v5, %v9016_v11  ;;  %v8816_v30 = vld [vmem:[%s17528_s1 + $0x668] sm:$0xf0]  ;;  %v8939_v11 = vor.u32 %v10966_v46, %v8936_v10  ;;  %v17748_v10 = vld [vmem:[#allocation53_spill] sm:$0xff] }
 0x2ea   :  { %v8827_v6 = vor.u32 %v10938_v4, %v8824_v1  ;;  %v17746_v29 = vld [vmem:[#allocation51_spill] sm:$0xff]  ;;  %v10984_v1 = vld [vmem:[%s17528_s1 + $0x7e4] sm:$0xf] }
 0x2eb   :  { %v14063_v12 = vadd.f32 %v3255_v18, %v3212_v7  ;;  %v3170_v36 = vadd.f32 %v3169_v35, %v3126_v37  ;;  %v10936_v18 = vld [vmem:[%s17528_s1 + $0x664] sm:$0xf]  ;;  %3593 = vmatpush.bf16.msrb.mxu3 %v9019_v26  ;;  %v10982_v26 = vld [vmem:[%s17528_s1 + $0x7d4] sm:$0xf] }
 0x2ec   :  { %3461 = vmatpush.bf16.msrb.mxu0 %v8827_v6  ;;  %v10952_v37 = vld [vmem:[%s17528_s1 + $0x6e4] sm:$0xf]  ;;  %v10946_v46 = vld [vmem:[%s17528_s1 + $0x6b4] sm:$0xf] }
 0x2f0   :  { %v3213_v42 = vpop.f32.mrf.mxu2  ;;  %v3128_v21 = vpop.f32.mrf.mxu0 }
 0x2f1   :  { %v3214_v47 = vadd.f32 %v3213_v42, %v3170_v36  ;;  %v3257_v48 = vpop.f32.mrf.mxu3  ;;  %v3129_v34 = vadd.f32 %v3128_v21, %v13867_v44  ;;  %v3172_v60 = vpop.f32.mrf.mxu1  ;;  %v17745_v44 = vld [vmem:[#allocation50_spill] sm:$0xff]  ;;  %v10968_v21 = vld [vmem:[%s17528_s1 + $0x764] sm:$0xf] }
 0x2f3   :  { %v14066_v32 = vadd.f32 %v3257_v48, %v3214_v47  ;;  %v3173_v41 = vadd.f32 %v3172_v60, %v3129_v34  ;;  %3308 = vmatmul.bf16.gmra.mxu0 %v17743_v0  ;;  %v8819_v47 = vor.u32 %v10936_v18, %v8816_v30  ;;  %v8880_v48 = vld [vmem:[%s17528_s1 + $0x6e8] sm:$0xf0] }
 0x2f4   :  { %3352 = vmatmul.bf16.gmra.mxu1 %v17744_v3  ;;  %v8944_v34 = vld [vmem:[%s17528_s1 + $0x768] sm:$0xf0] }
 0x2f5   :  { %3396 = vmatmul.bf16.gmra.mxu2 %v17745_v44  ;;  %v8947_v4 = vor.u32 %v10968_v21, %v8944_v34  ;;  %3462 = vmatpush.bf16.msrb.mxu0 %v8819_v47  ;;  %v9011_v44 = vor.u32 %v10984_v1, %v9008_v19  ;;  %v8864_v34 = vld [vmem:[%s17528_s1 + $0x6c8] sm:$0xf0] }
 0x2f6   :  { %3440 = vmatmul.bf16.gmra.mxu3 %v17746_v29  ;;  %v8872_v29 = vld [vmem:[%s17528_s1 + $0x6d8] sm:$0xf0] }
 0x2f7   :  { %3550 = vmatpush.bf16.msrb.mxu2 %v8947_v4  ;;  %3594 = vmatpush.bf16.msrb.mxu3 %v9011_v44  ;;  %v8875_v5 = vor.u32 %v10950_v50, %v8872_v29  ;;  %v10980_v44 = vld [vmem:[%s17528_s1 + $0x7c4] sm:$0xf]  ;;  %v8792_v29 = vld [vmem:[%s17528_s1 + $0x638] sm:$0xf0] }
 0x2f8   :  { %v3216_v7 = vpop.f32.mrf.mxu2  ;;  %v3130_v42 = vpop.f32.mrf.mxu0 }
 0x2f9   :  { %v3217_v35 = vadd.f32 %v3216_v7, %v3173_v41  ;;  %v3260_v36 = vpop.f32.mrf.mxu3  ;;  %v3131_v60 = vadd.f32 %v3130_v42, %v13917_v20  ;;  %v3174_v0 = vpop.f32.mrf.mxu1  ;;  %v8883_v41 = vor.u32 %v10952_v37, %v8880_v48  ;;  %v10934_v20 = vld [vmem:[%s17528_s1 + $0x654] sm:$0xf]  ;;  %v9000_v7 = vld [vmem:[%s17528_s1 + $0x7d8] sm:$0xf0]  ;;  %v10932_v37 = vld [vmem:[%s17528_s1 + $0x644] sm:$0xf] }
 0x2fa   :  { %v8811_v16 = vor.u32 %v10934_v20, %v8808_v23  ;;  %v9003_v18 = vor.u32 %v10982_v26, %v9000_v7  ;;  %v8856_v26 = vld [vmem:[%s17528_s1 + $0x6b8] sm:$0xf0]  ;;  %v10962_v7 = vld [vmem:[%s17528_s1 + $0x734] sm:$0xf] }
 0x2fb   :  { %v14121_v3 = vadd.f32 %v3260_v36, %v3217_v35  ;;  %v3175_v6 = vadd.f32 %v3174_v0, %v3131_v60  ;;  %3506 = vmatpush.bf16.msrb.mxu1 %v8883_v41  ;;  %3551 = vmatpush.bf16.msrb.mxu2 %v8939_v11  ;;  %v8800_v35 = vld [vmem:[%s17528_s1 + $0x648] sm:$0xf0]  ;;  %v10948_v36 = vld [vmem:[%s17528_s1 + $0x6c4] sm:$0xf] }
 0x2fc   :  { %3463 = vmatpush.bf16.msrb.mxu0 %v8811_v16  ;;  %3595 = vmatpush.bf16.msrb.mxu3 %v9003_v18  ;;  %v8803_v21 = vor.u32 %v10932_v37, %v8800_v35  ;;  %v10964_v60 = vld [vmem:[%s17528_s1 + $0x744] sm:$0xf]  ;;  %v8928_v0 = vld [vmem:[%s17528_s1 + $0x748] sm:$0xf0]  ;;  %v8867_v1 = vor.u32 %v10948_v36, %v8864_v34  ;;  %v17747_v16 = vld [vmem:[#allocation52_spill] sm:$0xff]  ;;  %v8859_v37 = vor.u32 %v10946_v46, %v8856_v26 }
 0x2fd   :  { %v8931_v19 = vor.u32 %v10964_v60, %v8928_v0  ;;  %v8920_v18 = vld [vmem:[%s17528_s1 + $0x738] sm:$0xf0]  ;;  %v10978_v36 = vld [vmem:[%s17528_s1 + $0x7b4] sm:$0xf]  ;;  %v8784_v34 = vld [vmem:[%s17528_s1 + $0x628] sm:$0xf0] }
 0x2fe   :  { %v8923_v35 = vor.u32 %v10962_v7, %v8920_v18  ;;  %v10944_v60 = vld [vmem:[%s17528_s1 + $0x6a4] sm:$0xf]  ;;  %v8976_v46 = vld [vmem:[%s17528_s1 + $0x7a8] sm:$0xf0]  ;;  %v8776_v26 = vld [vmem:[%s17528_s1 + $0x618] sm:$0xf0] }
 0x2ff   :  { %3507 = vmatpush.bf16.msrb.mxu1 %v8875_v5  ;;  %v17749_v5 = vld [vmem:[#allocation54_spill] sm:$0xff]  ;;  %3552 = vmatpush.bf16.msrb.mxu2 %v8931_v19  ;;  %v10942_v7 = vld [vmem:[%s17528_s1 + $0x694] sm:$0xf] }
 0x300   :  { %v3218_v30 = vpop.f32.mrf.mxu2  ;;  %v3133_v48 = vpop.f32.mrf.mxu0  ;;  %3464 = vmatpush.bf16.msrb.mxu0 %v8803_v21  ;;  %v10928_v21 = vld [vmem:[%s17528_s1 + $0x624] sm:$0xf]  ;;  %v8848_v19 = vld [vmem:[%s17528_s1 + $0x6a8] sm:$0xf0] }
 0x301   :  { %v3219_v42 = vadd.f32 %v3218_v30, %v3175_v6  ;;  %v3262_v47 = vpop.f32.mrf.mxu3  ;;  %v3134_v41 = vadd.f32 %v3133_v48, %v13971_v33  ;;  %v3177_v4 = vpop.f32.mrf.mxu1  ;;  %v8992_v6 = vld [vmem:[%s17528_s1 + $0x7c8] sm:$0xf0]  ;;  %v10930_v33 = vld [vmem:[%s17528_s1 + $0x634] sm:$0xf] }
 0x302   :  { %v8995_v23 = vor.u32 %v10980_v44, %v8992_v6  ;;  %v8795_v11 = vor.u32 %v10930_v33, %v8792_v29  ;;  %v17750_v30 = vld [vmem:[#allocation55_spill] sm:$0xff]  ;;  %v10960_v44 = vld [vmem:[%s17528_s1 + $0x724] sm:$0xf]  ;;  %v8912_v6 = vld [vmem:[%s17528_s1 + $0x728] sm:$0xf0] }
 0x303   :  { %v14172_v20 = vadd.f32 %v3262_v47, %v3219_v42  ;;  %v3178_v50 = vadd.f32 %v3177_v4, %v3134_v41  ;;  %3313 = vmatmul.bf16.gmra.mxu0 %v17747_v16  ;;  %3508 = vmatpush.bf16.msrb.mxu1 %v8867_v1  ;;  %v8984_v42 = vld [vmem:[%s17528_s1 + $0x7b8] sm:$0xf0]  ;;  %v8787_v1 = vor.u32 %v10928_v21, %v8784_v34  ;;  %v10976_v29 = vld [vmem:[%s17528_s1 + $0x7a4] sm:$0xf] }
 0x304   :  { %3357 = vmatmul.bf16.gmra.mxu1 %v17748_v10  ;;  %3596 = vmatpush.bf16.msrb.mxu3 %v8995_v23  ;;  %v8987_v47 = vor.u32 %v10978_v36, %v8984_v42  ;;  %v8915_v33 = vor.u32 %v10960_v44, %v8912_v6  ;;  %v8832_v6 = vld [vmem:[%s17528_s1 + $0x688] sm:$0xf0] }
 0x305   :  { %3401 = vmatmul.bf16.gmra.mxu2 %v17749_v5  ;;  %3465 = vmatpush.bf16.msrb.mxu0 %v8795_v11  ;;  %v8979_v5 = vor.u32 %v10976_v29, %v8976_v46 }
 0x306   :  { %3445 = vmatmul.bf16.gmra.mxu3 %v17750_v30  ;;  %3553 = vmatpush.bf16.msrb.mxu2 %v8923_v35  ;;  %v8840_v30 = vld [vmem:[%s17528_s1 + $0x698] sm:$0xf0] }
 0x307   :  { %3509 = vmatpush.bf16.msrb.mxu1 %v8859_v37  ;;  %v10958_v37 = vld [vmem:[%s17528_s1 + $0x714] sm:$0xf]  ;;  %v8904_v35 = vld [vmem:[%s17528_s1 + $0x718] sm:$0xf0]  ;;  %v8843_v36 = vor.u32 %v10942_v7, %v8840_v30  ;;  %v17753_v30 = vld [vmem:[#allocation58_spill] sm:$0xff] }
 0x308   :  { %v3221_v48 = vpop.f32.mrf.mxu2  ;;  %v3135_v4 = vpop.f32.mrf.mxu0  ;;  %3597 = vmatpush.bf16.msrb.mxu3 %v8987_v47  ;;  %v8907_v42 = vor.u32 %v10958_v37, %v8904_v35  ;;  %v10974_v47 = vld [vmem:[%s17528_s1 + $0x794] sm:$0xf] }
 0x309   :  { %v3222_v0 = vadd.f32 %v3221_v48, %v3178_v50  ;;  %v3265_v41 = vpop.f32.mrf.mxu3  ;;  %v3136_v23 = vadd.f32 %v3135_v4, %v14021_v51  ;;  %v3179_v16 = vpop.f32.mrf.mxu1  ;;  %v8851_v50 = vor.u32 %v10944_v60, %v8848_v19  ;;  %3466 = vmatpush.bf16.msrb.mxu0 %v8787_v1  ;;  %v10926_v51 = vld [vmem:[%s17528_s1 + $0x614] sm:$0xf]  ;;  %v8968_v48 = vld [vmem:[%s17528_s1 + $0x798] sm:$0xf0]  ;;  %v10924_v60 = vld [vmem:[%s17528_s1 + $0x604] sm:$0xf] }
 0x30a   :  { %v8779_v18 = vor.u32 %v10926_v51, %v8776_v26  ;;  %3554 = vmatpush.bf16.msrb.mxu2 %v8915_v33  ;;  %v8971_v21 = vor.u32 %v10974_v47, %v8968_v48  ;;  %v17754_v37 = vld [vmem:[#allocation59_spill] sm:$0xff] }
 0x30b   :  { %v14227_v10 = vadd.f32 %v3265_v41, %v3222_v0  ;;  %v3180_v11 = vadd.f32 %v3179_v16, %v3136_v23  ;;  %3510 = vmatpush.bf16.msrb.mxu1 %v8851_v50  ;;  %v8768_v0 = vld [vmem:[%s17528_s1 + $0x608] sm:$0xf0]  ;;  %v10940_v41 = vld [vmem:[%s17528_s1 + $0x684] sm:$0xf] }
 0x30c   :  { %3598 = vmatpush.bf16.msrb.mxu3 %v8979_v5  ;;  %v8771_v44 = vor.u32 %v10924_v60, %v8768_v0  ;;  %v10956_v23 = vld [vmem:[%s17528_s1 + $0x704] sm:$0xf]  ;;  %v8896_v16 = vld [vmem:[%s17528_s1 + $0x708] sm:$0xf0]  ;;  %v8835_v29 = vor.u32 %v10940_v41, %v8832_v6 }
 0x30d   :  { %3467 = vmatpush.bf16.msrb.mxu0 %v8779_v18  ;;  %v8899_v46 = vor.u32 %v10956_v23, %v8896_v16  ;;  %v10972_v5 = vld [vmem:[%s17528_s1 + $0x784] sm:$0xf]  ;;  %v17751_v18 = vld [vmem:[#allocation56_spill] sm:$0xff] }
 0x30e   :  { %3555 = vmatpush.bf16.msrb.mxu2 %v8907_v42  ;;  %v17755_v16 = vld [vmem:[#allocation60_spill] sm:$0xff] }
 0x30f   :  { %3511 = vmatpush.bf16.msrb.mxu1 %v8843_v36 }
 0x310   :  { %v3223_v34 = vpop.f32.mrf.mxu2  ;;  %v3138_v19 = vpop.f32.mrf.mxu0  ;;  %3599 = vmatpush.bf16.msrb.mxu3 %v8971_v21 }
 0x311   :  { %v3224_v4 = vadd.f32 %v3223_v34, %v3180_v11  ;;  %v3267_v1 = vpop.f32.mrf.mxu3  ;;  %v3139_v50 = vadd.f32 %v3138_v19, %v14027_v9  ;;  %v3182_v33 = vpop.f32.mrf.mxu1  ;;  %v8960_v11 = vld [vmem:[%s17528_s1 + $0x788] sm:$0xf0]  ;;  %3468 = vmatpush.bf16.msrb.mxu0 %v8771_v44  ;;  %v17752_v9 = vld [vmem:[#allocation57_spill] sm:$0xff] }
 0x312   :  { %v8963_v26 = vor.u32 %v10972_v5, %v8960_v11  ;;  %3556 = vmatpush.bf16.msrb.mxu2 %v8899_v46 }
 0x313   :  { %v14278_v51 = vadd.f32 %v3267_v1, %v3224_v4  ;;  %v3183_v7 = vadd.f32 %v3182_v33, %v3139_v50  ;;  %3318 = vmatmul.bf16.gmra.mxu0 %v17751_v18  ;;  %3512 = vmatpush.bf16.msrb.mxu1 %v8835_v29  ;;  %v17756_v50 = vld [vmem:[#allocation61_spill] sm:$0xff]  ;;  %v17757_v33 = vld [vmem:[#allocation62_spill] sm:$0xff] }
 0x314   :  { %3362 = vmatmul.bf16.gmra.mxu1 %v17752_v9  ;;  %3600 = vmatpush.bf16.msrb.mxu3 %v8963_v26 }
 0x315   :  { %3406 = vmatmul.bf16.gmra.mxu2 %v17753_v30 }
 0x316   :  { %3450 = vmatmul.bf16.gmra.mxu3 %v17754_v37 }
 0x318   :  { %v3226_v35 = vpop.f32.mrf.mxu2  ;;  %v3140_v47 = vpop.f32.mrf.mxu0 }
 0x319   :  { %v3227_v36 = vadd.f32 %v3226_v35, %v3183_v7  ;;  %v3270_v42 = vpop.f32.mrf.mxu3  ;;  %v3141_v48 = vadd.f32 %v3140_v47, %v14029_v15  ;;  %v3184_v21 = vpop.f32.mrf.mxu1  ;;  %v17758_v15 = vld [vmem:[#allocation63_spill] sm:$0xff] }
 0x31b   :  { %v14285_v34 = vadd.f32 %v3270_v42, %v3227_v36  ;;  %v3185_v60 = vadd.f32 %v3184_v21, %v3141_v48  ;;  %v17759_v21 = vld [vmem:[#allocation64_spill] sm:$0xff] }
 0x320   :  { %v3228_v0 = vpop.f32.mrf.mxu2  ;;  %v3143_v1 = vpop.f32.mrf.mxu0 }
 0x321   :  { %v3229_v41 = vadd.f32 %v3228_v0, %v3185_v60  ;;  %v3272_v4 = vpop.f32.mrf.mxu3  ;;  %v3144_v19 = vadd.f32 %v3143_v1, %v14035_v38  ;;  %v3187_v44 = vpop.f32.mrf.mxu1  ;;  %v17760_v60 = vld [vmem:[#allocation65_spill] sm:$0xff]  ;;  %v17761_v0 = vld [vmem:[#allocation66_spill] sm:$0xff] }
 0x323   :  { %v14288_v6 = vadd.f32 %v3272_v4, %v3229_v41  ;;  %v3188_v23 = vadd.f32 %v3187_v44, %v3144_v19  ;;  %3323 = vmatmul.bf16.gmra.mxu0 %v17755_v16 }
 0x324   :  { %3367 = vmatmul.bf16.gmra.mxu1 %v17756_v50 }
 0x325   :  { %3411 = vmatmul.bf16.gmra.mxu2 %v17757_v33 }
 0x326   :  { %3455 = vmatmul.bf16.gmra.mxu3 %v17758_v15 }
 0x328   :  { %v3231_v29 = vpop.f32.mrf.mxu2  ;;  %v3145_v11 = vpop.f32.mrf.mxu0 }
 0x329   :  { %v3232_v46 = vadd.f32 %v3231_v29, %v3188_v23  ;;  %v3275_v5 = vpop.f32.mrf.mxu3  ;;  %v3146_v26 = vadd.f32 %v3145_v11, %v14037_v58  ;;  %v3189_v7 = vpop.f32.mrf.mxu1  ;;  %v17762_v58 = vld [vmem:[#allocation67_spill] sm:$0xff] }
 0x32b   :  { %v14295_v38 = vadd.f32 %v3275_v5, %v3232_v46  ;;  %v3190_v18 = vadd.f32 %v3189_v7, %v3146_v26  ;;  %v17763_v7 = vld [vmem:[#allocation68_spill] sm:$0xff] }
 0x330   :  { %v3233_v9 = vpop.f32.mrf.mxu2  ;;  %v3148_v35 = vpop.f32.mrf.mxu0 }
 0x331   :  { %v3234_v30 = vadd.f32 %v3233_v9, %v3190_v18  ;;  %v3277_v37 = vpop.f32.mrf.mxu3  ;;  %v3149_v36 = vadd.f32 %v3148_v35, %v14043_v14  ;;  %v3192_v42 = vpop.f32.mrf.mxu1  ;;  %v17764_v18 = vld [vmem:[#allocation69_spill] sm:$0xff]  ;;  %v17765_v9 = vld [vmem:[#allocation70_spill] sm:$0xff] }
 0x333   :  { %v14298_v47 = vadd.f32 %v3277_v37, %v3234_v30  ;;  %v3193_v48 = vadd.f32 %v3192_v42, %v3149_v36  ;;  %3469 = vmatmul.bf16.vlgmr.msrb.gmra.mxu0 %v17759_v21 }
 0x334   :  { %3513 = vmatmul.bf16.vlgmr.msrb.gmra.mxu1 %v17760_v60 }
 0x335   :  { %3557 = vmatmul.bf16.vlgmr.msrb.gmra.mxu2 %v17761_v0 }
 0x336   :  { %3601 = vmatmul.bf16.vlgmr.msrb.gmra.mxu3 %v17762_v58 }
 0x338   :  { %v3236_v41 = vpop.f32.mrf.mxu2  ;;  %v3150_v19 = vpop.f32.mrf.mxu0 }
 0x339   :  { %v3237_v4 = vadd.f32 %v3236_v41, %v3193_v48  ;;  %v3280_v1 = vpop.f32.mrf.mxu3  ;;  %v3151_v44 = vadd.f32 %v3150_v19, %v14046_v55  ;;  %v3194_v23 = vpop.f32.mrf.mxu1  ;;  %v17766_v55 = vld [vmem:[#allocation71_spill] sm:$0xff] }
 0x33b   :  { %v14305_v14 = vadd.f32 %v3280_v1, %v3237_v4  ;;  %v3195_v16 = vadd.f32 %v3194_v23, %v3151_v44  ;;  %v17767_v23 = vld [vmem:[#allocation72_spill] sm:$0xff] }
 0x340   :  { %v3238_v50 = vpop.f32.mrf.mxu2  ;;  %v3294_v29 = vpop.f32.mrf.mxu0 }
 0x341   :  { %v3239_v33 = vadd.f32 %v3238_v50, %v3195_v16  ;;  %v3282_v15 = vpop.f32.mrf.mxu3  ;;  %v3295_v46 = vadd.f32 %v3294_v29, %v14053_v22  ;;  %v3338_v5 = vpop.f32.mrf.mxu1  ;;  %v17768_v16 = vld [vmem:[#allocation73_spill] sm:$0xff]  ;;  %v17769_v50 = vld [vmem:[#allocation74_spill] sm:$0xff] }
 0x343   :  { %v14308_v11 = vadd.f32 %v3282_v15, %v3239_v33  ;;  %v3339_v26 = vadd.f32 %v3338_v5, %v3295_v46  ;;  %3474 = vmatmul.bf16.gmra.mxu0 %v17763_v7 }
 0x344   :  { %3518 = vmatmul.bf16.gmra.mxu1 %v17764_v18 }
 0x345   :  { %3562 = vmatmul.bf16.gmra.mxu2 %v17765_v9 }
 0x346   :  { %3606 = vmatmul.bf16.gmra.mxu3 %v17766_v55 }
 0x348   :  { %v3382_v30 = vpop.f32.mrf.mxu2  ;;  %v3296_v36 = vpop.f32.mrf.mxu0 }
 0x349   :  { %v3383_v37 = vadd.f32 %v3382_v30, %v3339_v26  ;;  %v3426_v35 = vpop.f32.mrf.mxu3  ;;  %v3297_v42 = vadd.f32 %v3296_v36, %v14056_v56  ;;  %v3340_v48 = vpop.f32.mrf.mxu1  ;;  %v17770_v56 = vld [vmem:[#allocation75_spill] sm:$0xff] }
 0x34b   :  { %v14315_v22 = vadd.f32 %v3426_v35, %v3383_v37  ;;  %v3341_v21 = vadd.f32 %v3340_v48, %v3297_v42  ;;  %v17771_v48 = vld [vmem:[#allocation76_spill] sm:$0xff] }
 0x350   :  { %v3384_v60 = vpop.f32.mrf.mxu2  ;;  %v3299_v41 = vpop.f32.mrf.mxu0 }
 0x351   :  { %v3385_v0 = vadd.f32 %v3384_v60, %v3341_v21  ;;  %v3428_v58 = vpop.f32.mrf.mxu3  ;;  %v3300_v4 = vadd.f32 %v3299_v41, %v14063_v12  ;;  %v3343_v1 = vpop.f32.mrf.mxu1  ;;  %v17772_v21 = vld [vmem:[#allocation77_spill] sm:$0xff]  ;;  %v17773_v60 = vld [vmem:[#allocation78_spill] sm:$0xff] }
 0x353   :  { %v14318_v19 = vadd.f32 %v3428_v58, %v3385_v0  ;;  %v3344_v44 = vadd.f32 %v3343_v1, %v3300_v4  ;;  %3479 = vmatmul.bf16.gmra.mxu0 %v17767_v23 }
 0x354   :  { %3523 = vmatmul.bf16.gmra.mxu1 %v17768_v16 }
 0x355   :  { %3567 = vmatmul.bf16.gmra.mxu2 %v17769_v50 }
 0x356   :  { %3611 = vmatmul.bf16.gmra.mxu3 %v17770_v56 }
 0x358   :  { %v3387_v33 = vpop.f32.mrf.mxu2  ;;  %v3301_v46 = vpop.f32.mrf.mxu0 }
 0x359   :  { %v3388_v15 = vadd.f32 %v3387_v33, %v3344_v44  ;;  %v3431_v29 = vpop.f32.mrf.mxu3  ;;  %v3302_v5 = vadd.f32 %v3301_v46, %v14066_v32  ;;  %v3345_v26 = vpop.f32.mrf.mxu1  ;;  %v17774_v32 = vld [vmem:[#allocation79_spill] sm:$0xff]  ;;  %v17777_v46 = vld [vmem:[#allocation82_spill] sm:$0xff] }
 0x35b   :  { %v14325_v12 = vadd.f32 %v3431_v29, %v3388_v15  ;;  %v3346_v7 = vadd.f32 %v3345_v26, %v3302_v5  ;;  %v17775_v15 = vld [vmem:[#allocation80_spill] sm:$0xff]  ;;  %v17776_v29 = vld [vmem:[#allocation81_spill] sm:$0xff]  ;;  %v17778_v5 = vld [vmem:[#allocation83_spill] sm:$0xff] }
 0x360   :  { %v3389_v18 = vpop.f32.mrf.mxu2  ;;  %v3304_v30 = vpop.f32.mrf.mxu0 }
 0x361   :  { %v3390_v9 = vadd.f32 %v3389_v18, %v3346_v7  ;;  %v3433_v55 = vpop.f32.mrf.mxu3  ;;  %v3305_v37 = vadd.f32 %v3304_v30, %v14121_v3  ;;  %v3348_v35 = vpop.f32.mrf.mxu1 }
 0x363   :  { %v14328_v36 = vadd.f32 %v3433_v55, %v3390_v9  ;;  %v3349_v42 = vadd.f32 %v3348_v35, %v3305_v37  ;;  %3484 = vmatmul.bf16.gmra.mxu0 %v17771_v48 }
 0x364   :  { %3528 = vmatmul.bf16.gmra.mxu1 %v17772_v21 }
 0x365   :  { %3572 = vmatmul.bf16.gmra.mxu2 %v17773_v60 }
 0x366   :  { %3616 = vmatmul.bf16.gmra.mxu3 %v17774_v32 }
 0x368   :  { %v3392_v0 = vpop.f32.mrf.mxu2  ;;  %v14334_v4 = vpop.f32.mrf.mxu0 }
 0x369   :  { %v3393_v58 = vadd.f32 %v3392_v0, %v3349_v42  ;;  %v3436_v41 = vpop.f32.mrf.mxu3  ;;  %v14336_v1 = vpop.f32.mrf.mxu1 }
 0x36b   :  { %v14338_v3 = vadd.f32 %v3436_v41, %v3393_v58 }
 0x370   :  { %v14340_v44 = vpop.f32.mrf.mxu2  ;;  %v3309_v16 = vpop.f32.mrf.mxu0 }
 0x371   :  { %v14342_v23 = vpop.f32.mrf.mxu3  ;;  %v3310_v50 = vadd.f32 %v3309_v16, %v14227_v10  ;;  %v3353_v56 = vpop.f32.mrf.mxu1 }
 0x373   :  { %v3354_v33 = vadd.f32 %v3353_v56, %v3310_v50  ;;  %3489 = vmatmul.bf16.gmra.mxu0 %v17775_v15 }
 0x374   :  { %3533 = vmatmul.bf16.gmra.mxu1 %v17776_v29 }
 0x375   :  { %3577 = vmatmul.bf16.gmra.mxu2 %v17777_v46 }
 0x376   :  { %3621 = vmatmul.bf16.gmra.mxu3 %v17778_v5 }
 0x378   :  { %v3397_v26 = vpop.f32.mrf.mxu2  ;;  %v14349_v9 = vpop.f32.mrf.mxu0 }
 0x379   :  { %v3398_v7 = vadd.f32 %v3397_v26, %v3354_v33  ;;  %v3441_v18 = vpop.f32.mrf.mxu3  ;;  %v14351_v55 = vpop.f32.mrf.mxu1 }
 0x37b   :  { %v14353_v30 = vadd.f32 %v3441_v18, %v3398_v7 }
 0x380   :  { %v14355_v10 = vpop.f32.mrf.mxu2  ;;  %v3314_v35 = vpop.f32.mrf.mxu0 }
 0x381   :  { %v14357_v37 = vpop.f32.mrf.mxu3  ;;  %v3315_v42 = vadd.f32 %v3314_v35, %v14285_v34  ;;  %v3358_v48 = vpop.f32.mrf.mxu1 }
 0x383   :  { %v3359_v21 = vadd.f32 %v3358_v48, %v3315_v42  ;;  %3494 = vmatmul.bf16.gmra.mxu0 %v13441_v24 }
 0x384   :  { %3538 = vmatmul.bf16.gmra.mxu1 %v13452_v45 }
 0x385   :  { %3582 = vmatmul.bf16.gmra.mxu2 %v13454_v63 }
 0x386   :  { %3626 = vmatmul.bf16.gmra.mxu3 %v13466_v59 }
 0x388   :  { %v3402_v60 = vpop.f32.mrf.mxu2  ;;  %v14364_v58 = vpop.f32.mrf.mxu0 }
 0x389   :  { %v3403_v32 = vadd.f32 %v3402_v60, %v3359_v21  ;;  %v3446_v0 = vpop.f32.mrf.mxu3  ;;  %v14366_v41 = vpop.f32.mrf.mxu1 }
 0x38b   :  { %v14368_v16 = vadd.f32 %v3446_v0, %v3403_v32 }
 0x390   :  { %v14370_v34 = vpop.f32.mrf.mxu2  ;;  %v3319_v24 = vpop.f32.mrf.mxu0 }
 0x391   :  { %v14372_v50 = vpop.f32.mrf.mxu3  ;;  %v3320_v45 = vadd.f32 %v3319_v24, %v14295_v38  ;;  %v3363_v56 = vpop.f32.mrf.mxu1 }
 0x393   :  { %v3364_v63 = vadd.f32 %v3363_v56, %v3320_v45  ;;  %3499 = vmatmul.bf16.gmra.mxu0 %v13507_v17 }
 0x394   :  { %3543 = vmatmul.bf16.gmra.mxu1 %v13509_v49 }
 0x395   :  { %3587 = vmatmul.bf16.gmra.mxu2 %v13511_v57 }
 0x396   :  { %3631 = vmatmul.bf16.gmra.mxu3 %v13514_v27 }
 0x398   :  { %v3407_v59 = vpop.f32.mrf.mxu2  ;;  %v14379_v29 = vpop.f32.mrf.mxu0 }
 0x399   :  { %v3408_v33 = vadd.f32 %v3407_v59, %v3364_v63  ;;  %v3451_v15 = vpop.f32.mrf.mxu3  ;;  %v14381_v46 = vpop.f32.mrf.mxu1 }
 0x39b   :  { %v14383_v5 = vadd.f32 %v3451_v15, %v3408_v33 }
 0x3a0   :  { %v14385_v38 = vpop.f32.mrf.mxu2  ;;  %v3324_v17 = vpop.f32.mrf.mxu0 }
 0x3a1   :  { %v14387_v26 = vpop.f32.mrf.mxu3  ;;  %v3325_v49 = vadd.f32 %v3324_v17, %v14305_v14  ;;  %v3368_v7 = vpop.f32.mrf.mxu1 }
 0x3a3   :  { %v3369_v57 = vadd.f32 %v3368_v7, %v3325_v49 }
 0x3a8   :  { %v3412_v18 = vpop.f32.mrf.mxu2  ;;  %v14390_v42 = vpop.f32.mrf.mxu0 }
 0x3a9   :  { %v3413_v27 = vadd.f32 %v3412_v18, %v3369_v57  ;;  %v3456_v35 = vpop.f32.mrf.mxu3  ;;  %v14392_v48 = vpop.f32.mrf.mxu1 }
 0x3ab   :  { %v14394_v21 = vadd.f32 %v3456_v35, %v3413_v27 }
 0x3b0   :  { %v14396_v60 = vpop.f32.mrf.mxu2  ;;  %v3470_v0 = vpop.f32.mrf.mxu0 }
 0x3b1   :  { %v14398_v32 = vpop.f32.mrf.mxu3  ;;  %v3514_v24 = vpop.f32.mrf.mxu1  ;;  %v3471_v45 = vadd.f32 %v3470_v0, %v14315_v22 }
 0x3b2   :  { %17779 = vst [vmem:[#allocation8_spill] sm:$0xff] %v14398_v32 }
 0x3b3   :  { %v3515_v33 = vadd.f32 %v3514_v24, %v3471_v45 }
 0x3b8   :  { %v3558_v14 = vpop.f32.mrf.mxu2  ;;  %v3472_v63 = vpop.f32.mrf.mxu0 }
 0x3b9   :  { %v3602_v56 = vpop.f32.mrf.mxu3  ;;  %v3516_v59 = vpop.f32.mrf.mxu1  ;;  %v3473_v15 = vadd.f32 %v3472_v63, %v14318_v19  ;;  %v3559_v17 = vadd.f32 %v3558_v14, %v3515_v33 }
 0x3bb   :  { %v3517_v49 = vadd.f32 %v3516_v59, %v3473_v15  ;;  %v3603_v57 = vadd.f32 %v3602_v56, %v3559_v17 }
 0x3bd   :  { %v3652_v22 = vrot.slane %v3603_v57, 1 }
 0x3c0   :  { %v3560_v7 = vpop.f32.mrf.mxu2  ;;  %v3475_v35 = vpop.f32.mrf.mxu0 }
 0x3c1   :  { %v3561_v18 = vadd.f32 %v3560_v7, %v3517_v49  ;;  %v3604_v27 = vpop.f32.mrf.mxu3  ;;  %v3519_v62 = vpop.f32.mrf.mxu1  ;;  %v3476_v43 = vadd.f32 %v3475_v35, %v14325_v12  ;;  %v14409_v12 = vld [vmem:[%s17530_s2] ss:$0 sm:$0xff] }
 0x3c3   :  { %v3605_v25 = vadd.f32 %v3604_v27, %v3561_v18  ;;  %v3520_v32 = vadd.f32 %v3519_v62, %v3476_v43 }
 0x3c5   :  { %v3653_v0 = vrot.slane %v3605_v25, 1 }
 0x3c7   :  { %v3654_v31 = vsel %vm3651_vm0, %v3652_v22, %v3653_v0 }
 0x3c8   :  { %v3693_v24 = vadd.f32 %v3654_v31, %v13543_v8  ;;  %v3563_v19 = vpop.f32.mrf.mxu2  ;;  %v3477_v63 = vpop.f32.mrf.mxu0 }
 0x3c9   :  { %v3564_v45 = vadd.f32 %v3563_v19, %v3520_v32  ;;  %v3607_v14 = vpop.f32.mrf.mxu3  ;;  %v3521_v56 = vpop.f32.mrf.mxu1  ;;  %v3478_v33 = vadd.f32 %v3477_v63, %v14328_v36  ;;  %v3307_v36 = vadd.f32 %v14334_v4, %v14172_v20 }
 0x3ca   :  { %v3711_v43 = vadd.f32 %v14409_v12, %v3693_v24 }
 0x3cb   :  { %v3608_v59 = vadd.f32 %v3607_v14, %v3564_v45  ;;  %v3522_v17 = vadd.f32 %v3521_v56, %v3478_v33  ;;  %v3351_v24 = vadd.f32 %v14336_v1, %v3307_v36  ;;  %v3312_v1 = vadd.f32 %v14349_v9, %v14278_v51 }
 0x3cc   :  { %v3725_v35 = vmax.f32 %v3711_v43, 0.0 }
 0x3cd   :  { %v3655_v15 = vrot.slane %v3608_v59, 1  ;;  %v3395_v14 = vadd.f32 %v14340_v44, %v3351_v24 }
 0x3cf   :  { %v3656_v25 = vsel %vm3651_vm0, %v3653_v0, %v3655_v15 }
 0x3d0   :  { %v3694_v8 = vadd.f32 %v3656_v25, %v13546_v54  ;;  %v3565_v31 = vpop.f32.mrf.mxu2  ;;  %v3480_v49 = vpop.f32.mrf.mxu0  ;;  %v3439_v25 = vadd.f32 %v14342_v23, %v3395_v14 }
 0x3d1   :  { %v3566_v62 = vadd.f32 %v3565_v31, %v3522_v17  ;;  %v3609_v32 = vpop.f32.mrf.mxu3  ;;  %v3524_v57 = vpop.f32.mrf.mxu1  ;;  %v3481_v27 = vadd.f32 %v3480_v49, %v14338_v3  ;;  %v3356_v49 = vadd.f32 %v14351_v55, %v3312_v1  ;;  %v3317_v1 = vadd.f32 %v14364_v58, %v14288_v6  ;;  %v11003_v6 = vld [vmem:[%s17531_s3 + $0x74] sm:$0xf0] }
 0x3d2   :  { %v3712_v7 = vadd.f32 %v14409_v12, %v3694_v8 }
 0x3d3   :  { %v3610_v18 = vadd.f32 %v3609_v32, %v3566_v62  ;;  %v3525_v45 = vadd.f32 %v3524_v57, %v3481_v27  ;;  %v3400_v23 = vadd.f32 %v14355_v10, %v3356_v49 }
 0x3d4   :  { %v3726_v22 = vmax.f32 %v3712_v7, 0.0 }
 0x3d5   :  { %v3657_v0 = vrot.slane %v3610_v18, 1 }
 0x3d6   :  { %v11391_v19 = vpack.c.bf16 %v3726_v22, %v3725_v35  ;;  %v3444_v35 = vadd.f32 %v14357_v37, %v3400_v23 }
 0x3d7   :  { %v3658_v54 = vsel %vm3651_vm0, %v3655_v15, %v3657_v0 }
 0x3d8   :  { %11392 = vst [vmem:[#allocation2] sm:$0xff] %v11391_v19   ;;  %v3695_v20 = vadd.f32 %v3658_v54, %v13553_v61  ;;  %v3568_v4 = vpop.f32.mrf.mxu2  ;;  %v3482_v59 = vpop.f32.mrf.mxu0 }
 0x3d9   :  { %v3569_v63 = vadd.f32 %v3568_v4, %v3525_v45  ;;  %v3612_v56 = vpop.f32.mrf.mxu3  ;;  %v3526_v33 = vpop.f32.mrf.mxu1  ;;  %v3483_v43 = vadd.f32 %v3482_v59, %v3439_v25 }
 0x3da   :  { %v3713_v36 = vadd.f32 %v14409_v12, %v3695_v20 }
 0x3db   :  { %v3613_v3 = vadd.f32 %v3612_v56, %v3569_v63  ;;  %v3527_v62 = vadd.f32 %v3526_v33, %v3483_v43 }
 0x3dc   :  { %v3727_v18 = vmax.f32 %v3713_v36, 0.0  ;;  %v9142_v36 = vld [vmem:[%s17531_s3 + $0xf0] sm:$0xf] }
 0x3dd   :  { %v3659_v17 = vrot.slane %v3613_v3, 1 }
 0x3df   :  { %v3660_v15 = vsel %vm3651_vm0, %v3657_v0, %v3659_v17 }
 0x3e0   :  { %v3696_v44 = vadd.f32 %v3660_v15, %v13556_v2  ;;  %v3570_v8 = vpop.f32.mrf.mxu2  ;;  %v3485_v61 = vpop.f32.mrf.mxu0 }
 0x3e1   :  { %v3614_v31 = vpop.f32.mrf.mxu3  ;;  %v3529_v32 = vpop.f32.mrf.mxu1  ;;  %v3571_v7 = vadd.f32 %v3570_v8, %v3527_v62  ;;  %v3486_v27 = vadd.f32 %v3485_v61, %v14353_v30 }
 0x3e2   :  { %v3714_v57 = vadd.f32 %v14409_v12, %v3696_v44  ;;  %v3361_v44 = vadd.f32 %v14366_v41, %v3317_v1  ;;  %v10999_v1 = vld [vmem:[%s17531_s3 + $0x54] sm:$0xf0] }
 0x3e3   :  { %v3615_v9 = vadd.f32 %v3614_v31, %v3571_v7  ;;  %v3530_v55 = vadd.f32 %v3529_v32, %v3486_v27  ;;  %v11019_v7 = vld [vmem:[%s17531_s3 + $0xf4] sm:$0xf0]  ;;  %v9270_v27 = vld [vmem:[%s17531_s3 + $0x1f0] sm:$0xf] }
 0x3e4   :  { %v3728_v51 = vmax.f32 %v3714_v57, 0.0  ;;  %v3405_v58 = vadd.f32 %v14370_v34, %v3361_v44  ;;  %v11035_v34 = vld [vmem:[%s17531_s3 + $0x174] sm:$0xf0] }
 0x3e5   :  { %v3661_v19 = vrot.slane %v3615_v9, 1 }
 0x3e6   :  { %v11396_v22 = vpack.c.bf16 %v3728_v51, %v3727_v18  ;;  %v9206_v18 = vld [vmem:[%s17531_s3 + $0x170] sm:$0xf] }
 0x3e7   :  { %v3662_v10 = vsel %vm3651_vm0, %v3659_v17, %v3661_v19 }
 0x3e8   :  { %v3573_v2 = vpop.f32.mrf.mxu2  ;;  %v3487_v24 = vpop.f32.mrf.mxu0  ;;  %11413 = vst [vmem:[#allocation2 + $0x8] sm:$0xff] %v11396_v22   ;;  %v3697_v20 = vadd.f32 %v3662_v10, %v13611_v40 }
 0x3e9   :  { %v3617_v0 = vpop.f32.mrf.mxu3  ;;  %v3531_v54 = vpop.f32.mrf.mxu1  ;;  %v3488_v45 = vadd.f32 %v3487_v24, %v3444_v35  ;;  %v3574_v14 = vadd.f32 %v3573_v2, %v3530_v55  ;;  %v11051_v2 = vld [vmem:[%s17531_s3 + $0x1f4] sm:$0xf0]  ;;  %v9207_v24 = vor.u32 %v11035_v34, %v9206_v18  ;;  %v9134_v55 = vld [vmem:[%s17531_s3 + $0xe0] sm:$0xf] }
 0x3ea   :  { %v3715_v17 = vadd.f32 %v14409_v12, %v3697_v20  ;;  %v9271_v10 = vor.u32 %v11051_v2, %v9270_v27  ;;  %v9198_v20 = vld [vmem:[%s17531_s3 + $0x160] sm:$0xf] }
 0x3eb   :  { %v3618_v4 = vadd.f32 %v3617_v0, %v3574_v14  ;;  %v3532_v63 = vadd.f32 %v3531_v54, %v3488_v45  ;;  %v9143_v0 = vor.u32 %v11019_v7, %v9142_v36  ;;  %v3449_v54 = vadd.f32 %v14372_v50, %v3405_v58  ;;  %v11017_v14 = vld [vmem:[%s17531_s3 + $0xe4] sm:$0xf0]  ;;  %6897 = vmatpush.bf16.msra.mxu2 %v9207_v24  ;;  %v9190_v58 = vld [vmem:[%s17531_s3 + $0x150] sm:$0xf]  ;;  %v11047_v36 = vld [vmem:[%s17531_s3 + $0x1d4] sm:$0xf0] }
 0x3ec   :  { %v11033_v50 = vld [vmem:[%s17531_s3 + $0x164] sm:$0xf0]  ;;  %6910 = vmatpush.bf16.msra.mxu3 %v9271_v10  ;;  %v9054_v7 = vld [vmem:[%s17531_s3 + $0x40] sm:$0xf] }
 0x3ed   :  { %v3663_v56 = vrot.slane %v3618_v4, 1  ;;  %6884 = vmatpush.bf16.msra.mxu1 %v9143_v0  ;;  %v9118_v34 = vld [vmem:[%s17531_s3 + $0xc0] sm:$0xf] }
 0x3ef   :  { %v3664_v3 = vsel %vm3651_vm0, %v3661_v19, %v3663_v56  ;;  %v9070_v19 = vld [vmem:[%s17531_s3 + $0x60] sm:$0xf] }
 0x3f0   :  { %v3575_v30 = vpop.f32.mrf.mxu2  ;;  %v3490_v37 = vpop.f32.mrf.mxu0  ;;  %v3698_v43 = vadd.f32 %v3664_v3, %v13662_v28  ;;  %v9078_v28 = vld [vmem:[%s17531_s3 + $0x70] sm:$0xf]  ;;  %v9199_v3 = vor.u32 %v11033_v50, %v9198_v20 }
 0x3f1   :  { %v3576_v59 = vadd.f32 %v3575_v30, %v3532_v63  ;;  %v3619_v33 = vpop.f32.mrf.mxu3  ;;  %v3534_v25 = vpop.f32.mrf.mxu1  ;;  %v3491_v40 = vadd.f32 %v3490_v37, %v14368_v16  ;;  %v3729_v16 = vmax.f32 %v3715_v17, 0.0  ;;  %v9079_v22 = vor.u32 %v11003_v6, %v9078_v28  ;;  %v9262_v30 = vld [vmem:[%s17531_s3 + $0x1e0] sm:$0xf] }
 0x3f2   :  { %v3716_v8 = vadd.f32 %v14409_v12, %v3698_v43  ;;  %v9062_v43 = vld [vmem:[%s17531_s3 + $0x50] sm:$0xf]  ;;  %6898 = vmatpush.bf16.msra.mxu2 %v9199_v3  ;;  %v10995_v3 = vld [vmem:[%s17531_s3 + $0x34] sm:$0xf0] }
 0x3f3   :  { %v14439_v15 = vadd.f32 %v3619_v33, %v3576_v59  ;;  %v3535_v57 = vadd.f32 %v3534_v25, %v3491_v40  ;;  %6871 = vmatpush.bf16.msra.mxu0 %v9079_v22  ;;  %v11049_v59 = vld [vmem:[%s17531_s3 + $0x1e4] sm:$0xf0] }
 0x3f4   :  { %v3730_v49 = vmax.f32 %v3716_v8, 0.0  ;;  %v9263_v25 = vor.u32 %v11049_v59, %v9262_v30  ;;  %v9126_v8 = vld [vmem:[%s17531_s3 + $0xd0] sm:$0xf] }
 0x3f5   :  { %v3665_v61 = vrot.slane %v14439_v15, 1  ;;  %v9046_v30 = vld [vmem:[%s17531_s3 + $0x30] sm:$0xf] }
 0x3f6   :  { %v11401_v51 = vpack.c.bf16 %v3730_v49, %v3729_v16  ;;  %v9254_v16 = vld [vmem:[%s17531_s3 + $0x1d0] sm:$0xf]  ;;  %6911 = vmatpush.bf16.msra.mxu3 %v9263_v25 }
 0x3f7   :  { %v3666_v23 = vsel %vm3651_vm0, %v3663_v56, %v3665_v61  ;;  %v9135_v56 = vor.u32 %v11017_v14, %v9134_v55  ;;  %v9255_v18 = vor.u32 %v11047_v36, %v9254_v16  ;;  %v9182_v14 = vld [vmem:[%s17531_s3 + $0x140] sm:$0xf]  ;;  %v11043_v16 = vld [vmem:[%s17531_s3 + $0x1b4] sm:$0xf0]  ;;  %v17614_v36 = vmov 0  }
 0x3f8   :  { %v3578_v31 = vpop.f32.mrf.mxu2  ;;  %v3492_v32 = vpop.f32.mrf.mxu0  ;;  %v3699_v9 = vadd.f32 %v3666_v23, %v13717_v52  ;;  %v11001_v52 = vld [vmem:[%s17531_s3 + $0x64] sm:$0xf0]  ;;  %11414 = vst [vmem:[#allocation2 + $0x10] sm:$0xff] %v11401_v51  }
 0x3f9   :  { %v3622_v62 = vpop.f32.mrf.mxu3  ;;  %v14453_v41 = vpop.f32.mrf.mxu1  ;;  %v3579_v35 = vadd.f32 %v3578_v31, %v3535_v57  ;;  %v9071_v63 = vor.u32 %v11001_v52, %v9070_v19  ;;  %v3493_v17 = vadd.f32 %v3492_v32, %v3449_v54  ;;  %v11015_v31 = vld [vmem:[%s17531_s3 + $0xd4] sm:$0xf0]  ;;  %6885 = vmatpush.bf16.msra.mxu1 %v9135_v56  ;;  %v10997_v23 = vld [vmem:[%s17531_s3 + $0x44] sm:$0xf0]  ;;  %3768 = vst [vmem:[#allocation3] sm:$0xff] %v17614_v36 }
 0x3fa   :  { %v3717_v45 = vadd.f32 %v14409_v12, %v3699_v9  ;;  %v11031_v32 = vld [vmem:[%s17531_s3 + $0x154] sm:$0xf0]  ;;  %v11013_v51 = vld [vmem:[%s17531_s3 + $0xc4] sm:$0xf0]  ;;  %6912 = vmatpush.bf16.msra.mxu3 %v9255_v18  ;;  %3769 = vst [vmem:[#allocation3 + $0x8] sm:$0xff] %v17614_v36 }
 0x3fb   :  { %v14492_v4 = vadd.f32 %v3622_v62, %v3579_v35  ;;  %v3322_v62 = vadd.f32 %v14379_v29, %v14298_v47  ;;  %6872 = vmatpush.bf16.msra.mxu0 %v9071_v63  ;;  %v9063_v47 = vor.u32 %v10999_v1, %v9062_v43  ;;  %v9127_v29 = vor.u32 %v11015_v31, %v9126_v8  ;;  %v11011_v8 = vld [vmem:[%s17531_s3 + $0xb4] sm:$0xf0]  ;;  %v9174_v31 = vld [vmem:[%s17531_s3 + $0x130] sm:$0xf] }
 0x3fc   :  { %v3731_v33 = vmax.f32 %v3717_v45, 0.0  ;;  %v3537_v9 = vadd.f32 %v14453_v41, %v3493_v17  ;;  %v9119_v35 = vor.u32 %v11013_v51, %v9118_v34  ;;  %3770 = vst [vmem:[#allocation3 + $0x10] sm:$0xff] %v17614_v36 }
 0x3fd   :  { %v3667_v15 = vrot.slane %v14492_v4, 1  ;;  %v3366_v27 = vadd.f32 %v14381_v46, %v3322_v62  ;;  %6886 = vmatpush.bf16.msra.mxu1 %v9127_v29  ;;  %v3327_v4 = vadd.f32 %v14390_v42, %v14308_v11  ;;  %v10993_v29 = vld [vmem:[%s17531_s3 + $0x24] sm:$0xf0]  ;;  %3771 = vst [vmem:[#allocation3 + $0x18] sm:$0xff] %v17614_v36 }
 0x3fe   :  { %v3745_v28 = vpack.c.bf16 %v3731_v33, %v3731_v33  ;;  %3772 = vst [vmem:[#allocation3 + $0x20] sm:$0xff] %v17614_v36 }
 0x3ff   :  { %v3668_v49 = vsel %vm3651_vm0, %v3665_v61, %v3667_v15  ;;  %v9191_v61 = vor.u32 %v11031_v32, %v9190_v58  ;;  %6873 = vmatpush.bf16.msra.mxu0 %v9063_v47  ;;  %v3410_v24 = vadd.f32 %v14385_v38, %v3366_v27  ;;  %v11029_v38 = vld [vmem:[%s17531_s3 + $0x144] sm:$0xf0]  ;;  %v11027_v58 = vld [vmem:[%s17531_s3 + $0x134] sm:$0xf0]  ;;  %v9238_v32 = vld [vmem:[%s17531_s3 + $0x1b0] sm:$0xf] }
 0x400   :  { %v3580_v37 = vpop.f32.mrf.mxu2  ;;  %v3495_v44 = vpop.f32.mrf.mxu0  ;;  %3759 = vst [vmem:[#allocation2 + $0x18] sm:$0x1] %v3745_v28  ;;  %v3700_v57 = vadd.f32 %v3668_v49, %v13768_v13  ;;  %v9055_v13 = vor.u32 %v10997_v23, %v9054_v7  ;;  %v9183_v33 = vor.u32 %v11029_v38, %v9182_v14  ;;  %v9239_v49 = vor.u32 %v11043_v16, %v9238_v32  ;;  %v9038_v47 = vld [vmem:[%s17531_s3 + $0x20] sm:$0xf] }
 0x401   :  { %v3624_v40 = vpop.f32.mrf.mxu3  ;;  %v3539_v6 = vpop.f32.mrf.mxu1  ;;  %v3581_v2 = vadd.f32 %v3580_v37, %v3537_v9  ;;  %6899 = vmatpush.bf16.msra.mxu2 %v9191_v61  ;;  %v3496_v19 = vadd.f32 %v3495_v44, %v14383_v5  ;;  %6887 = vmatpush.bf16.msra.mxu1 %v9119_v35  ;;  %v3454_v45 = vadd.f32 %v14387_v26, %v3410_v24  ;;  %v9246_v5 = vld [vmem:[%s17531_s3 + $0x1c0] sm:$0xf]  ;;  %v11045_v26 = vld [vmem:[%s17531_s3 + $0x1c4] sm:$0xf0]  ;;  %v9110_v44 = vld [vmem:[%s17531_s3 + $0xb0] sm:$0xf] }
 0x402   :  { %v3718_v22 = vadd.f32 %v14409_v12, %v3700_v57  ;;  %v9247_v37 = vor.u32 %v11045_v26, %v9246_v5  ;;  %v9039_v7 = vor.u32 %v10993_v29, %v9038_v47  ;;  %v9102_v23 = vld [vmem:[%s17531_s3 + $0xa0] sm:$0xf]  ;;  %v11009_v57 = vld [vmem:[%s17531_s3 + $0xa4] sm:$0xf0]  ;;  %v9030_v24 = vld [vmem:[%s17531_s3 + $0x10] sm:$0xf] }
 0x403   :  { %v3625_v54 = vadd.f32 %v3624_v40, %v3581_v2  ;;  %6874 = vmatpush.bf16.msra.mxu0 %v9055_v13  ;;  %v3540_v10 = vadd.f32 %v3539_v6, %v3496_v19  ;;  %v9047_v40 = vor.u32 %v10995_v3, %v9046_v30  ;;  %v9111_v6 = vor.u32 %v11011_v8, %v9110_v44  ;;  %v9166_v61 = vld [vmem:[%s17531_s3 + $0x120] sm:$0xf]  ;;  %v11025_v9 = vld [vmem:[%s17531_s3 + $0x124] sm:$0xf0]  ;;  %v10991_v19 = vld [vmem:[%s17531_s3 + $0x14] sm:$0xf0] }
 0x404   :  { %v3732_v46 = vmax.f32 %v3718_v22, 0.0  ;;  %6913 = vmatpush.bf16.msra.mxu3 %v9247_v37  ;;  %v9103_v51 = vor.u32 %v11009_v57, %v9102_v23  ;;  %v9230_v27 = vld [vmem:[%s17531_s3 + $0x1a0] sm:$0xf]  ;;  %v11041_v2 = vld [vmem:[%s17531_s3 + $0x1a4] sm:$0xf0]  ;;  %v9167_v22 = vor.u32 %v11025_v9, %v9166_v61  ;;  %3773 = vst [vmem:[#allocation3 + $0x28] sm:$0xff] %v17614_v36 }
 0x405   :  { %v3669_v63 = vrot.slane %v3625_v54, 1  ;;  %6900 = vmatpush.bf16.msra.mxu2 %v9183_v33  ;;  %6888 = vmatpush.bf16.msra.mxu1 %v9111_v6  ;;  %v3804_v54 = vld [vmem:[#allocation2] sm:$0x2]  ;;  %v9158_v26 = vld [vmem:[%s17531_s3 + $0x110] sm:$0xf]  ;;  %3774 = vst [vmem:[#allocation3 + $0x30] sm:$0xff] %v17614_v36 }
 0x406   :  { %v3746_v20 = vpack.c.bf16 %v3732_v46, %v3732_v46  ;;  %v9031_v46 = vor.u32 %v10991_v19, %v9030_v24  ;;  %v3816_v14 = vld [vmem:[#allocation2] sm:$0x2]  ;;  %v3808_v5 = vunpack.c.l.b16 %v3804_v54  ;;  %v11023_v37 = vld [vmem:[%s17531_s3 + $0x114] sm:$0xf0]  ;;  %v9222_v3 = vld [vmem:[%s17531_s3 + $0x190] sm:$0xf] }
 0x407   :  { %v3670_v25 = vsel %vm3651_vm0, %v3667_v15, %v3669_v63  ;;  %v3793_v15 = vld [vmem:[#allocation2] sm:$0x1]  ;;  %6875 = vmatpush.bf16.msra.mxu0 %v9047_v40  ;;  %v11039_v8 = vld [vmem:[%s17531_s3 + $0x194] sm:$0xf0]  ;;  %v10989_v6 = vld [vmem:[%s17531_s3 + $0x4] sm:$0xf0]  ;;  %v9159_v61 = vor.u32 %v11023_v37, %v9158_v26 }
 0x408   :  { %v3583_v0 = vpop.f32.mrf.mxu2  ;;  %v3497_v55 = vpop.f32.mrf.mxu0  ;;  %3761 = vst [vmem:[#allocation2 + $0x1c] sm:$0xf] %v3746_v20  ;;  %v3701_v62 = vadd.f32 %v3670_v25, %v13775_v53  ;;  %v9175_v53 = vor.u32 %v11027_v58, %v9174_v31  ;;  %6914 = vmatpush.bf16.msra.mxu3 %v9239_v49  ;;  %v3828_v20 = vld [vmem:[#allocation2] sm:$0x4]  ;;  %v14685_v32 = vld [vmem:[#allocation2] sm:$0x8] }
 0x409   :  { %v3627_v52 = vpop.f32.mrf.mxu3  ;;  %v3541_v41 = vpop.f32.mrf.mxu1  ;;  %v3584_v56 = vadd.f32 %v3583_v0, %v3540_v10  ;;  %v3498_v50 = vadd.f32 %v3497_v55, %v3454_v45  ;;  %v9231_v0 = vor.u32 %v11041_v2, %v9230_v27  ;;  %v3797_v55 = vunpack.c.l.b16 %v3793_v15  ;;  %6889 = vmatpush.bf16.msra.mxu1 %v9103_v51  ;;  %v17780_v25 = vld [vmem:[#allocation8_spill] sm:$0xff]  ;;  %v11021_v29 = vld [vmem:[%s17531_s3 + $0x104] sm:$0xf0]  ;;  %v9334_v27 = vld [vmem:[%s17531_s3 + $0x270] sm:$0xf]  ;;  %3775 = vst [vmem:[#allocation3 + $0x38] sm:$0xff] %v17614_v36 }
 0x40a   :  { %6901 = vmatpush.bf16.msra.mxu2 %v9175_v53  ;;  %v3832_v40 = vunpack.c.l.b16 %v3828_v20  ;;  %v9022_v31 = vld [vmem:[%s17531_s3] sm:$0xf]  ;;  %v11037_v9 = vld [vmem:[%s17531_s3 + $0x184] sm:$0xf0]  ;;  %v9398_v24 = vld [vmem:[%s17531_s3 + $0x2f0] sm:$0xf] }
 0x40b   :  { %v14573_v43 = vadd.f32 %v3627_v52, %v3584_v56  ;;  %v3542_v1 = vadd.f32 %v3541_v41, %v3498_v50  ;;  %v3371_v52 = vadd.f32 %v14392_v48, %v3327_v4  ;;  %6876 = vmatpush.bf16.msra.mxu0 %v9039_v7  ;;  %v14640_v48 = vld [vmem:[#allocation2] sm:$0x4]  ;;  %v14646_v50 = vrot.slane %v3797_v55, 1  ;;  %v14747_v26 = vld [vmem:[#allocation2 + $0x4] sm:$0x4]  ;;  %3776 = vst [vmem:[#allocation3 + $0x40] sm:$0xff] %v17614_v36 }
 0x40c   :  { %6915 = vmatpush.bf16.msra.mxu3 %v9231_v0  ;;  %v14670_v4 = vrot.slane %v3808_v5, 2  ;;  %v3844_v15 = vunpack.c.l.b16 %v14640_v48  ;;  %v9086_v58 = vld [vmem:[%s17531_s3 + $0x80] sm:$0xf]  ;;  %v11067_v0 = vld [vmem:[%s17531_s3 + $0x274] sm:$0xf0]  ;;  %v14720_v19 = vrot.slane %v3832_v40, 4 }
 0x40d   :  { %v3671_v11 = vrot.slane %v14573_v43, 1  ;;  %v3415_v10 = vadd.f32 %v14396_v60, %v3371_v52  ;;  %v11007_v60 = vld [vmem:[%s17531_s3 + $0x94] sm:$0xf0]  ;;  %v9150_v47 = vld [vmem:[%s17531_s3 + $0x100] sm:$0xf]  ;;  %v9335_v5 = vor.u32 %v11067_v0, %v9334_v27  ;;  %v17782_v40 = vld [vmem:[#allocation5_spill] sm:$0xff]  ;;  %v3938_v27 = vunpack.c.l.b16 %v14747_v26 }
 0x40e   :  { %6902 = vmatpush.bf16.msra.mxu2 %v9167_v22  ;;  %v9214_v51 = vld [vmem:[%s17531_s3 + $0x180] sm:$0xf]  ;;  %v9023_v22 = vor.u32 %v10989_v6, %v9022_v31  ;;  %v14722_v52 = vld [vmem:[#allocation2 + $0x4] sm:$0x1]  ;;  %v11099_v48 = vld [vmem:[%s17531_s3 + $0x374] sm:$0xf0] }
 0x40f   :  { %v3672_v18 = vsel %vm3651_vm0, %v3669_v63, %v3671_v11  ;;  %6877 = vmatpush.bf16.msra.mxu0 %v9031_v46  ;;  %v9151_v46 = vor.u32 %v11021_v29, %v9150_v47  ;;  %v9318_v29 = vld [vmem:[%s17531_s3 + $0x250] sm:$0xf]  ;;  %3777 = vst [vmem:[#allocation3 + $0x48] sm:$0xff] %v17614_v36 }
 0x410   :  { %v3585_v59 = vpop.f32.mrf.mxu2  ;;  %v3500_v28 = vpop.f32.mrf.mxu0  ;;  %v3702_v13 = vadd.f32 %v3672_v18, %v13778_v39  ;;  %v3719_v39 = vadd.f32 %v14409_v12, %v3701_v62  ;;  %v9223_v18 = vor.u32 %v11039_v8, %v9222_v3  ;;  %v11115_v3 = vld [vmem:[%s17531_s3 + $0x3f4] sm:$0xf0]  ;;  %3778 = vst [vmem:[#allocation3 + $0x50] sm:$0xff] %v17614_v36 }
 0x411   :  { %v3629_v17 = vpop.f32.mrf.mxu3  ;;  %v3586_v42 = vadd.f32 %v3585_v59, %v3542_v1  ;;  %v3544_v35 = vpop.f32.mrf.mxu1  ;;  %v3501_v41 = vadd.f32 %v3500_v28, %v14394_v21  ;;  %v9094_v21 = vld [vmem:[%s17531_s3 + $0x90] sm:$0xf]  ;;  %v3459_v1 = vadd.f32 %v17780_v25, %v3415_v10  ;;  %v14733_v10 = vld [vmem:[#allocation2 + $0x4] sm:$0x2]  ;;  %v9326_v25 = vld [vmem:[%s17531_s3 + $0x260] sm:$0xf] }
 0x412   :  { %v3720_v38 = vadd.f32 %v14409_v12, %v3702_v13  ;;  %v3733_v30 = vmax.f32 %v3719_v39, 0.0  ;;  %v9095_v49 = vor.u32 %v11007_v60, %v9094_v21  ;;  %v14712_v13 = vld [vmem:[#allocation2] sm:$0x8]  ;;  %6903 = vmatpush.bf16.msra.mxu2 %v9159_v61  ;;  %6916 = vmatpush.bf16.msra.mxu3 %v9223_v18  ;;  %v11083_v39 = vld [vmem:[%s17531_s3 + $0x2f4] sm:$0xf0]  ;;  %v3856_v21 = vunpack.c.l.b16 %v14685_v32  ;;  %3779 = vst [vmem:[#allocation3 + $0x58] sm:$0xff] %v17614_v36 }
 0x413   :  { %v14616_v34 = vadd.f32 %v3629_v17, %v3586_v42  ;;  %v3545_v59 = vadd.f32 %v3544_v35, %v3501_v41  ;;  %v3820_v17 = vunpack.c.l.b16 %v3816_v14  ;;  %v17781_v42 = vld [vmem:[#allocation4_spill] sm:$0xff]  ;;  %v9462_v41 = vld [vmem:[%s17531_s3 + $0x370] sm:$0xf]  ;;  %v14735_v14 = vld [vmem:[#allocation2 + $0x4] sm:$0x2]  ;;  %6878 = vmatpush.bf16.msra.mxu0 %v9023_v22  ;;  %v3868_v6 = vunpack.c.l.b16 %v14712_v13 }
 0x414   :  { %v3734_v44 = vmax.f32 %v3720_v38, 0.0  ;;  %6890 = vmatpush.bf16.msra.mxu1 %v9095_v49  ;;  %v9215_v38 = vor.u32 %v11037_v9, %v9214_v51  ;;  %v14745_v60 = vld [vmem:[#allocation2 + $0x4] sm:$0x4]  ;;  %v9463_v37 = vor.u32 %v11099_v48, %v9462_v41  ;;  %v11097_v32 = vld [vmem:[%s17531_s3 + $0x364] sm:$0xf0]  ;;  %v3902_v61 = vunpack.c.l.b16 %v14733_v10  ;;  %v17783_v10 = vld [vmem:[#allocation6_spill] sm:$0xff] }
 0x415   :  { %v3673_v63 = vrot.slane %v14616_v34, 1  ;;  %v14710_v2 = vrot.slane %v3820_v17, 3  ;;  %v14763_v17 = vld [vmem:[#allocation2 + $0x4] sm:$0x8]  ;;  %v3914_v18 = vunpack.c.l.b16 %v14735_v14  ;;  %v3926_v9 = vunpack.c.l.b16 %v14745_v60  ;;  %v3992_v13 = vld [vmem:[#allocation2 + $0x8] sm:$0x2] }
 0x416   :  { %v11406_v16 = vpack.c.bf16 %v3734_v44, %v3733_v30  ;;  %v14765_v34 = vld [vmem:[#allocation2 + $0x4] sm:$0x8]  ;;  %6904 = vmatpush.bf16.msra.mxu2 %v9151_v46  ;;  %6917 = vmatpush.bf16.msra.mxu3 %v9215_v38  ;;  %v4016_v22 = vld [vmem:[#allocation2 + $0x8] sm:$0x4]  ;;  %v4040_v41 = vld [vmem:[#allocation2 + $0x8] sm:$0x8]  ;;  %v3996_v48 = vunpack.c.l.b16 %v3992_v13 }
 0x417   :  { %v3674_v62 = vsel %vm3651_vm0, %v3671_v11, %v3673_v63  ;;  %v11005_v11 = vld [vmem:[%s17531_s3 + $0x84] sm:$0xf0]  ;;  %6923 = vmatpush.bf16.msrb.mxu0 %v9335_v5  ;;  %v14819_v5 = vrot.slane %v3902_v61, 2  ;;  %v14822_v60 = vrot.slane %v3914_v18, 3  ;;  %v14824_v26 = vrot.slane %v3926_v9, 4 }
 0x418   :  { %v3588_v45 = vpop.f32.mrf.mxu2  ;;  %v3502_v33 = vpop.f32.mrf.mxu0  ;;  %v14688_v53 = vadd.f32 %v3674_v62, %v17781_v42  ;;  %11415 = vst [vmem:[#allocation2 + $0x20] sm:$0xff] %v11406_v16   ;;  %v9087_v54 = vor.u32 %v11005_v11, %v9086_v58  ;;  %v11081_v62 = vld [vmem:[%s17531_s3 + $0x2e4] sm:$0xf0]  ;;  %v9518_v16 = vld [vmem:[%s17531_s3 + $0x3e0] sm:$0xf] }
 0x419   :  { %v3632_v56 = vpop.f32.mrf.mxu3  ;;  %v3589_v28 = vadd.f32 %v3588_v45, %v3545_v59  ;;  %v3503_v43 = vadd.f32 %v3502_v33, %v3459_v1  ;;  %v3546_v23 = vpop.f32.mrf.mxu1  ;;  %v14731_v45 = vrot.slane %v3844_v15, 5  ;;  %v9399_v33 = vor.u32 %v11083_v39, %v9398_v24  ;;  %v11065_v1 = vld [vmem:[%s17531_s3 + $0x264] sm:$0xf0]  ;;  %v9390_v15 = vld [vmem:[%s17531_s3 + $0x2e0] sm:$0xf] }
 0x41a   :  { %6891 = vmatpush.bf16.msra.mxu1 %v9087_v54  ;;  %v9327_v58 = vor.u32 %v11065_v1, %v9326_v25  ;;  %v11113_v42 = vld [vmem:[%s17531_s3 + $0x3e4] sm:$0xf0]  ;;  %6949 = vmatpush.bf16.msrb.mxu2 %v9463_v37  ;;  %v9391_v11 = vor.u32 %v11081_v62, %v9390_v15  ;;  %v3962_v54 = vunpack.c.l.b16 %v14765_v34  ;;  %v11079_v34 = vld [vmem:[%s17531_s3 + $0x2d4] sm:$0xf0]  ;;  %v9446_v62 = vld [vmem:[%s17531_s3 + $0x350] sm:$0xf] }
 0x41b   :  { %v14699_v7 = vadd.f32 %v3632_v56, %v3589_v28  ;;  %v3547_v35 = vadd.f32 %v3546_v23, %v3503_v43  ;;  %v9526_v56 = vld [vmem:[%s17531_s3 + $0x3f0] sm:$0xf]  ;;  %v9454_v28 = vld [vmem:[%s17531_s3 + $0x360] sm:$0xf]  ;;  %v3891_v43 = vunpack.c.l.b16 %v14722_v52  ;;  %v11063_v23 = vld [vmem:[%s17531_s3 + $0x254] sm:$0xf0]  ;;  %v9519_v51 = vor.u32 %v11113_v42, %v9518_v16 }
 0x41c   :  { %v9527_v31 = vor.u32 %v11115_v3, %v9526_v56  ;;  %v9455_v47 = vor.u32 %v11097_v32, %v9454_v28  ;;  %6924 = vmatpush.bf16.msrb.mxu0 %v9327_v58  ;;  %v9319_v24 = vor.u32 %v11063_v23, %v9318_v29  ;;  %v3950_v52 = vunpack.c.l.b16 %v14763_v17  ;;  %v4028_v39 = vld [vmem:[#allocation2 + $0x8] sm:$0x4]  ;;  %v9382_v17 = vld [vmem:[%s17531_s3 + $0x2d0] sm:$0xf]  ;;  %v14856_v58 = vld [vmem:[#allocation2 + $0xc] sm:$0x1] }
 0x41d   :  { %v3675_v55 = vrot.slane %v14699_v7, 1  ;;  %v14814_v38 = vrot.slane %v3891_v43, 1  ;;  %v3721_v7 = vadd.f32 %v14409_v12, %v14688_v53  ;;  %v14826_v53 = vrot.slane %v3938_v27, 5  ;;  %v14858_v32 = vld [vmem:[#allocation2 + $0xc] sm:$0x2] }
 0x41e   :  { %6936 = vmatpush.bf16.msrb.mxu1 %v9399_v33  ;;  %6962 = vmatpush.bf16.msrb.mxu3 %v9527_v31  ;;  %v14828_v33 = vrot.slane %v3950_v52, 6  ;;  %v14830_v37 = vrot.slane %v3962_v54, 7  ;;  %v17786_v31 = vld [vmem:[#allocation7_spill] sm:$0xff]  ;;  %v9310_v61 = vld [vmem:[%s17531_s3 + $0x240] sm:$0xf] }
 0x41f   :  { %v3676_v30 = vsel %vm3651_vm0, %v3673_v63, %v3675_v55  ;;  %v14767_v63 = vld [vmem:[#allocation2 + $0x8] sm:$0x1]  ;;  %6950 = vmatpush.bf16.msrb.mxu2 %v9455_v47  ;;  %v3735_v25 = vmax.f32 %v3721_v7, 0.0  ;;  %v11095_v43 = vld [vmem:[%s17531_s3 + $0x354] sm:$0xf0]  ;;  %v9383_v47 = vor.u32 %v11079_v34, %v9382_v17 }
 0x420   :  { %v3590_v57 = vpop.f32.mrf.mxu2  ;;  %v3704_v44 = vadd.f32 %v3676_v30, %v17782_v40  ;;  %v3985_v46 = vunpack.c.l.b16 %v14767_v63  ;;  %v4032_v30 = vunpack.c.l.b16 %v4028_v39  ;;  %6925 = vmatpush.bf16.msrb.mxu0 %v9319_v24  ;;  %v14841_v63 = vrot.slane %v3996_v48, 2  ;;  %v11111_v23 = vld [vmem:[%s17531_s3 + $0x3d4] sm:$0xf0]  ;;  %v11061_v18 = vld [vmem:[%s17531_s3 + $0x244] sm:$0xf0] }
 0x421   :  { %v3591_v20 = vadd.f32 %v3590_v57, %v3547_v35  ;;  %v3634_v59 = vpop.f32.mrf.mxu3  ;;  %v14799_v57 = vrot.slane %v3856_v21, 6  ;;  %v4004_v35 = vld [vmem:[#allocation2 + $0x8] sm:$0x2]  ;;  %v4020_v21 = vunpack.c.l.b16 %v4016_v22  ;;  %v9447_v29 = vor.u32 %v11095_v43, %v9446_v62  ;;  %v14883_v22 = vld [vmem:[#allocation2 + $0xc] sm:$0x4] }
 0x422   :  { %6937 = vmatpush.bf16.msrb.mxu1 %v9391_v11  ;;  %v4008_v56 = vunpack.c.l.b16 %v4004_v35  ;;  %6963 = vmatpush.bf16.msrb.mxu3 %v9519_v51  ;;  %v14832_v3 = vrot.slane %v3985_v46, 1  ;;  %v14852_v28 = vrot.slane %v4032_v30, 5  ;;  %v9311_v27 = vor.u32 %v11061_v18, %v9310_v61  ;;  %v11077_v13 = vld [vmem:[%s17531_s3 + $0x2c4] sm:$0xf0]  ;;  %v4110_v35 = vld [vmem:[#allocation2 + $0xc] sm:$0x4] }
 0x423   :  { %v14770_v8 = vadd.f32 %v3634_v59, %v3591_v20  ;;  %v14812_v20 = vrot.slane %v3868_v6, 7  ;;  %v4044_v59 = vunpack.c.l.b16 %v4040_v41  ;;  %6951 = vmatpush.bf16.msrb.mxu2 %v9447_v29  ;;  %v9438_v52 = vld [vmem:[%s17531_s3 + $0x340] sm:$0xf]  ;;  %v11093_v54 = vld [vmem:[%s17531_s3 + $0x344] sm:$0xf0]  ;;  %v4079_v48 = vunpack.c.l.b16 %v14856_v58 }
 0x424   :  { %v14843_v40 = vrot.slane %v4008_v56, 3  ;;  %17787 = vst [vmem:[#allocation11_spill] sm:$0xff] %v14852_v28  ;;  %v4134_v39 = vld [vmem:[#allocation2 + $0xc] sm:$0x8]  ;;  %6926 = vmatpush.bf16.msrb.mxu0 %v9311_v27  ;;  %v11109_v7 = vld [vmem:[%s17531_s3 + $0x3c4] sm:$0xf0]  ;;  %v4103_v56 = vunpack.c.l.b16 %v14858_v32  ;;  %v4126_v43 = vunpack.c.l.b16 %v14883_v22 }
 0x425   :  { %v3677_v49 = vrot.slane %v14770_v8, 1  ;;  %v4052_v8 = vld [vmem:[#allocation2 + $0x8] sm:$0x8]  ;;  %v14854_v6 = vrot.slane %v4044_v59, 6  ;;  %v11075_v17 = vld [vmem:[%s17531_s3 + $0x2b4] sm:$0xf0]  ;;  %v4138_v61 = vunpack.c.l.b16 %v4134_v39 }
 0x426   :  { %17784 = vst [vmem:[#allocation9_spill] sm:$0xff] %v14843_v40  ;;  %6938 = vmatpush.bf16.msrb.mxu1 %v9383_v47  ;;  %v4056_v46 = vunpack.c.l.b16 %v4052_v8  ;;  %v9430_v8 = vld [vmem:[%s17531_s3 + $0x330] sm:$0xf]  ;;  %v11107_v32 = vld [vmem:[%s17531_s3 + $0x3b4] sm:$0xf0]  ;;  %v14933_v29 = vrot.slane %v4079_v48, 7 }
 0x427   :  { %v3678_v0 = vsel %vm3651_vm0, %v3675_v55, %v3677_v49  ;;  %v3722_v55 = vadd.f32 %v14409_v12, %v3704_v44  ;;  %v14845_v44 = vrot.slane %v4020_v21, 4  ;;  %v3706_v15 = vadd.f32 %v3677_v49, %v17786_v31  ;;  %17788 = vst [vmem:[#allocation12_spill] sm:$0xff] %v14854_v6  ;;  %v9510_v49 = vld [vmem:[%s17531_s3 + $0x3d0] sm:$0xf]  ;;  %v4146_v21 = vld [vmem:[#allocation2 + $0xc] sm:$0x8] }
 0x428   :  { %v3705_v14 = vadd.f32 %v3678_v0, %v17783_v10  ;;  %v9511_v9 = vor.u32 %v11111_v23, %v9510_v49  ;;  %v9439_v10 = vor.u32 %v11093_v54, %v9438_v52  ;;  %v11091_v31 = vld [vmem:[%s17531_s3 + $0x334] sm:$0xf0]  ;;  %v9494_v58 = vld [vmem:[%s17531_s3 + $0x3b0] sm:$0xf]  ;;  %v11057_v47 = vld [vmem:[%s17531_s3 + $0x224] sm:$0xf0]  ;;  %v4150_v27 = vunpack.c.l.b16 %v4146_v21 }
 0x429   :  { %v3736_v1 = vmax.f32 %v3722_v55, 0.0  ;;  %17785 = vst [vmem:[#allocation10_spill] sm:$0xff] %v14845_v44  ;;  %v3724_v11 = vadd.f32 %v14409_v12, %v3706_v15  ;;  %v9302_v55 = vld [vmem:[%s17531_s3 + $0x230] sm:$0xf]  ;;  %v9431_v62 = vor.u32 %v11091_v31, %v9430_v8  ;;  %v9495_v49 = vor.u32 %v11107_v32, %v9494_v58  ;;  %v3805_v48 = vld [vmem:[#allocation2 + $0x1c] sm:$0x2] }
 0x42a   :  { %v3723_v42 = vadd.f32 %v14409_v12, %v3705_v14  ;;  %v9374_v12 = vld [vmem:[%s17531_s3 + $0x2c0] sm:$0xf]  ;;  %6964 = vmatpush.bf16.msrb.mxu3 %v9511_v9  ;;  %6952 = vmatpush.bf16.msrb.mxu2 %v9439_v10  ;;  %v14935_v23 = vrot.slane %v4103_v56, 1  ;;  %v4158_v18 = vld [vmem:[#allocation2 + $0x10] sm:$0x1]  ;;  %v14940_v39 = vrot.slane %v4126_v43, 3 }
 0x42b   :  { %v11411_v16 = vpack.c.bf16 %v3736_v1, %v3735_v25  ;;  %v3738_v0 = vmax.f32 %v3724_v11, 0.0  ;;  %v9375_v24 = vor.u32 %v11077_v13, %v9374_v12  ;;  %v9502_v14 = vld [vmem:[%s17531_s3 + $0x3c0] sm:$0xf]  ;;  %v11059_v25 = vld [vmem:[%s17531_s3 + $0x234] sm:$0xf0]  ;;  %v4162_v54 = vunpack.c.l.b16 %v4158_v18 }
 0x42c   :  { %v3737_v51 = vmax.f32 %v3723_v42, 0.0  ;;  %v9503_v59 = vor.u32 %v11109_v7, %v9502_v14  ;;  %v9366_v1 = vld [vmem:[%s17531_s3 + $0x2b0] sm:$0xf]  ;;  %v9303_v34 = vor.u32 %v11059_v25, %v9302_v55  ;;  %v4114_v42 = vunpack.c.l.b16 %v4110_v35  ;;  %v9294_v11 = vld [vmem:[%s17531_s3 + $0x220] sm:$0xf] }
 0x42d   :  { %11416 = vst [vmem:[#allocation2 + $0x28] sm:$0xff] %v11411_v16   ;;  %v3752_v30 = vpack.c.bf16 %v3738_v0, %v3738_v0  ;;  %6939 = vmatpush.bf16.msrb.mxu1 %v9375_v24  ;;  %v9367_v15 = vor.u32 %v11075_v17, %v9366_v1  ;;  %v14924_v16 = vrot.slane %v4056_v46, 7  ;;  %v9295_v9 = vor.u32 %v11057_v47, %v9294_v11  ;;  %v4193_v12 = vld [vmem:[#allocation2 + $0x10] sm:$0x2]  ;;  %v4204_v13 = vld [vmem:[#allocation2 + $0x10] sm:$0x4] }
 0x42e   :  { %v3751_v41 = vpack.c.bf16 %v3737_v51, %v3737_v51  ;;  %6965 = vmatpush.bf16.msrb.mxu3 %v9503_v59  ;;  %6927 = vmatpush.bf16.msrb.mxu0 %v9303_v34  ;;  %v4170_v51 = vld [vmem:[#allocation2 + $0x10] sm:$0x1]  ;;  %v4216_v35 = vld [vmem:[#allocation2 + $0x10] sm:$0x4]  ;;  %v4228_v22 = vld [vmem:[#allocation2 + $0x10] sm:$0x8]  ;;  %v4197_v7 = vunpack.c.l.b16 %v4193_v12  ;;  %v4208_v55 = vunpack.c.l.b16 %v4204_v13 }
 0x42f   :  { %3767 = vst [vmem:[#allocation2 + $0x34] sm:$0x1] %v3752_v30  ;;  %v4240_v0 = vld [vmem:[#allocation2 + $0x10] sm:$0x8]  ;;  %v3782_v24 = vld [vmem:[#allocation2 + $0x1c] sm:$0x1]  ;;  %6953 = vmatpush.bf16.msrb.mxu2 %v9431_v62  ;;  %v4174_v46 = vunpack.c.l.b16 %v4170_v51  ;;  %v4220_v30 = vunpack.c.l.b16 %v4216_v35  ;;  %v4232_v59 = vunpack.c.l.b16 %v4228_v22 }
 0x430   :  { %3766 = vst [vmem:[#allocation2 + $0x30] sm:$0xf] %v3751_v41  ;;  %v14937_v52 = vrot.slane %v4114_v42, 2  ;;  %v4346_v41 = vld [vmem:[#allocation2 + $0x18] sm:$0x1]  ;;  %v14942_v14 = vrot.slane %v4138_v61, 4  ;;  %v3786_v25 = vunpack.c.l.b16 %v3782_v24  ;;  %v4244_v34 = vunpack.c.l.b16 %v4240_v0 }
 0x431   :  { %17789 = vst [vmem:[#allocation13_spill] sm:$0xff] %v14924_v16  ;;  %6940 = vmatpush.bf16.msrb.mxu1 %v9367_v15  ;;  %v4358_v10 = vld [vmem:[#allocation2 + $0x18] sm:$0x1]  ;;  %v14944_v21 = vrot.slane %v4150_v27, 5  ;;  %v3817_v1 = vld [vmem:[#allocation2 + $0x1c] sm:$0x2]  ;;  %v4350_v8 = vunpack.c.l.b16 %v4346_v41  ;;  %v3809_v42 = vunpack.c.l.b16 %v3805_v48 }
 0x432   :  { %6966 = vmatpush.bf16.msrb.mxu3 %v9495_v49  ;;  %6928 = vmatpush.bf16.msrb.mxu0 %v9295_v9  ;;  %v4362_v31 = vunpack.c.l.b16 %v4358_v10  ;;  %v14946_v62 = vrot.slane %v4162_v54, 6  ;;  %v14948_v58 = vrot.slane %v4174_v46, 7  ;;  %v3794_v32 = vld [vmem:[#allocation2 + $0x1c] sm:$0x1]  ;;  %v3781_v49 = vld [vmem:[#allocation2] sm:$0x1]  ;;  %v3821_v18 = vunpack.c.l.b16 %v3817_v1 }
 0x433   :  { %v14950_v11 = vld [vmem:[#allocation2 + $0xc] sm:$0x2]  ;;  %v14952_v47 = vrot.slane %v4197_v7, 1  ;;  %v14954_v61 = vrot.slane %v4208_v55, 2  ;;  %v14956_v9 = vrot.slane %v4220_v30, 3  ;;  %v14958_v27 = vrot.slane %v4232_v59, 4 }
 0x434   :  { %v4076_v56 = vld [vmem:[#allocation2 + $0x28] sm:$0x1]  ;;  %v4089_v17 = vld [vmem:[#allocation2 + $0x28] sm:$0x2]  ;;  %v4111_v15 = vld [vmem:[#allocation2 + $0x28] sm:$0x4]  ;;  %v3798_v46 = vunpack.c.l.b16 %v3794_v32  ;;  %v3785_v10 = vunpack.c.l.b16 %v3781_v49  ;;  %v4092_v7 = vunpack.c.l.b16 %v14950_v11 }
 0x435   :  { %v4080_v43 = vunpack.c.l.b16 %v4076_v56  ;;  %v4093_v51 = vunpack.c.l.b16 %v4089_v17  ;;  %v3787_v12 = vrot.slane %v3786_v25, 7  ;;  %v4115_v13 = vunpack.c.l.b16 %v4111_v15  ;;  %v14962_v22 = vld [vmem:[#allocation2 + $0x14] sm:$0x1]  ;;  %v9358_v41 = vld [vmem:[%s17531_s3 + $0x2a0] sm:$0xf] }
 0x436   :  { %v14960_v35 = vrot.slane %v4244_v34, 5  ;;  %v14964_v0 = vld [vmem:[#allocation2 + $0x14] sm:$0x1]  ;;  %v4352_v24 = vrot.slane %v4350_v8, 6  ;;  %v14966_v54 = vrot.slane %v4362_v31, 7  ;;  %v14972_v55 = vrot.slane %v3809_v42, 1 }
 0x437   :  { %v4082_v48 = vrot.slane %v4080_v43, 6  ;;  %v4347_v56 = vld [vmem:[#allocation2 + $0x34] sm:$0x1]  ;;  %v14974_v59 = vld [vmem:[#allocation2 + $0x14] sm:$0x2]  ;;  %v14976_v25 = vrot.slane %v3821_v18, 2  ;;  %v14987_v32 = vsel %vm3788_vm1, %v3787_v12, %v3785_v10  ;;  %v14999_v18 = vsel %vm3788_vm1, %v3798_v46, %v14646_v50 }
 0x438   :  { %v4359_v30 = vld [vmem:[#allocation2 + $0x34] sm:$0x1]  ;;  %v4094_v1 = vrot.slane %v4093_v51, 7  ;;  %v14978_v17 = vld [vmem:[#allocation2 + $0x28] sm:$0x2]  ;;  %v4351_v34 = vunpack.c.l.b16 %v4347_v56  ;;  %v14989_v42 = vrot.slane %v4115_v13, 1 }
 0x439   :  { %v4363_v8 = vunpack.c.l.b16 %v4359_v30  ;;  %v11073_v31 = vld [vmem:[%s17531_s3 + $0x2a4] sm:$0xf0]  ;;  %v9422_v15 = vld [vmem:[%s17531_s3 + $0x320] sm:$0xf]  ;;  %v15001_v51 = vld [vmem:[#allocation2 + $0x1c] sm:$0x4] }
 0x43a   :  { %v9359_v43 = vor.u32 %v11073_v31, %v9358_v41  ;;  %v11089_v49 = vld [vmem:[%s17531_s3 + $0x324] sm:$0xf0]  ;;  %v9486_v11 = vld [vmem:[%s17531_s3 + $0x3a0] sm:$0xf]  ;;  %v4353_v12 = vrot.slane %v4351_v34, 5  ;;  %v3833_v44 = vunpack.c.l.b16 %v15001_v51  ;;  %v3812_v51 = vsel %vm3788_vm1, %v14972_v55, %v14670_v4 }
 0x43b   :  { %v4365_v10 = vrot.slane %v4363_v8, 6  ;;  %v9423_v13 = vor.u32 %v11089_v49, %v9422_v15  ;;  %v11105_v41 = vld [vmem:[%s17531_s3 + $0x3a4] sm:$0xf0]  ;;  %v9286_v56 = vld [vmem:[%s17531_s3 + $0x210] sm:$0xf]  ;;  %v4084_v49 = vsel %vm4083_vm2, %v4082_v48, %v14933_v29  ;;  %v3790_v29 = vpack.c.b16 %v14987_v32, %v14987_v32 }
 0x43c   :  { %v15011_v36 = vld [vmem:[#allocation2 + $0x1c] sm:$0x4]  ;;  %v15013_v50 = vld [vmem:[#allocation2 + $0x1c] sm:$0x8]  ;;  %6941 = vmatpush.bf16.msrb.mxu1 %v9359_v43  ;;  %v9487_v46 = vor.u32 %v11105_v41, %v9486_v11  ;;  %v11055_v34 = vld [vmem:[%s17531_s3 + $0x214] sm:$0xf0]  ;;  %v4095_v48 = vsel %vm4083_vm2, %v4094_v1, %v4092_v7  ;;  %v4354_v1 = vsel %vm4083_vm2, %v4353_v12, %v4352_v24 }
 0x43d   :  { %v9350_v8 = vld [vmem:[%s17531_s3 + $0x290] sm:$0xf]  ;;  %v11071_v15 = vld [vmem:[%s17531_s3 + $0x294] sm:$0xf0]  ;;  %v15026_v31 = vld [vmem:[#allocation2 + $0x28] sm:$0x4]  ;;  %6954 = vmatpush.bf16.msrb.mxu2 %v9423_v13  ;;  %v9287_v43 = vor.u32 %v11055_v34, %v9286_v56  ;;  %v3801_v56 = vpack.c.b16 %v14999_v18, %v14999_v18  ;;  %v4085_v13 = vpack.c.b16 %v4084_v49, %v4084_v49  ;;  %v4366_v24 = vsel %vm4083_vm2, %v4365_v10, %v14966_v54 }
 0x43e   :  { %v9351_v11 = vor.u32 %v11071_v15, %v9350_v8  ;;  %v9414_v41 = vld [vmem:[%s17531_s3 + $0x310] sm:$0xf]  ;;  %v11087_v30 = vld [vmem:[%s17531_s3 + $0x314] sm:$0xf0]  ;;  %v3865_v34 = vld [vmem:[#allocation2 + $0x1c] sm:$0x8]  ;;  %v4104_v8 = vunpack.c.l.b16 %v14978_v17  ;;  %6967 = vmatpush.bf16.msrb.mxu3 %v9487_v46  ;;  %v4096_v49 = vpack.c.b16 %v4095_v48, %v4095_v48  ;;  %v3845_v54 = vunpack.c.l.b16 %v15011_v36 }
 0x43f   :  { %v9478_v16 = vld [vmem:[%s17531_s3 + $0x390] sm:$0xf]  ;;  %v4135_v15 = vld [vmem:[#allocation2 + $0x28] sm:$0x8]  ;;  %v9415_v6 = vor.u32 %v11087_v30, %v9414_v41  ;;  %v11103_v28 = vld [vmem:[%s17531_s3 + $0x394] sm:$0xf0]  ;;  %6929 = vmatpush.bf16.msrb.mxu0 %v9287_v43  ;;  %v3857_v10 = vunpack.c.l.b16 %v15013_v50  ;;  %v3869_v40 = vunpack.c.l.b16 %v3865_v34  ;;  %v4367_v55 = vpack.c.b16 %v4366_v24, %v4366_v24 }
 0x440   :  { %v9278_v32 = vld [vmem:[%s17531_s3 + $0x200] sm:$0xf]  ;;  %v11053_v7 = vld [vmem:[%s17531_s3 + $0x204] sm:$0xf0]  ;;  %v9479_v18 = vor.u32 %v11103_v28, %v9478_v16  ;;  %6942 = vmatpush.bf16.msrb.mxu1 %v9351_v11  ;;  %3792 = vst [vmem:[#allocation3] sm:$0x1] %v3790_v29  ;;  %v4139_v4 = vunpack.c.l.b16 %v4135_v15  ;;  %v4106_v36 = vsel %vm4083_vm2, %v4104_v8, %v14935_v23  ;;  %v17791_v34 = vunpack.c.l.b16 %v14964_v0 }
 0x441   :  { %v9279_v17 = vor.u32 %v11053_v7, %v9278_v32  ;;  %v9342_v30 = vld [vmem:[%s17531_s3 + $0x280] sm:$0xf]  ;;  %v11069_v46 = vld [vmem:[%s17531_s3 + $0x284] sm:$0xf0]  ;;  %6955 = vmatpush.bf16.msrb.mxu2 %v9415_v6  ;;  %v3824_v7 = vsel %vm3788_vm1, %v14976_v25, %v14710_v2  ;;  %3803 = vst [vmem:[#allocation3 + $0x4] sm:$0x1] %v3801_v56  ;;  %v3813_v2 = vpack.c.b16 %v3812_v51, %v3812_v51  ;;  %v17793_v0 = vunpack.c.l.b16 %v14974_v59 }
 0x442   :  { %v9406_v41 = vld [vmem:[%s17531_s3 + $0x300] sm:$0xf]  ;;  %v9343_v28 = vor.u32 %v11069_v46, %v9342_v30  ;;  %v11085_v16 = vld [vmem:[%s17531_s3 + $0x304] sm:$0xf0]  ;;  %v4127_v30 = vunpack.c.l.b16 %v15026_v31  ;;  %v4355_v46 = vpack.c.b16 %v4354_v1, %v4354_v1  ;;  %6968 = vmatpush.bf16.msrb.mxu3 %v9479_v18  ;;  %4087 = vst [vmem:[#allocation3] sm:$0x2] %v4085_v13  ;;  %v4118_v25 = vsel %vm4083_vm2, %v14989_v42, %v14937_v52 }
 0x443   :  { %v9470_v12 = vld [vmem:[%s17531_s3 + $0x380] sm:$0xf]  ;;  %v11101_v43 = vld [vmem:[%s17531_s3 + $0x384] sm:$0xf0]  ;;  %v9407_v32 = vor.u32 %v11085_v16, %v9406_v41  ;;  %6930 = vmatpush.bf16.msrb.mxu0 %v9279_v17  ;;  %v3835_v6 = vrot.slane %v3833_v44, 3  ;;  %v17790_v31 = vunpack.c.l.b16 %v14962_v22  ;;  %v15095_v13 = vrot.slane %v17791_v34, 7 }
 0x444   :  { %v4147_v11 = vld [vmem:[#allocation2 + $0x28] sm:$0x8]  ;;  %v9471_v48 = vor.u32 %v11101_v43, %v9470_v12  ;;  %v4159_v29 = vld [vmem:[#allocation2 + $0x2c] sm:$0x1]  ;;  %6943 = vmatpush.bf16.msrb.mxu1 %v9343_v28  ;;  %4098 = vst [vmem:[#allocation3 + $0x4] sm:$0x2] %v4096_v49  ;;  %v3825_v23 = vpack.c.b16 %v3824_v7, %v3824_v7  ;;  %v4107_v17 = vpack.c.b16 %v4106_v36, %v4106_v36 }
 0x445   :  { %v4151_v50 = vunpack.c.l.b16 %v4147_v11  ;;  %v15091_v56 = vrot.slane %v17790_v31, 6  ;;  %v3847_v15 = vrot.slane %v3845_v54, 4  ;;  %6956 = vmatpush.bf16.msrb.mxu2 %v9407_v32  ;;  %v17792_v44 = vmov 0   ;;  %v3877_v1 = vld [vmem:[#allocation2 + $0x20] sm:$0x1] }
 0x446   :  { %3780 = vst [vmem:[#allocation3 + $0x60] sm:$0xf] %v17792_v44  ;;  %v3859_v8 = vrot.slane %v3857_v10, 5  ;;  %v4129_v18 = vrot.slane %v4127_v30, 2  ;;  %6969 = vmatpush.bf16.msrb.mxu3 %v9471_v48  ;;  %v3871_v52 = vrot.slane %v3869_v40, 6  ;;  %v4141_v42 = vrot.slane %v4139_v4, 3 }
 0x447   :  { %4357 = vst [vmem:[#allocation3 + $0x5c] sm:$0x2] %v4355_v46  ;;  %v4163_v22 = vunpack.c.l.b16 %v4159_v29  ;;  %v4119_v41 = vpack.c.b16 %v4118_v25, %v4118_v25  ;;  %v15100_v24 = vrot.slane %v17793_v0, 1  ;;  %v3836_v28 = vsel %vm3788_vm1, %v3835_v6, %v14720_v19  ;;  %v15104_v16 = vld [vmem:[#allocation2 + $0x20] sm:$0x2] }
 0x448   :  { %4369 = vst [vmem:[#allocation3 + $0x60] sm:$0x2] %v4367_v55  ;;  %v4153_v12 = vrot.slane %v4151_v50, 4  ;;  %v3848_v43 = vsel %vm3788_vm1, %v3847_v15, %v14731_v45  ;;  %v3881_v49 = vunpack.c.l.b16 %v3877_v1  ;;  %v9590_v40 = vld [vmem:[%s17531_s3 + $0x470] sm:$0xf]  ;;  %v15116_v19 = vsel %vm3788_vm1, %v3859_v8, %v14799_v57 }
 0x449   :  { %3815 = vst [vmem:[#allocation3 + $0x8] sm:$0x1] %v3813_v2  ;;  %v11131_v59 = vld [vmem:[%s17531_s3 + $0x474] sm:$0xf0]  ;;  %v9654_v51 = vld [vmem:[%s17531_s3 + $0x4f0] sm:$0xf]  ;;  %v4130_v54 = vsel %vm4083_vm2, %v4129_v18, %v14940_v39  ;;  %v15128_v10 = vsel %vm3788_vm1, %v3871_v52, %v14812_v20  ;;  %v3837_v57 = vpack.c.b16 %v3836_v28, %v3836_v28  ;;  %v4142_v7 = vsel %vm4083_vm2, %v4141_v42, %v14942_v14 }
 0x44a   :  { %3827 = vst [vmem:[#allocation3 + $0xc] sm:$0x1] %v3825_v23  ;;  %v11147_v45 = vld [vmem:[%s17531_s3 + $0x4f4] sm:$0xf0]  ;;  %v4165_v11 = vrot.slane %v4163_v22, 5  ;;  %v3903_v46 = vunpack.c.l.b16 %v15104_v16  ;;  %v3849_v55 = vpack.c.b16 %v3848_v43, %v3848_v43  ;;  %v15135_v36 = vrot.slane %v3881_v49, 7 }
 0x44b   :  { %4109 = vst [vmem:[#allocation3 + $0x8] sm:$0x2] %v4107_v17  ;;  %v4370_v32 = vld [vmem:[#allocation3] sm:$0xff]  ;;  %v15132_v30 = vld [vmem:[#allocation2 + $0x4] sm:$0x1]  ;;  %v9591_v6 = vor.u32 %v11131_v59, %v9590_v40  ;;  %v9655_v50 = vor.u32 %v11147_v45, %v9654_v51  ;;  %v4131_v14 = vpack.c.b16 %v4130_v54, %v4130_v54  ;;  %v4143_v8 = vpack.c.b16 %v4142_v7, %v4142_v7 }
 0x44c   :  { %4121 = vst [vmem:[#allocation3 + $0xc] sm:$0x2] %v4119_v41  ;;  %v4796_v48 = vunpack.c.l.b16 %v4370_v32  ;;  %v4797_v4 = vunpack.c.h.b16 %v4370_v32  ;;  %v15137_v39 = vld [vmem:[#allocation2 + $0x20] sm:$0x2]  ;;  %v15139_v20 = vld [vmem:[#allocation2 + $0x20] sm:$0x4]  ;;  %v4154_v1 = vsel %vm4083_vm2, %v4153_v12, %v14944_v21  ;;  %v3861_v21 = vpack.c.b16 %v15116_v19, %v15116_v19 }
 0x44d   :  { %v9582_v29 = vld [vmem:[%s17531_s3 + $0x460] sm:$0xf]  ;;  %v15146_v25 = vld [vmem:[#allocation2 + $0x2c] sm:$0x1]  ;;  %v11129_v15 = vld [vmem:[%s17531_s3 + $0x464] sm:$0xf0]  ;;  %v4166_v22 = vsel %vm4083_vm2, %v4165_v11, %v14946_v62  ;;  %v3880_v41 = vunpack.c.l.b16 %v15132_v30  ;;  %v3873_v16 = vpack.c.b16 %v15128_v10, %v15128_v10  ;;  %v4155_v19 = vpack.c.b16 %v4154_v1, %v4154_v1 }
 0x44e   :  { %v15144_v2 = vld [vmem:[#allocation2 + $0x20] sm:$0x4]  ;;  %v15148_v31 = vpack.c.b16 %v4796_v48, %v4796_v48  ;;  %v15150_v34 = vpack.c.b16 %v4797_v4, %v4797_v4  ;;  %v11145_v23 = vld [vmem:[%s17531_s3 + $0x4e4] sm:$0xf0]  ;;  %v15163_v18 = vld [vmem:[#allocation2 + $0x2c] sm:$0x2]  ;;  %v9583_v43 = vor.u32 %v11129_v15, %v9582_v29  ;;  %v3915_v45 = vunpack.c.l.b16 %v15137_v39 }
 0x44f   :  { %v9646_v44 = vld [vmem:[%s17531_s3 + $0x4e0] sm:$0xf]  ;;  %v15168_v17 = vld [vmem:[%s17531_s3 + $0x570] sm:$0xf]  ;;  %v15173_v52 = vld [vmem:[%s17531_s3 + $0x574] sm:$0xf0]  ;;  %v3927_v54 = vunpack.c.l.b16 %v15139_v20  ;;  %v4167_v32 = vpack.c.b16 %v4166_v22, %v4166_v22  ;;  %v4175_v7 = vunpack.c.l.b16 %v15146_v25  ;;  %v4187_v20 = vunpack.c.l.b16 %v15163_v18 }
 0x450   :  { %v15178_v42 = vld [vmem:[%s17531_s3 + $0x5f0] sm:$0xf]  ;;  %3839 = vst [vmem:[#allocation3 + $0x10] sm:$0x1] %v3837_v57  ;;  %6879 = vmatmul.bf16.vlgmr.msra.gmra.mxu0 %v15148_v31  ;;  %6892 = vmatmul.bf16.vlgmr.msra.gmra.mxu1 %v15150_v34  ;;  %v11179_v0 = vld [vmem:[%s17531_s3 + $0x5f4] sm:$0xf0]  ;;  %v9647_v49 = vor.u32 %v11145_v23, %v9646_v44  ;;  %v3939_v57 = vunpack.c.l.b16 %v15144_v2 }
 0x451   :  { %v15193_v28 = vld [vmem:[%s17531_s3 + $0x450] sm:$0xf]  ;;  %3851 = vst [vmem:[#allocation3 + $0x14] sm:$0x1] %v3849_v55  ;;  %v15197_v62 = vld [vmem:[#allocation2 + $0x20] sm:$0x1]  ;;  %6975 = vmatpush.bf16.msra.mxu0 %v9591_v6  ;;  %6988 = vmatpush.bf16.msra.mxu1 %v9655_v50  ;;  %v9719_v6 = vor.u32 %v15173_v52, %v15168_v17  ;;  %v9783_v50 = vor.u32 %v11179_v0, %v15178_v42 }
 0x452   :  { %v15199_v12 = vld [vmem:[#allocation2 + $0x20] sm:$0x8]  ;;  %v11127_v40 = vld [vmem:[%s17531_s3 + $0x454] sm:$0xf0]  ;;  %v9638_v59 = vld [vmem:[%s17531_s3 + $0x4d0] sm:$0xf]  ;;  %v3892_v1 = vunpack.c.l.b16 %v15197_v62 }
 0x453   :  { %4133 = vst [vmem:[#allocation3 + $0x10] sm:$0x2] %v4131_v14  ;;  %v15207_v51 = vrot.slane %v3903_v46, 1  ;;  %v4371_v10 = vld [vmem:[#allocation3 + $0x8] sm:$0xff]  ;;  %v11143_v11 = vld [vmem:[%s17531_s3 + $0x4d4] sm:$0xf0]  ;;  %v9575_v2 = vor.u32 %v11127_v40, %v15193_v28  ;;  %v3951_v18 = vunpack.c.l.b16 %v15199_v12  ;;  %v15261_v28 = vsel %vm3788_vm1, %v15135_v36, %v3880_v41 }
 0x454   :  { %4145 = vst [vmem:[#allocation3 + $0x14] sm:$0x2] %v4143_v8  ;;  %v15216_v30 = vld [vmem:[#allocation2 + $0x2c] sm:$0x4]  ;;  %v4798_v48 = vunpack.c.l.b16 %v4371_v10  ;;  %v4799_v46 = vunpack.c.h.b16 %v4371_v10  ;;  %v9710_v4 = vld [vmem:[%s17531_s3 + $0x560] sm:$0xf]  ;;  %v9639_v44 = vor.u32 %v11143_v11, %v9638_v59 }
 0x455   :  { %v11161_v55 = vld [vmem:[%s17531_s3 + $0x564] sm:$0xf0]  ;;  %3863 = vst [vmem:[#allocation3 + $0x18] sm:$0x1] %v3861_v21  ;;  %v15224_v39 = vld [vmem:[#allocation2 + $0x10] sm:$0x2]  ;;  %6976 = vmatpush.bf16.msra.mxu0 %v9583_v43  ;;  %6989 = vmatpush.bf16.msra.mxu1 %v9647_v49  ;;  %v4209_v62 = vunpack.c.l.b16 %v15216_v30  ;;  %v3894_v30 = vsel %vm3788_vm1, %v3892_v1, %v14814_v38  ;;  %v15302_v38 = vsel %vm3788_vm1, %v15207_v51, %v14819_v5 }
 0x456   :  { %v9774_v29 = vld [vmem:[%s17531_s3 + $0x5e0] sm:$0xf]  ;;  %v11177_v14 = vld [vmem:[%s17531_s3 + $0x5e4] sm:$0xf0]  ;;  %3875 = vst [vmem:[#allocation3 + $0x1c] sm:$0x1] %v3873_v16  ;;  %v15237_v25 = vpack.c.b16 %v4798_v48, %v4798_v48  ;;  %v15239_v15 = vpack.c.b16 %v4799_v46, %v4799_v46  ;;  %v9711_v12 = vor.u32 %v11161_v55, %v9710_v4  ;;  %v4186_v59 = vunpack.c.l.b16 %v15224_v39 }
 0x457   :  { %v9566_v23 = vld [vmem:[%s17531_s3 + $0x440] sm:$0xf]  ;;  %v11125_v8 = vld [vmem:[%s17531_s3 + $0x444] sm:$0xf0]  ;;  %4157 = vst [vmem:[#allocation3 + $0x18] sm:$0x2] %v4155_v19  ;;  %v9775_v43 = vor.u32 %v11177_v14, %v9774_v29 }
 0x458   :  { %v9630_v17 = vld [vmem:[%s17531_s3 + $0x4c0] sm:$0xf]  ;;  %v11141_v52 = vld [vmem:[%s17531_s3 + $0x4c4] sm:$0xf0]  ;;  %4169 = vst [vmem:[#allocation3 + $0x1c] sm:$0x2] %v4167_v32  ;;  %6905 = vmatmul.bf16.vlgmr.msra.gmra.mxu2 %v15237_v25  ;;  %6918 = vmatmul.bf16.vlgmr.msra.gmra.mxu3 %v15239_v15 }
 0x459   :  { %v3917_v42 = vrot.slane %v3915_v45, 2  ;;  %v15255_v21 = vrot.slane %v3927_v54, 3  ;;  %v4177_v22 = vrot.slane %v4175_v7, 6  ;;  %v4194_v0 = vld [vmem:[#allocation2 + $0x2c] sm:$0x2]  ;;  %v4188_v16 = vrot.slane %v4187_v20, 7  ;;  %7001 = vmatpush.bf16.msra.mxu2 %v9719_v6  ;;  %7014 = vmatpush.bf16.msra.mxu3 %v9783_v50 }
 0x45a   :  { %v9702_v49 = vld [vmem:[%s17531_s3 + $0x550] sm:$0xf]  ;;  %v11159_v40 = vld [vmem:[%s17531_s3 + $0x554] sm:$0xf0]  ;;  %v15271_v19 = vrot.slane %v3939_v57, 4  ;;  %6977 = vmatpush.bf16.msra.mxu0 %v9575_v2  ;;  %6990 = vmatpush.bf16.msra.mxu1 %v9639_v44  ;;  %v9567_v45 = vor.u32 %v11125_v8, %v9566_v23  ;;  %v9631_v54 = vor.u32 %v11141_v52, %v9630_v17  ;;  %v15279_v11 = vrot.slane %v3951_v18, 5 }
 0x45b   :  { %v9766_v36 = vld [vmem:[%s17531_s3 + $0x5d0] sm:$0xf]  ;;  %v11175_v41 = vld [vmem:[%s17531_s3 + $0x5d4] sm:$0xf0]  ;;  %v4372_v10 = vld [vmem:[#allocation3 + $0x10] sm:$0xff]  ;;  %v4198_v32 = vunpack.c.l.b16 %v4194_v0  ;;  %v3884_v7 = vpack.c.b16 %v15261_v28, %v15261_v28  ;;  %v4178_v20 = vsel %vm4083_vm2, %v4177_v22, %v14948_v58  ;;  %v4211_v6 = vrot.slane %v4209_v62, 1 }
 0x45c   :  { %v9558_v57 = vld [vmem:[%s17531_s3 + $0x430] sm:$0xf]  ;;  %v4800_v48 = vunpack.c.l.b16 %v4372_v10  ;;  %v4801_v46 = vunpack.c.h.b16 %v4372_v10  ;;  %v11123_v4 = vld [vmem:[%s17531_s3 + $0x434] sm:$0xf0]  ;;  %v9703_v50 = vor.u32 %v11159_v40, %v9702_v49  ;;  %v9767_v29 = vor.u32 %v11175_v41, %v9766_v36  ;;  %v9694_v14 = vld [vmem:[%s17531_s3 + $0x540] sm:$0xf] }
 0x45d   :  { %v9622_v55 = vld [vmem:[%s17531_s3 + $0x4b0] sm:$0xf]  ;;  %v11139_v39 = vld [vmem:[%s17531_s3 + $0x4b4] sm:$0xf0]  ;;  %7002 = vmatpush.bf16.msra.mxu2 %v9711_v12  ;;  %7015 = vmatpush.bf16.msra.mxu3 %v9775_v43  ;;  %v4189_v2 = vsel %vm4083_vm2, %v4188_v16, %v4186_v59  ;;  %v11157_v58 = vld [vmem:[%s17531_s3 + $0x544] sm:$0xf0]  ;;  %v3895_v44 = vpack.c.b16 %v3894_v30, %v3894_v30  ;;  %v3918_v23 = vsel %vm3788_vm1, %v3917_v42, %v14822_v60 }
 0x45e   :  { %6978 = vmatpush.bf16.msra.mxu0 %v9567_v45  ;;  %6991 = vmatpush.bf16.msra.mxu1 %v9631_v54  ;;  %v9758_v5 = vld [vmem:[%s17531_s3 + $0x5c0] sm:$0xf]  ;;  %v11173_v51 = vld [vmem:[%s17531_s3 + $0x5c4] sm:$0xf0]  ;;  %v9559_v1 = vor.u32 %v11123_v4, %v9558_v57  ;;  %v9623_v18 = vor.u32 %v11139_v39, %v9622_v55  ;;  %v4179_v52 = vpack.c.b16 %v4178_v20, %v4178_v20  ;;  %v9686_v40 = vld [vmem:[%s17531_s3 + $0x530] sm:$0xf] }
 0x45f   :  { %v4373_v8 = vld [vmem:[#allocation3 + $0x18] sm:$0xff]  ;;  %v9550_v17 = vld [vmem:[%s17531_s3 + $0x420] sm:$0xf]  ;;  %v3907_v22 = vpack.c.b16 %v15302_v38, %v15302_v38  ;;  %v15324_v0 = vpack.c.b16 %v4800_v48, %v4800_v48  ;;  %v15326_v28 = vpack.c.b16 %v4801_v46, %v4801_v46  ;;  %v11121_v16 = vld [vmem:[%s17531_s3 + $0x424] sm:$0xf0]  ;;  %v4190_v62 = vpack.c.b16 %v4189_v2, %v4189_v2 }
 0x460   :  { %v9614_v60 = vld [vmem:[%s17531_s3 + $0x4a0] sm:$0xf]  ;;  %v11137_v42 = vld [vmem:[%s17531_s3 + $0x4a4] sm:$0xf0]  ;;  %v4200_v12 = vsel %vm4083_vm2, %v4198_v32, %v14952_v47  ;;  %v9695_v43 = vor.u32 %v11157_v58, %v9694_v14  ;;  %v9759_v49 = vor.u32 %v11173_v51, %v9758_v5  ;;  %v11155_v59 = vld [vmem:[%s17531_s3 + $0x534] sm:$0xf0]  ;;  %v4212_v36 = vsel %vm4083_vm2, %v4211_v6, %v14954_v61 }
 0x461   :  { %7003 = vmatpush.bf16.msra.mxu2 %v9703_v50  ;;  %7016 = vmatpush.bf16.msra.mxu3 %v9767_v29  ;;  %3886 = vst [vmem:[#allocation3 + $0x20] sm:$0x1] %v3884_v7  ;;  %v4802_v47 = vunpack.c.l.b16 %v4373_v8  ;;  %v4803_v41 = vunpack.c.h.b16 %v4373_v8  ;;  %v9750_v45 = vld [vmem:[%s17531_s3 + $0x5b0] sm:$0xf]  ;;  %v11171_v54 = vld [vmem:[%s17531_s3 + $0x5b4] sm:$0xf0]  ;;  %v3919_v10 = vpack.c.b16 %v3918_v23, %v3918_v23  ;;  %v9551_v32 = vor.u32 %v11121_v16, %v9550_v17 }
 0x462   :  { %6931 = vmatmul.bf16.vlgmr.msrb.gmra.mxu0 %v15324_v0  ;;  %6944 = vmatmul.bf16.vlgmr.msrb.gmra.mxu1 %v15326_v28  ;;  %3897 = vst [vmem:[#allocation3 + $0x24] sm:$0x1] %v3895_v44  ;;  %v9615_v61 = vor.u32 %v11137_v42, %v9614_v60  ;;  %v9542_v57 = vld [vmem:[%s17531_s3 + $0x410] sm:$0xf]  ;;  %v11119_v7 = vld [vmem:[%s17531_s3 + $0x414] sm:$0xf0]  ;;  %v4201_v30 = vpack.c.b16 %v4200_v12, %v4200_v12 }
 0x463   :  { %6979 = vmatpush.bf16.msra.mxu0 %v9559_v1  ;;  %6992 = vmatpush.bf16.msra.mxu1 %v9623_v18  ;;  %4181 = vst [vmem:[#allocation3 + $0x20] sm:$0x2] %v4179_v52  ;;  %v9678_v48 = vld [vmem:[%s17531_s3 + $0x520] sm:$0xf]  ;;  %v9606_v46 = vld [vmem:[%s17531_s3 + $0x490] sm:$0xf]  ;;  %v4213_v55 = vpack.c.b16 %v4212_v36, %v4212_v36  ;;  %v9687_v39 = vor.u32 %v11155_v59, %v9686_v40 }
 0x464   :  { %v11135_v4 = vld [vmem:[%s17531_s3 + $0x494] sm:$0xf0]  ;;  %4192 = vst [vmem:[#allocation3 + $0x24] sm:$0x2] %v4190_v62  ;;  %v9751_v20 = vor.u32 %v11171_v54, %v9750_v45  ;;  %v11153_v38 = vld [vmem:[%s17531_s3 + $0x524] sm:$0xf0]  ;;  %v15378_v14 = vpack.c.b16 %v4802_v47, %v4802_v47  ;;  %v15380_v2 = vpack.c.b16 %v4803_v41, %v4803_v41  ;;  %v9543_v51 = vor.u32 %v11119_v7, %v9542_v57 }
 0x465   :  { %7004 = vmatpush.bf16.msra.mxu2 %v9695_v43  ;;  %7017 = vmatpush.bf16.msra.mxu3 %v9759_v49  ;;  %v9742_v6 = vld [vmem:[%s17531_s3 + $0x5a0] sm:$0xf]  ;;  %3909 = vst [vmem:[#allocation3 + $0x28] sm:$0x1] %v3907_v22  ;;  %v4217_v50 = vld [vmem:[#allocation2 + $0x2c] sm:$0x4]  ;;  %v9607_v44 = vor.u32 %v11135_v4, %v9606_v46  ;;  %v9679_v22 = vor.u32 %v11153_v38, %v9678_v48 }
 0x466   :  { %v15376_v29 = vld [vmem:[#allocation2 + $0x2c] sm:$0x8]  ;;  %v11169_v58 = vld [vmem:[%s17531_s3 + $0x5a4] sm:$0xf0]  ;;  %v9534_v5 = vld [vmem:[%s17531_s3 + $0x400] sm:$0xf]  ;;  %v4221_v59 = vunpack.c.l.b16 %v4217_v50 }
 0x467   :  { %3921 = vst [vmem:[#allocation3 + $0x2c] sm:$0x1] %v3919_v10  ;;  %6980 = vmatpush.bf16.msra.mxu0 %v9551_v32  ;;  %6993 = vmatpush.bf16.msra.mxu1 %v9615_v61  ;;  %v11117_v23 = vld [vmem:[%s17531_s3 + $0x404] sm:$0xf0]  ;;  %v9598_v8 = vld [vmem:[%s17531_s3 + $0x480] sm:$0xf]  ;;  %v9743_v16 = vor.u32 %v11169_v58, %v9742_v6  ;;  %v4233_v36 = vunpack.c.l.b16 %v15376_v29 }
 0x468   :  { %4203 = vst [vmem:[#allocation3 + $0x28] sm:$0x2] %v4201_v30  ;;  %6957 = vmatmul.bf16.vlgmr.msrb.gmra.mxu2 %v15378_v14  ;;  %6970 = vmatmul.bf16.vlgmr.msrb.gmra.mxu3 %v15380_v2  ;;  %v15399_v1 = vld [vmem:[%s17531_s3 + $0x510] sm:$0xf]  ;;  %v11133_v18 = vld [vmem:[%s17531_s3 + $0x484] sm:$0xf0]  ;;  %v9535_v41 = vor.u32 %v11117_v23, %v9534_v5 }
 0x469   :  { %v9846_v17 = vld [vmem:[%s17531_s3 + $0x670] sm:$0xf]  ;;  %4215 = vst [vmem:[#allocation3 + $0x2c] sm:$0x2] %v4213_v55  ;;  %v15407_v52 = vld [vmem:[#allocation2 + $0x14] sm:$0x4]  ;;  %7005 = vmatpush.bf16.msra.mxu2 %v9687_v39  ;;  %7018 = vmatpush.bf16.msra.mxu3 %v9751_v20  ;;  %v9599_v45 = vor.u32 %v11133_v18, %v9598_v8 }
 0x46a   :  { %v11195_v60 = vld [vmem:[%s17531_s3 + $0x674] sm:$0xf0]  ;;  %v9910_v42 = vld [vmem:[%s17531_s3 + $0x6f0] sm:$0xf]  ;;  %v15427_v40 = vld [vmem:[#allocation2 + $0x20] sm:$0x8]  ;;  %v4302_v29 = vunpack.c.l.b16 %v15407_v52 }
 0x46b   :  { %v11211_v62 = vld [vmem:[%s17531_s3 + $0x6f4] sm:$0xf0]  ;;  %v9734_v43 = vld [vmem:[%s17531_s3 + $0x590] sm:$0xf]  ;;  %v15430_v47 = vld [vmem:[#allocation2 + $0x2c] sm:$0x8]  ;;  %6981 = vmatpush.bf16.msra.mxu0 %v9543_v51  ;;  %6994 = vmatpush.bf16.msra.mxu1 %v9607_v44  ;;  %v9847_v7 = vor.u32 %v11195_v60, %v9846_v17  ;;  %v3963_v58 = vunpack.c.l.b16 %v15427_v40 }
 0x46c   :  { %v11151_v12 = vld [vmem:[%s17531_s3 + $0x514] sm:$0xf0]  ;;  %v15432_v10 = vld [vmem:[#allocation2 + $0x14] sm:$0x4]  ;;  %v15434_v32 = vld [vmem:[#allocation2 + $0x30] sm:$0x1]  ;;  %v9911_v30 = vor.u32 %v11211_v62, %v9910_v42  ;;  %v4245_v8 = vunpack.c.l.b16 %v15430_v47 }
 0x46d   :  { %v11167_v49 = vld [vmem:[%s17531_s3 + $0x594] sm:$0xf0]  ;;  %v15439_v61 = vld [vmem:[%s17531_s3 + $0x500] sm:$0xf]  ;;  %v15444_v57 = vld [vmem:[%s17531_s3 + $0x504] sm:$0xf0]  ;;  %7006 = vmatpush.bf16.msra.mxu2 %v9679_v22  ;;  %7019 = vmatpush.bf16.msra.mxu3 %v9743_v16  ;;  %v9671_v39 = vor.u32 %v11151_v12, %v15399_v1  ;;  %v15483_v22 = vsel %vm3788_vm1, %v15255_v21, %v14824_v26 }
 0x46e   :  { %v4374_v54 = vld [vmem:[#allocation3 + $0x20] sm:$0xff]  ;;  %v9838_v4 = vld [vmem:[%s17531_s3 + $0x660] sm:$0xf]  ;;  %v11193_v55 = vld [vmem:[%s17531_s3 + $0x664] sm:$0xf0]  ;;  %v9735_v20 = vor.u32 %v11167_v49, %v9734_v43  ;;  %v4223_v23 = vrot.slane %v4221_v59, 2  ;;  %v4314_v43 = vunpack.c.l.b16 %v15432_v10  ;;  %v4257_v49 = vunpack.c.l.b16 %v15434_v32 }
 0x46f   :  { %v4804_v48 = vunpack.c.l.b16 %v4374_v54  ;;  %v4805_v46 = vunpack.c.h.b16 %v4374_v54  ;;  %v9726_v38 = vld [vmem:[%s17531_s3 + $0x580] sm:$0xf]  ;;  %v11209_v50 = vld [vmem:[%s17531_s3 + $0x6e4] sm:$0xf0]  ;;  %v9974_v51 = vld [vmem:[%s17531_s3 + $0x770] sm:$0xf]  ;;  %6982 = vmatpush.bf16.msra.mxu0 %v9535_v41  ;;  %6995 = vmatpush.bf16.msra.mxu1 %v9599_v45  ;;  %v9839_v52 = vor.u32 %v11193_v55, %v9838_v4  ;;  %v9663_v26 = vor.u32 %v15444_v57, %v15439_v61 }
 0x470   :  { %v9902_v6 = vld [vmem:[%s17531_s3 + $0x6e0] sm:$0xf]  ;;  %v11165_v5 = vld [vmem:[%s17531_s3 + $0x584] sm:$0xf0]  ;;  %v11227_v44 = vld [vmem:[%s17531_s3 + $0x774] sm:$0xf0] }
 0x471   :  { %v10038_v1 = vld [vmem:[%s17531_s3 + $0x7f0] sm:$0xf]  ;;  %v11243_v18 = vld [vmem:[%s17531_s3 + $0x7f4] sm:$0xf0]  ;;  %v4375_v17 = vld [vmem:[#allocation3 + $0x28] sm:$0xff]  ;;  %v4235_v16 = vrot.slane %v4233_v36, 3  ;;  %v15485_v60 = vpack.c.b16 %v4804_v48, %v4804_v48  ;;  %v15487_v42 = vpack.c.b16 %v4805_v46, %v4805_v46  ;;  %v9903_v62 = vor.u32 %v11209_v50, %v9902_v6  ;;  %7007 = vmatpush.bf16.msra.mxu2 %v9671_v39  ;;  %7020 = vmatpush.bf16.msra.mxu3 %v9735_v20 }
 0x472   :  { %v15492_v12 = vld [vmem:[%s17531_s3 + $0x760] sm:$0xf]  ;;  %v9727_v21 = vor.u32 %v11165_v5, %v9726_v38  ;;  %v11225_v40 = vld [vmem:[%s17531_s3 + $0x764] sm:$0xf0]  ;;  %v9830_v59 = vld [vmem:[%s17531_s3 + $0x650] sm:$0xf]  ;;  %v9975_v47 = vor.u32 %v11227_v44, %v9974_v51  ;;  %v10039_v41 = vor.u32 %v11243_v18, %v10038_v1  ;;  %v4806_v45 = vunpack.c.l.b16 %v4375_v17 }
 0x473   :  { %7027 = vmatpush.bf16.msrb.mxu0 %v9847_v7  ;;  %7040 = vmatpush.bf16.msrb.mxu1 %v9911_v30  ;;  %v11191_v36 = vld [vmem:[%s17531_s3 + $0x654] sm:$0xf0]  ;;  %v4807_v54 = vunpack.c.h.b16 %v4375_v17  ;;  %v9894_v10 = vld [vmem:[%s17531_s3 + $0x6d0] sm:$0xf]  ;;  %v15515_v61 = vrot.slane %v4302_v29, 2  ;;  %v3965_v57 = vrot.slane %v3963_v58, 6  ;;  %v3931_v48 = vpack.c.b16 %v15483_v22, %v15483_v22 }
 0x474   :  { %6983 = vmatmul.bf16.vlgmr.msra.gmra.mxu0 %v15485_v60  ;;  %6996 = vmatmul.bf16.vlgmr.msra.gmra.mxu1 %v15487_v42  ;;  %v11207_v32 = vld [vmem:[%s17531_s3 + $0x6d4] sm:$0xf0]  ;;  %v10030_v7 = vld [vmem:[%s17531_s3 + $0x7e0] sm:$0xf]  ;;  %v11241_v30 = vld [vmem:[%s17531_s3 + $0x7e4] sm:$0xf0]  ;;  %v3942_v46 = vsel %vm3788_vm1, %v15271_v19, %v14826_v53  ;;  %v9967_v55 = vor.u32 %v11225_v40, %v15492_v12  ;;  %v9831_v39 = vor.u32 %v11191_v36, %v9830_v59 }
 0x475   :  { %v4247_v4 = vrot.slane %v4245_v8, 4  ;;  %v15532_v20 = vsel %vm3788_vm1, %v15279_v11, %v14828_v33  ;;  %v4259_v38 = vrot.slane %v4257_v49, 5  ;;  %7008 = vmatpush.bf16.msra.mxu2 %v9663_v26  ;;  %7021 = vmatpush.bf16.msra.mxu3 %v9727_v21  ;;  %v9895_v6 = vor.u32 %v11207_v32, %v9894_v10  ;;  %v9958_v50 = vld [vmem:[%s17531_s3 + $0x750] sm:$0xf]  ;;  %v9822_v53 = vld [vmem:[%s17531_s3 + $0x640] sm:$0xf] }
 0x476   :  { %v4224_v19 = vsel %vm4083_vm2, %v4223_v23, %v14956_v9  ;;  %v4236_v29 = vsel %vm4083_vm2, %v4235_v16, %v14958_v27  ;;  %v15544_v33 = vpack.c.b16 %v4806_v45, %v4806_v45  ;;  %v15546_v11 = vpack.c.b16 %v4807_v54, %v4807_v54  ;;  %v11189_v5 = vld [vmem:[%s17531_s3 + $0x644] sm:$0xf0]  ;;  %v9886_v51 = vld [vmem:[%s17531_s3 + $0x6c0] sm:$0xf]  ;;  %v11223_v27 = vld [vmem:[%s17531_s3 + $0x754] sm:$0xf0] }
 0x477   :  { %7028 = vmatpush.bf16.msrb.mxu0 %v9839_v52  ;;  %7041 = vmatpush.bf16.msrb.mxu1 %v9903_v62  ;;  %v10031_v58 = vor.u32 %v11241_v30, %v10030_v7  ;;  %v11205_v9 = vld [vmem:[%s17531_s3 + $0x6c4] sm:$0xf0]  ;;  %v10022_v44 = vld [vmem:[%s17531_s3 + $0x7d0] sm:$0xf]  ;;  %v11239_v23 = vld [vmem:[%s17531_s3 + $0x7d4] sm:$0xf0]  ;;  %v3943_v8 = vpack.c.b16 %v3942_v46, %v3942_v46  ;;  %v3955_v1 = vpack.c.b16 %v15532_v20, %v15532_v20 }
 0x478   :  { %v15568_v18 = vrot.slane %v4314_v43, 3  ;;  %v4322_v17 = vld [vmem:[#allocation2 + $0x14] sm:$0x8]  ;;  %7009 = vmatmul.bf16.vlgmr.msra.gmra.mxu2 %v15544_v33  ;;  %7022 = vmatmul.bf16.vlgmr.msra.gmra.mxu3 %v15546_v11  ;;  %v4225_v22 = vpack.c.b16 %v4224_v19, %v4224_v19  ;;  %v4237_v16 = vpack.c.b16 %v4236_v29, %v4236_v29  ;;  %v3966_v62 = vsel %vm3788_vm1, %v3965_v57, %v14830_v37  ;;  %v9950_v43 = vld [vmem:[%s17531_s3 + $0x740] sm:$0xf] }
 0x479   :  { %7053 = vmatpush.bf16.msrb.mxu2 %v9975_v47  ;;  %7066 = vmatpush.bf16.msrb.mxu3 %v10039_v41  ;;  %v4334_v52 = vld [vmem:[#allocation2 + $0x14] sm:$0x8]  ;;  %v9823_v12 = vor.u32 %v11189_v5, %v9822_v53  ;;  %v9887_v49 = vor.u32 %v11205_v9, %v9886_v51  ;;  %v11221_v26 = vld [vmem:[%s17531_s3 + $0x744] sm:$0xf0]  ;;  %v9814_v21 = vld [vmem:[%s17531_s3 + $0x630] sm:$0xf]  ;;  %v4248_v40 = vsel %vm4083_vm2, %v4247_v4, %v14960_v35  ;;  %v4326_v32 = vunpack.c.l.b16 %v4322_v17 }
 0x47a   :  { %v11187_v37 = vld [vmem:[%s17531_s3 + $0x634] sm:$0xf0]  ;;  %v9959_v59 = vor.u32 %v11223_v27, %v9958_v50  ;;  %v10023_v36 = vor.u32 %v11239_v23, %v10022_v44  ;;  %v9878_v47 = vld [vmem:[%s17531_s3 + $0x6b0] sm:$0xf]  ;;  %3933 = vst [vmem:[#allocation3 + $0x30] sm:$0x1] %v3931_v48  ;;  %v4260_v45 = vsel %vm4083_vm2, %v4259_v38, %v15091_v56  ;;  %v3967_v10 = vpack.c.b16 %v3966_v62, %v3966_v62 }
 0x47b   :  { %7029 = vmatpush.bf16.msrb.mxu0 %v9831_v39  ;;  %7042 = vmatpush.bf16.msrb.mxu1 %v9895_v6  ;;  %v11203_v41 = vld [vmem:[%s17531_s3 + $0x6b4] sm:$0xf0]  ;;  %v10014_v35 = vld [vmem:[%s17531_s3 + $0x7c0] sm:$0xf]  ;;  %v11237_v54 = vld [vmem:[%s17531_s3 + $0x7c4] sm:$0xf0]  ;;  %v4338_v57 = vunpack.c.l.b16 %v4334_v52  ;;  %v4249_v46 = vpack.c.b16 %v4248_v40, %v4248_v40  ;;  %v9815_v48 = vor.u32 %v11187_v37, %v9814_v21  ;;  %v4261_v38 = vpack.c.b16 %v4260_v45, %v4260_v45 }
 0x47c   :  { %3945 = vst [vmem:[#allocation3 + $0x34] sm:$0x1] %v3943_v8  ;;  %v3971_v7 = vld [vmem:[#allocation2 + $0x24] sm:$0x1]  ;;  %v3993_v30 = vld [vmem:[#allocation2 + $0x24] sm:$0x2]  ;;  %v9879_v56 = vor.u32 %v11203_v41, %v9878_v47  ;;  %v9951_v6 = vor.u32 %v11221_v26, %v9950_v43  ;;  %v10015_v50 = vor.u32 %v11237_v54, %v10014_v35 }
 0x47d   :  { %7054 = vmatpush.bf16.msrb.mxu2 %v9967_v55  ;;  %7067 = vmatpush.bf16.msrb.mxu3 %v10031_v58  ;;  %4227 = vst [vmem:[#allocation3 + $0x30] sm:$0x2] %v4225_v22  ;;  %v9942_v4 = vld [vmem:[%s17531_s3 + $0x730] sm:$0xf]  ;;  %v11219_v55 = vld [vmem:[%s17531_s3 + $0x734] sm:$0xf0]  ;;  %v3975_v9 = vunpack.c.l.b16 %v3971_v7  ;;  %v3997_v27 = vunpack.c.l.b16 %v3993_v30 }
 0x47e   :  { %v9806_v39 = vld [vmem:[%s17531_s3 + $0x620] sm:$0xf]  ;;  %v11185_v20 = vld [vmem:[%s17531_s3 + $0x624] sm:$0xf0]  ;;  %4239 = vst [vmem:[#allocation3 + $0x34] sm:$0x2] %v4237_v16  ;;  %v9943_v16 = vor.u32 %v11219_v55, %v9942_v4 }
 0x47f   :  { %7030 = vmatpush.bf16.msrb.mxu0 %v9823_v12  ;;  %7043 = vmatpush.bf16.msrb.mxu1 %v9887_v49  ;;  %v9870_v53 = vld [vmem:[%s17531_s3 + $0x6a0] sm:$0xf]  ;;  %v11201_v19 = vld [vmem:[%s17531_s3 + $0x6a4] sm:$0xf0]  ;;  %3957 = vst [vmem:[#allocation3 + $0x38] sm:$0x1] %v3955_v1  ;;  %v9807_v23 = vor.u32 %v11185_v20, %v9806_v39 }
 0x480   :  { %v10006_v29 = vld [vmem:[%s17531_s3 + $0x7b0] sm:$0xf]  ;;  %v11235_v58 = vld [vmem:[%s17531_s3 + $0x7b4] sm:$0xf0]  ;;  %3969 = vst [vmem:[#allocation3 + $0x3c] sm:$0x1] %v3967_v10  ;;  %v9871_v8 = vor.u32 %v11201_v19, %v9870_v53 }
 0x481   :  { %7055 = vmatpush.bf16.msrb.mxu2 %v9959_v59  ;;  %7068 = vmatpush.bf16.msrb.mxu3 %v10023_v36  ;;  %v15626_v5 = vrot.slane %v4326_v32, 4  ;;  %v15628_v51 = vrot.slane %v4338_v57, 5  ;;  %v4265_v44 = vld [vmem:[#allocation2 + $0x30] sm:$0x1]  ;;  %4251 = vst [vmem:[#allocation3 + $0x38] sm:$0x2] %v4249_v46  ;;  %v10007_v62 = vor.u32 %v11235_v58, %v10006_v29 }
 0x482   :  { %v15633_v1 = vld [vmem:[%s17531_s3 + $0x720] sm:$0xf]  ;;  %v9798_v17 = vld [vmem:[%s17531_s3 + $0x610] sm:$0xf]  ;;  %4263 = vst [vmem:[#allocation3 + $0x3c] sm:$0x2] %v4261_v38  ;;  %v4269_v59 = vunpack.c.l.b16 %v4265_v44 }
 0x483   :  { %7031 = vmatpush.bf16.msrb.mxu0 %v9815_v48  ;;  %7044 = vmatpush.bf16.msrb.mxu1 %v9879_v56  ;;  %v3970_v52 = vld [vmem:[#allocation2 + $0x8] sm:$0x1]  ;;  %v15638_v22 = vld [vmem:[#allocation2 + $0x24] sm:$0x2]  ;;  %v11183_v12 = vld [vmem:[%s17531_s3 + $0x614] sm:$0xf0] }
 0x484   :  { %v9862_v49 = vld [vmem:[%s17531_s3 + $0x690] sm:$0xf]  ;;  %v11199_v43 = vld [vmem:[%s17531_s3 + $0x694] sm:$0xf0]  ;;  %v15649_v26 = vld [vmem:[#allocation2 + $0x14] sm:$0x2]  ;;  %v9799_v32 = vor.u32 %v11183_v12, %v9798_v17  ;;  %v3974_v38 = vunpack.c.l.b16 %v3970_v52 }
 0x485   :  { %7056 = vmatpush.bf16.msrb.mxu2 %v9951_v6  ;;  %7069 = vmatpush.bf16.msrb.mxu3 %v10015_v50  ;;  %v15651_v21 = vld [vmem:[#allocation2 + $0x24] sm:$0x1]  ;;  %v15653_v37 = vld [vmem:[#allocation2 + $0x24] sm:$0x4]  ;;  %v11217_v36 = vld [vmem:[%s17531_s3 + $0x724] sm:$0xf0]  ;;  %v9863_v57 = vor.u32 %v11199_v43, %v9862_v49  ;;  %v4009_v6 = vunpack.c.l.b16 %v15638_v22 }
 0x486   :  { %v15655_v40 = vld [vmem:[#allocation2 + $0x24] sm:$0x4]  ;;  %v9998_v47 = vld [vmem:[%s17531_s3 + $0x7a0] sm:$0xf]  ;;  %v11233_v41 = vld [vmem:[%s17531_s3 + $0x7a4] sm:$0xf0]  ;;  %v9935_v56 = vor.u32 %v11217_v36, %v15633_v1  ;;  %v4021_v44 = vunpack.c.l.b16 %v15653_v37 }
 0x487   :  { %v3976_v45 = vrot.slane %v3975_v9, 7  ;;  %v15666_v35 = vrot.slane %v3997_v27, 1  ;;  %v4277_v54 = vld [vmem:[#allocation2 + $0x30] sm:$0x2]  ;;  %v15668_v10 = vld [vmem:[#allocation2 + $0x30] sm:$0x4]  ;;  %7032 = vmatpush.bf16.msrb.mxu0 %v9807_v23  ;;  %7045 = vmatpush.bf16.msrb.mxu1 %v9871_v8  ;;  %v9999_v4 = vor.u32 %v11233_v41, %v9998_v47  ;;  %v4280_v9 = vunpack.c.l.b16 %v15649_v26 }
 0x488   :  { %v15673_v7 = vld [vmem:[%s17531_s3 + $0x710] sm:$0xf]  ;;  %v15678_v30 = vld [vmem:[%s17531_s3 + $0x714] sm:$0xf0]  ;;  %v9790_v48 = vld [vmem:[%s17531_s3 + $0x600] sm:$0xf]  ;;  %v4281_v53 = vunpack.c.l.b16 %v4277_v54  ;;  %v3986_v27 = vunpack.c.l.b16 %v15651_v21  ;;  %v4033_v23 = vunpack.c.l.b16 %v15655_v40  ;;  %v4303_v22 = vunpack.c.l.b16 %v15668_v10 }
 0x489   :  { %v15683_v46 = vld [vmem:[%s17531_s3 + $0x790] sm:$0xf]  ;;  %7057 = vmatpush.bf16.msrb.mxu2 %v9943_v16  ;;  %7070 = vmatpush.bf16.msrb.mxu3 %v10007_v62  ;;  %v11181_v55 = vld [vmem:[%s17531_s3 + $0x604] sm:$0xf0]  ;;  %v9854_v39 = vld [vmem:[%s17531_s3 + $0x680] sm:$0xf]  ;;  %v15737_v21 = vsel %vm3788_vm1, %v3976_v45, %v3974_v38  ;;  %v9927_v37 = vor.u32 %v15678_v30, %v15673_v7 }
 0x48a   :  { %v11197_v20 = vld [vmem:[%s17531_s3 + $0x684] sm:$0xf0]  ;;  %v4271_v50 = vrot.slane %v4269_v59, 6  ;;  %v11231_v19 = vld [vmem:[%s17531_s3 + $0x794] sm:$0xf0]  ;;  %v9791_v16 = vor.u32 %v11181_v55, %v9790_v48  ;;  %v4011_v54 = vrot.slane %v4009_v6, 2  ;;  %v15770_v55 = vsel %vm3788_vm1, %v3986_v27, %v14832_v3 }
 0x48b   :  { %v10102_v29 = vld [vmem:[%s17531_s3 + $0x870] sm:$0xf]  ;;  %v4376_v58 = vld [vmem:[#allocation3 + $0x30] sm:$0xff]  ;;  %v11259_v1 = vld [vmem:[%s17531_s3 + $0x874] sm:$0xf0]  ;;  %7033 = vmatpush.bf16.msrb.mxu0 %v9799_v32  ;;  %7046 = vmatpush.bf16.msrb.mxu1 %v9863_v57  ;;  %v9855_v62 = vor.u32 %v11197_v20, %v9854_v39  ;;  %v9991_v40 = vor.u32 %v11231_v19, %v15683_v46  ;;  %v4282_v10 = vrot.slane %v4281_v53, 7  ;;  %v15775_v39 = vsel %vm3788_vm1, %v15666_v35, %v14841_v63 }
 0x48c   :  { %v15709_v8 = vld [vmem:[#allocation2 + $0x30] sm:$0x2]  ;;  %v11275_v52 = vld [vmem:[%s17531_s3 + $0x8f4] sm:$0xf0]  ;;  %v15724_v12 = vld [vmem:[%s17531_s3 + $0x700] sm:$0xf]  ;;  %v4808_v41 = vunpack.c.l.b16 %v4376_v58  ;;  %v4809_v45 = vunpack.c.h.b16 %v4376_v58  ;;  %v10103_v32 = vor.u32 %v11259_v1, %v10102_v29 }
 0x48d   :  { %v10166_v17 = vld [vmem:[%s17531_s3 + $0x8f0] sm:$0xf]  ;;  %v15729_v49 = vld [vmem:[%s17531_s3 + $0x704] sm:$0xf0]  ;;  %v15734_v43 = vld [vmem:[%s17531_s3 + $0x780] sm:$0xf]  ;;  %7058 = vmatpush.bf16.msrb.mxu2 %v9935_v56  ;;  %7071 = vmatpush.bf16.msrb.mxu3 %v9999_v4  ;;  %v3978_v4 = vpack.c.b16 %v15737_v21, %v15737_v21  ;;  %v4292_v20 = vunpack.c.l.b16 %v15709_v8  ;;  %v4272_v8 = vsel %vm4083_vm2, %v4271_v50, %v15095_v13 }
 0x48e   :  { %v11229_v59 = vld [vmem:[%s17531_s3 + $0x784] sm:$0xf0]  ;;  %v15748_v36 = vld [vmem:[%s17531_s3 + $0x970] sm:$0xf]  ;;  %v15753_v47 = vld [vmem:[%s17531_s3 + $0x974] sm:$0xf0]  ;;  %v10167_v57 = vor.u32 %v11275_v52, %v10166_v17  ;;  %v9919_v38 = vor.u32 %v15729_v49, %v15724_v12  ;;  %v15792_v29 = vpack.c.b16 %v4808_v41, %v4808_v41  ;;  %v15794_v58 = vpack.c.b16 %v4809_v45, %v4809_v45 }
 0x48f   :  { %v10294_v7 = vld [vmem:[%s17531_s3 + $0x9f0] sm:$0xf]  ;;  %v15758_v30 = vrot.slane %v4021_v44, 3  ;;  %v11307_v46 = vld [vmem:[%s17531_s3 + $0x9f4] sm:$0xf0]  ;;  %7034 = vmatpush.bf16.msrb.mxu0 %v9791_v16  ;;  %7047 = vmatpush.bf16.msrb.mxu1 %v9855_v62  ;;  %v9983_v6 = vor.u32 %v11229_v59, %v15734_v43  ;;  %v10231_v53 = vor.u32 %v15753_v47, %v15748_v36  ;;  %v4305_v19 = vrot.slane %v4303_v22, 1 }
 0x490   :  { %v4377_v48 = vld [vmem:[#allocation3 + $0x38] sm:$0xff]  ;;  %v10094_v56 = vld [vmem:[%s17531_s3 + $0x860] sm:$0xf]  ;;  %v11257_v3 = vld [vmem:[%s17531_s3 + $0x864] sm:$0xf0]  ;;  %v10295_v1 = vor.u32 %v11307_v46, %v10294_v7  ;;  %v4283_v62 = vsel %vm4083_vm2, %v4282_v10, %v4280_v9  ;;  %v15817_v12 = vrot.slane %v4033_v23, 4  ;;  %v3989_v43 = vpack.c.b16 %v15770_v55, %v15770_v55 }
 0x491   :  { %v10158_v63 = vld [vmem:[%s17531_s3 + $0x8e0] sm:$0xf]  ;;  %v11273_v35 = vld [vmem:[%s17531_s3 + $0x8e4] sm:$0xf0]  ;;  %7059 = vmatpush.bf16.msrb.mxu2 %v9927_v37  ;;  %7072 = vmatpush.bf16.msrb.mxu3 %v9991_v40  ;;  %v4810_v17 = vunpack.c.l.b16 %v4377_v48  ;;  %v4811_v52 = vunpack.c.h.b16 %v4377_v48  ;;  %v10095_v13 = vor.u32 %v11257_v3, %v10094_v56  ;;  %v10086_v49 = vld [vmem:[%s17531_s3 + $0x850] sm:$0xf]  ;;  %v4273_v40 = vpack.c.b16 %v4272_v8, %v4272_v8 }
 0x492   :  { %v15799_v27 = vld [vmem:[%s17531_s3 + $0x960] sm:$0xf]  ;;  %v15804_v44 = vld [vmem:[%s17531_s3 + $0x964] sm:$0xf0]  ;;  %7035 = vmatmul.bf16.vlgmr.msrb.gmra.mxu0 %v15792_v29  ;;  %7048 = vmatmul.bf16.vlgmr.msrb.gmra.mxu1 %v15794_v58  ;;  %v10159_v50 = vor.u32 %v11273_v35, %v10158_v63  ;;  %v15826_v21 = vld [vmem:[#allocation2 + $0x30] sm:$0x4]  ;;  %v4001_v59 = vpack.c.b16 %v15775_v39, %v15775_v39  ;;  %v4294_v7 = vsel %vm4083_vm2, %v4292_v20, %v15100_v24 }
 0x493   :  { %7079 = vmatpush.bf16.msra.mxu0 %v10103_v32  ;;  %7092 = vmatpush.bf16.msra.mxu1 %v10167_v57  ;;  %v10286_v22 = vld [vmem:[%s17531_s3 + $0x9e0] sm:$0xf]  ;;  %v11305_v16 = vld [vmem:[%s17531_s3 + $0x9e4] sm:$0xf0]  ;;  %v10223_v26 = vor.u32 %v15804_v44, %v15799_v27  ;;  %v11255_v9 = vld [vmem:[%s17531_s3 + $0x854] sm:$0xf0]  ;;  %v4284_v57 = vpack.c.b16 %v4283_v62, %v4283_v62  ;;  %v15855_v46 = vpack.c.b16 %v4811_v52, %v4811_v52 }
 0x494   :  { %v10150_v23 = vld [vmem:[%s17531_s3 + $0x8d0] sm:$0xf]  ;;  %v11271_v37 = vld [vmem:[%s17531_s3 + $0x8d4] sm:$0xf0]  ;;  %v17794_v36 = vld [vmem:[#allocation9_spill] sm:$0xff]  ;;  %v10287_v45 = vor.u32 %v11305_v16, %v10286_v22  ;;  %v4306_v55 = vsel %vm4083_vm2, %v4305_v19, %v15515_v61  ;;  %v10087_v24 = vor.u32 %v11255_v9, %v10086_v49  ;;  %v4295_v35 = vpack.c.b16 %v4294_v7, %v4294_v7 }
 0x495   :  { %v4012_v47 = vsel %vm3788_vm1, %v4011_v54, %v17794_v36  ;;  %v15843_v41 = vld [vmem:[#allocation2 + $0x30] sm:$0x8]  ;;  %7060 = vmatpush.bf16.msrb.mxu2 %v9919_v38  ;;  %7073 = vmatpush.bf16.msrb.mxu3 %v9983_v6  ;;  %v11287_v32 = vld [vmem:[%s17531_s3 + $0x954] sm:$0xf0]  ;;  %v15853_v54 = vpack.c.b16 %v4810_v17, %v4810_v17  ;;  %3980 = vst [vmem:[#allocation3 + $0x40] sm:$0x1] %v3978_v4  ;;  %v4315_v19 = vunpack.c.l.b16 %v15826_v21 }
 0x496   :  { %v10214_v10 = vld [vmem:[%s17531_s3 + $0x950] sm:$0xf]  ;;  %v11303_v56 = vld [vmem:[%s17531_s3 + $0x9d4] sm:$0xf0]  ;;  %v15865_v39 = vld [vmem:[#allocation2 + $0x24] sm:$0x8]  ;;  %v10151_v20 = vor.u32 %v11271_v37, %v10150_v23  ;;  %v4327_v27 = vunpack.c.l.b16 %v15843_v41 }
 0x497   :  { %v10278_v48 = vld [vmem:[%s17531_s3 + $0x9d0] sm:$0xf]  ;;  %7080 = vmatpush.bf16.msra.mxu0 %v10095_v13  ;;  %7093 = vmatpush.bf16.msra.mxu1 %v10159_v50  ;;  %v10078_v38 = vld [vmem:[%s17531_s3 + $0x840] sm:$0xf]  ;;  %v11253_v6 = vld [vmem:[%s17531_s3 + $0x844] sm:$0xf0]  ;;  %v10215_v17 = vor.u32 %v11287_v32, %v10214_v10 }
 0x498   :  { %3991 = vst [vmem:[#allocation3 + $0x44] sm:$0x1] %v3989_v43  ;;  %v4053_v4 = vld [vmem:[#allocation2 + $0x24] sm:$0x8]  ;;  %v4335_v3 = vld [vmem:[#allocation2 + $0x30] sm:$0x8]  ;;  %7061 = vmatmul.bf16.vlgmr.msrb.gmra.mxu2 %v15853_v54  ;;  %7074 = vmatmul.bf16.vlgmr.msrb.gmra.mxu3 %v15855_v46  ;;  %v10279_v52 = vor.u32 %v11303_v56, %v10278_v48  ;;  %v10079_v50 = vor.u32 %v11253_v6, %v10078_v38 }
 0x499   :  { %7105 = vmatpush.bf16.msra.mxu2 %v10231_v53  ;;  %7118 = vmatpush.bf16.msra.mxu3 %v10295_v1  ;;  %v4013_v53 = vpack.c.b16 %v4012_v47, %v4012_v47  ;;  %v10142_v61 = vld [vmem:[%s17531_s3 + $0x8c0] sm:$0xf]  ;;  %v11269_v63 = vld [vmem:[%s17531_s3 + $0x8c4] sm:$0xf0]  ;;  %4275 = vst [vmem:[#allocation3 + $0x40] sm:$0x2] %v4273_v40  ;;  %v4307_v1 = vpack.c.b16 %v4306_v55, %v4306_v55  ;;  %v4057_v23 = vunpack.c.l.b16 %v4053_v4  ;;  %v4339_v40 = vunpack.c.l.b16 %v4335_v3 }
 0x49a   :  { %v10206_v44 = vld [vmem:[%s17531_s3 + $0x940] sm:$0xf]  ;;  %v11285_v8 = vld [vmem:[%s17531_s3 + $0x944] sm:$0xf0]  ;;  %4286 = vst [vmem:[#allocation3 + $0x44] sm:$0x2] %v4284_v57  ;;  %v10143_v49 = vor.u32 %v11269_v63, %v10142_v61 }
 0x49b   :  { %v10270_v22 = vld [vmem:[%s17531_s3 + $0x9c0] sm:$0xf]  ;;  %v11301_v16 = vld [vmem:[%s17531_s3 + $0x9c4] sm:$0xf0]  ;;  %4003 = vst [vmem:[#allocation3 + $0x48] sm:$0x1] %v4001_v59  ;;  %7081 = vmatpush.bf16.msra.mxu0 %v10087_v24  ;;  %7094 = vmatpush.bf16.msra.mxu1 %v10151_v20  ;;  %v10207_v47 = vor.u32 %v11285_v8, %v10206_v44 }
 0x49c   :  { %v17795_v62 = vld [vmem:[#allocation10_spill] sm:$0xff]  ;;  %v11251_v21 = vld [vmem:[%s17531_s3 + $0x834] sm:$0xf0]  ;;  %4015 = vst [vmem:[#allocation3 + $0x4c] sm:$0x1] %v4013_v53  ;;  %v4317_v37 = vrot.slane %v4315_v19, 2  ;;  %v10271_v41 = vor.u32 %v11301_v16, %v10270_v22 }
 0x49d   :  { %7106 = vmatpush.bf16.msra.mxu2 %v10223_v26  ;;  %7119 = vmatpush.bf16.msra.mxu3 %v10287_v45  ;;  %v4024_v13 = vsel %vm3788_vm1, %v15758_v30, %v17795_v62  ;;  %v10070_v43 = vld [vmem:[%s17531_s3 + $0x830] sm:$0xf]  ;;  %v4045_v26 = vunpack.c.l.b16 %v15865_v39  ;;  %v11267_v30 = vld [vmem:[%s17531_s3 + $0x8b4] sm:$0xf0]  ;;  %4297 = vst [vmem:[#allocation3 + $0x48] sm:$0x2] %v4295_v35 }
 0x49e   :  { %v10134_v9 = vld [vmem:[%s17531_s3 + $0x8b0] sm:$0xf]  ;;  %4309 = vst [vmem:[#allocation3 + $0x4c] sm:$0x2] %v4307_v1  ;;  %v4025_v59 = vpack.c.b16 %v4024_v13, %v4024_v13  ;;  %v4329_v36 = vrot.slane %v4327_v27, 3  ;;  %v17796_v32 = vld [vmem:[#allocation11_spill] sm:$0xff]  ;;  %v10071_v7 = vor.u32 %v11251_v21, %v10070_v43  ;;  %v4318_v4 = vsel %vm4083_vm2, %v4317_v37, %v15568_v18 }
 0x49f   :  { %v10198_v45 = vld [vmem:[%s17531_s3 + $0x930] sm:$0xf]  ;;  %v11283_v10 = vld [vmem:[%s17531_s3 + $0x934] sm:$0xf0]  ;;  %v4036_v57 = vsel %vm3788_vm1, %v15817_v12, %v17796_v32  ;;  %7082 = vmatpush.bf16.msra.mxu0 %v10079_v50  ;;  %7095 = vmatpush.bf16.msra.mxu1 %v10143_v49  ;;  %v10135_v48 = vor.u32 %v11267_v30, %v10134_v9  ;;  %v10062_v39 = vld [vmem:[%s17531_s3 + $0x820] sm:$0xf]  ;;  %v4319_v62 = vpack.c.b16 %v4318_v4, %v4318_v4 }
 0x4a0   :  { %v10262_v56 = vld [vmem:[%s17531_s3 + $0x9b0] sm:$0xf]  ;;  %v11299_v55 = vld [vmem:[%s17531_s3 + $0x9b4] sm:$0xf0]  ;;  %v11249_v12 = vld [vmem:[%s17531_s3 + $0x824] sm:$0xf0]  ;;  %v4037_v53 = vpack.c.b16 %v4036_v57, %v4036_v57  ;;  %v10199_v63 = vor.u32 %v11283_v10, %v10198_v45  ;;  %v4330_v44 = vsel %vm4083_vm2, %v4329_v36, %v15626_v5 }
 0x4a1   :  { %7107 = vmatpush.bf16.msra.mxu2 %v10215_v17  ;;  %7120 = vmatpush.bf16.msra.mxu3 %v10279_v52  ;;  %v10126_v24 = vld [vmem:[%s17531_s3 + $0x8a0] sm:$0xf]  ;;  %v11265_v20 = vld [vmem:[%s17531_s3 + $0x8a4] sm:$0xf0]  ;;  %v4047_v38 = vrot.slane %v4045_v26, 5  ;;  %v4059_v6 = vrot.slane %v4057_v23, 6  ;;  %v10263_v35 = vor.u32 %v11299_v55, %v10262_v56  ;;  %v10063_v18 = vor.u32 %v11249_v12, %v10062_v39 }
 0x4a2   :  { %4027 = vst [vmem:[#allocation3 + $0x50] sm:$0x1] %v4025_v59  ;;  %v4065_v3 = vld [vmem:[#allocation2 + $0x28] sm:$0x1]  ;;  %v15940_v61 = vrot.slane %v4339_v40, 4  ;;  %v10127_v8 = vor.u32 %v11265_v20, %v10126_v24  ;;  %v4331_v49 = vpack.c.b16 %v4330_v44, %v4330_v44  ;;  %v17797_v43 = vld [vmem:[#allocation12_spill] sm:$0xff] }
 0x4a3   :  { %v10190_v19 = vld [vmem:[%s17531_s3 + $0x920] sm:$0xf]  ;;  %v11281_v27 = vld [vmem:[%s17531_s3 + $0x924] sm:$0xf0]  ;;  %7083 = vmatpush.bf16.msra.mxu0 %v10071_v7  ;;  %7096 = vmatpush.bf16.msra.mxu1 %v10135_v48  ;;  %v10054_v52 = vld [vmem:[%s17531_s3 + $0x810] sm:$0xf]  ;;  %v4048_v21 = vsel %vm3788_vm1, %v4047_v38, %v17797_v43  ;;  %v4069_v36 = vunpack.c.l.b16 %v4065_v3 }
 0x4a4   :  { %v10254_v1 = vld [vmem:[%s17531_s3 + $0x9a0] sm:$0xf]  ;;  %v11297_v17 = vld [vmem:[%s17531_s3 + $0x9a4] sm:$0xf0]  ;;  %v11247_v5 = vld [vmem:[%s17531_s3 + $0x814] sm:$0xf0]  ;;  %v10191_v26 = vor.u32 %v11281_v27, %v10190_v19  ;;  %v4049_v12 = vpack.c.b16 %v4048_v21, %v4048_v21 }
 0x4a5   :  { %7108 = vmatpush.bf16.msra.mxu2 %v10207_v47  ;;  %7121 = vmatpush.bf16.msra.mxu3 %v10271_v41  ;;  %v10118_v22 = vld [vmem:[%s17531_s3 + $0x890] sm:$0xf]  ;;  %v11263_v16 = vld [vmem:[%s17531_s3 + $0x894] sm:$0xf0]  ;;  %4039 = vst [vmem:[#allocation3 + $0x54] sm:$0x1] %v4037_v53  ;;  %v10255_v9 = vor.u32 %v11297_v17, %v10254_v1  ;;  %v10055_v47 = vor.u32 %v11247_v5, %v10054_v52 }
 0x4a6   :  { %v10182_v13 = vld [vmem:[%s17531_s3 + $0x910] sm:$0xf]  ;;  %v11279_v50 = vld [vmem:[%s17531_s3 + $0x914] sm:$0xf0]  ;;  %v10046_v37 = vld [vmem:[%s17531_s3 + $0x800] sm:$0xf]  ;;  %v10119_v41 = vor.u32 %v11263_v16, %v10118_v22  ;;  %v4342_v22 = vsel %vm4083_vm2, %v15940_v61, %v15628_v51 }
 0x4a7   :  { %v10246_v30 = vld [vmem:[%s17531_s3 + $0x990] sm:$0xf]  ;;  %v11295_v23 = vld [vmem:[%s17531_s3 + $0x994] sm:$0xf0]  ;;  %v17798_v40 = vld [vmem:[#allocation13_spill] sm:$0xff]  ;;  %7084 = vmatpush.bf16.msra.mxu0 %v10063_v18  ;;  %7097 = vmatpush.bf16.msra.mxu1 %v10127_v8 }
 0x4a8   :  { %v4060_v59 = vsel %vm3788_vm1, %v4059_v6, %v17798_v40  ;;  %v11245_v45 = vld [vmem:[%s17531_s3 + $0x804] sm:$0xf0]  ;;  %v10110_v10 = vld [vmem:[%s17531_s3 + $0x880] sm:$0xf]  ;;  %v4064_v57 = vld [vmem:[#allocation2 + $0xc] sm:$0x1]  ;;  %v10183_v6 = vor.u32 %v11279_v50, %v10182_v13  ;;  %v10247_v53 = vor.u32 %v11295_v23, %v10246_v30  ;;  %v4343_v40 = vpack.c.b16 %v4342_v22, %v4342_v22 }
 0x4a9   :  { %7109 = vmatpush.bf16.msra.mxu2 %v10199_v63  ;;  %7122 = vmatpush.bf16.msra.mxu3 %v10263_v35  ;;  %v11261_v32 = vld [vmem:[%s17531_s3 + $0x884] sm:$0xf0]  ;;  %v10174_v7 = vld [vmem:[%s17531_s3 + $0x900] sm:$0xf]  ;;  %v10358_v55 = vld [vmem:[%s17531_s3 + $0xa70] sm:$0xf]  ;;  %v4061_v38 = vpack.c.b16 %v4060_v59, %v4060_v59  ;;  %v10047_v19 = vor.u32 %v11245_v45, %v10046_v37  ;;  %v4068_v16 = vunpack.c.l.b16 %v4064_v57 }
 0x4aa   :  { %v11277_v48 = vld [vmem:[%s17531_s3 + $0x904] sm:$0xf0]  ;;  %v10238_v56 = vld [vmem:[%s17531_s3 + $0x980] sm:$0xf]  ;;  %v11323_v39 = vld [vmem:[%s17531_s3 + $0xa74] sm:$0xf0]  ;;  %v10111_v27 = vor.u32 %v11261_v32, %v10110_v10 }
 0x4ab   :  { %4321 = vst [vmem:[#allocation3 + $0x50] sm:$0x2] %v4319_v62  ;;  %v10422_v24 = vld [vmem:[%s17531_s3 + $0xaf0] sm:$0xf]  ;;  %v11339_v20 = vld [vmem:[%s17531_s3 + $0xaf4] sm:$0xf0]  ;;  %7085 = vmatpush.bf16.msra.mxu0 %v10055_v47  ;;  %7098 = vmatpush.bf16.msra.mxu1 %v10119_v41  ;;  %v10359_v1 = vor.u32 %v11323_v39, %v10358_v55  ;;  %v10175_v62 = vor.u32 %v11277_v48, %v10174_v7 }
 0x4ac   :  { %4333 = vst [vmem:[#allocation3 + $0x54] sm:$0x2] %v4331_v49  ;;  %v11293_v4 = vld [vmem:[%s17531_s3 + $0x984] sm:$0xf0]  ;;  %v10486_v3 = vld [vmem:[%s17531_s3 + $0xb70] sm:$0xf]  ;;  %v10423_v17 = vor.u32 %v11339_v20, %v10422_v24 }
 0x4ad   :  { %7110 = vmatpush.bf16.msra.mxu2 %v10191_v26  ;;  %7123 = vmatpush.bf16.msra.mxu3 %v10255_v9  ;;  %v11355_v63 = vld [vmem:[%s17531_s3 + $0xb74] sm:$0xf0]  ;;  %v4070_v35 = vrot.slane %v4069_v36, 7  ;;  %v10550_v44 = vld [vmem:[%s17531_s3 + $0xbf0] sm:$0xf]  ;;  %v4379_v52 = vld [vmem:[#allocation3 + $0x48] sm:$0xff]  ;;  %v10239_v13 = vor.u32 %v11293_v4, %v10238_v56 }
 0x4ae   :  { %v11371_v18 = vld [vmem:[%s17531_s3 + $0xbf4] sm:$0xf0]  ;;  %v10350_v5 = vld [vmem:[%s17531_s3 + $0xa60] sm:$0xf]  ;;  %4051 = vst [vmem:[#allocation3 + $0x58] sm:$0x1] %v4049_v12  ;;  %v10487_v43 = vor.u32 %v11355_v63, %v10486_v3  ;;  %v4814_v23 = vunpack.c.l.b16 %v4379_v52  ;;  %v4815_v37 = vunpack.c.h.b16 %v4379_v52 }
 0x4af   :  { %v4378_v8 = vld [vmem:[#allocation3 + $0x40] sm:$0xff]  ;;  %v11321_v50 = vld [vmem:[%s17531_s3 + $0xa64] sm:$0xf0]  ;;  %v10414_v49 = vld [vmem:[%s17531_s3 + $0xae0] sm:$0xf]  ;;  %v10551_v21 = vor.u32 %v11371_v18, %v10550_v44  ;;  %7086 = vmatpush.bf16.msra.mxu0 %v10047_v19  ;;  %7099 = vmatpush.bf16.msra.mxu1 %v10111_v27  ;;  %v4071_v59 = vsel %vm3788_vm1, %v4070_v35, %v4068_v16 }
 0x4b0   :  { %4063 = vst [vmem:[#allocation3 + $0x5c] sm:$0x1] %v4061_v38  ;;  %v4812_v26 = vunpack.c.l.b16 %v4378_v8  ;;  %v4813_v9 = vunpack.c.h.b16 %v4378_v8  ;;  %v11337_v51 = vld [vmem:[%s17531_s3 + $0xae4] sm:$0xf0]  ;;  %v10478_v61 = vld [vmem:[%s17531_s3 + $0xb60] sm:$0xf]  ;;  %v10351_v41 = vor.u32 %v11321_v50, %v10350_v5  ;;  %v4072_v55 = vpack.c.b16 %v4071_v59, %v4071_v59 }
 0x4b1   :  { %7111 = vmatpush.bf16.msra.mxu2 %v10183_v6  ;;  %7124 = vmatpush.bf16.msra.mxu3 %v10247_v53  ;;  %v11353_v30 = vld [vmem:[%s17531_s3 + $0xb64] sm:$0xf0]  ;;  %v10542_v36 = vld [vmem:[%s17531_s3 + $0xbe0] sm:$0xf]  ;;  %v10415_v45 = vor.u32 %v11337_v51, %v10414_v49  ;;  %v10342_v7 = vld [vmem:[%s17531_s3 + $0xa50] sm:$0xf]  ;;  %v16073_v39 = vpack.c.b16 %v4814_v23, %v4814_v23  ;;  %v16075_v12 = vpack.c.b16 %v4815_v37, %v4815_v37 }
 0x4b2   :  { %v11369_v47 = vld [vmem:[%s17531_s3 + $0xbe4] sm:$0xf0]  ;;  %v10479_v10 = vor.u32 %v11353_v30, %v10478_v61  ;;  %v16060_v32 = vpack.c.b16 %v4812_v26, %v4812_v26  ;;  %v16062_v57 = vpack.c.b16 %v4813_v9, %v4813_v9  ;;  %v11319_v48 = vld [vmem:[%s17531_s3 + $0xa54] sm:$0xf0]  ;;  %v10406_v56 = vld [vmem:[%s17531_s3 + $0xad0] sm:$0xf] }
 0x4b3   :  { %7131 = vmatpush.bf16.msrb.mxu0 %v10359_v1  ;;  %7144 = vmatpush.bf16.msrb.mxu1 %v10423_v17  ;;  %v10543_v24 = vor.u32 %v11369_v47, %v10542_v36  ;;  %v11335_v20 = vld [vmem:[%s17531_s3 + $0xad4] sm:$0xf0]  ;;  %v10470_v38 = vld [vmem:[%s17531_s3 + $0xb50] sm:$0xf]  ;;  %4345 = vst [vmem:[#allocation3 + $0x58] sm:$0x2] %v4343_v40  ;;  %v10343_v3 = vor.u32 %v11319_v48, %v10342_v7 }
 0x4b4   :  { %7087 = vmatmul.bf16.vlgmr.msra.gmra.mxu0 %v16060_v32  ;;  %7100 = vmatmul.bf16.vlgmr.msra.gmra.mxu1 %v16062_v57  ;;  %v11351_v6 = vld [vmem:[%s17531_s3 + $0xb54] sm:$0xf0]  ;;  %v10534_v53 = vld [vmem:[%s17531_s3 + $0xbd0] sm:$0xf]  ;;  %v10407_v63 = vor.u32 %v11335_v20, %v10406_v56  ;;  %v10334_v35 = vld [vmem:[%s17531_s3 + $0xa40] sm:$0xf] }
 0x4b5   :  { %7112 = vmatpush.bf16.msra.mxu2 %v10175_v62  ;;  %7125 = vmatpush.bf16.msra.mxu3 %v10239_v13  ;;  %v11367_v4 = vld [vmem:[%s17531_s3 + $0xbd4] sm:$0xf0]  ;;  %v11317_v19 = vld [vmem:[%s17531_s3 + $0xa44] sm:$0xf0]  ;;  %4074 = vst [vmem:[#allocation3 + $0x60] sm:$0x1] %v4072_v55  ;;  %v10471_v27 = vor.u32 %v11351_v6, %v10470_v38 }
 0x4b6   :  { %v10535_v44 = vor.u32 %v11367_v4, %v10534_v53  ;;  %v10398_v18 = vld [vmem:[%s17531_s3 + $0xac0] sm:$0xf]  ;;  %v11333_v8 = vld [vmem:[%s17531_s3 + $0xac4] sm:$0xf0]  ;;  %v10335_v22 = vor.u32 %v11317_v19, %v10334_v35  ;;  %v10326_v62 = vld [vmem:[%s17531_s3 + $0xa30] sm:$0xf] }
 0x4b7   :  { %7132 = vmatpush.bf16.msrb.mxu0 %v10351_v41  ;;  %7145 = vmatpush.bf16.msrb.mxu1 %v10415_v45  ;;  %v10462_v1 = vld [vmem:[%s17531_s3 + $0xb40] sm:$0xf]  ;;  %v11349_v17 = vld [vmem:[%s17531_s3 + $0xb44] sm:$0xf0]  ;;  %v10399_v16 = vor.u32 %v11333_v8, %v10398_v18  ;;  %v11315_v13 = vld [vmem:[%s17531_s3 + $0xa34] sm:$0xf0] }
 0x4b8   :  { %7113 = vmatmul.bf16.vlgmr.msra.gmra.mxu2 %v16073_v39  ;;  %7126 = vmatmul.bf16.vlgmr.msra.gmra.mxu3 %v16075_v12  ;;  %v10526_v52 = vld [vmem:[%s17531_s3 + $0xbc0] sm:$0xf]  ;;  %v11365_v5 = vld [vmem:[%s17531_s3 + $0xbc4] sm:$0xf0]  ;;  %v10463_v50 = vor.u32 %v11349_v17, %v10462_v1  ;;  %v10454_v26 = vld [vmem:[%s17531_s3 + $0xb30] sm:$0xf]  ;;  %v10327_v30 = vor.u32 %v11315_v13, %v10326_v62 }
 0x4b9   :  { %7157 = vmatpush.bf16.msrb.mxu2 %v10487_v43  ;;  %7170 = vmatpush.bf16.msrb.mxu3 %v10551_v21  ;;  %v10527_v49 = vor.u32 %v11365_v5, %v10526_v52  ;;  %v10390_v43 = vld [vmem:[%s17531_s3 + $0xab0] sm:$0xf]  ;;  %v11331_v21 = vld [vmem:[%s17531_s3 + $0xab4] sm:$0xf0]  ;;  %v10318_v37 = vld [vmem:[%s17531_s3 + $0xa20] sm:$0xf] }
 0x4ba   :  { %v11347_v9 = vld [vmem:[%s17531_s3 + $0xb34] sm:$0xf0]  ;;  %v10518_v51 = vld [vmem:[%s17531_s3 + $0xbb0] sm:$0xf]  ;;  %v10391_v23 = vor.u32 %v11331_v21, %v10390_v43  ;;  %v11313_v40 = vld [vmem:[%s17531_s3 + $0xa24] sm:$0xf0] }
 0x4bb   :  { %7133 = vmatpush.bf16.msrb.mxu0 %v10343_v3  ;;  %7146 = vmatpush.bf16.msrb.mxu1 %v10407_v63  ;;  %v11363_v61 = vld [vmem:[%s17531_s3 + $0xbb4] sm:$0xf0]  ;;  %v10455_v59 = vor.u32 %v11347_v9, %v10454_v26  ;;  %v10382_v47 = vld [vmem:[%s17531_s3 + $0xaa0] sm:$0xf]  ;;  %v11329_v41 = vld [vmem:[%s17531_s3 + $0xaa4] sm:$0xf0]  ;;  %v10319_v56 = vor.u32 %v11313_v40, %v10318_v37 }
 0x4bc   :  { %v10519_v36 = vor.u32 %v11363_v61, %v10518_v51  ;;  %v10446_v45 = vld [vmem:[%s17531_s3 + $0xb20] sm:$0xf]  ;;  %v11361_v48 = vld [vmem:[%s17531_s3 + $0xba4] sm:$0xf0]  ;;  %v10383_v55 = vor.u32 %v11329_v41, %v10382_v47  ;;  %v11311_v20 = vld [vmem:[%s17531_s3 + $0xa14] sm:$0xf0] }
 0x4bd   :  { %7158 = vmatpush.bf16.msrb.mxu2 %v10479_v10  ;;  %7171 = vmatpush.bf16.msrb.mxu3 %v10543_v24  ;;  %v11345_v10 = vld [vmem:[%s17531_s3 + $0xb24] sm:$0xf0]  ;;  %v10510_v7 = vld [vmem:[%s17531_s3 + $0xba0] sm:$0xf]  ;;  %v10310_v24 = vld [vmem:[%s17531_s3 + $0xa10] sm:$0xf] }
 0x4be   :  { %v10447_v38 = vor.u32 %v11345_v10, %v10446_v45  ;;  %v10511_v6 = vor.u32 %v11361_v48, %v10510_v7  ;;  %v10374_v53 = vld [vmem:[%s17531_s3 + $0xa90] sm:$0xf]  ;;  %v11327_v4 = vld [vmem:[%s17531_s3 + $0xa94] sm:$0xf0]  ;;  %v10366_v18 = vld [vmem:[%s17531_s3 + $0xa80] sm:$0xf]  ;;  %v10311_v8 = vor.u32 %v11311_v20, %v10310_v24 }
 0x4bf   :  { %7134 = vmatpush.bf16.msrb.mxu0 %v10335_v22  ;;  %7147 = vmatpush.bf16.msrb.mxu1 %v10399_v16  ;;  %v10438_v3 = vld [vmem:[%s17531_s3 + $0xb10] sm:$0xf]  ;;  %v11343_v63 = vld [vmem:[%s17531_s3 + $0xb14] sm:$0xf0]  ;;  %v10375_v1 = vor.u32 %v11327_v4, %v10374_v53  ;;  %v11325_v17 = vld [vmem:[%s17531_s3 + $0xa84] sm:$0xf0] }
 0x4c0   :  { %v10502_v35 = vld [vmem:[%s17531_s3 + $0xb90] sm:$0xf]  ;;  %v11359_v19 = vld [vmem:[%s17531_s3 + $0xb94] sm:$0xf0]  ;;  %v10430_v52 = vld [vmem:[%s17531_s3 + $0xb00] sm:$0xf]  ;;  %v10439_v22 = vor.u32 %v11343_v63, %v10438_v3 }
 0x4c1   :  { %7159 = vmatpush.bf16.msrb.mxu2 %v10471_v27  ;;  %7172 = vmatpush.bf16.msrb.mxu3 %v10535_v44  ;;  %v10302_v27 = vld [vmem:[%s17531_s3 + $0xa00] sm:$0xf]  ;;  %v11309_v44 = vld [vmem:[%s17531_s3 + $0xa04] sm:$0xf0]  ;;  %v10503_v16 = vor.u32 %v11359_v19, %v10502_v35  ;;  %v11002_v43 = vld [vmem:[%s17531_s3 + $0x74] sm:$0xf] }
 0x4c2   :  { %v11341_v5 = vld [vmem:[%s17531_s3 + $0xb04] sm:$0xf0]  ;;  %v10494_v62 = vld [vmem:[%s17531_s3 + $0xb80] sm:$0xf]  ;;  %v9080_v26 = vld [vmem:[%s17531_s3 + $0x78] sm:$0xf0]  ;;  %v10303_v61 = vor.u32 %v11309_v44, %v10302_v27 }
 0x4c3   :  { %7135 = vmatpush.bf16.msrb.mxu0 %v10327_v30  ;;  %7148 = vmatpush.bf16.msrb.mxu1 %v10391_v23  ;;  %v11357_v13 = vld [vmem:[%s17531_s3 + $0xb84] sm:$0xf0]  ;;  %v11018_v9 = vld [vmem:[%s17531_s3 + $0xf4] sm:$0xf]  ;;  %v9144_v51 = vld [vmem:[%s17531_s3 + $0xf8] sm:$0xf0]  ;;  %v10367_v30 = vor.u32 %v11325_v17, %v10366_v18  ;;  %v9083_v45 = vor.u32 %v11002_v43, %v9080_v26 }
 0x4c4   :  { %v4380_v21 = vld [vmem:[#allocation3 + $0x50] sm:$0xff]  ;;  %v11034_v23 = vld [vmem:[%s17531_s3 + $0x174] sm:$0xf]  ;;  %v9208_v37 = vld [vmem:[%s17531_s3 + $0x178] sm:$0xf0] }
 0x4c5   :  { %7160 = vmatpush.bf16.msrb.mxu2 %v10463_v50  ;;  %7173 = vmatpush.bf16.msrb.mxu3 %v10527_v49  ;;  %v10614_v50 = vld [vmem:[%s17531_s3 + $0xc70] sm:$0xf]  ;;  %v11387_v49 = vld [vmem:[%s17531_s3 + $0xc74] sm:$0xf0]  ;;  %v4816_v47 = vunpack.c.l.b16 %v4380_v21  ;;  %v4817_v10 = vunpack.c.h.b16 %v4380_v21  ;;  %v10606_v7 = vld [vmem:[%s17531_s3 + $0xc60] sm:$0xf]  ;;  %v9211_v24 = vor.u32 %v11034_v23, %v9208_v37 }
 0x4c6   :  { %v4381_v40 = vld [vmem:[#allocation3 + $0x58] sm:$0xff]  ;;  %v10615_v41 = vor.u32 %v11387_v49, %v10614_v50  ;;  %v11385_v48 = vld [vmem:[%s17531_s3 + $0xc64] sm:$0xf0]  ;;  %v11016_v53 = vld [vmem:[%s17531_s3 + $0xe4] sm:$0xf] }
 0x4c7   :  { %7136 = vmatpush.bf16.msrb.mxu0 %v10319_v56  ;;  %7149 = vmatpush.bf16.msrb.mxu1 %v10383_v55  ;;  %v11000_v56 = vld [vmem:[%s17531_s3 + $0x64] sm:$0xf]  ;;  %v9147_v55 = vor.u32 %v11018_v9, %v9144_v51  ;;  %v4818_v20 = vunpack.c.l.b16 %v4381_v40  ;;  %v9136_v4 = vld [vmem:[%s17531_s3 + $0xe8] sm:$0xf0]  ;;  %v16264_v35 = vpack.c.b16 %v4816_v47, %v4816_v47  ;;  %v10607_v19 = vor.u32 %v11385_v48, %v10606_v7  ;;  %v9128_v49 = vld [vmem:[%s17531_s3 + $0xd8] sm:$0xf0] }
 0x4c8   :  { %v11032_v3 = vld [vmem:[%s17531_s3 + $0x164] sm:$0xf]  ;;  %v9200_v63 = vld [vmem:[%s17531_s3 + $0x168] sm:$0xf0]  ;;  %v16266_v27 = vpack.c.b16 %v4817_v10, %v4817_v10  ;;  %v9139_v18 = vor.u32 %v11016_v53, %v9136_v4  ;;  %v11030_v43 = vld [vmem:[%s17531_s3 + $0x154] sm:$0xf] }
 0x4c9   :  { %7161 = vmatpush.bf16.msrb.mxu2 %v10455_v59  ;;  %7174 = vmatpush.bf16.msrb.mxu3 %v10519_v36  ;;  %v10431_v59 = vor.u32 %v11341_v5, %v10430_v52  ;;  %v10495_v36 = vor.u32 %v11357_v13, %v10494_v62  ;;  %v16274_v17 = vpack.c.b16 %v4818_v20, %v4818_v20  ;;  %v11014_v62 = vld [vmem:[%s17531_s3 + $0xd4] sm:$0xf]  ;;  %v9192_v21 = vld [vmem:[%s17531_s3 + $0x158] sm:$0xf0]  ;;  %v9120_v47 = vld [vmem:[%s17531_s3 + $0xc8] sm:$0xf0] }
 0x4ca   :  { %v9203_v5 = vor.u32 %v11032_v3, %v9200_v63  ;;  %v9131_v23 = vor.u32 %v11014_v62, %v9128_v49  ;;  %v9195_v37 = vor.u32 %v11030_v43, %v9192_v21  ;;  %v10582_v48 = vld [vmem:[%s17531_s3 + $0xc30] sm:$0xf]  ;;  %v10994_v20 = vld [vmem:[%s17531_s3 + $0x34] sm:$0xf]  ;;  %v9112_v3 = vld [vmem:[%s17531_s3 + $0xb8] sm:$0xf0] }
 0x4cb   :  { %7137 = vmatpush.bf16.msrb.mxu0 %v10311_v8  ;;  %7150 = vmatpush.bf16.msrb.mxu1 %v10375_v1  ;;  %v10598_v8 = vld [vmem:[%s17531_s3 + $0xc50] sm:$0xf]  ;;  %v11383_v1 = vld [vmem:[%s17531_s3 + $0xc54] sm:$0xf0]  ;;  %v11026_v63 = vld [vmem:[%s17531_s3 + $0x134] sm:$0xf] }
 0x4cc   :  { %v10599_v9 = vor.u32 %v11383_v1, %v10598_v8  ;;  %v10574_v8 = vld [vmem:[%s17531_s3 + $0xc20] sm:$0xf]  ;;  %v11377_v1 = vld [vmem:[%s17531_s3 + $0xc24] sm:$0xf0]  ;;  %v9040_v62 = vld [vmem:[%s17531_s3 + $0x28] sm:$0xf0] }
 0x4cd   :  { %7162 = vmatpush.bf16.msrb.mxu2 %v10447_v38  ;;  %7175 = vmatpush.bf16.msrb.mxu3 %v10511_v6  ;;  %v4819_v38 = vunpack.c.h.b16 %v4381_v40  ;;  %v9072_v6 = vld [vmem:[%s17531_s3 + $0x68] sm:$0xf0]  ;;  %v6880_v13 = vpop.f32.mrf.mxu0  ;;  %v6893_v50 = vpop.f32.mrf.mxu1  ;;  %v10996_v40 = vld [vmem:[%s17531_s3 + $0x44] sm:$0xf] }
 0x4ce   :  { %v9075_v44 = vor.u32 %v11000_v56, %v9072_v6  ;;  %v6894_v26 = vadd.f32 %v6893_v50, %v6880_v13  ;;  %v11379_v56 = vld [vmem:[%s17531_s3 + $0xc34] sm:$0xf0]  ;;  %v11010_v6 = vld [vmem:[%s17531_s3 + $0xb4] sm:$0xf]  ;;  %v11008_v13 = vld [vmem:[%s17531_s3 + $0xa4] sm:$0xf] }
 0x4cf   :  { %7138 = vmatpush.bf16.msrb.mxu0 %v10303_v61  ;;  %7151 = vmatpush.bf16.msrb.mxu1 %v10367_v30  ;;  %v16276_v52 = vpack.c.b16 %v4819_v38, %v4819_v38  ;;  %v10590_v61 = vld [vmem:[%s17531_s3 + $0xc40] sm:$0xf]  ;;  %v11381_v30 = vld [vmem:[%s17531_s3 + $0xc44] sm:$0xf0]  ;;  %v9048_v38 = vld [vmem:[%s17531_s3 + $0x38] sm:$0xf0] }
 0x4d0   :  { %v10591_v10 = vor.u32 %v11381_v30, %v10590_v61  ;;  %v9104_v43 = vld [vmem:[%s17531_s3 + $0xa8] sm:$0xf0]  ;;  %v11024_v21 = vld [vmem:[%s17531_s3 + $0x124] sm:$0xf]  ;;  %v10575_v61 = vor.u32 %v11377_v1, %v10574_v8  ;;  %v4382_v1 = vld [vmem:[#allocation3 + $0x60] sm:$0xf] }
 0x4d1   :  { %7163 = vmatpush.bf16.msrb.mxu2 %v10439_v22  ;;  %7176 = vmatpush.bf16.msrb.mxu3 %v10503_v16  ;;  %v10998_v22 = vld [vmem:[%s17531_s3 + $0x54] sm:$0xf]  ;;  %v9064_v16 = vld [vmem:[%s17531_s3 + $0x58] sm:$0xf0]  ;;  %v11020_v8 = vld [vmem:[%s17531_s3 + $0x104] sm:$0xf] }
 0x4d2   :  { %7139 = vmatmul.bf16.vlgmr.msrb.gmra.mxu0 %v16264_v35  ;;  %7152 = vmatmul.bf16.vlgmr.msrb.gmra.mxu1 %v16266_v27  ;;  %v9067_v51 = vor.u32 %v10998_v22, %v9064_v16  ;;  %v10992_v16 = vld [vmem:[%s17531_s3 + $0x24] sm:$0xf] }
 0x4d3   :  { %7183 = vmatpush.bf16.msra.mxu0 %v10615_v41  ;;  %7196 = vmatpush.bf16.msra.mxu1 %v9083_v45  ;;  %v11028_v41 = vld [vmem:[%s17531_s3 + $0x144] sm:$0xf]  ;;  %v9184_v45 = vld [vmem:[%s17531_s3 + $0x148] sm:$0xf0]  ;;  %v9043_v30 = vor.u32 %v10992_v16, %v9040_v62  ;;  %v11050_v62 = vld [vmem:[%s17531_s3 + $0x1f4] sm:$0xf] }
 0x4d4   :  { %v9152_v16 = vld [vmem:[%s17531_s3 + $0x108] sm:$0xf0] }
 0x4d5   :  { %7164 = vmatpush.bf16.msrb.mxu2 %v10431_v59  ;;  %7177 = vmatpush.bf16.msrb.mxu3 %v10495_v36  ;;  %v9056_v59 = vld [vmem:[%s17531_s3 + $0x48] sm:$0xf0]  ;;  %v11012_v36 = vld [vmem:[%s17531_s3 + $0xc4] sm:$0xf]  ;;  %v6882_v53 = vpop.f32.mrf.mxu0  ;;  %v6895_v4 = vpop.f32.mrf.mxu1 }
 0x4d6   :  { %v9059_v7 = vor.u32 %v10996_v40, %v9056_v59  ;;  %v9107_v59 = vor.u32 %v11008_v13, %v9104_v43  ;;  %v10988_v53 = vld [vmem:[%s17531_s3 + $0x4] sm:$0xf]  ;;  %v9024_v4 = vld [vmem:[%s17531_s3 + $0x8] sm:$0xf0]  ;;  %v9272_v13 = vld [vmem:[%s17531_s3 + $0x1f8] sm:$0xf0] }
 0x4d7   :  { %7184 = vmatpush.bf16.msra.mxu0 %v10607_v19  ;;  %7197 = vmatpush.bf16.msra.mxu1 %v9075_v44  ;;  %v9176_v19 = vld [vmem:[%s17531_s3 + $0x138] sm:$0xf0]  ;;  %v10583_v44 = vor.u32 %v11379_v56, %v10582_v48  ;;  %v11082_v43 = vld [vmem:[%s17531_s3 + $0x2f4] sm:$0xf] }
 0x4d8   :  { %7165 = vmatmul.bf16.vlgmr.msrb.gmra.mxu2 %v16274_v17  ;;  %7178 = vmatmul.bf16.vlgmr.msrb.gmra.mxu3 %v16276_v52  ;;  %v9179_v22 = vor.u32 %v11026_v63, %v9176_v19 }
 0x4d9   :  { %7209 = vmatpush.bf16.msra.mxu2 %v9147_v55  ;;  %7222 = vmatpush.bf16.msra.mxu3 %v9211_v24  ;;  %v9123_v55 = vor.u32 %v11012_v36, %v9120_v47  ;;  %v9187_v24 = vor.u32 %v11028_v41, %v9184_v45  ;;  %v9032_v47 = vld [vmem:[%s17531_s3 + $0x18] sm:$0xf0]  ;;  %v11006_v41 = vld [vmem:[%s17531_s3 + $0x94] sm:$0xf] }
 0x4da   :  { %v9096_v45 = vld [vmem:[%s17531_s3 + $0x98] sm:$0xf0] }
 0x4db   :  { %7185 = vmatpush.bf16.msra.mxu0 %v10599_v9  ;;  %7198 = vmatpush.bf16.msra.mxu1 %v9067_v51  ;;  %v6906_v50 = vpop.f32.mrf.mxu2  ;;  %v6919_v49 = vpop.f32.mrf.mxu3  ;;  %v9168_v9 = vld [vmem:[%s17531_s3 + $0x128] sm:$0xf0] }
 0x4dc   :  { %v6907_v51 = vadd.f32 %v6906_v50, %v6894_v26  ;;  %v9171_v36 = vor.u32 %v11024_v21, %v9168_v9  ;;  %v10990_v26 = vld [vmem:[%s17531_s3 + $0x14] sm:$0xf]  ;;  %v9027_v9 = vor.u32 %v10988_v53, %v9024_v4 }
 0x4dd   :  { %7210 = vmatpush.bf16.msra.mxu2 %v9139_v18  ;;  %7223 = vmatpush.bf16.msra.mxu3 %v9203_v5  ;;  %v9051_v18 = vor.u32 %v10994_v20, %v9048_v38  ;;  %v9115_v5 = vor.u32 %v11010_v6, %v9112_v3  ;;  %v9035_v38 = vor.u32 %v10990_v26, %v9032_v47  ;;  %v11373_v6 = vld [vmem:[%s17531_s3 + $0xc04] sm:$0xf0]  ;;  %v11066_v50 = vld [vmem:[%s17531_s3 + $0x274] sm:$0xf] }
 0x4de   :  { %v6920_v40 = vadd.f32 %v6919_v49, %v6907_v51  ;;  %v9099_v3 = vor.u32 %v11006_v41, %v9096_v45  ;;  %v9336_v49 = vld [vmem:[%s17531_s3 + $0x278] sm:$0xf0]  ;;  %v11048_v41 = vld [vmem:[%s17531_s3 + $0x1e4] sm:$0xf]  ;;  %v9264_v45 = vld [vmem:[%s17531_s3 + $0x1e8] sm:$0xf0] }
 0x4df   :  { %7186 = vmatpush.bf16.msra.mxu0 %v10591_v10  ;;  %7199 = vmatpush.bf16.msra.mxu1 %v9059_v7  ;;  %v11022_v10 = vld [vmem:[%s17531_s3 + $0x114] sm:$0xf]  ;;  %v9160_v7 = vld [vmem:[%s17531_s3 + $0x118] sm:$0xf0]  ;;  %v6932_v48 = vpop.f32.mrf.mxu0  ;;  %v6945_v56 = vpop.f32.mrf.mxu1 }
 0x4e0   :  { %v9163_v63 = vor.u32 %v11022_v10, %v9160_v7  ;;  %v9400_v51 = vld [vmem:[%s17531_s3 + $0x2f8] sm:$0xf0] }
 0x4e1   :  { %7211 = vmatpush.bf16.msra.mxu2 %v9131_v23  ;;  %7224 = vmatpush.bf16.msra.mxu3 %v9195_v37  ;;  %v10566_v23 = vld [vmem:[%s17531_s3 + $0xc10] sm:$0xf]  ;;  %v11375_v37 = vld [vmem:[%s17531_s3 + $0xc14] sm:$0xf0]  ;;  %v9403_v10 = vor.u32 %v11082_v43, %v9400_v51  ;;  %v11044_v51 = vld [vmem:[%s17531_s3 + $0x1c4] sm:$0xf] }
 0x4e2   :  { %v10567_v20 = vor.u32 %v11375_v37, %v10566_v23  ;;  %v9155_v37 = vor.u32 %v11020_v8, %v9152_v16  ;;  %v9320_v16 = vld [vmem:[%s17531_s3 + $0x258] sm:$0xf0] }
 0x4e3   :  { %7187 = vmatpush.bf16.msra.mxu0 %v10583_v44  ;;  %7200 = vmatpush.bf16.msra.mxu1 %v9051_v18  ;;  %v11004_v44 = vld [vmem:[%s17531_s3 + $0x84] sm:$0xf]  ;;  %v9088_v18 = vld [vmem:[%s17531_s3 + $0x88] sm:$0xf0] }
 0x4e4   :  { %v9091_v23 = vor.u32 %v11004_v44, %v9088_v18  ;;  %v11046_v44 = vld [vmem:[%s17531_s3 + $0x1d4] sm:$0xf]  ;;  %v9256_v18 = vld [vmem:[%s17531_s3 + $0x1d8] sm:$0xf0] }
 0x4e5   :  { %7212 = vmatpush.bf16.msra.mxu2 %v9123_v55  ;;  %7225 = vmatpush.bf16.msra.mxu3 %v9187_v24  ;;  %v6933_v55 = vadd.f32 %v6932_v48, %v6920_v40  ;;  %v10558_v24 = vld [vmem:[%s17531_s3 + $0xc00] sm:$0xf]  ;;  %v9275_v40 = vor.u32 %v11050_v62, %v9272_v13  ;;  %v11064_v48 = vld [vmem:[%s17531_s3 + $0x264] sm:$0xf]  ;;  %v11078_v62 = vld [vmem:[%s17531_s3 + $0x2d4] sm:$0xf] }
 0x4e6   :  { %v10559_v21 = vor.u32 %v11373_v6, %v10558_v24  ;;  %v9392_v24 = vld [vmem:[%s17531_s3 + $0x2e8] sm:$0xf0]  ;;  %v11094_v13 = vld [vmem:[%s17531_s3 + $0x354] sm:$0xf] }
 0x4e7   :  { %7188 = vmatpush.bf16.msra.mxu0 %v10575_v61  ;;  %7201 = vmatpush.bf16.msra.mxu1 %v9043_v30  ;;  %v6946_v19 = vadd.f32 %v6945_v56, %v6933_v55  ;;  %v11098_v61 = vld [vmem:[%s17531_s3 + $0x374] sm:$0xf]  ;;  %v9464_v30 = vld [vmem:[%s17531_s3 + $0x378] sm:$0xf0]  ;;  %v6934_v26 = vpop.f32.mrf.mxu0  ;;  %v6947_v47 = vpop.f32.mrf.mxu1  ;;  %v9328_v56 = vld [vmem:[%s17531_s3 + $0x268] sm:$0xf0] }
 0x4e8   :  { %v9467_v7 = vor.u32 %v11098_v61, %v9464_v30  ;;  %v11080_v55 = vld [vmem:[%s17531_s3 + $0x2e4] sm:$0xf]  ;;  %v9248_v61 = vld [vmem:[%s17531_s3 + $0x1c8] sm:$0xf0] }
 0x4e9   :  { %7213 = vmatpush.bf16.msra.mxu2 %v9115_v5  ;;  %7226 = vmatpush.bf16.msra.mxu3 %v9179_v22  ;;  %v6908_v5 = vpop.f32.mrf.mxu2  ;;  %v6921_v22 = vpop.f32.mrf.mxu3  ;;  %v9440_v26 = vld [vmem:[%s17531_s3 + $0x348] sm:$0xf0] }
 0x4ea   :  { %v11062_v22 = vld [vmem:[%s17531_s3 + $0x254] sm:$0xf] }
 0x4eb   :  { %7189 = vmatpush.bf16.msra.mxu0 %v10567_v20  ;;  %7202 = vmatpush.bf16.msra.mxu1 %v9035_v38  ;;  %v11096_v20 = vld [vmem:[%s17531_s3 + $0x364] sm:$0xf]  ;;  %v9456_v38 = vld [vmem:[%s17531_s3 + $0x368] sm:$0xf0]  ;;  %v9323_v43 = vor.u32 %v11062_v22, %v9320_v16 }
 0x4ec   :  { %v9459_v5 = vor.u32 %v11096_v20, %v9456_v38  ;;  %v11058_v20 = vld [vmem:[%s17531_s3 + $0x234] sm:$0xf]  ;;  %v9304_v38 = vld [vmem:[%s17531_s3 + $0x238] sm:$0xf0]  ;;  %v9232_v22 = vld [vmem:[%s17531_s3 + $0x1a8] sm:$0xf0] }
 0x4ed   :  { %7214 = vmatpush.bf16.msra.mxu2 %v9107_v59  ;;  %7227 = vmatpush.bf16.msra.mxu3 %v9171_v36  ;;  %v9339_v59 = vor.u32 %v11066_v50, %v9336_v49  ;;  %v4820_v36 = vunpack.c.l.b16 %v4382_v1  ;;  %v9395_v1 = vor.u32 %v11080_v55, %v9392_v24  ;;  %v9448_v50 = vld [vmem:[%s17531_s3 + $0x358] sm:$0xf0] }
 0x4ef   :  { %7190 = vmatpush.bf16.msra.mxu0 %v10559_v21  ;;  %7203 = vmatpush.bf16.msra.mxu1 %v9027_v9  ;;  %v16468_v4 = vpack.c.b16 %v4820_v36, %v4820_v36  ;;  %v11092_v36 = vld [vmem:[%s17531_s3 + $0x344] sm:$0xf] }
 0x4f0   :  { %v9443_v24 = vor.u32 %v11092_v36, %v9440_v26  ;;  %v11070_v36 = vld [vmem:[%s17531_s3 + $0x294] sm:$0xf]  ;;  %v9352_v26 = vld [vmem:[%s17531_s3 + $0x298] sm:$0xf0] }
 0x4f1   :  { %7215 = vmatpush.bf16.msra.mxu2 %v9099_v3  ;;  %7228 = vmatpush.bf16.msra.mxu3 %v9163_v63  ;;  %v6958_v6 = vpop.f32.mrf.mxu2  ;;  %v6971_v53 = vpop.f32.mrf.mxu3  ;;  %v9267_v3 = vor.u32 %v11048_v41, %v9264_v45  ;;  %v9331_v63 = vor.u32 %v11064_v48, %v9328_v56  ;;  %v11042_v48 = vld [vmem:[%s17531_s3 + $0x1b4] sm:$0xf]  ;;  %v9240_v56 = vld [vmem:[%s17531_s3 + $0x1b8] sm:$0xf0] }
 0x4f2   :  { %v6959_v8 = vadd.f32 %v6958_v6, %v6946_v19  ;;  %7191 = vmatmul.bf16.vlgmr.msra.gmra.mxu0 %v16468_v4  ;;  %7204 = vmatmul.bf16.vlgmr.msra.gmra.mxu1 %v15148_v31  ;;  %v9384_v19 = vld [vmem:[%s17531_s3 + $0x2d8] sm:$0xf0]  ;;  %v9259_v31 = vor.u32 %v11046_v44, %v9256_v18  ;;  %v6984_v21 = vpop.f32.mrf.mxu0  ;;  %v6997_v9 = vpop.f32.mrf.mxu1  ;;  %v11074_v6 = vld [vmem:[%s17531_s3 + $0x2b4] sm:$0xf]  ;;  %v9243_v44 = vor.u32 %v11042_v48, %v9240_v56  ;;  %v9216_v56 = vld [vmem:[%s17531_s3 + $0x188] sm:$0xf0] }
 0x4f3   :  { %7235 = vmatpush.bf16.msrb.mxu0 %v9275_v40  ;;  %7248 = vmatpush.bf16.msrb.mxu1 %v9339_v59  ;;  %v9387_v30 = vor.u32 %v11078_v62, %v9384_v19  ;;  %v11076_v40 = vld [vmem:[%s17531_s3 + $0x2c4] sm:$0xf]  ;;  %v9376_v59 = vld [vmem:[%s17531_s3 + $0x2c8] sm:$0xf0]  ;;  %v9307_v18 = vor.u32 %v11058_v20, %v9304_v38  ;;  %v9355_v20 = vor.u32 %v11070_v36, %v9352_v26 }
 0x4f4   :  { %v6972_v49 = vadd.f32 %v6971_v53, %v6959_v8  ;;  %v9379_v55 = vor.u32 %v11076_v40, %v9376_v59  ;;  %v9368_v53 = vld [vmem:[%s17531_s3 + $0x2b8] sm:$0xf0]  ;;  %v11056_v19 = vld [vmem:[%s17531_s3 + $0x224] sm:$0xf]  ;;  %v11054_v40 = vld [vmem:[%s17531_s3 + $0x214] sm:$0xf] }
 0x4f5   :  { %7216 = vmatpush.bf16.msra.mxu2 %v9091_v23  ;;  %7229 = vmatpush.bf16.msra.mxu3 %v9155_v37  ;;  %v9312_v37 = vld [vmem:[%s17531_s3 + $0x248] sm:$0xf0]  ;;  %v9371_v16 = vor.u32 %v11074_v6, %v9368_v53  ;;  %v9288_v59 = vld [vmem:[%s17531_s3 + $0x218] sm:$0xf0]  ;;  %v11068_v6 = vld [vmem:[%s17531_s3 + $0x284] sm:$0xf] }
 0x4f6   :  { %v6985_v23 = vadd.f32 %v6984_v21, %v6972_v49  ;;  %v9360_v49 = vld [vmem:[%s17531_s3 + $0x2a8] sm:$0xf0]  ;;  %v9291_v48 = vor.u32 %v11054_v40, %v9288_v59  ;;  %v11160_v59 = vld [vmem:[%s17531_s3 + $0x564] sm:$0xf] }
 0x4f7   :  { %7236 = vmatpush.bf16.msrb.mxu0 %v9267_v3  ;;  %7249 = vmatpush.bf16.msrb.mxu1 %v9331_v63  ;;  %v11090_v3 = vld [vmem:[%s17531_s3 + $0x334] sm:$0xf]  ;;  %v9432_v63 = vld [vmem:[%s17531_s3 + $0x338] sm:$0xf0]  ;;  %v9344_v53 = vld [vmem:[%s17531_s3 + $0x288] sm:$0xf0] }
 0x4f8   :  { %7217 = vmatmul.bf16.vlgmr.msra.gmra.mxu2 %v15150_v34  ;;  %7230 = vmatmul.bf16.vlgmr.msra.gmra.mxu3 %v15237_v25  ;;  %v9451_v34 = vor.u32 %v11094_v13, %v9448_v50  ;;  %v11060_v25 = vld [vmem:[%s17531_s3 + $0x244] sm:$0xf]  ;;  %v6998_v47 = vadd.f32 %v6997_v9, %v6985_v23  ;;  %v9435_v62 = vor.u32 %v11090_v3, %v9432_v63  ;;  %v9296_v13 = vld [vmem:[%s17531_s3 + $0x228] sm:$0xf0] }
 0x4f9   :  { %7261 = vmatpush.bf16.msrb.mxu2 %v9403_v10  ;;  %7274 = vmatpush.bf16.msrb.mxu3 %v9467_v7  ;;  %v6960_v41 = vpop.f32.mrf.mxu2  ;;  %v6973_v45 = vpop.f32.mrf.mxu3  ;;  %v9251_v10 = vor.u32 %v11044_v51, %v9248_v61  ;;  %v9315_v7 = vor.u32 %v11060_v25, %v9312_v37  ;;  %v11072_v50 = vld [vmem:[%s17531_s3 + $0x2a4] sm:$0xf]  ;;  %v9299_v61 = vor.u32 %v11056_v19, %v9296_v13  ;;  %v9408_v63 = vld [vmem:[%s17531_s3 + $0x308] sm:$0xf0]  ;;  %v9656_v13 = vld [vmem:[%s17531_s3 + $0x4f8] sm:$0xf0] }
 0x4fa   :  { %v6986_v8 = vpop.f32.mrf.mxu0  ;;  %v9363_v25 = vor.u32 %v11072_v50, %v9360_v49  ;;  %v9416_v41 = vld [vmem:[%s17531_s3 + $0x318] sm:$0xf0]  ;;  %v11084_v3 = vld [vmem:[%s17531_s3 + $0x304] sm:$0xf]  ;;  %v11162_v50 = vld [vmem:[%s17531_s3 + $0x574] sm:$0xf] }
 0x4fb   :  { %7237 = vmatpush.bf16.msrb.mxu0 %v9259_v31  ;;  %7250 = vmatpush.bf16.msrb.mxu1 %v9323_v43  ;;  %v11088_v31 = vld [vmem:[%s17531_s3 + $0x324] sm:$0xf]  ;;  %v9424_v43 = vld [vmem:[%s17531_s3 + $0x328] sm:$0xf0]  ;;  %v11130_v8 = vld [vmem:[%s17531_s3 + $0x474] sm:$0xf] }
 0x4fc   :  { %v9427_v37 = vor.u32 %v11088_v31, %v9424_v43  ;;  %v9720_v49 = vld [vmem:[%s17531_s3 + $0x578] sm:$0xf0]  ;;  %v9347_v31 = vor.u32 %v11068_v6, %v9344_v53  ;;  %v9411_v43 = vor.u32 %v11084_v3, %v9408_v63  ;;  %v9648_v40 = vld [vmem:[%s17531_s3 + $0x4e8] sm:$0xf0]  ;;  %v11108_v63 = vld [vmem:[%s17531_s3 + $0x3c4] sm:$0xf] }
 0x4fd   :  { %7262 = vmatpush.bf16.msrb.mxu2 %v9395_v1  ;;  %7275 = vmatpush.bf16.msrb.mxu3 %v9459_v5  ;;  %v6999_v1 = vpop.f32.mrf.mxu1  ;;  %v11040_v5 = vld [vmem:[%s17531_s3 + $0x1a4] sm:$0xf]  ;;  %v9712_v36 = vld [vmem:[%s17531_s3 + $0x568] sm:$0xf0]  ;;  %v9704_v6 = vld [vmem:[%s17531_s3 + $0x558] sm:$0xf0] }
 0x4fe   :  { %v9235_v51 = vor.u32 %v11040_v5, %v9232_v22  ;;  %v9592_v1 = vld [vmem:[%s17531_s3 + $0x478] sm:$0xf0]  ;;  %v11146_v5 = vld [vmem:[%s17531_s3 + $0x4f4] sm:$0xf] }
 0x4ff   :  { %7238 = vmatpush.bf16.msrb.mxu0 %v9251_v10  ;;  %7251 = vmatpush.bf16.msrb.mxu1 %v9315_v7  ;;  %v11036_v10 = vld [vmem:[%s17531_s3 + $0x184] sm:$0xf] }
 0x501   :  { %7263 = vmatpush.bf16.msrb.mxu2 %v9387_v30  ;;  %7276 = vmatpush.bf16.msrb.mxu3 %v9451_v34  ;;  %v7010_v21 = vpop.f32.mrf.mxu2  ;;  %v7023_v9 = vpop.f32.mrf.mxu3  ;;  %v11038_v30 = vld [vmem:[%s17531_s3 + $0x194] sm:$0xf]  ;;  %v9224_v34 = vld [vmem:[%s17531_s3 + $0x198] sm:$0xf0] }
 0x502   :  { %v7011_v23 = vadd.f32 %v7010_v21, %v6998_v47  ;;  %v11086_v47 = vld [vmem:[%s17531_s3 + $0x314] sm:$0xf]  ;;  %v9227_v7 = vor.u32 %v11038_v30, %v9224_v34  ;;  %v9659_v30 = vor.u32 %v11146_v5, %v9656_v13  ;;  %v9723_v34 = vor.u32 %v11162_v50, %v9720_v49  ;;  %v11140_v5 = vld [vmem:[%s17531_s3 + $0x4c4] sm:$0xf]  ;;  %v9496_v49 = vld [vmem:[%s17531_s3 + $0x3b8] sm:$0xf0] }
 0x503   :  { %7239 = vmatpush.bf16.msrb.mxu0 %v9243_v44  ;;  %7252 = vmatpush.bf16.msrb.mxu1 %v9307_v18  ;;  %v9419_v38 = vor.u32 %v11086_v47, %v9416_v41  ;;  %v11114_v44 = vld [vmem:[%s17531_s3 + $0x3f4] sm:$0xf]  ;;  %v9528_v18 = vld [vmem:[%s17531_s3 + $0x3f8] sm:$0xf0] }
 0x504   :  { %v16594_v45 = vadd.f32 %v7023_v9, %v7011_v23  ;;  %v9531_v21 = vor.u32 %v11114_v44, %v9528_v18  ;;  %v9595_v9 = vor.u32 %v11130_v8, %v9592_v1  ;;  %v11128_v23 = vld [vmem:[%s17531_s3 + $0x464] sm:$0xf]  ;;  %v11110_v41 = vld [vmem:[%s17531_s3 + $0x3d4] sm:$0xf]  ;;  %v9504_v44 = vld [vmem:[%s17531_s3 + $0x3c8] sm:$0xf0] }
 0x505   :  { %7264 = vmatpush.bf16.msrb.mxu2 %v9379_v55  ;;  %7277 = vmatpush.bf16.msrb.mxu3 %v9443_v24  ;;  %v11052_v55 = vld [vmem:[%s17531_s3 + $0x204] sm:$0xf]  ;;  %v9280_v24 = vld [vmem:[%s17531_s3 + $0x208] sm:$0xf0]  ;;  %v11106_v50 = vld [vmem:[%s17531_s3 + $0x3b4] sm:$0xf] }
 0x506   :  { %v9283_v19 = vor.u32 %v11052_v55, %v9280_v24  ;;  %v9576_v55 = vld [vmem:[%s17531_s3 + $0x458] sm:$0xf0]  ;;  %v11142_v24 = vld [vmem:[%s17531_s3 + $0x4d4] sm:$0xf]  ;;  %v11124_v8 = vld [vmem:[%s17531_s3 + $0x444] sm:$0xf] }
 0x507   :  { %7240 = vmatpush.bf16.msrb.mxu0 %v9235_v51  ;;  %7253 = vmatpush.bf16.msrb.mxu1 %v9299_v61  ;;  %v11112_v51 = vld [vmem:[%s17531_s3 + $0x3e4] sm:$0xf]  ;;  %v9520_v61 = vld [vmem:[%s17531_s3 + $0x3e8] sm:$0xf0] }
 0x508   :  { %v9523_v26 = vor.u32 %v11112_v51, %v9520_v61  ;;  %v9568_v1 = vld [vmem:[%s17531_s3 + $0x448] sm:$0xf0]  ;;  %v11138_v51 = vld [vmem:[%s17531_s3 + $0x4b4] sm:$0xf]  ;;  %v9624_v61 = vld [vmem:[%s17531_s3 + $0x4b8] sm:$0xf0] }
 0x509   :  { %7265 = vmatpush.bf16.msrb.mxu2 %v9371_v16  ;;  %7278 = vmatpush.bf16.msrb.mxu3 %v9435_v62  ;;  %v7012_v22 = vpop.f32.mrf.mxu2  ;;  %v7025_v16 = vpop.f32.mrf.mxu3  ;;  %v9219_v62 = vor.u32 %v11036_v10, %v9216_v56  ;;  %v9512_v10 = vld [vmem:[%s17531_s3 + $0x3d8] sm:$0xf0]  ;;  %v11126_v56 = vld [vmem:[%s17531_s3 + $0x454] sm:$0xf]  ;;  %v9571_v13 = vor.u32 %v11124_v8, %v9568_v1 }
 0x50a   :  { %v9632_v22 = vld [vmem:[%s17531_s3 + $0x4c8] sm:$0xf0]  ;;  %v9608_v8 = vld [vmem:[%s17531_s3 + $0x498] sm:$0xf0]  ;;  %v11150_v1 = vld [vmem:[%s17531_s3 + $0x514] sm:$0xf] }
 0x50b   :  { %7241 = vmatpush.bf16.msrb.mxu0 %v9227_v7  ;;  %7254 = vmatpush.bf16.msrb.mxu1 %v9291_v48  ;;  %v9715_v48 = vor.u32 %v11160_v59, %v9712_v36  ;;  %v9696_v16 = vld [vmem:[%s17531_s3 + $0x548] sm:$0xf0]  ;;  %v11104_v59 = vld [vmem:[%s17531_s3 + $0x3a4] sm:$0xf] }
 0x50c   :  { %v9488_v36 = vld [vmem:[%s17531_s3 + $0x3a8] sm:$0xf0] }
 0x50d   :  { %7266 = vmatpush.bf16.msrb.mxu2 %v9363_v25  ;;  %7279 = vmatpush.bf16.msrb.mxu3 %v9427_v37  ;;  %v9584_v25 = vld [vmem:[%s17531_s3 + $0x468] sm:$0xf0]  ;;  %v11144_v37 = vld [vmem:[%s17531_s3 + $0x4e4] sm:$0xf] }
 0x50e   :  { %v9587_v47 = vor.u32 %v11128_v23, %v9584_v25  ;;  %v9651_v7 = vor.u32 %v11144_v37, %v9648_v40  ;;  %v9499_v23 = vor.u32 %v11106_v50, %v9496_v49 }
 0x50f   :  { %7242 = vmatpush.bf16.msrb.mxu0 %v9219_v62  ;;  %7255 = vmatpush.bf16.msrb.mxu1 %v9283_v19  ;;  %v7036_v53 = vpop.f32.mrf.mxu0  ;;  %v7049_v3 = vpop.f32.mrf.mxu1  ;;  %v9507_v19 = vor.u32 %v11108_v63, %v9504_v44  ;;  %v11118_v44 = vld [vmem:[%s17531_s3 + $0x414] sm:$0xf] }
 0x511   :  { %7267 = vmatpush.bf16.msrb.mxu2 %v9355_v20  ;;  %7280 = vmatpush.bf16.msrb.mxu3 %v9419_v38  ;;  %v9640_v20 = vld [vmem:[%s17531_s3 + $0x4d8] sm:$0xf0]  ;;  %v11158_v38 = vld [vmem:[%s17531_s3 + $0x554] sm:$0xf] }
 0x512   :  { %7243 = vmatmul.bf16.vlgmr.msrb.gmra.mxu0 %v15239_v15  ;;  %7256 = vmatmul.bf16.vlgmr.msrb.gmra.mxu1 %v15324_v0  ;;  %v9515_v15 = vor.u32 %v11110_v41, %v9512_v10  ;;  %v9579_v0 = vor.u32 %v11126_v56, %v9576_v55  ;;  %v9643_v18 = vor.u32 %v11142_v24, %v9640_v20  ;;  %v11120_v41 = vld [vmem:[%s17531_s3 + $0x424] sm:$0xf]  ;;  %v9552_v10 = vld [vmem:[%s17531_s3 + $0x428] sm:$0xf0] }
 0x513   :  { %7287 = vmatpush.bf16.msra.mxu0 %v9531_v21  ;;  %7300 = vmatpush.bf16.msra.mxu1 %v9595_v9  ;;  %v11122_v21 = vld [vmem:[%s17531_s3 + $0x434] sm:$0xf]  ;;  %v9560_v9 = vld [vmem:[%s17531_s3 + $0x438] sm:$0xf0]  ;;  %v11152_v56 = vld [vmem:[%s17531_s3 + $0x524] sm:$0xf] }
 0x514   :  { %v9563_v25 = vor.u32 %v11122_v21, %v9560_v9  ;;  %v9680_v55 = vld [vmem:[%s17531_s3 + $0x528] sm:$0xf0]  ;;  %v11148_v21 = vld [vmem:[%s17531_s3 + $0x504] sm:$0xf] }
 0x515   :  { %7268 = vmatpush.bf16.msrb.mxu2 %v9347_v31  ;;  %7281 = vmatpush.bf16.msrb.mxu3 %v9411_v43  ;;  %v9635_v31 = vor.u32 %v11140_v5, %v9632_v22  ;;  %v9683_v63 = vor.u32 %v11152_v56, %v9680_v55  ;;  %v9672_v5 = vld [vmem:[%s17531_s3 + $0x518] sm:$0xf0]  ;;  %v11100_v22 = vld [vmem:[%s17531_s3 + $0x384] sm:$0xf]  ;;  %v9664_v9 = vld [vmem:[%s17531_s3 + $0x508] sm:$0xf0] }
 0x516   :  { %v9675_v49 = vor.u32 %v11150_v1, %v9672_v5  ;;  %v11176_v56 = vld [vmem:[%s17531_s3 + $0x5e4] sm:$0xf]  ;;  %v9776_v55 = vld [vmem:[%s17531_s3 + $0x5e8] sm:$0xf0]  ;;  %v11190_v5 = vld [vmem:[%s17531_s3 + $0x654] sm:$0xf] }
 0x517   :  { %7288 = vmatpush.bf16.msra.mxu0 %v9523_v26  ;;  %7301 = vmatpush.bf16.msra.mxu1 %v9587_v47  ;;  %v7038_v37 = vpop.f32.mrf.mxu0  ;;  %v7051_v40 = vpop.f32.mrf.mxu1  ;;  %v9627_v26 = vor.u32 %v11138_v51, %v9624_v61  ;;  %v11178_v51 = vld [vmem:[%s17531_s3 + $0x5f4] sm:$0xf]  ;;  %v9784_v61 = vld [vmem:[%s17531_s3 + $0x5f8] sm:$0xf0] }
 0x518   :  { %7269 = vmatmul.bf16.vlgmr.msrb.gmra.mxu2 %v15326_v28  ;;  %7282 = vmatmul.bf16.vlgmr.msrb.gmra.mxu3 %v15378_v14  ;;  %v9707_v28 = vor.u32 %v11158_v38, %v9704_v6  ;;  %v7037_v14 = vadd.f32 %v7036_v53, %v16594_v45  ;;  %v11156_v45 = vld [vmem:[%s17531_s3 + $0x544] sm:$0xf]  ;;  %v9491_v6 = vor.u32 %v11104_v59, %v9488_v36  ;;  %v9480_v53 = vld [vmem:[%s17531_s3 + $0x398] sm:$0xf0]  ;;  %v11210_v37 = vld [vmem:[%s17531_s3 + $0x6f4] sm:$0xf] }
 0x519   :  { %7313 = vmatpush.bf16.msra.mxu2 %v9659_v30  ;;  %7326 = vmatpush.bf16.msra.mxu3 %v9723_v34  ;;  %v9699_v43 = vor.u32 %v11156_v45, %v9696_v16  ;;  %v11154_v30 = vld [vmem:[%s17531_s3 + $0x534] sm:$0xf]  ;;  %v9688_v34 = vld [vmem:[%s17531_s3 + $0x538] sm:$0xf0] }
 0x51a   :  { %v7050_v62 = vadd.f32 %v7049_v3, %v7037_v14  ;;  %v9691_v47 = vor.u32 %v11154_v30, %v9688_v34  ;;  %v9912_v36 = vld [vmem:[%s17531_s3 + $0x6f8] sm:$0xf0] }
 0x51b   :  { %7289 = vmatpush.bf16.msra.mxu0 %v9515_v15  ;;  %7302 = vmatpush.bf16.msra.mxu1 %v9579_v0  ;;  %v7062_v24 = vpop.f32.mrf.mxu2  ;;  %v7075_v20 = vpop.f32.mrf.mxu3  ;;  %v9555_v15 = vor.u32 %v11120_v41, %v9552_v10  ;;  %v11102_v0 = vld [vmem:[%s17531_s3 + $0x394] sm:$0xf]  ;;  %v9667_v10 = vor.u32 %v11148_v21, %v9664_v9  ;;  %v9888_v21 = vld [vmem:[%s17531_s3 + $0x6c8] sm:$0xf0]  ;;  %v11220_v9 = vld [vmem:[%s17531_s3 + $0x744] sm:$0xf] }
 0x51c   :  { %v7063_v38 = vadd.f32 %v7062_v24, %v7050_v62  ;;  %v9483_v45 = vor.u32 %v11102_v0, %v9480_v53  ;;  %v9472_v62 = vld [vmem:[%s17531_s3 + $0x388] sm:$0xf0]  ;;  %v9915_v24 = vor.u32 %v11210_v37, %v9912_v36  ;;  %v11224_v53 = vld [vmem:[%s17531_s3 + $0x764] sm:$0xf]  ;;  %v11170_v37 = vld [vmem:[%s17531_s3 + $0x5b4] sm:$0xf] }
 0x51d   :  { %7314 = vmatpush.bf16.msra.mxu2 %v9651_v7  ;;  %7327 = vmatpush.bf16.msra.mxu3 %v9715_v48  ;;  %v11136_v7 = vld [vmem:[%s17531_s3 + $0x4a4] sm:$0xf]  ;;  %v9616_v48 = vld [vmem:[%s17531_s3 + $0x4a8] sm:$0xf0]  ;;  %v9475_v40 = vor.u32 %v11100_v22, %v9472_v62  ;;  %v9832_v22 = vld [vmem:[%s17531_s3 + $0x658] sm:$0xf0] }
 0x51e   :  { %v9619_v3 = vor.u32 %v11136_v7, %v9616_v48  ;;  %v16784_v14 = vadd.f32 %v7075_v20, %v7063_v38  ;;  %v9787_v7 = vor.u32 %v11178_v51, %v9784_v61  ;;  %v11192_v38 = vld [vmem:[%s17531_s3 + $0x664] sm:$0xf]  ;;  %v9904_v0 = vld [vmem:[%s17531_s3 + $0x6e8] sm:$0xf0]  ;;  %v11222_v62 = vld [vmem:[%s17531_s3 + $0x754] sm:$0xf] }
 0x51f   :  { %7290 = vmatpush.bf16.msra.mxu0 %v9507_v19  ;;  %7303 = vmatpush.bf16.msra.mxu1 %v9571_v13  ;;  %v11116_v19 = vld [vmem:[%s17531_s3 + $0x404] sm:$0xf]  ;;  %v9536_v13 = vld [vmem:[%s17531_s3 + $0x408] sm:$0xf0] }
 0x520   :  { %v9539_v59 = vor.u32 %v11116_v19, %v9536_v13  ;;  %v9960_v19 = vld [vmem:[%s17531_s3 + $0x758] sm:$0xf0]  ;;  %v11172_v13 = vld [vmem:[%s17531_s3 + $0x5c4] sm:$0xf]  ;;  %v9952_v51 = vld [vmem:[%s17531_s3 + $0x748] sm:$0xf0] }
 0x521   :  { %7315 = vmatpush.bf16.msra.mxu2 %v9643_v18  ;;  %7328 = vmatpush.bf16.msra.mxu3 %v9707_v28  ;;  %v9544_v18 = vld [vmem:[%s17531_s3 + $0x418] sm:$0xf0]  ;;  %v11134_v28 = vld [vmem:[%s17531_s3 + $0x494] sm:$0xf]  ;;  %v9955_v36 = vor.u32 %v11220_v9, %v9952_v51  ;;  %v9728_v51 = vld [vmem:[%s17531_s3 + $0x588] sm:$0xf0] }
 0x522   :  { %v9547_v16 = vor.u32 %v11118_v44, %v9544_v18  ;;  %v9611_v50 = vor.u32 %v11134_v28, %v9608_v8  ;;  %v11174_v18 = vld [vmem:[%s17531_s3 + $0x5d4] sm:$0xf]  ;;  %v9768_v28 = vld [vmem:[%s17531_s3 + $0x5d8] sm:$0xf0] }
 0x523   :  { %7291 = vmatpush.bf16.msra.mxu0 %v9499_v23  ;;  %7304 = vmatpush.bf16.msra.mxu1 %v9563_v25  ;;  %v7064_v30 = vpop.f32.mrf.mxu2  ;;  %v7077_v34 = vpop.f32.mrf.mxu3  ;;  %v11194_v23 = vld [vmem:[%s17531_s3 + $0x674] sm:$0xf]  ;;  %v9848_v25 = vld [vmem:[%s17531_s3 + $0x678] sm:$0xf0] }
 0x524   :  { %v9851_v48 = vor.u32 %v11194_v23, %v9848_v25 }
 0x525   :  { %7316 = vmatpush.bf16.msra.mxu2 %v9635_v31  ;;  %7329 = vmatpush.bf16.msra.mxu3 %v9699_v43  ;;  %v11132_v31 = vld [vmem:[%s17531_s3 + $0x484] sm:$0xf]  ;;  %v9600_v43 = vld [vmem:[%s17531_s3 + $0x488] sm:$0xf0] }
 0x526   :  { %v9603_v41 = vor.u32 %v11132_v31, %v9600_v43  ;;  %v9963_v31 = vor.u32 %v11222_v62, %v9960_v19  ;;  %v11204_v43 = vld [vmem:[%s17531_s3 + $0x6c4] sm:$0xf]  ;;  %v9736_v62 = vld [vmem:[%s17531_s3 + $0x598] sm:$0xf0] }
 0x527   :  { %7292 = vmatpush.bf16.msra.mxu0 %v9491_v6  ;;  %7305 = vmatpush.bf16.msra.mxu1 %v9555_v15  ;;  %v9840_v6 = vld [vmem:[%s17531_s3 + $0x668] sm:$0xf0]  ;;  %v11208_v15 = vld [vmem:[%s17531_s3 + $0x6e4] sm:$0xf] }
 0x528   :  { %v9843_v44 = vor.u32 %v11192_v38, %v9840_v6  ;;  %v9907_v8 = vor.u32 %v11208_v15, %v9904_v0  ;;  %v11184_v15 = vld [vmem:[%s17531_s3 + $0x624] sm:$0xf]  ;;  %v9808_v0 = vld [vmem:[%s17531_s3 + $0x628] sm:$0xf0] }
 0x529   :  { %7317 = vmatpush.bf16.msra.mxu2 %v9627_v26  ;;  %7330 = vmatpush.bf16.msra.mxu3 %v9691_v47  ;;  %v11226_v26 = vld [vmem:[%s17531_s3 + $0x774] sm:$0xf]  ;;  %v9976_v47 = vld [vmem:[%s17531_s3 + $0x778] sm:$0xf0] }
 0x52a   :  { %v9979_v20 = vor.u32 %v11226_v26, %v9976_v47  ;;  %v11186_v26 = vld [vmem:[%s17531_s3 + $0x634] sm:$0xf] }
 0x52b   :  { %7293 = vmatpush.bf16.msra.mxu0 %v9483_v45  ;;  %7306 = vmatpush.bf16.msra.mxu1 %v9547_v16  ;;  %v11206_v45 = vld [vmem:[%s17531_s3 + $0x6d4] sm:$0xf]  ;;  %v9896_v16 = vld [vmem:[%s17531_s3 + $0x6d8] sm:$0xf0] }
 0x52c   :  { %v11202_v47 = vld [vmem:[%s17531_s3 + $0x6b4] sm:$0xf] }
 0x52d   :  { %7318 = vmatpush.bf16.msra.mxu2 %v9619_v3  ;;  %7331 = vmatpush.bf16.msra.mxu3 %v9683_v63  ;;  %v9968_v3 = vld [vmem:[%s17531_s3 + $0x768] sm:$0xf0]  ;;  %v9779_v63 = vor.u32 %v11176_v56, %v9776_v55 }
 0x52e   :  { %v9971_v1 = vor.u32 %v11224_v53, %v9968_v3  ;;  %v11200_v53 = vld [vmem:[%s17531_s3 + $0x6a4] sm:$0xf] }
 0x52f   :  { %7294 = vmatpush.bf16.msra.mxu0 %v9475_v40  ;;  %7307 = vmatpush.bf16.msra.mxu1 %v9539_v59  ;;  %v9752_v40 = vld [vmem:[%s17531_s3 + $0x5b8] sm:$0xf0]  ;;  %v9891_v59 = vor.u32 %v11204_v43, %v9888_v21  ;;  %v11164_v43 = vld [vmem:[%s17531_s3 + $0x584] sm:$0xf] }
 0x530   :  { %v9755_v56 = vor.u32 %v11170_v37, %v9752_v40  ;;  %v9856_v37 = vld [vmem:[%s17531_s3 + $0x688] sm:$0xf0]  ;;  %v11212_v40 = vld [vmem:[%s17531_s3 + $0x704] sm:$0xf] }
 0x531   :  { %7319 = vmatpush.bf16.msra.mxu2 %v9611_v50  ;;  %7332 = vmatpush.bf16.msra.mxu3 %v9675_v49  ;;  %v9760_v50 = vld [vmem:[%s17531_s3 + $0x5c8] sm:$0xf0]  ;;  %v9899_v49 = vor.u32 %v11206_v45, %v9896_v16  ;;  %v7088_v61 = vpop.f32.mrf.mxu0  ;;  %v7101_v30 = vpop.f32.mrf.mxu1  ;;  %v9811_v45 = vor.u32 %v11184_v15, %v9808_v0  ;;  %v11166_v16 = vld [vmem:[%s17531_s3 + $0x594] sm:$0xf] }
 0x532   :  { %7295 = vmatmul.bf16.vlgmr.msra.gmra.mxu0 %v15380_v2  ;;  %7308 = vmatmul.bf16.vlgmr.msra.gmra.mxu1 %v15485_v60  ;;  %v9771_v2 = vor.u32 %v11174_v18, %v9768_v28  ;;  %v9835_v60 = vor.u32 %v11190_v5, %v9832_v22  ;;  %v7089_v34 = vadd.f32 %v7088_v61, %v16784_v14  ;;  %v9816_v14 = vld [vmem:[%s17531_s3 + $0x638] sm:$0xf0]  ;;  %v11216_v18 = vld [vmem:[%s17531_s3 + $0x724] sm:$0xf]  ;;  %v9936_v28 = vld [vmem:[%s17531_s3 + $0x728] sm:$0xf0] }
 0x533   :  { %7339 = vmatpush.bf16.msrb.mxu0 %v9787_v7  ;;  %7352 = vmatpush.bf16.msrb.mxu1 %v9851_v48  ;;  %v9763_v23 = vor.u32 %v11172_v13, %v9760_v50  ;;  %v11218_v7 = vld [vmem:[%s17531_s3 + $0x734] sm:$0xf]  ;;  %v9944_v48 = vld [vmem:[%s17531_s3 + $0x738] sm:$0xf0]  ;;  %v9819_v55 = vor.u32 %v11186_v26, %v9816_v14  ;;  %v9739_v21 = vor.u32 %v11166_v16, %v9736_v62  ;;  %v11180_v61 = vld [vmem:[%s17531_s3 + $0x604] sm:$0xf] }
 0x534   :  { %v9947_v6 = vor.u32 %v11218_v7, %v9944_v48  ;;  %v11182_v13 = vld [vmem:[%s17531_s3 + $0x614] sm:$0xf]  ;;  %v9800_v50 = vld [vmem:[%s17531_s3 + $0x618] sm:$0xf0]  ;;  %v9920_v26 = vld [vmem:[%s17531_s3 + $0x708] sm:$0xf0]  ;;  %v9731_v48 = vor.u32 %v11164_v43, %v9728_v51 }
 0x535   :  { %7320 = vmatpush.bf16.msra.mxu2 %v9603_v41  ;;  %7333 = vmatpush.bf16.msra.mxu3 %v9667_v10  ;;  %v7102_v41 = vadd.f32 %v7101_v30, %v7089_v34  ;;  %v9880_v10 = vld [vmem:[%s17531_s3 + $0x6b8] sm:$0xf0]  ;;  %v9803_v9 = vor.u32 %v11182_v13, %v9800_v50  ;;  %v9792_v30 = vld [vmem:[%s17531_s3 + $0x608] sm:$0xf0]  ;;  %v11242_v14 = vld [vmem:[%s17531_s3 + $0x7f4] sm:$0xf] }
 0x536   :  { %v9883_v38 = vor.u32 %v11202_v47, %v9880_v10  ;;  %v10040_v47 = vld [vmem:[%s17531_s3 + $0x7f8] sm:$0xf0]  ;;  %v11274_v7 = vld [vmem:[%s17531_s3 + $0x8f4] sm:$0xf] }
 0x537   :  { %7340 = vmatpush.bf16.msrb.mxu0 %v9779_v63  ;;  %7353 = vmatpush.bf16.msrb.mxu1 %v9843_v44  ;;  %v9872_v44 = vld [vmem:[%s17531_s3 + $0x6a8] sm:$0xf0]  ;;  %v10104_v10 = vld [vmem:[%s17531_s3 + $0x878] sm:$0xf0]  ;;  %v10043_v15 = vor.u32 %v11242_v14, %v10040_v47  ;;  %v11238_v62 = vld [vmem:[%s17531_s3 + $0x7d4] sm:$0xf] }
 0x538   :  { %7321 = vmatmul.bf16.vlgmr.msra.gmra.mxu2 %v15487_v42  ;;  %7334 = vmatmul.bf16.vlgmr.msra.gmra.mxu3 %v15544_v33  ;;  %v11188_v42 = vld [vmem:[%s17531_s3 + $0x644] sm:$0xf]  ;;  %v9824_v33 = vld [vmem:[%s17531_s3 + $0x648] sm:$0xf0]  ;;  %v11254_v50 = vld [vmem:[%s17531_s3 + $0x854] sm:$0xf] }
 0x539   :  { %7365 = vmatpush.bf16.msrb.mxu2 %v9915_v24  ;;  %7378 = vmatpush.bf16.msrb.mxu3 %v9979_v20  ;;  %v9827_v25 = vor.u32 %v11188_v42, %v9824_v33  ;;  %v11168_v24 = vld [vmem:[%s17531_s3 + $0x5a4] sm:$0xf]  ;;  %v9744_v20 = vld [vmem:[%s17531_s3 + $0x5a8] sm:$0xf0]  ;;  %v7103_v5 = vpop.f32.mrf.mxu1  ;;  %v11214_v42 = vld [vmem:[%s17531_s3 + $0x714] sm:$0xf] }
 0x53a   :  { %v9747_v22 = vor.u32 %v11168_v24, %v9744_v20  ;;  %v9928_v33 = vld [vmem:[%s17531_s3 + $0x718] sm:$0xf0]  ;;  %v11290_v24 = vld [vmem:[%s17531_s3 + $0x974] sm:$0xf]  ;;  %v11288_v5 = vld [vmem:[%s17531_s3 + $0x964] sm:$0xf] }
 0x53b   :  { %7341 = vmatpush.bf16.msrb.mxu0 %v9771_v2  ;;  %7354 = vmatpush.bf16.msrb.mxu1 %v9835_v60  ;;  %v7114_v3 = vpop.f32.mrf.mxu2  ;;  %v7127_v63 = vpop.f32.mrf.mxu3  ;;  %v9875_v2 = vor.u32 %v11200_v53, %v9872_v44  ;;  %v9939_v60 = vor.u32 %v11216_v18, %v9936_v28  ;;  %v10232_v20 = vld [vmem:[%s17531_s3 + $0x978] sm:$0xf0]  ;;  %v11240_v53 = vld [vmem:[%s17531_s3 + $0x7e4] sm:$0xf]  ;;  %v10096_v28 = vld [vmem:[%s17531_s3 + $0x868] sm:$0xf0] }
 0x53c   :  { %v10235_v44 = vor.u32 %v11290_v24, %v10232_v20  ;;  %v11256_v18 = vld [vmem:[%s17531_s3 + $0x864] sm:$0xf]  ;;  %v10216_v43 = vld [vmem:[%s17531_s3 + $0x958] sm:$0xf0]  ;;  %v11234_v14 = vld [vmem:[%s17531_s3 + $0x7b4] sm:$0xf] }
 0x53d   :  { %7366 = vmatpush.bf16.msrb.mxu2 %v9907_v8  ;;  %7379 = vmatpush.bf16.msrb.mxu3 %v9971_v1  ;;  %v7115_v8 = vadd.f32 %v7114_v3, %v7102_v41  ;;  %v7090_v1 = vpop.f32.mrf.mxu0  ;;  %v11258_v41 = vld [vmem:[%s17531_s3 + $0x874] sm:$0xf]  ;;  %v10032_v3 = vld [vmem:[%s17531_s3 + $0x7e8] sm:$0xf0]  ;;  %v10099_v16 = vor.u32 %v11256_v18, %v10096_v28  ;;  %v10008_v47 = vld [vmem:[%s17531_s3 + $0x7b8] sm:$0xf0] }
 0x53e   :  { %v10107_v0 = vor.u32 %v11258_v41, %v10104_v10  ;;  %v10160_v1 = vld [vmem:[%s17531_s3 + $0x8e8] sm:$0xf0]  ;;  %v11282_v24 = vld [vmem:[%s17531_s3 + $0x934] sm:$0xf]  ;;  %v10200_v20 = vld [vmem:[%s17531_s3 + $0x938] sm:$0xf0] }
 0x53f   :  { %7342 = vmatpush.bf16.msrb.mxu0 %v9763_v23  ;;  %7355 = vmatpush.bf16.msrb.mxu1 %v9827_v25  ;;  %v16974_v19 = vadd.f32 %v7127_v63, %v7115_v8  ;;  %v9931_v23 = vor.u32 %v11214_v42, %v9928_v33  ;;  %v11196_v25 = vld [vmem:[%s17531_s3 + $0x684] sm:$0xf]  ;;  %v10152_v42 = vld [vmem:[%s17531_s3 + $0x8d8] sm:$0xf0]  ;;  %v11286_v33 = vld [vmem:[%s17531_s3 + $0x954] sm:$0xf] }
 0x540   :  { %v11272_v8 = vld [vmem:[%s17531_s3 + $0x8e4] sm:$0xf] }
 0x541   :  { %7367 = vmatpush.bf16.msrb.mxu2 %v9899_v49  ;;  %7380 = vmatpush.bf16.msrb.mxu3 %v9963_v31  ;;  %v11198_v49 = vld [vmem:[%s17531_s3 + $0x694] sm:$0xf]  ;;  %v9864_v31 = vld [vmem:[%s17531_s3 + $0x698] sm:$0xf0]  ;;  %v11264_v18 = vld [vmem:[%s17531_s3 + $0x8a4] sm:$0xf] }
 0x542   :  { %v9867_v34 = vor.u32 %v11198_v49, %v9864_v31  ;;  %v10088_v49 = vld [vmem:[%s17531_s3 + $0x858] sm:$0xf0]  ;;  %v11270_v31 = vld [vmem:[%s17531_s3 + $0x8d4] sm:$0xf] }
 0x543   :  { %7343 = vmatpush.bf16.msrb.mxu0 %v9755_v56  ;;  %7356 = vmatpush.bf16.msrb.mxu1 %v9819_v55  ;;  %v9795_v56 = vor.u32 %v11180_v61, %v9792_v30  ;;  %v10168_v55 = vld [vmem:[%s17531_s3 + $0x8f8] sm:$0xf0]  ;;  %v10155_v51 = vor.u32 %v11270_v31, %v10152_v42  ;;  %v10219_v61 = vor.u32 %v11286_v33, %v10216_v43  ;;  %v11268_v30 = vld [vmem:[%s17531_s3 + $0x8c4] sm:$0xf]  ;;  %v11246_v33 = vld [vmem:[%s17531_s3 + $0x814] sm:$0xf] }
 0x544   :  { %v10171_v63 = vor.u32 %v11274_v7, %v10168_v55  ;;  %v11250_v7 = vld [vmem:[%s17531_s3 + $0x834] sm:$0xf]  ;;  %v10136_v55 = vld [vmem:[%s17531_s3 + $0x8b8] sm:$0xf0] }
 0x545   :  { %7368 = vmatpush.bf16.msrb.mxu2 %v9891_v59  ;;  %7381 = vmatpush.bf16.msrb.mxu3 %v9955_v36  ;;  %v7116_v59 = vpop.f32.mrf.mxu2  ;;  %v7129_v36 = vpop.f32.mrf.mxu3  ;;  %v10056_v43 = vld [vmem:[%s17531_s3 + $0x818] sm:$0xf0] }
 0x547   :  { %7344 = vmatpush.bf16.msrb.mxu0 %v9747_v22  ;;  %7357 = vmatpush.bf16.msrb.mxu1 %v9811_v45  ;;  %v10224_v22 = vld [vmem:[%s17531_s3 + $0x968] sm:$0xf0]  ;;  %v10035_v45 = vor.u32 %v11240_v53, %v10032_v3  ;;  %v10203_v3 = vor.u32 %v11282_v24, %v10200_v20  ;;  %v11354_v24 = vld [vmem:[%s17531_s3 + $0xb74] sm:$0xf]  ;;  %v10488_v20 = vld [vmem:[%s17531_s3 + $0xb78] sm:$0xf0] }
 0x548   :  { %v10227_v13 = vor.u32 %v11288_v5, %v10224_v22  ;;  %v11280_v5 = vld [vmem:[%s17531_s3 + $0x924] sm:$0xf]  ;;  %v10192_v22 = vld [vmem:[%s17531_s3 + $0x928] sm:$0xf0] }
 0x549   :  { %7369 = vmatpush.bf16.msrb.mxu2 %v9883_v38  ;;  %7382 = vmatpush.bf16.msrb.mxu3 %v9947_v6  ;;  %v9859_v38 = vor.u32 %v11196_v25, %v9856_v37  ;;  %v9923_v6 = vor.u32 %v11212_v40, %v9920_v26  ;;  %v10208_v25 = vld [vmem:[%s17531_s3 + $0x948] sm:$0xf0]  ;;  %v10195_v42 = vor.u32 %v11280_v5, %v10192_v22  ;;  %v11352_v5 = vld [vmem:[%s17531_s3 + $0xb64] sm:$0xf] }
 0x54a   :  { %v10480_v22 = vld [vmem:[%s17531_s3 + $0xb68] sm:$0xf0] }
 0x54b   :  { %7345 = vmatpush.bf16.msrb.mxu0 %v9739_v21  ;;  %7358 = vmatpush.bf16.msrb.mxu1 %v9803_v9  ;;  %v11236_v21 = vld [vmem:[%s17531_s3 + $0x7c4] sm:$0xf]  ;;  %v10016_v9 = vld [vmem:[%s17531_s3 + $0x7c8] sm:$0xf0] }
 0x54c   :  { %v10019_v36 = vor.u32 %v11236_v21, %v10016_v9  ;;  %v11278_v21 = vld [vmem:[%s17531_s3 + $0x914] sm:$0xf]  ;;  %v10184_v9 = vld [vmem:[%s17531_s3 + $0x918] sm:$0xf0] }
 0x54d   :  { %7370 = vmatpush.bf16.msrb.mxu2 %v9875_v2  ;;  %7383 = vmatpush.bf16.msrb.mxu3 %v9939_v60  ;;  %v10024_v2 = vld [vmem:[%s17531_s3 + $0x7d8] sm:$0xf0]  ;;  %v10163_v60 = vor.u32 %v11272_v8, %v10160_v1  ;;  %v10128_v1 = vld [vmem:[%s17531_s3 + $0x8a8] sm:$0xf0] }
 0x54e   :  { %v10131_v31 = vor.u32 %v11264_v18, %v10128_v1  ;;  %v11320_v18 = vld [vmem:[%s17531_s3 + $0xa64] sm:$0xf]  ;;  %v10416_v1 = vld [vmem:[%s17531_s3 + $0xae8] sm:$0xf0] }
 0x54f   :  { %7346 = vmatpush.bf16.msrb.mxu0 %v9731_v48  ;;  %7359 = vmatpush.bf16.msrb.mxu1 %v9795_v56  ;;  %v7140_v37 = vpop.f32.mrf.mxu0  ;;  %v7153_v40 = vpop.f32.mrf.mxu1  ;;  %v11266_v48 = vld [vmem:[%s17531_s3 + $0x8b4] sm:$0xf] }
 0x550   :  { %v7141_v59 = vadd.f32 %v7140_v37, %v16974_v19  ;;  %v10072_v19 = vld [vmem:[%s17531_s3 + $0x838] sm:$0xf0]  ;;  %v10139_v53 = vor.u32 %v11266_v48, %v10136_v55  ;;  %v11260_v37 = vld [vmem:[%s17531_s3 + $0x884] sm:$0xf] }
 0x551   :  { %7371 = vmatpush.bf16.msrb.mxu2 %v9867_v34  ;;  %7384 = vmatpush.bf16.msrb.mxu3 %v9931_v23  ;;  %v10144_v34 = vld [vmem:[%s17531_s3 + $0x8c8] sm:$0xf0]  ;;  %v11284_v23 = vld [vmem:[%s17531_s3 + $0x944] sm:$0xf]  ;;  %v10424_v55 = vld [vmem:[%s17531_s3 + $0xaf8] sm:$0xf0] }
 0x552   :  { %7347 = vmatmul.bf16.vlgmr.msrb.gmra.mxu0 %v15546_v11  ;;  %7360 = vmatmul.bf16.vlgmr.msrb.gmra.mxu1 %v15792_v29  ;;  %v10027_v11 = vor.u32 %v11238_v62, %v10024_v2  ;;  %v10091_v29 = vor.u32 %v11254_v50, %v10088_v49  ;;  %v10147_v41 = vor.u32 %v11268_v30, %v10144_v34  ;;  %v9992_v50 = vld [vmem:[%s17531_s3 + $0x798] sm:$0xf0]  ;;  %v11244_v30 = vld [vmem:[%s17531_s3 + $0x804] sm:$0xf]  ;;  %v10048_v34 = vld [vmem:[%s17531_s3 + $0x808] sm:$0xf0] }
 0x553   :  { %7391 = vmatpush.bf16.msra.mxu0 %v10043_v15  ;;  %7404 = vmatpush.bf16.msra.mxu1 %v10107_v0  ;;  %v10211_v10 = vor.u32 %v11284_v23, %v10208_v25  ;;  %v7154_v56 = vadd.f32 %v7153_v40, %v7141_v59  ;;  %v11232_v15 = vld [vmem:[%s17531_s3 + $0x7a4] sm:$0xf]  ;;  %v10000_v0 = vld [vmem:[%s17531_s3 + $0x7a8] sm:$0xf0]  ;;  %v10187_v25 = vor.u32 %v11278_v21, %v10184_v9 }
 0x554   :  { %v10003_v2 = vor.u32 %v11232_v15, %v10000_v0  ;;  %v10112_v40 = vld [vmem:[%s17531_s3 + $0x888] sm:$0xf0]  ;;  %v11276_v59 = vld [vmem:[%s17531_s3 + $0x904] sm:$0xf] }
 0x555   :  { %7372 = vmatpush.bf16.msrb.mxu2 %v9859_v38  ;;  %7385 = vmatpush.bf16.msrb.mxu3 %v9923_v6  ;;  %v10011_v38 = vor.u32 %v11234_v14, %v10008_v47  ;;  %v10075_v6 = vor.u32 %v11250_v7, %v10072_v19  ;;  %v10176_v14 = vld [vmem:[%s17531_s3 + $0x908] sm:$0xf0]  ;;  %v11306_v47 = vld [vmem:[%s17531_s3 + $0x9f4] sm:$0xf]  ;;  %v10360_v7 = vld [vmem:[%s17531_s3 + $0xa78] sm:$0xf0] }
 0x556   :  { %v11338_v19 = vld [vmem:[%s17531_s3 + $0xaf4] sm:$0xf]  ;;  %v10272_v21 = vld [vmem:[%s17531_s3 + $0x9c8] sm:$0xf0] }
 0x557   :  { %7392 = vmatpush.bf16.msra.mxu0 %v10035_v45  ;;  %7405 = vmatpush.bf16.msra.mxu1 %v10099_v16  ;;  %v7142_v16 = vpop.f32.mrf.mxu0  ;;  %v7155_v62 = vpop.f32.mrf.mxu1 }
 0x558   :  { %7373 = vmatmul.bf16.vlgmr.msrb.gmra.mxu2 %v15794_v58  ;;  %7386 = vmatmul.bf16.vlgmr.msrb.gmra.mxu3 %v15853_v54  ;;  %v11252_v58 = vld [vmem:[%s17531_s3 + $0x844] sm:$0xf]  ;;  %v10080_v54 = vld [vmem:[%s17531_s3 + $0x848] sm:$0xf0]  ;;  %v11302_v62 = vld [vmem:[%s17531_s3 + $0x9d4] sm:$0xf] }
 0x559   :  { %7417 = vmatpush.bf16.msra.mxu2 %v10171_v63  ;;  %7430 = vmatpush.bf16.msra.mxu3 %v10235_v44  ;;  %v10083_v26 = vor.u32 %v11252_v58, %v10080_v54  ;;  %v11248_v63 = vld [vmem:[%s17531_s3 + $0x824] sm:$0xf]  ;;  %v10064_v44 = vld [vmem:[%s17531_s3 + $0x828] sm:$0xf0]  ;;  %v10059_v58 = vor.u32 %v11246_v33, %v10056_v43  ;;  %v10408_v33 = vld [vmem:[%s17531_s3 + $0xad8] sm:$0xf0] }
 0x55a   :  { %v9984_v54 = vld [vmem:[%s17531_s3 + $0x788] sm:$0xf0]  ;;  %v11350_v43 = vld [vmem:[%s17531_s3 + $0xb54] sm:$0xf] }
 0x55b   :  { %7393 = vmatpush.bf16.msra.mxu0 %v10027_v11  ;;  %7406 = vmatpush.bf16.msra.mxu1 %v10091_v29  ;;  %v7166_v28 = vpop.f32.mrf.mxu2  ;;  %v7179_v8 = vpop.f32.mrf.mxu3  ;;  %v11262_v11 = vld [vmem:[%s17531_s3 + $0x894] sm:$0xf]  ;;  %v10120_v29 = vld [vmem:[%s17531_s3 + $0x898] sm:$0xf0] }
 0x55c   :  { %v7167_v45 = vadd.f32 %v7166_v28, %v7154_v56  ;;  %v10123_v23 = vor.u32 %v11262_v11, %v10120_v29  ;;  %v10051_v56 = vor.u32 %v11244_v30, %v10048_v34  ;;  %v10352_v28 = vld [vmem:[%s17531_s3 + $0xa68] sm:$0xf0]  ;;  %v10472_v11 = vld [vmem:[%s17531_s3 + $0xb58] sm:$0xf0]  ;;  %v11300_v29 = vld [vmem:[%s17531_s3 + $0x9c4] sm:$0xf] }
 0x55d   :  { %7418 = vmatpush.bf16.msra.mxu2 %v10163_v60  ;;  %7431 = vmatpush.bf16.msra.mxu3 %v10227_v13  ;;  %v10067_v60 = vor.u32 %v11248_v63, %v10064_v44  ;;  %v11230_v13 = vld [vmem:[%s17531_s3 + $0x794] sm:$0xf]  ;;  %v10427_v63 = vor.u32 %v11338_v19, %v10424_v55  ;;  %v10491_v44 = vor.u32 %v11354_v24, %v10488_v20  ;;  %v10464_v30 = vld [vmem:[%s17531_s3 + $0xb48] sm:$0xf0]  ;;  %v10456_v19 = vld [vmem:[%s17531_s3 + $0xb38] sm:$0xf0] }
 0x55e   :  { %v17173_v49 = vadd.f32 %v7179_v8, %v7167_v45  ;;  %v11336_v8 = vld [vmem:[%s17531_s3 + $0xae4] sm:$0xf]  ;;  %v10355_v16 = vor.u32 %v11320_v18, %v10352_v28  ;;  %v10256_v24 = vld [vmem:[%s17531_s3 + $0x9a8] sm:$0xf0] }
 0x55f   :  { %7394 = vmatpush.bf16.msra.mxu0 %v10019_v36  ;;  %7407 = vmatpush.bf16.msra.mxu1 %v10083_v26  ;;  %v11296_v55 = vld [vmem:[%s17531_s3 + $0x9a4] sm:$0xf]  ;;  %v10448_v18 = vld [vmem:[%s17531_s3 + $0xb28] sm:$0xf0] }
 0x561   :  { %7419 = vmatpush.bf16.msra.mxu2 %v10155_v51  ;;  %7432 = vmatpush.bf16.msra.mxu3 %v10219_v61  ;;  %v11228_v51 = vld [vmem:[%s17531_s3 + $0x784] sm:$0xf]  ;;  %v9995_v61 = vor.u32 %v11230_v13, %v9992_v50  ;;  %v10483_v13 = vor.u32 %v11352_v5, %v10480_v22  ;;  %v11318_v50 = vld [vmem:[%s17531_s3 + $0xa54] sm:$0xf]  ;;  %v10259_v5 = vor.u32 %v11296_v55, %v10256_v24 }
 0x562   :  { %v9987_v48 = vor.u32 %v11228_v51, %v9984_v54  ;;  %v10475_v51 = vor.u32 %v11350_v43, %v10472_v11  ;;  %v11348_v54 = vld [vmem:[%s17531_s3 + $0xb44] sm:$0xf]  ;;  %v10440_v43 = vld [vmem:[%s17531_s3 + $0xb18] sm:$0xf0]  ;;  %v11366_v24 = vld [vmem:[%s17531_s3 + $0xbd4] sm:$0xf] }
 0x563   :  { %7395 = vmatpush.bf16.msra.mxu0 %v10011_v38  ;;  %7408 = vmatpush.bf16.msra.mxu1 %v10075_v6  ;;  %v7168_v36 = vpop.f32.mrf.mxu2  ;;  %v7181_v26 = vpop.f32.mrf.mxu3  ;;  %v10115_v38 = vor.u32 %v11260_v37, %v10112_v40  ;;  %v10179_v6 = vor.u32 %v11276_v59, %v10176_v14  ;;  %v10275_v37 = vor.u32 %v11300_v29, %v10272_v21  ;;  %v11298_v59 = vld [vmem:[%s17531_s3 + $0x9b4] sm:$0xf]  ;;  %v10240_v29 = vld [vmem:[%s17531_s3 + $0x988] sm:$0xf0]  ;;  %v11308_v21 = vld [vmem:[%s17531_s3 + $0xa04] sm:$0xf] }
 0x564   :  { %v10264_v36 = vld [vmem:[%s17531_s3 + $0x9b8] sm:$0xf0]  ;;  %v10467_v14 = vor.u32 %v11348_v54, %v10464_v30  ;;  %v11340_v30 = vld [vmem:[%s17531_s3 + $0xb04] sm:$0xf] }
 0x565   :  { %7420 = vmatpush.bf16.msra.mxu2 %v10147_v41  ;;  %7433 = vmatpush.bf16.msra.mxu3 %v10211_v10  ;;  %v10296_v41 = vld [vmem:[%s17531_s3 + $0x9f8] sm:$0xf0]  ;;  %v11322_v10 = vld [vmem:[%s17531_s3 + $0xa74] sm:$0xf] }
 0x566   :  { %v10299_v15 = vor.u32 %v11306_v47, %v10296_v41  ;;  %v10363_v0 = vor.u32 %v11322_v10, %v10360_v7  ;;  %v11314_v47 = vld [vmem:[%s17531_s3 + $0xa34] sm:$0xf]  ;;  %v10392_v10 = vld [vmem:[%s17531_s3 + $0xab8] sm:$0xf0] }
 0x567   :  { %7396 = vmatpush.bf16.msra.mxu0 %v10003_v2  ;;  %7409 = vmatpush.bf16.msra.mxu1 %v10067_v60  ;;  %v10280_v2 = vld [vmem:[%s17531_s3 + $0x9d8] sm:$0xf0]  ;;  %v10419_v60 = vor.u32 %v11336_v8, %v10416_v1  ;;  %v11330_v41 = vld [vmem:[%s17531_s3 + $0xab4] sm:$0xf] }
 0x568   :  { %v11346_v7 = vld [vmem:[%s17531_s3 + $0xb34] sm:$0xf]  ;;  %v10395_v20 = vor.u32 %v11330_v41, %v10392_v10  ;;  %v11368_v10 = vld [vmem:[%s17531_s3 + $0xbe4] sm:$0xf] }
 0x569   :  { %7421 = vmatpush.bf16.msra.mxu2 %v10139_v53  ;;  %7434 = vmatpush.bf16.msra.mxu3 %v10203_v3  ;;  %v11304_v53 = vld [vmem:[%s17531_s3 + $0x9e4] sm:$0xf]  ;;  %v10288_v3 = vld [vmem:[%s17531_s3 + $0x9e8] sm:$0xf0] }
 0x56a   :  { %v10291_v45 = vor.u32 %v11304_v53, %v10288_v3 }
 0x56b   :  { %7397 = vmatpush.bf16.msra.mxu0 %v9995_v61  ;;  %7410 = vmatpush.bf16.msra.mxu1 %v10059_v58  ;;  %v11332_v61 = vld [vmem:[%s17531_s3 + $0xac4] sm:$0xf]  ;;  %v10400_v58 = vld [vmem:[%s17531_s3 + $0xac8] sm:$0xf0] }
 0x56c   :  { %v10403_v26 = vor.u32 %v11332_v61, %v10400_v58  ;;  %v10368_v61 = vld [vmem:[%s17531_s3 + $0xa88] sm:$0xf0] }
 0x56d   :  { %7422 = vmatpush.bf16.msra.mxu2 %v10131_v31  ;;  %7435 = vmatpush.bf16.msra.mxu3 %v10195_v42  ;;  %v10344_v31 = vld [vmem:[%s17531_s3 + $0xa58] sm:$0xf0]  ;;  %v11334_v42 = vld [vmem:[%s17531_s3 + $0xad4] sm:$0xf] }
 0x56e   :  { %v10411_v9 = vor.u32 %v11334_v42, %v10408_v33  ;;  %v10376_v42 = vld [vmem:[%s17531_s3 + $0xa98] sm:$0xf0]  ;;  %v11342_v33 = vld [vmem:[%s17531_s3 + $0xb14] sm:$0xf] }
 0x56f   :  { %7398 = vmatpush.bf16.msra.mxu0 %v9987_v48  ;;  %7411 = vmatpush.bf16.msra.mxu1 %v10051_v56  ;;  %v7192_v34 = vpop.f32.mrf.mxu0  ;;  %v10267_v48 = vor.u32 %v11298_v59, %v10264_v36  ;;  %v10616_v59 = vld [vmem:[%s17531_s3 + $0xc78] sm:$0xf0] }
 0x571   :  { %7423 = vmatpush.bf16.msra.mxu2 %v10123_v23  ;;  %7436 = vmatpush.bf16.msra.mxu3 %v10187_v25  ;;  %v7205_v23 = vpop.f32.mrf.mxu1  ;;  %v17318_v25 = vadd.f32 %v7192_v34, %v17173_v49  ;;  %v10328_v49 = vld [vmem:[%s17531_s3 + $0xa38] sm:$0xf0]  ;;  %v10432_v34 = vld [vmem:[%s17531_s3 + $0xb08] sm:$0xf0] }
 0x572   :  { %7399 = vmatmul.bf16.vlgmr.msra.gmra.mxu0 %v15855_v46  ;;  %7412 = vmatmul.bf16.vlgmr.msra.gmra.mxu1 %v16060_v32  ;;  %v10283_v46 = vor.u32 %v11302_v62, %v10280_v2  ;;  %v10347_v32 = vor.u32 %v11318_v50, %v10344_v31  ;;  %v10331_v56 = vor.u32 %v11314_v47, %v10328_v49  ;;  %v10312_v50 = vld [vmem:[%s17531_s3 + $0xa18] sm:$0xf0]  ;;  %v11326_v31 = vld [vmem:[%s17531_s3 + $0xa94] sm:$0xf] }
 0x573   :  { %7443 = vmatpush.bf16.msrb.mxu0 %v10299_v15  ;;  %7456 = vmatpush.bf16.msrb.mxu1 %v10363_v0  ;;  %v10320_v15 = vld [vmem:[%s17531_s3 + $0xa28] sm:$0xf0]  ;;  %v11328_v0 = vld [vmem:[%s17531_s3 + $0xaa4] sm:$0xf]  ;;  %v10435_v47 = vor.u32 %v11340_v30, %v10432_v34 }
 0x574   :  { %v10560_v30 = vld [vmem:[%s17531_s3 + $0xc08] sm:$0xf0] }
 0x575   :  { %7424 = vmatpush.bf16.msra.mxu2 %v10115_v38  ;;  %7437 = vmatpush.bf16.msra.mxu3 %v10179_v6  ;;  %v10459_v38 = vor.u32 %v11346_v7, %v10456_v19  ;;  %v11312_v6 = vld [vmem:[%s17531_s3 + $0xa24] sm:$0xf]  ;;  %v10544_v7 = vld [vmem:[%s17531_s3 + $0xbe8] sm:$0xf0] }
 0x576   :  { %v10323_v22 = vor.u32 %v11312_v6, %v10320_v15  ;;  %v11384_v19 = vld [vmem:[%s17531_s3 + $0xc64] sm:$0xf]  ;;  %v10600_v6 = vld [vmem:[%s17531_s3 + $0xc58] sm:$0xf0] }
 0x577   :  { %7444 = vmatpush.bf16.msrb.mxu0 %v10291_v45  ;;  %7457 = vmatpush.bf16.msrb.mxu1 %v10355_v16  ;;  %v7194_v8 = vpop.f32.mrf.mxu0  ;;  %v11294_v45 = vld [vmem:[%s17531_s3 + $0x994] sm:$0xf]  ;;  %v10248_v16 = vld [vmem:[%s17531_s3 + $0x998] sm:$0xf0]  ;;  %v11364_v15 = vld [vmem:[%s17531_s3 + $0xbc4] sm:$0xf] }
 0x578   :  { %7425 = vmatmul.bf16.vlgmr.msra.gmra.mxu2 %v16062_v57  ;;  %7438 = vmatmul.bf16.vlgmr.msra.gmra.mxu3 %v16073_v39  ;;  %v11316_v57 = vld [vmem:[%s17531_s3 + $0xa44] sm:$0xf]  ;;  %v10336_v39 = vld [vmem:[%s17531_s3 + $0xa48] sm:$0xf0]  ;;  %v10251_v11 = vor.u32 %v11294_v45, %v10248_v16  ;;  %v10520_v8 = vld [vmem:[%s17531_s3 + $0xbb8] sm:$0xf0] }
 0x579   :  { %7469 = vmatpush.bf16.msrb.mxu2 %v10427_v63  ;;  %7482 = vmatpush.bf16.msrb.mxu3 %v10491_v44  ;;  %v10339_v40 = vor.u32 %v11316_v57, %v10336_v39  ;;  %v10384_v63 = vld [vmem:[%s17531_s3 + $0xaa8] sm:$0xf0]  ;;  %v11344_v44 = vld [vmem:[%s17531_s3 + $0xb24] sm:$0xf]  ;;  %v7207_v1 = vpop.f32.mrf.mxu1 }
 0x57a   :  { %v10387_v2 = vor.u32 %v11328_v0, %v10384_v63  ;;  %v10304_v57 = vld [vmem:[%s17531_s3 + $0xa08] sm:$0xf0]  ;;  %v11324_v39 = vld [vmem:[%s17531_s3 + $0xa84] sm:$0xf]  ;;  %v11378_v1 = vld [vmem:[%s17531_s3 + $0xc34] sm:$0xf] }
 0x57b   :  { %7445 = vmatpush.bf16.msrb.mxu0 %v10283_v46  ;;  %7458 = vmatpush.bf16.msrb.mxu1 %v10347_v32  ;;  %v7218_v53 = vpop.f32.mrf.mxu2  ;;  %v7231_v3 = vpop.f32.mrf.mxu3  ;;  %v11292_v32 = vld [vmem:[%s17531_s3 + $0x984] sm:$0xf]  ;;  %v10528_v0 = vld [vmem:[%s17531_s3 + $0xbc8] sm:$0xf0] }
 0x57c   :  { %v7219_v28 = vadd.f32 %v7218_v53, %v7205_v23  ;;  %v11370_v23 = vld [vmem:[%s17531_s3 + $0xbf4] sm:$0xf]  ;;  %v10243_v36 = vor.u32 %v11292_v32, %v10240_v29  ;;  %v11380_v53 = vld [vmem:[%s17531_s3 + $0xc44] sm:$0xf] }
 0x57d   :  { %7470 = vmatpush.bf16.msrb.mxu2 %v10419_v60  ;;  %7483 = vmatpush.bf16.msrb.mxu3 %v10483_v13  ;;  %v10451_v60 = vor.u32 %v11344_v44, %v10448_v18  ;;  %v11310_v13 = vld [vmem:[%s17531_s3 + $0xa14] sm:$0xf]  ;;  %v10531_v44 = vor.u32 %v11364_v15, %v10528_v0 }
 0x57e   :  { %v17374_v62 = vadd.f32 %v7231_v3, %v7219_v28  ;;  %v10315_v46 = vor.u32 %v11310_v13, %v10312_v50  ;;  %v11362_v28 = vld [vmem:[%s17531_s3 + $0xbb4] sm:$0xf]  ;;  %v10576_v13 = vld [vmem:[%s17531_s3 + $0xc28] sm:$0xf0] }
 0x57f   :  { %7446 = vmatpush.bf16.msrb.mxu0 %v10275_v37  ;;  %7459 = vmatpush.bf16.msrb.mxu1 %v10339_v40  ;;  %v10552_v37 = vld [vmem:[%s17531_s3 + $0xbf8] sm:$0xf0]  ;;  %v11386_v40 = vld [vmem:[%s17531_s3 + $0xc74] sm:$0xf]  ;;  %v10523_v45 = vor.u32 %v11362_v28, %v10520_v8 }
 0x580   :  { %v10555_v49 = vor.u32 %v11370_v23, %v10552_v37  ;;  %v10619_v41 = vor.u32 %v11386_v40, %v10616_v59  ;;  %v11358_v32 = vld [vmem:[%s17531_s3 + $0xb94] sm:$0xf] }
 0x581   :  { %7471 = vmatpush.bf16.msrb.mxu2 %v10411_v9  ;;  %7484 = vmatpush.bf16.msrb.mxu3 %v10475_v51  ;;  %v10379_v9 = vor.u32 %v11326_v31, %v10376_v42  ;;  %v10443_v51 = vor.u32 %v11342_v33, %v10440_v43 }
 0x583   :  { %7447 = vmatpush.bf16.msrb.mxu0 %v10267_v48  ;;  %7460 = vmatpush.bf16.msrb.mxu1 %v10331_v56  ;;  %v7220_v58 = vpop.f32.mrf.mxu2  ;;  %v7233_v54 = vpop.f32.mrf.mxu3  ;;  %v10608_v48 = vld [vmem:[%s17531_s3 + $0xc68] sm:$0xf0]  ;;  %v10547_v56 = vor.u32 %v11368_v10, %v10544_v7 }
 0x584   :  { %v10611_v55 = vor.u32 %v11384_v19, %v10608_v48  ;;  %v10496_v58 = vld [vmem:[%s17531_s3 + $0xb88] sm:$0xf0]  ;;  %v11372_v54 = vld [vmem:[%s17531_s3 + $0xc04] sm:$0xf] }
 0x585   :  { %7472 = vmatpush.bf16.msrb.mxu2 %v10403_v26  ;;  %7485 = vmatpush.bf16.msrb.mxu3 %v10467_v14  ;;  %v10307_v26 = vor.u32 %v11308_v21, %v10304_v57  ;;  %v10371_v14 = vor.u32 %v11324_v39, %v10368_v61  ;;  %v10504_v21 = vld [vmem:[%s17531_s3 + $0xb98] sm:$0xf0]  ;;  %v11356_v61 = vld [vmem:[%s17531_s3 + $0xb84] sm:$0xf]  ;;  %v10563_v40 = vor.u32 %v11372_v54, %v10560_v30 }
 0x586   :  { %v10507_v57 = vor.u32 %v11358_v32, %v10504_v21  ;;  %v10499_v37 = vor.u32 %v11356_v61, %v10496_v58  ;;  %v7531_v61 = vlaneseq }
 0x587   :  { %7448 = vmatpush.bf16.msrb.mxu0 %v10259_v5  ;;  %7461 = vmatpush.bf16.msrb.mxu1 %v10323_v22  ;;  %v10584_v5 = vld [vmem:[%s17531_s3 + $0xc38] sm:$0xf0] }
 0x588   :  { %v10587_v16 = vor.u32 %v11378_v1, %v10584_v5 }
 0x589   :  { %7473 = vmatpush.bf16.msrb.mxu2 %v10395_v20  ;;  %7486 = vmatpush.bf16.msrb.mxu3 %v10459_v38  ;;  %v10536_v20 = vld [vmem:[%s17531_s3 + $0xbd8] sm:$0xf0]  ;;  %v11382_v38 = vld [vmem:[%s17531_s3 + $0xc54] sm:$0xf] }
 0x58b   :  { %7449 = vmatpush.bf16.msrb.mxu0 %v10251_v11  ;;  %7462 = vmatpush.bf16.msrb.mxu1 %v10315_v46 }
 0x58d   :  { %7474 = vmatpush.bf16.msrb.mxu2 %v10387_v2  ;;  %7487 = vmatpush.bf16.msrb.mxu3 %v10451_v60  ;;  %v10512_v2 = vld [vmem:[%s17531_s3 + $0xba8] sm:$0xf0]  ;;  %v11376_v60 = vld [vmem:[%s17531_s3 + $0xc24] sm:$0xf] }
 0x58e   :  { %v10579_v46 = vor.u32 %v11376_v60, %v10576_v13 }
 0x58f   :  { %7450 = vmatpush.bf16.msrb.mxu0 %v10243_v36  ;;  %7463 = vmatpush.bf16.msrb.mxu1 %v10307_v26  ;;  %v7257_v3 = vpop.f32.mrf.mxu1 }
 0x591   :  { %7475 = vmatpush.bf16.msrb.mxu2 %v10379_v9  ;;  %7488 = vmatpush.bf16.msrb.mxu3 %v10443_v51  ;;  %v11374_v9 = vld [vmem:[%s17531_s3 + $0xc14] sm:$0xf]  ;;  %v10568_v51 = vld [vmem:[%s17531_s3 + $0xc18] sm:$0xf0] }
 0x592   :  { %7451 = vmatmul.bf16.vlgmr.msrb.gmra.mxu0 %v16075_v12  ;;  %7464 = vmatmul.bf16.vlgmr.msrb.gmra.mxu1 %v16264_v35  ;;  %v10539_v12 = vor.u32 %v11366_v24, %v10536_v20  ;;  %v10603_v35 = vor.u32 %v11382_v38, %v10600_v6  ;;  %v10571_v39 = vor.u32 %v11374_v9, %v10568_v51 }
 0x593   :  { %7495 = vmatpush.bf16.msra.mxu0 %v10555_v49  ;;  %7508 = vmatpush.bf16.msra.mxu1 %v10619_v41 }
 0x595   :  { %7476 = vmatpush.bf16.msrb.mxu2 %v10371_v14  ;;  %7489 = vmatpush.bf16.msrb.mxu3 %v10435_v47 }
 0x597   :  { %7496 = vmatpush.bf16.msra.mxu0 %v10547_v56  ;;  %7509 = vmatpush.bf16.msra.mxu1 %v10611_v55  ;;  %v7259_v43 = vpop.f32.mrf.mxu1 }
 0x598   :  { %7477 = vmatmul.bf16.vlgmr.msrb.gmra.mxu2 %v16266_v27  ;;  %7490 = vmatmul.bf16.vlgmr.msrb.gmra.mxu3 %v16274_v17  ;;  %v10592_v27 = vld [vmem:[%s17531_s3 + $0xc48] sm:$0xf0]  ;;  %v7244_v17 = vpop.f32.mrf.mxu0 }
 0x599   :  { %v7245_v63 = vadd.f32 %v7244_v17, %v17374_v62  ;;  %v10595_v18 = vor.u32 %v11380_v53, %v10592_v27  ;;  %v11360_v62 = vld [vmem:[%s17531_s3 + $0xba4] sm:$0xf] }
 0x59a   :  { %v10515_v11 = vor.u32 %v11360_v62, %v10512_v2 }
 0x59b   :  { %7497 = vmatpush.bf16.msra.mxu0 %v10539_v12  ;;  %7510 = vmatpush.bf16.msra.mxu1 %v10603_v35  ;;  %v7258_v22 = vadd.f32 %v7257_v3, %v7245_v63  ;;  %v7270_v50 = vpop.f32.mrf.mxu2  ;;  %v7283_v31 = vpop.f32.mrf.mxu3 }
 0x59d   :  { %v7271_v42 = vadd.f32 %v7270_v50, %v7258_v22 }
 0x59f   :  { %7498 = vmatpush.bf16.msra.mxu0 %v10531_v44  ;;  %7511 = vmatpush.bf16.msra.mxu1 %v10595_v18  ;;  %v7284_v29 = vadd.f32 %v7283_v31, %v7271_v42 }
 0x5a0   :  { %v7246_v33 = vpop.f32.mrf.mxu0 }
 0x5a3   :  { %7499 = vmatpush.bf16.msra.mxu0 %v10523_v45  ;;  %7512 = vmatpush.bf16.msra.mxu1 %v10587_v16  ;;  %v7272_v34 = vpop.f32.mrf.mxu2  ;;  %v7285_v23 = vpop.f32.mrf.mxu3 }
 0x5a4   :  { %v7532_v34 = vshrl.u32 %v7531_v61, 7 }
 0x5a6   :  { %vm7533_vm3 = vcmp.lt.s32.totalorder %v7532_v34, 2 }
 0x5a7   :  { %7500 = vmatpush.bf16.msra.mxu0 %v10515_v11  ;;  %7513 = vmatpush.bf16.msra.mxu1 %v10579_v46 }
 0x5ab   :  { %7501 = vmatpush.bf16.msra.mxu0 %v10507_v57  ;;  %7514 = vmatpush.bf16.msra.mxu1 %v10571_v39  ;;  %v11419_v57 = vld [vmem:[%s17532_s4] ss:$0 sm:$0xff] }
 0x5af   :  { %7502 = vmatpush.bf16.msra.mxu0 %v10499_v37  ;;  %7515 = vmatpush.bf16.msra.mxu1 %v10563_v40  ;;  %v7296_v59 = vpop.f32.mrf.mxu0  ;;  %v7309_v36 = vpop.f32.mrf.mxu1 }
 0x5b0   :  { %v7297_v26 = vadd.f32 %v7296_v59, %v7284_v29 }
 0x5b2   :  { %7503 = vmatmul.bf16.vlgmr.msra.gmra.mxu0 %v16276_v52  ;;  %7516 = vmatmul.bf16.vlgmr.msra.gmra.mxu1 %v16468_v4  ;;  %v7310_v14 = vadd.f32 %v7309_v36, %v7297_v26 }
 0x5b7   :  { %v7298_v10 = vpop.f32.mrf.mxu0  ;;  %v7311_v7 = vpop.f32.mrf.mxu1 }
 0x5bb   :  { %v7322_v47 = vpop.f32.mrf.mxu2  ;;  %v7335_v49 = vpop.f32.mrf.mxu3 }
 0x5bc   :  { %v7323_v41 = vadd.f32 %v7322_v47, %v7310_v14 }
 0x5be   :  { %v7336_v19 = vadd.f32 %v7335_v49, %v7323_v41 }
 0x5c3   :  { %v7324_v48 = vpop.f32.mrf.mxu2  ;;  %v7337_v56 = vpop.f32.mrf.mxu3 }
 0x5cf   :  { %v7348_v55 = vpop.f32.mrf.mxu0  ;;  %v7361_v24 = vpop.f32.mrf.mxu1 }
 0x5d0   :  { %v7349_v20 = vadd.f32 %v7348_v55, %v7336_v19 }
 0x5d2   :  { %v7362_v38 = vadd.f32 %v7361_v24, %v7349_v20 }
 0x5d7   :  { %v7350_v4 = vpop.f32.mrf.mxu0  ;;  %v7363_v35 = vpop.f32.mrf.mxu1 }
 0x5db   :  { %v7374_v6 = vpop.f32.mrf.mxu2  ;;  %v7387_v52 = vpop.f32.mrf.mxu3 }
 0x5dc   :  { %v7375_v12 = vadd.f32 %v7374_v6, %v7362_v38 }
 0x5de   :  { %v7388_v15 = vadd.f32 %v7387_v52, %v7375_v12 }
 0x5e3   :  { %v7376_v0 = vpop.f32.mrf.mxu2  ;;  %v7389_v53 = vpop.f32.mrf.mxu3 }
 0x5ef   :  { %v7400_v27 = vpop.f32.mrf.mxu0  ;;  %v7413_v17 = vpop.f32.mrf.mxu1 }
 0x5f0   :  { %v7401_v22 = vadd.f32 %v7400_v27, %v7388_v15 }
 0x5f2   :  { %v7414_v60 = vadd.f32 %v7413_v17, %v7401_v22 }
 0x5f7   :  { %v7402_v44 = vpop.f32.mrf.mxu0  ;;  %v7415_v18 = vpop.f32.mrf.mxu1 }
 0x5fb   :  { %v7426_v3 = vpop.f32.mrf.mxu2  ;;  %v7439_v63 = vpop.f32.mrf.mxu3 }
 0x5fc   :  { %v7427_v13 = vadd.f32 %v7426_v3, %v7414_v60 }
 0x5fe   :  { %v7440_v42 = vadd.f32 %v7439_v63, %v7427_v13 }
 0x603   :  { %v7428_v28 = vpop.f32.mrf.mxu2  ;;  %v7441_v8 = vpop.f32.mrf.mxu3 }
 0x60f   :  { %v7452_v1 = vpop.f32.mrf.mxu0  ;;  %v7465_v5 = vpop.f32.mrf.mxu1 }
 0x610   :  { %v7453_v33 = vadd.f32 %v7452_v1, %v7440_v42 }
 0x612   :  { %v7466_v43 = vadd.f32 %v7465_v5, %v7453_v33 }
 0x617   :  { %v7454_v62 = vpop.f32.mrf.mxu0  ;;  %v7467_v2 = vpop.f32.mrf.mxu1 }
 0x61b   :  { %v7478_v45 = vpop.f32.mrf.mxu2  ;;  %v7491_v16 = vpop.f32.mrf.mxu3 }
 0x61c   :  { %v7479_v11 = vadd.f32 %v7478_v45, %v7466_v43 }
 0x61e   :  { %v7492_v46 = vadd.f32 %v7491_v16, %v7479_v11 }
 0x623   :  { %v7480_v50 = vpop.f32.mrf.mxu2  ;;  %v7493_v31 = vpop.f32.mrf.mxu3 }
 0x62f   :  { %v7504_v32 = vpop.f32.mrf.mxu0  ;;  %v7517_v29 = vpop.f32.mrf.mxu1 }
 0x630   :  { %v7505_v21 = vadd.f32 %v7504_v32, %v7492_v46 }
 0x632   :  { %v7518_v9 = vadd.f32 %v7517_v29, %v7505_v21 }
 0x634   :  { %v7522_v51 = vrot.slane %v7518_v9, 2 }
 0x636   :  { %v7524_v39 = vadd.f32 %v7522_v51, %v17318_v25 }
 0x637   :  { %v7506_v58 = vpop.f32.mrf.mxu0  ;;  %v7519_v54 = vpop.f32.mrf.mxu1 }
 0x638   :  { %v7529_v30 = vadd.f32 %v11419_v57, %v7524_v39 }
 0x63a   :  { %11420 = vtanh.f32 %v7529_v30 }
 0x640   :  { %v11421_v23 = vpop.eup %11420 }
 0x641   :  { %v7534_v37 = vsel %vm7533_vm3, %v11421_v23, -inf }
 0x642   :  { %v7536_v40 = vsel %vm7535_vm4, %v7534_v37, -inf }
 0x643   :  { %v7537_v59 = vrot.slane %v7536_v40, 4 }
 0x645   :  { %v7538_v36 = vmax.f32 %v7536_v40, %v7537_v59 }
 0x647   :  { %v7539_v26 = vrot.slane %v7538_v36, 2 }
 0x649   :  { %v7540_v14 = vmax.f32 %v7538_v36, %v7539_v26 }
 0x64b   :  { %v7541_v47 = vrot.slane %v7540_v14, 1 }
 0x64d   :  { %v7542_v49 = vmax.f32 %v7540_v14, %v7541_v47 }
 0x64f   :  { %7543 = vst [vmem:[%s17533_s5] sm:$0x1] %v7542_v49 }

</bundles_post_ra>
